<compile_context>
chip_gen: v7x
topology: tpu7x:2x2x1
jax: 0.10.0
libtpu: 0.0.40
codegen_flags: <defaults>
</compile_context>

<pallas_src>
import jax
import jax.numpy as jnp
from jax import lax
from jax.experimental import pallas as pl
from jax.experimental.pallas import tpu as pltpu

ODE_UNFOLDS = 6          # ode_unfolds
MAX_COMPUTATION = 10     # max_computation
ACT_EPSILON = 0.01       # ACT halting epsilon
ODE_EPS = 1e-8           # LTC ODE denominator epsilon (ncps default)

# Order of the (pre-folded) parameter arrays passed to the kernel.
FOLDED_ORDER = [
    "input_w", "input_b",
    "sens_wm", "sens_wme", "sensory_mu", "sensory_sigma",
    "wm", "wme", "mu", "sigma",
    "cm_t", "cm_gleak", "gleak_vleak",
    "output_w", "output_b",
    "halt_w", "halt_b",
]


def _act_ltc_kernel(
    x_ref,                                                   # (TB, BB, F) block
    input_w_ref, input_b_ref,                                # (1, F)
    sens_wm_ref, sens_wme_ref, sens_mu_ref, sens_sigma_ref,  # (F, U)
    wm_ref, wme_ref, mu_ref, sigma_ref,                      # (U, U)
    cm_t_ref, cm_gleak_ref, gleak_vleak_ref,                 # (1, U)
    output_w_ref, output_b_ref,                              # (1, U)
    halt_w_ref, halt_b_ref,                                  # (1, U), (1, 1)
    out_seq_ref,                                             # (TB, BB, U)
    h_final_ref,                                             # (BB, U)   resident per batch-block
    ponder_ref,                                              # (1, 1, 1) resident per batch-block
    state_scr, acc_scr,                                      # VMEM (BB, U)
    hp_scr, rem_scr, nup_scr,                                # VMEM (BB, 1)
):
    ti = pl.program_id(1)

    # Per-batch-block init at the first time block (time is the inner, "arbitrary" axis).
    @pl.when(ti == 0)
    def _init():
        h_final_ref[...] = jnp.zeros(h_final_ref.shape, jnp.float32)
        ponder_ref[...] = jnp.zeros(ponder_ref.shape, jnp.float32)

    sigmoid = jax.nn.sigmoid
    tb = x_ref.shape[0]
    threshold = 1.0 - ACT_EPSILON

    # Time-invariant parameters: load (and lift to broadcastable rank) once per grid step
    # (broadcast_in_dim is not CSE'd by JAX -> hoist out of all loops).
    input_w = input_w_ref[...]
    input_b = input_b_ref[...]
    sens_wm = sens_wm_ref[...][None]        # (1, F, U)
    sens_wme = sens_wme_ref[...][None]
    sens_mu = sens_mu_ref[...][None]
    sens_sigma = sens_sigma_ref[...][None]
    wm = wm_ref[...][None]                  # (1, U, U)
    wme = wme_ref[...][None]
    mu = mu_ref[...][None]
    sigma = sigma_ref[...][None]
    cm_t = cm_t_ref[...]                    # (1, U)
    cm_gleak = cm_gleak_ref[...]            # (1, U) == cm_t + softplus(gleak)
    gleak_vleak = gleak_vleak_ref[...]      # (1, U) == softplus(gleak) * vleak
    output_w = output_w_ref[...]
    output_b = output_b_ref[...]
    halt_w = halt_w_ref[...]                # (1, U)
    halt_b = halt_b_ref[...]                # (1, 1)

    def timestep(tt, carry):
        # ---- affine input mapping ----
        x = x_ref[tt] * input_w + input_b                               # (BB, F)

        # ---- sensory (input -> neuron) synapses: fixed within this timestep ----
        s_sens = sigmoid((x[:, :, None] - sens_mu) * sens_sigma)        # (BB, F, U)
        w_num_s = jnp.sum(sens_wme * s_sens, axis=1)                    # (BB, U)
        w_den_s = jnp.sum(sens_wm * s_sens, axis=1)                     # (BB, U)

        # per-timestep constants of the ODE num/den, folded once (outside the ACT loop)
        num_base = gleak_vleak + w_num_s                                # (BB, U)
        den_base = cm_gleak + w_den_s + ODE_EPS                         # (BB, U)

        def ltc_ode(v):
            # hybrid (semi-implicit) Euler with ODE_UNFOLDS sub-steps
            for _ in range(ODE_UNFOLDS):
                s = sigmoid((v[:, :, None] - mu) * sigma)               # (BB, U, U)
                num = cm_t * v + num_base + jnp.sum(wme * s, axis=1)
                den = den_base + jnp.sum(wm * s, axis=1)
                r = pl.reciprocal(den, approx=True)
                r = r * (2.0 - den * r)                                 # one Newton step
                v = num * r
            return v

        # ---- ACT (Graves 2016) state for this timestep ----
        state_scr[...] = h_final_ref[...]
        acc_scr[...] = jnp.zeros(acc_scr.shape, jnp.float32)
        hp_scr[...] = jnp.zeros(hp_scr.shape, jnp.float32)
        rem_scr[...] = jnp.zeros(rem_scr.shape, jnp.float32)
        nup_scr[...] = jnp.zeros(nup_scr.shape, jnp.float32)

        def act_body(i, c):
            halt_prob = hp_scr[...]                                     # (BB, 1)
            running = (halt_prob <= threshold).astype(jnp.float32)
            any_running = jnp.max(running) > 0.0

            # Skip the whole ponder step (60 sub-steps + bookkeeping) once every batch
            # element has halted; per-element masks make all updates exactly zero then.
            @pl.when(any_running)
            def _step():
                state = ltc_ode(state_scr[...])
                state_scr[...] = state
                p = sigmoid(jnp.sum(state * halt_w, axis=-1, keepdims=True) + halt_b)
                crossed = ((halt_prob + p * running) > threshold).astype(jnp.float32)
                new_halted = crossed * running
                still_running = (1.0 - crossed) * running
                hp_new = halt_prob + p * still_running
                remainders = rem_scr[...] + new_halted * (1.0 - hp_new)
                hp_new = hp_new + new_halted * remainders
                update_w = p * still_running + new_halted * remainders
                acc_scr[...] = acc_scr[...] + state * update_w
                hp_scr[...] = hp_new
                rem_scr[...] = remainders
                nup_scr[...] = nup_scr[...] + still_running + new_halted
            return c

        lax.fori_loop(0, MAX_COMPUTATION, act_body, 0)

        # force-halt anything that never crossed the threshold within MAX_COMPUTATION
        state = state_scr[...]
        halt_prob = hp_scr[...]
        still = (halt_prob <= threshold).astype(jnp.float32)
        rem_final = still * (1.0 - halt_prob)
        h_new = acc_scr[...] + state * rem_final
        remainders = rem_scr[...] + rem_final

        # ponder cost for this timestep: sum over this batch block (wrapper divides by B)
        ponder_t = jnp.sum(nup_scr[...] + remainders, axis=0, keepdims=True)   # (1, 1)

        # ---- state carry + affine output mapping ----
        h_final_ref[...] = h_new
        out_seq_ref[tt] = h_new * output_w + output_b
        ponder_ref[...] = ponder_ref[...] + ponder_t.reshape(1, 1, 1)
        return carry

    lax.fori_loop(0, tb, timestep, 0)


def _choose_time_block(t, target):
    tb = min(t, target)
    while t % tb != 0:
        tb -= 1
    return tb


def _choose_batch_block(b, target):
    if b <= target or b % 8 != 0:
        return b
    bb = (min(b, target) // 8) * 8
    while bb >= 8 and b % bb != 0:
        bb -= 8
    return bb if bb >= 8 else b


def init_params(key, input_size, units):
    """Deterministic parameter init matching ncps LTCCell init ranges (+ ACT halting unit)."""
    f, u = input_size, units
    ks = jax.random.split(key, 12)

    def unif(k, shape, lo, hi):
        return jax.random.uniform(k, shape, jnp.float32, lo, hi)

    def rand_erev(k, shape):
        return jax.random.bernoulli(k, 0.5, shape).astype(jnp.float32) * 2.0 - 1.0

    return {
        "input_w": jnp.ones((1, f), jnp.float32),
        "input_b": jnp.zeros((1, f), jnp.float32),
        "sensory_w": unif(ks[0], (f, u), 0.001, 1.0),
        "sensory_mu": unif(ks[1], (f, u), 0.3, 0.8),
        "sensory_sigma": unif(ks[2], (f, u), 3.0, 8.0),
        "sensory_erev": rand_erev(ks[3], (f, u)),
        "sensory_mask": jnp.ones((f, u), jnp.float32),    # FullyConnected wiring -> dense
        "w": unif(ks[4], (u, u), 0.001, 1.0),
        "mu": unif(ks[5], (u, u), 0.3, 0.8),
        "sigma": unif(ks[6], (u, u), 3.0, 8.0),
        "erev": rand_erev(ks[7], (u, u)),
        "mask": jnp.ones((u, u), jnp.float32),
        "gleak": unif(ks[8], (1, u), 0.001, 1.0),
        "vleak": unif(ks[9], (1, u), -0.2, 0.2),
        "cm": unif(ks[10], (1, u), 0.4, 0.6),
        "output_w": jnp.ones((1, u), jnp.float32),
        "output_b": jnp.zeros((1, u), jnp.float32),
        "halt_w": unif(ks[11], (1, u), -0.1, 0.1),
        "halt_b": jnp.ones((1, 1), jnp.float32),
    }


def act_ltc_forward(x_btf, params, *, time_block=8, batch_block=8):
    """Equivalent of ACTLTC.forward(input) with hx=None, timespans=None, batch_first=True,
    return_sequences=True, mixed_memory=False.
    Returns (readout (B,T,U), h_state (B,U), total_ponder_cost scalar)."""
    b, t, f = x_btf.shape
    u = params["w"].shape[0]
    x_tbf = jnp.transpose(x_btf, (1, 0, 2)).astype(jnp.float32)

    # ---- fold the time-invariant implicit constraints / masks / reversal potentials ----
    sp = jax.nn.softplus
    sens_wm = sp(params["sensory_w"]) * params["sensory_mask"]
    sens_wme = sens_wm * params["sensory_erev"]
    wm = sp(params["w"]) * params["mask"]
    wme = wm * params["erev"]
    gleak_p = sp(params["gleak"])
    cm_t = sp(params["cm"]) * float(ODE_UNFOLDS)      # elapsed=1.0 (timespans=None)
    folded = {
        "input_w": params["input_w"], "input_b": params["input_b"],
        "sens_wm": sens_wm, "sens_wme": sens_wme,
        "sensory_mu": params["sensory_mu"], "sensory_sigma": params["sensory_sigma"],
        "wm": wm, "wme": wme, "mu": params["mu"], "sigma": params["sigma"],
        "cm_t": cm_t, "cm_gleak": cm_t + gleak_p, "gleak_vleak": gleak_p * params["vleak"],
        "output_w": params["output_w"], "output_b": params["output_b"],
        "halt_w": params["halt_w"], "halt_b": params["halt_b"],
    }
    folded_arrays = [folded[k].astype(jnp.float32) for k in FOLDED_ORDER]

    tb = _choose_time_block(t, time_block)
    bb = _choose_batch_block(b, batch_block)
    n_bb, n_tb = b // bb, t // tb

    def _full_spec(arr):
        nd = arr.ndim
        return pl.BlockSpec(arr.shape, lambda bi, ti, _nd=nd: (0,) * _nd)

    in_specs = [pl.BlockSpec((tb, bb, f), lambda bi, ti: (ti, bi, 0))]
    in_specs += [_full_spec(a) for a in folded_arrays]

    out_specs = (
        pl.BlockSpec((tb, bb, u), lambda bi, ti: (ti, bi, 0)),
        pl.BlockSpec((bb, u), lambda bi, ti: (bi, 0)),
        pl.BlockSpec((1, 1, 1), lambda bi, ti: (bi, 0, 0)),
    )
    out_shape = (
        jax.ShapeDtypeStruct((t, b, u), jnp.float32),
        jax.ShapeDtypeStruct((b, u), jnp.float32),
        jax.ShapeDtypeStruct((n_bb, 1, 1), jnp.float32),
    )
    grid_spec = pltpu.PrefetchScalarGridSpec(
        num_scalar_prefetch=0,
        grid=(n_bb, n_tb),
        in_specs=in_specs,
        out_specs=out_specs,
        scratch_shapes=[
            pltpu.VMEM((bb, u), jnp.float32),   # state
            pltpu.VMEM((bb, u), jnp.float32),   # accumulated state
            pltpu.VMEM((bb, 1), jnp.float32),   # halting probability
            pltpu.VMEM((bb, 1), jnp.float32),   # remainders
            pltpu.VMEM((bb, 1), jnp.float32),   # n_updates
        ],
    )
    out_seq, h_final, ponder = pl.pallas_call(
        _act_ltc_kernel,
        out_shape=out_shape,
        grid_spec=grid_spec,
        compiler_params=pltpu.CompilerParams(
            dimension_semantics=("parallel", "arbitrary")),
    )(x_tbf, *folded_arrays)

    readout = jnp.transpose(out_seq, (1, 0, 2))        # (B, T, U), return_sequences=True
    total_ponder = jnp.sum(ponder) / float(b)          # per-block sums -> batch mean per step
    return readout, h_final, total_ponder


if __name__ == "__main__":
    key = jax.random.PRNGKey(0)
    k_x, k_p = jax.random.split(key)

    B, T, F, U = 16, 16, 8, 32        # batch, seq, input_size, units
    x = jax.random.normal(k_x, (B, T, F), jnp.float32)
    params = init_params(k_p, F, U)

    fwd = jax.jit(act_ltc_forward)
    readout, h_state, total_ponder = fwd(x, params)
    jax.block_until_ready((readout, h_state, total_ponder))

    assert readout.shape == (B, T, U)
    assert h_state.shape == (B, U)
    assert total_ponder.shape == ()
    assert bool(jnp.all(jnp.isfinite(readout)))
    assert bool(jnp.all(jnp.isfinite(h_state)))
    assert bool(jnp.isfinite(total_ponder))
    print("KERNEL_OK")
</pallas_src>

<mosaic_0001>
module attributes {stable_mosaic.version = 11 : i64} {
  func.func @_act_ltc_kernel(%arg0: i32, %arg1: i32, %arg2: memref<8x8x8xf32, #tpu.memory_space<vmem>>, %arg3: memref<1x8xf32, #tpu.memory_space<vmem>>, %arg4: memref<1x8xf32, #tpu.memory_space<vmem>>, %arg5: memref<8x32xf32, #tpu.memory_space<vmem>>, %arg6: memref<8x32xf32, #tpu.memory_space<vmem>>, %arg7: memref<8x32xf32, #tpu.memory_space<vmem>>, %arg8: memref<8x32xf32, #tpu.memory_space<vmem>>, %arg9: memref<32x32xf32, #tpu.memory_space<vmem>>, %arg10: memref<32x32xf32, #tpu.memory_space<vmem>>, %arg11: memref<32x32xf32, #tpu.memory_space<vmem>>, %arg12: memref<32x32xf32, #tpu.memory_space<vmem>>, %arg13: memref<1x32xf32, #tpu.memory_space<vmem>>, %arg14: memref<1x32xf32, #tpu.memory_space<vmem>>, %arg15: memref<1x32xf32, #tpu.memory_space<vmem>>, %arg16: memref<1x32xf32, #tpu.memory_space<vmem>>, %arg17: memref<1x32xf32, #tpu.memory_space<vmem>>, %arg18: memref<1x32xf32, #tpu.memory_space<vmem>>, %arg19: memref<1x1xf32, #tpu.memory_space<vmem>>, %arg20: memref<8x8x32xf32, #tpu.memory_space<vmem>>, %arg21: memref<8x32xf32, #tpu.memory_space<vmem>>, %arg22: memref<1x1x1xf32, #tpu.memory_space<vmem>>, %arg23: memref<8x32xf32, #tpu.memory_space<vmem>>, %arg24: memref<8x32xf32, #tpu.memory_space<vmem>>, %arg25: memref<8x1xf32, #tpu.memory_space<vmem>>, %arg26: memref<8x1xf32, #tpu.memory_space<vmem>>, %arg27: memref<8x1xf32, #tpu.memory_space<vmem>>) attributes {dimension_semantics = [#tpu.dimension_semantics<parallel>, #tpu.dimension_semantics<arbitrary>], iteration_bounds = array<i64: 2, 2>, scalar_prefetch = 0 : i64, scratch_operands = 5 : i64, tpu.core_type = #tpu.core_type<tc>, window_params = [{transform_indices = @transform_0, window_bounds = array<i64: 8, 8, 8>}, {pipeline_mode = #tpu.pipeline_mode<synchronous>, transform_indices = @transform_1, window_bounds = array<i64: 1, 8>}, {pipeline_mode = #tpu.pipeline_mode<synchronous>, transform_indices = @transform_2, window_bounds = array<i64: 1, 8>}, {pipeline_mode = #tpu.pipeline_mode<synchronous>, transform_indices = @transform_3, window_bounds = array<i64: 8, 32>}, {pipeline_mode = #tpu.pipeline_mode<synchronous>, transform_indices = @transform_4, window_bounds = array<i64: 8, 32>}, {pipeline_mode = #tpu.pipeline_mode<synchronous>, transform_indices = @transform_5, window_bounds = array<i64: 8, 32>}, {pipeline_mode = #tpu.pipeline_mode<synchronous>, transform_indices = @transform_6, window_bounds = array<i64: 8, 32>}, {pipeline_mode = #tpu.pipeline_mode<synchronous>, transform_indices = @transform_7, window_bounds = array<i64: 32, 32>}, {pipeline_mode = #tpu.pipeline_mode<synchronous>, transform_indices = @transform_8, window_bounds = array<i64: 32, 32>}, {pipeline_mode = #tpu.pipeline_mode<synchronous>, transform_indices = @transform_9, window_bounds = array<i64: 32, 32>}, {pipeline_mode = #tpu.pipeline_mode<synchronous>, transform_indices = @transform_10, window_bounds = array<i64: 32, 32>}, {pipeline_mode = #tpu.pipeline_mode<synchronous>, transform_indices = @transform_11, window_bounds = array<i64: 1, 32>}, {pipeline_mode = #tpu.pipeline_mode<synchronous>, transform_indices = @transform_12, window_bounds = array<i64: 1, 32>}, {pipeline_mode = #tpu.pipeline_mode<synchronous>, transform_indices = @transform_13, window_bounds = array<i64: 1, 32>}, {pipeline_mode = #tpu.pipeline_mode<synchronous>, transform_indices = @transform_14, window_bounds = array<i64: 1, 32>}, {pipeline_mode = #tpu.pipeline_mode<synchronous>, transform_indices = @transform_15, window_bounds = array<i64: 1, 32>}, {pipeline_mode = #tpu.pipeline_mode<synchronous>, transform_indices = @transform_16, window_bounds = array<i64: 1, 32>}, {pipeline_mode = #tpu.pipeline_mode<synchronous>, transform_indices = @transform_17, window_bounds = array<i64: 1, 1>}, {transform_indices = @transform_18, window_bounds = array<i64: 8, 8, 32>}, {transform_indices = @transform_19, window_bounds = array<i64: 8, 32>}, {transform_indices = @transform_20, window_bounds = array<i64: 1, 1, 1>}]} {
    %c0_i32 = arith.constant 0 : i32
    %0 = arith.cmpi eq, %arg1, %c0_i32 : i32
    %1 = arith.extui %0 : i1 to i32
    %c0_i32_0 = arith.constant 0 : i32
    %2 = arith.cmpi ne, %1, %c0_i32_0 : i32
    scf.if %2 {
      %cst = arith.constant 0.000000e+00 : f32
      %29 = vector.broadcast %cst : f32 to vector<8x32xf32>
      %c0_36 = arith.constant 0 : index
      %c0_37 = arith.constant 0 : index
      %30 = vector.load %arg21[%c0_36, %c0_37] : memref<8x32xf32, #tpu.memory_space<vmem>>, vector<8x32xf32>
      tpu.vector_store %arg21[%c0_36, %c0_37], %29 {strides = array<i32>} : memref<8x32xf32, #tpu.memory_space<vmem>>, vector<8x32xf32>,
      %cst_38 = arith.constant 0.000000e+00 : f32
      %31 = vector.broadcast %cst_38 : f32 to vector<1x1x1xf32>
      %c0_39 = arith.constant 0 : index
      %c0_40 = arith.constant 0 : index
      %c0_41 = arith.constant 0 : index
      %32 = vector.load %arg22[%c0_39, %c0_40, %c0_41] : memref<1x1x1xf32, #tpu.memory_space<vmem>>, vector<1x1x1xf32>
      tpu.vector_store %arg22[%c0_39, %c0_40, %c0_41], %31 {strides = array<i32>} : memref<1x1x1xf32, #tpu.memory_space<vmem>>, vector<1x1x1xf32>,
    } else {
    }
    %c0 = arith.constant 0 : index
    %c0_1 = arith.constant 0 : index
    %3 = vector.load %arg3[%c0, %c0_1] : memref<1x8xf32, #tpu.memory_space<vmem>>, vector<1x8xf32>
    %c0_2 = arith.constant 0 : index
    %c0_3 = arith.constant 0 : index
    %4 = vector.load %arg4[%c0_2, %c0_3] : memref<1x8xf32, #tpu.memory_space<vmem>>, vector<1x8xf32>
    %c0_4 = arith.constant 0 : index
    %c0_5 = arith.constant 0 : index
    %5 = vector.load %arg5[%c0_4, %c0_5] : memref<8x32xf32, #tpu.memory_space<vmem>>, vector<8x32xf32>
    %6 = vector.shape_cast %5 : vector<8x32xf32> to vector<1x8x32xf32>
    %c0_6 = arith.constant 0 : index
    %c0_7 = arith.constant 0 : index
    %7 = vector.load %arg6[%c0_6, %c0_7] : memref<8x32xf32, #tpu.memory_space<vmem>>, vector<8x32xf32>
    %8 = vector.shape_cast %7 : vector<8x32xf32> to vector<1x8x32xf32>
    %c0_8 = arith.constant 0 : index
    %c0_9 = arith.constant 0 : index
    %9 = vector.load %arg7[%c0_8, %c0_9] : memref<8x32xf32, #tpu.memory_space<vmem>>, vector<8x32xf32>
    %10 = vector.shape_cast %9 : vector<8x32xf32> to vector<1x8x32xf32>
    %c0_10 = arith.constant 0 : index
    %c0_11 = arith.constant 0 : index
    %11 = vector.load %arg8[%c0_10, %c0_11] : memref<8x32xf32, #tpu.memory_space<vmem>>, vector<8x32xf32>
    %12 = vector.shape_cast %11 : vector<8x32xf32> to vector<1x8x32xf32>
    %c0_12 = arith.constant 0 : index
    %c0_13 = arith.constant 0 : index
    %13 = vector.load %arg9[%c0_12, %c0_13] : memref<32x32xf32, #tpu.memory_space<vmem>>, vector<32x32xf32>
    %14 = vector.shape_cast %13 : vector<32x32xf32> to vector<1x32x32xf32>
    %c0_14 = arith.constant 0 : index
    %c0_15 = arith.constant 0 : index
    %15 = vector.load %arg10[%c0_14, %c0_15] : memref<32x32xf32, #tpu.memory_space<vmem>>, vector<32x32xf32>
    %16 = vector.shape_cast %15 : vector<32x32xf32> to vector<1x32x32xf32>
    %c0_16 = arith.constant 0 : index
    %c0_17 = arith.constant 0 : index
    %17 = vector.load %arg11[%c0_16, %c0_17] : memref<32x32xf32, #tpu.memory_space<vmem>>, vector<32x32xf32>
    %18 = vector.shape_cast %17 : vector<32x32xf32> to vector<1x32x32xf32>
    %c0_18 = arith.constant 0 : index
    %c0_19 = arith.constant 0 : index
    %19 = vector.load %arg12[%c0_18, %c0_19] : memref<32x32xf32, #tpu.memory_space<vmem>>, vector<32x32xf32>
    %20 = vector.shape_cast %19 : vector<32x32xf32> to vector<1x32x32xf32>
    %c0_20 = arith.constant 0 : index
    %c0_21 = arith.constant 0 : index
    %21 = vector.load %arg13[%c0_20, %c0_21] : memref<1x32xf32, #tpu.memory_space<vmem>>, vector<1x32xf32>
    %c0_22 = arith.constant 0 : index
    %c0_23 = arith.constant 0 : index
    %22 = vector.load %arg14[%c0_22, %c0_23] : memref<1x32xf32, #tpu.memory_space<vmem>>, vector<1x32xf32>
    %c0_24 = arith.constant 0 : index
    %c0_25 = arith.constant 0 : index
    %23 = vector.load %arg15[%c0_24, %c0_25] : memref<1x32xf32, #tpu.memory_space<vmem>>, vector<1x32xf32>
    %c0_26 = arith.constant 0 : index
    %c0_27 = arith.constant 0 : index
    %24 = vector.load %arg16[%c0_26, %c0_27] : memref<1x32xf32, #tpu.memory_space<vmem>>, vector<1x32xf32>
    %c0_28 = arith.constant 0 : index
    %c0_29 = arith.constant 0 : index
    %25 = vector.load %arg17[%c0_28, %c0_29] : memref<1x32xf32, #tpu.memory_space<vmem>>, vector<1x32xf32>
    %c0_30 = arith.constant 0 : index
    %c0_31 = arith.constant 0 : index
    %26 = vector.load %arg18[%c0_30, %c0_31] : memref<1x32xf32, #tpu.memory_space<vmem>>, vector<1x32xf32>
    %c0_32 = arith.constant 0 : index
    %c0_33 = arith.constant 0 : index
    %27 = vector.load %arg19[%c0_32, %c0_33] : memref<1x1xf32, #tpu.memory_space<vmem>>, vector<1x1xf32>
    %c0_i32_34 = arith.constant 0 : i32
    %c8_i32 = arith.constant 8 : i32
    %28 = arith.addi %c0_i32_34, %c8_i32 : i32
    %c1_i32 = arith.constant 1 : i32
    scf.for %arg28 = %c0_i32_34 to %28 step %c1_i32  : i32 {
      %29 = arith.index_cast %arg28 : i32 to index
      %c0_36 = arith.constant 0 : index
      %c0_37 = arith.constant 0 : index
      %30 = vector.load %arg2[%29, %c0_36, %c0_37] : memref<8x8x8xf32, #tpu.memory_space<vmem>>, vector<1x8x8xf32>
      %31 = vector.shape_cast %30 : vector<1x8x8xf32> to vector<8x8xf32>
      %32 = vector.broadcast %3 : vector<1x8xf32> to vector<8x8xf32>
      %33 = arith.mulf %31, %32 : vector<8x8xf32>
      %34 = vector.broadcast %4 : vector<1x8xf32> to vector<8x8xf32>
      %35 = arith.addf %33, %34 : vector<8x8xf32>
      %36 = vector.shape_cast %35 : vector<8x8xf32> to vector<8x8x1xf32>
      %37 = vector.broadcast %36 : vector<8x8x1xf32> to vector<8x8x32xf32>
      %38 = vector.broadcast %10 : vector<1x8x32xf32> to vector<8x8x32xf32>
      %39 = arith.subf %37, %38 : vector<8x8x32xf32>
      %40 = vector.broadcast %12 : vector<1x8x32xf32> to vector<8x8x32xf32>
      %41 = arith.mulf %39, %40 : vector<8x8x32xf32>
      %42 = arith.negf %41 : vector<8x8x32xf32>
      %43 = math.exp %42 : vector<8x8x32xf32>
      %cst = arith.constant 1.000000e+00 : f32
      %44 = vector.broadcast %cst : f32 to vector<8x8x32xf32>
      %45 = arith.addf %44, %43 : vector<8x8x32xf32>
      %46 = arith.divf %44, %45 : vector<8x8x32xf32>
      %47 = vector.broadcast %8 : vector<1x8x32xf32> to vector<8x8x32xf32>
      %48 = arith.mulf %47, %46 : vector<8x8x32xf32>
      %cst_38 = arith.constant dense<0.000000e+00> : vector<8x32xf32>
      %49 = vector.multi_reduction <add>, %48, %cst_38 [1] : vector<8x8x32xf32> to vector<8x32xf32>
      %50 = vector.broadcast %6 : vector<1x8x32xf32> to vector<8x8x32xf32>
      %51 = arith.mulf %50, %46 : vector<8x8x32xf32>
      %cst_39 = arith.constant dense<0.000000e+00> : vector<8x32xf32>
      %52 = vector.multi_reduction <add>, %51, %cst_39 [1] : vector<8x8x32xf32> to vector<8x32xf32>
      %53 = vector.broadcast %23 : vector<1x32xf32> to vector<8x32xf32>
      %54 = arith.addf %53, %49 : vector<8x32xf32>
      %55 = vector.broadcast %22 : vector<1x32xf32> to vector<8x32xf32>
      %56 = arith.addf %55, %52 : vector<8x32xf32>
      %cst_40 = arith.constant 9.99999993E-9 : f32
      %57 = vector.broadcast %cst_40 : f32 to vector<8x32xf32>
      %58 = arith.addf %56, %57 : vector<8x32xf32>
      %c0_41 = arith.constant 0 : index
      %c0_42 = arith.constant 0 : index
      %59 = vector.load %arg21[%c0_41, %c0_42] : memref<8x32xf32, #tpu.memory_space<vmem>>, vector<8x32xf32>
      %c0_43 = arith.constant 0 : index
      %c0_44 = arith.constant 0 : index
      %60 = vector.load %arg23[%c0_43, %c0_44] : memref<8x32xf32, #tpu.memory_space<vmem>>, vector<8x32xf32>
      tpu.vector_store %arg23[%c0_43, %c0_44], %59 {strides = array<i32>} : memref<8x32xf32, #tpu.memory_space<vmem>>, vector<8x32xf32>,
      %cst_45 = arith.constant 0.000000e+00 : f32
      %61 = vector.broadcast %cst_45 : f32 to vector<8x32xf32>
      %c0_46 = arith.constant 0 : index
      %c0_47 = arith.constant 0 : index
      %62 = vector.load %arg24[%c0_46, %c0_47] : memref<8x32xf32, #tpu.memory_space<vmem>>, vector<8x32xf32>
      tpu.vector_store %arg24[%c0_46, %c0_47], %61 {strides = array<i32>} : memref<8x32xf32, #tpu.memory_space<vmem>>, vector<8x32xf32>,
      %cst_48 = arith.constant 0.000000e+00 : f32
      %63 = vector.broadcast %cst_48 : f32 to vector<8x1xf32>
      %c0_49 = arith.constant 0 : index
      %c0_50 = arith.constant 0 : index
      %64 = vector.load %arg25[%c0_49, %c0_50] : memref<8x1xf32, #tpu.memory_space<vmem>>, vector<8x1xf32>
      tpu.vector_store %arg25[%c0_49, %c0_50], %63 {strides = array<i32>} : memref<8x1xf32, #tpu.memory_space<vmem>>, vector<8x1xf32>,
      %cst_51 = arith.constant 0.000000e+00 : f32
      %65 = vector.broadcast %cst_51 : f32 to vector<8x1xf32>
      %c0_52 = arith.constant 0 : index
      %c0_53 = arith.constant 0 : index
      %66 = vector.load %arg26[%c0_52, %c0_53] : memref<8x1xf32, #tpu.memory_space<vmem>>, vector<8x1xf32>
      tpu.vector_store %arg26[%c0_52, %c0_53], %65 {strides = array<i32>} : memref<8x1xf32, #tpu.memory_space<vmem>>, vector<8x1xf32>,
      %cst_54 = arith.constant 0.000000e+00 : f32
      %67 = vector.broadcast %cst_54 : f32 to vector<8x1xf32>
      %c0_55 = arith.constant 0 : index
      %c0_56 = arith.constant 0 : index
      %68 = vector.load %arg27[%c0_55, %c0_56] : memref<8x1xf32, #tpu.memory_space<vmem>>, vector<8x1xf32>
      tpu.vector_store %arg27[%c0_55, %c0_56], %67 {strides = array<i32>} : memref<8x1xf32, #tpu.memory_space<vmem>>, vector<8x1xf32>,
      %c0_i32_57 = arith.constant 0 : i32
      %c10_i32 = arith.constant 10 : i32
      %69 = arith.addi %c0_i32_57, %c10_i32 : i32
      %c1_i32_58 = arith.constant 1 : i32
      scf.for %arg29 = %c0_i32_57 to %69 step %c1_i32_58  : i32 {
        %c0_82 = arith.constant 0 : index
        %c0_83 = arith.constant 0 : index
        %102 = vector.load %arg25[%c0_82, %c0_83] : memref<8x1xf32, #tpu.memory_space<vmem>>, vector<8x1xf32>
        %cst_84 = arith.constant 9.900000e-01 : f32
        %103 = vector.broadcast %cst_84 : f32 to vector<8x1xf32>
        %104 = arith.cmpf ole, %102, %103 : vector<8x1xf32>
        %105 = arith.extui %104 : vector<8x1xi1> to vector<8x1xi32>
        %106 = arith.sitofp %105 : vector<8x1xi32> to vector<8x1xf32>
        %107 = vector.shape_cast %106 : vector<8x1xf32> to vector<1x8x1xf32>
        %cst_85 = arith.constant dense<0xFF800000> : vector<1xf32>
        %108 = vector.multi_reduction <maximumf>, %107, %cst_85 [1, 2] : vector<1x8x1xf32> to vector<1xf32>
        %109 = vector.shape_cast %108 : vector<1xf32> to vector<1x1x1xf32>
        %110 = vector.extract %109[0, 0, 0] : f32 from vector<1x1x1xf32>
        %cst_86 = arith.constant 0.000000e+00 : f32
        %111 = arith.cmpf ogt, %110, %cst_86 : f32
        %112 = arith.extui %111 : i1 to i32
        %c0_i32_87 = arith.constant 0 : i32
        %113 = arith.cmpi ne, %112, %c0_i32_87 : i32
        scf.if %113 {
          %c0_88 = arith.constant 0 : index
          %c0_89 = arith.constant 0 : index
          %114 = vector.load %arg23[%c0_88, %c0_89] : memref<8x32xf32, #tpu.memory_space<vmem>>, vector<8x32xf32>
          %115 = vector.shape_cast %114 : vector<8x32xf32> to vector<8x32x1xf32>
          %116 = vector.broadcast %115 : vector<8x32x1xf32> to vector<8x32x32xf32>
          %117 = vector.broadcast %18 : vector<1x32x32xf32> to vector<8x32x32xf32>
          %118 = arith.subf %116, %117 : vector<8x32x32xf32>
          %119 = vector.broadcast %20 : vector<1x32x32xf32> to vector<8x32x32xf32>
          %120 = arith.mulf %118, %119 : vector<8x32x32xf32>
          %121 = arith.negf %120 : vector<8x32x32xf32>
          %122 = math.exp %121 : vector<8x32x32xf32>
          %cst_90 = arith.constant 1.000000e+00 : f32
          %123 = vector.broadcast %cst_90 : f32 to vector<8x32x32xf32>
          %124 = arith.addf %123, %122 : vector<8x32x32xf32>
          %125 = arith.divf %123, %124 : vector<8x32x32xf32>
          %126 = vector.broadcast %21 : vector<1x32xf32> to vector<8x32xf32>
          %127 = arith.mulf %126, %114 : vector<8x32xf32>
          %128 = arith.addf %127, %54 : vector<8x32xf32>
          %129 = vector.broadcast %16 : vector<1x32x32xf32> to vector<8x32x32xf32>
          %130 = arith.mulf %129, %125 : vector<8x32x32xf32>
          %cst_91 = arith.constant dense<0.000000e+00> : vector<8x32xf32>
          %131 = vector.multi_reduction <add>, %130, %cst_91 [1] : vector<8x32x32xf32> to vector<8x32xf32>
          %132 = arith.addf %128, %131 : vector<8x32xf32>
          %133 = vector.broadcast %14 : vector<1x32x32xf32> to vector<8x32x32xf32>
          %134 = arith.mulf %133, %125 : vector<8x32x32xf32>
          %cst_92 = arith.constant dense<0.000000e+00> : vector<8x32xf32>
          %135 = vector.multi_reduction <add>, %134, %cst_92 [1] : vector<8x32x32xf32> to vector<8x32xf32>
          %136 = arith.addf %58, %135 : vector<8x32xf32>
          %137 = tpu.reciprocal %136 {approx = true} : vector<8x32xf32> -> vector<8x32xf32>
          %138 = arith.mulf %136, %137 : vector<8x32xf32>
          %cst_93 = arith.constant 2.000000e+00 : f32
          %139 = vector.broadcast %cst_93 : f32 to vector<8x32xf32>
          %140 = arith.subf %139, %138 : vector<8x32xf32>
          %141 = arith.mulf %137, %140 : vector<8x32xf32>
          %142 = arith.mulf %132, %141 : vector<8x32xf32>
          %143 = vector.shape_cast %142 : vector<8x32xf32> to vector<8x32x1xf32>
          %144 = vector.broadcast %143 : vector<8x32x1xf32> to vector<8x32x32xf32>
          %145 = vector.broadcast %18 : vector<1x32x32xf32> to vector<8x32x32xf32>
          %146 = arith.subf %144, %145 : vector<8x32x32xf32>
          %147 = vector.broadcast %20 : vector<1x32x32xf32> to vector<8x32x32xf32>
          %148 = arith.mulf %146, %147 : vector<8x32x32xf32>
          %149 = arith.negf %148 : vector<8x32x32xf32>
          %150 = math.exp %149 : vector<8x32x32xf32>
          %cst_94 = arith.constant 1.000000e+00 : f32
          %151 = vector.broadcast %cst_94 : f32 to vector<8x32x32xf32>
          %152 = arith.addf %151, %150 : vector<8x32x32xf32>
          %153 = arith.divf %151, %152 : vector<8x32x32xf32>
          %154 = vector.broadcast %21 : vector<1x32xf32> to vector<8x32xf32>
          %155 = arith.mulf %154, %142 : vector<8x32xf32>
          %156 = arith.addf %155, %54 : vector<8x32xf32>
          %157 = vector.broadcast %16 : vector<1x32x32xf32> to vector<8x32x32xf32>
          %158 = arith.mulf %157, %153 : vector<8x32x32xf32>
          %cst_95 = arith.constant dense<0.000000e+00> : vector<8x32xf32>
          %159 = vector.multi_reduction <add>, %158, %cst_95 [1] : vector<8x32x32xf32> to vector<8x32xf32>
          %160 = arith.addf %156, %159 : vector<8x32xf32>
          %161 = vector.broadcast %14 : vector<1x32x32xf32> to vector<8x32x32xf32>
          %162 = arith.mulf %161, %153 : vector<8x32x32xf32>
          %cst_96 = arith.constant dense<0.000000e+00> : vector<8x32xf32>
          %163 = vector.multi_reduction <add>, %162, %cst_96 [1] : vector<8x32x32xf32> to vector<8x32xf32>
          %164 = arith.addf %58, %163 : vector<8x32xf32>
          %165 = tpu.reciprocal %164 {approx = true} : vector<8x32xf32> -> vector<8x32xf32>
          %166 = arith.mulf %164, %165 : vector<8x32xf32>
          %cst_97 = arith.constant 2.000000e+00 : f32
          %167 = vector.broadcast %cst_97 : f32 to vector<8x32xf32>
          %168 = arith.subf %167, %166 : vector<8x32xf32>
          %169 = arith.mulf %165, %168 : vector<8x32xf32>
          %170 = arith.mulf %160, %169 : vector<8x32xf32>
          %171 = vector.shape_cast %170 : vector<8x32xf32> to vector<8x32x1xf32>
          %172 = vector.broadcast %171 : vector<8x32x1xf32> to vector<8x32x32xf32>
          %173 = vector.broadcast %18 : vector<1x32x32xf32> to vector<8x32x32xf32>
          %174 = arith.subf %172, %173 : vector<8x32x32xf32>
          %175 = vector.broadcast %20 : vector<1x32x32xf32> to vector<8x32x32xf32>
          %176 = arith.mulf %174, %175 : vector<8x32x32xf32>
          %177 = arith.negf %176 : vector<8x32x32xf32>
          %178 = math.exp %177 : vector<8x32x32xf32>
          %cst_98 = arith.constant 1.000000e+00 : f32
          %179 = vector.broadcast %cst_98 : f32 to vector<8x32x32xf32>
          %180 = arith.addf %179, %178 : vector<8x32x32xf32>
          %181 = arith.divf %179, %180 : vector<8x32x32xf32>
          %182 = vector.broadcast %21 : vector<1x32xf32> to vector<8x32xf32>
          %183 = arith.mulf %182, %170 : vector<8x32xf32>
          %184 = arith.addf %183, %54 : vector<8x32xf32>
          %185 = vector.broadcast %16 : vector<1x32x32xf32> to vector<8x32x32xf32>
          %186 = arith.mulf %185, %181 : vector<8x32x32xf32>
          %cst_99 = arith.constant dense<0.000000e+00> : vector<8x32xf32>
          %187 = vector.multi_reduction <add>, %186, %cst_99 [1] : vector<8x32x32xf32> to vector<8x32xf32>
          %188 = arith.addf %184, %187 : vector<8x32xf32>
          %189 = vector.broadcast %14 : vector<1x32x32xf32> to vector<8x32x32xf32>
          %190 = arith.mulf %189, %181 : vector<8x32x32xf32>
          %cst_100 = arith.constant dense<0.000000e+00> : vector<8x32xf32>
          %191 = vector.multi_reduction <add>, %190, %cst_100 [1] : vector<8x32x32xf32> to vector<8x32xf32>
          %192 = arith.addf %58, %191 : vector<8x32xf32>
          %193 = tpu.reciprocal %192 {approx = true} : vector<8x32xf32> -> vector<8x32xf32>
          %194 = arith.mulf %192, %193 : vector<8x32xf32>
          %cst_101 = arith.constant 2.000000e+00 : f32
          %195 = vector.broadcast %cst_101 : f32 to vector<8x32xf32>
          %196 = arith.subf %195, %194 : vector<8x32xf32>
          %197 = arith.mulf %193, %196 : vector<8x32xf32>
          %198 = arith.mulf %188, %197 : vector<8x32xf32>
          %199 = vector.shape_cast %198 : vector<8x32xf32> to vector<8x32x1xf32>
          %200 = vector.broadcast %199 : vector<8x32x1xf32> to vector<8x32x32xf32>
          %201 = vector.broadcast %18 : vector<1x32x32xf32> to vector<8x32x32xf32>
          %202 = arith.subf %200, %201 : vector<8x32x32xf32>
          %203 = vector.broadcast %20 : vector<1x32x32xf32> to vector<8x32x32xf32>
          %204 = arith.mulf %202, %203 : vector<8x32x32xf32>
          %205 = arith.negf %204 : vector<8x32x32xf32>
          %206 = math.exp %205 : vector<8x32x32xf32>
          %cst_102 = arith.constant 1.000000e+00 : f32
          %207 = vector.broadcast %cst_102 : f32 to vector<8x32x32xf32>
          %208 = arith.addf %207, %206 : vector<8x32x32xf32>
          %209 = arith.divf %207, %208 : vector<8x32x32xf32>
          %210 = vector.broadcast %21 : vector<1x32xf32> to vector<8x32xf32>
          %211 = arith.mulf %210, %198 : vector<8x32xf32>
          %212 = arith.addf %211, %54 : vector<8x32xf32>
          %213 = vector.broadcast %16 : vector<1x32x32xf32> to vector<8x32x32xf32>
          %214 = arith.mulf %213, %209 : vector<8x32x32xf32>
          %cst_103 = arith.constant dense<0.000000e+00> : vector<8x32xf32>
          %215 = vector.multi_reduction <add>, %214, %cst_103 [1] : vector<8x32x32xf32> to vector<8x32xf32>
          %216 = arith.addf %212, %215 : vector<8x32xf32>
          %217 = vector.broadcast %14 : vector<1x32x32xf32> to vector<8x32x32xf32>
          %218 = arith.mulf %217, %209 : vector<8x32x32xf32>
          %cst_104 = arith.constant dense<0.000000e+00> : vector<8x32xf32>
          %219 = vector.multi_reduction <add>, %218, %cst_104 [1] : vector<8x32x32xf32> to vector<8x32xf32>
          %220 = arith.addf %58, %219 : vector<8x32xf32>
          %221 = tpu.reciprocal %220 {approx = true} : vector<8x32xf32> -> vector<8x32xf32>
          %222 = arith.mulf %220, %221 : vector<8x32xf32>
          %cst_105 = arith.constant 2.000000e+00 : f32
          %223 = vector.broadcast %cst_105 : f32 to vector<8x32xf32>
          %224 = arith.subf %223, %222 : vector<8x32xf32>
          %225 = arith.mulf %221, %224 : vector<8x32xf32>
          %226 = arith.mulf %216, %225 : vector<8x32xf32>
          %227 = vector.shape_cast %226 : vector<8x32xf32> to vector<8x32x1xf32>
          %228 = vector.broadcast %227 : vector<8x32x1xf32> to vector<8x32x32xf32>
          %229 = vector.broadcast %18 : vector<1x32x32xf32> to vector<8x32x32xf32>
          %230 = arith.subf %228, %229 : vector<8x32x32xf32>
          %231 = vector.broadcast %20 : vector<1x32x32xf32> to vector<8x32x32xf32>
          %232 = arith.mulf %230, %231 : vector<8x32x32xf32>
          %233 = arith.negf %232 : vector<8x32x32xf32>
          %234 = math.exp %233 : vector<8x32x32xf32>
          %cst_106 = arith.constant 1.000000e+00 : f32
          %235 = vector.broadcast %cst_106 : f32 to vector<8x32x32xf32>
          %236 = arith.addf %235, %234 : vector<8x32x32xf32>
          %237 = arith.divf %235, %236 : vector<8x32x32xf32>
          %238 = vector.broadcast %21 : vector<1x32xf32> to vector<8x32xf32>
          %239 = arith.mulf %238, %226 : vector<8x32xf32>
          %240 = arith.addf %239, %54 : vector<8x32xf32>
          %241 = vector.broadcast %16 : vector<1x32x32xf32> to vector<8x32x32xf32>
          %242 = arith.mulf %241, %237 : vector<8x32x32xf32>
          %cst_107 = arith.constant dense<0.000000e+00> : vector<8x32xf32>
          %243 = vector.multi_reduction <add>, %242, %cst_107 [1] : vector<8x32x32xf32> to vector<8x32xf32>
          %244 = arith.addf %240, %243 : vector<8x32xf32>
          %245 = vector.broadcast %14 : vector<1x32x32xf32> to vector<8x32x32xf32>
          %246 = arith.mulf %245, %237 : vector<8x32x32xf32>
          %cst_108 = arith.constant dense<0.000000e+00> : vector<8x32xf32>
          %247 = vector.multi_reduction <add>, %246, %cst_108 [1] : vector<8x32x32xf32> to vector<8x32xf32>
          %248 = arith.addf %58, %247 : vector<8x32xf32>
          %249 = tpu.reciprocal %248 {approx = true} : vector<8x32xf32> -> vector<8x32xf32>
          %250 = arith.mulf %248, %249 : vector<8x32xf32>
          %cst_109 = arith.constant 2.000000e+00 : f32
          %251 = vector.broadcast %cst_109 : f32 to vector<8x32xf32>
          %252 = arith.subf %251, %250 : vector<8x32xf32>
          %253 = arith.mulf %249, %252 : vector<8x32xf32>
          %254 = arith.mulf %244, %253 : vector<8x32xf32>
          %255 = vector.shape_cast %254 : vector<8x32xf32> to vector<8x32x1xf32>
          %256 = vector.broadcast %255 : vector<8x32x1xf32> to vector<8x32x32xf32>
          %257 = vector.broadcast %18 : vector<1x32x32xf32> to vector<8x32x32xf32>
          %258 = arith.subf %256, %257 : vector<8x32x32xf32>
          %259 = vector.broadcast %20 : vector<1x32x32xf32> to vector<8x32x32xf32>
          %260 = arith.mulf %258, %259 : vector<8x32x32xf32>
          %261 = arith.negf %260 : vector<8x32x32xf32>
          %262 = math.exp %261 : vector<8x32x32xf32>
          %cst_110 = arith.constant 1.000000e+00 : f32
          %263 = vector.broadcast %cst_110 : f32 to vector<8x32x32xf32>
          %264 = arith.addf %263, %262 : vector<8x32x32xf32>
          %265 = arith.divf %263, %264 : vector<8x32x32xf32>
          %266 = vector.broadcast %21 : vector<1x32xf32> to vector<8x32xf32>
          %267 = arith.mulf %266, %254 : vector<8x32xf32>
          %268 = arith.addf %267, %54 : vector<8x32xf32>
          %269 = vector.broadcast %16 : vector<1x32x32xf32> to vector<8x32x32xf32>
          %270 = arith.mulf %269, %265 : vector<8x32x32xf32>
          %cst_111 = arith.constant dense<0.000000e+00> : vector<8x32xf32>
          %271 = vector.multi_reduction <add>, %270, %cst_111 [1] : vector<8x32x32xf32> to vector<8x32xf32>
          %272 = arith.addf %268, %271 : vector<8x32xf32>
          %273 = vector.broadcast %14 : vector<1x32x32xf32> to vector<8x32x32xf32>
          %274 = arith.mulf %273, %265 : vector<8x32x32xf32>
          %cst_112 = arith.constant dense<0.000000e+00> : vector<8x32xf32>
          %275 = vector.multi_reduction <add>, %274, %cst_112 [1] : vector<8x32x32xf32> to vector<8x32xf32>
          %276 = arith.addf %58, %275 : vector<8x32xf32>
          %277 = tpu.reciprocal %276 {approx = true} : vector<8x32xf32> -> vector<8x32xf32>
          %278 = arith.mulf %276, %277 : vector<8x32xf32>
          %cst_113 = arith.constant 2.000000e+00 : f32
          %279 = vector.broadcast %cst_113 : f32 to vector<8x32xf32>
          %280 = arith.subf %279, %278 : vector<8x32xf32>
          %281 = arith.mulf %277, %280 : vector<8x32xf32>
          %282 = arith.mulf %272, %281 : vector<8x32xf32>
          %c0_114 = arith.constant 0 : index
          %c0_115 = arith.constant 0 : index
          %283 = vector.load %arg23[%c0_114, %c0_115] : memref<8x32xf32, #tpu.memory_space<vmem>>, vector<8x32xf32>
          tpu.vector_store %arg23[%c0_114, %c0_115], %282 {strides = array<i32>} : memref<8x32xf32, #tpu.memory_space<vmem>>, vector<8x32xf32>,
          %284 = vector.broadcast %26 : vector<1x32xf32> to vector<8x32xf32>
          %285 = arith.mulf %282, %284 : vector<8x32xf32>
          %cst_116 = arith.constant dense<0.000000e+00> : vector<8xf32>
          %286 = vector.multi_reduction <add>, %285, %cst_116 [1] : vector<8x32xf32> to vector<8xf32>
          %287 = vector.shape_cast %286 : vector<8xf32> to vector<8x1xf32>
          %288 = vector.broadcast %27 : vector<1x1xf32> to vector<8x1xf32>
          %289 = arith.addf %287, %288 : vector<8x1xf32>
          %290 = arith.negf %289 : vector<8x1xf32>
          %291 = math.exp %290 : vector<8x1xf32>
          %cst_117 = arith.constant 1.000000e+00 : f32
          %292 = vector.broadcast %cst_117 : f32 to vector<8x1xf32>
          %293 = arith.addf %292, %291 : vector<8x1xf32>
          %294 = arith.divf %292, %293 : vector<8x1xf32>
          %295 = arith.mulf %294, %106 : vector<8x1xf32>
          %296 = arith.addf %102, %295 : vector<8x1xf32>
          %cst_118 = arith.constant 9.900000e-01 : f32
          %297 = vector.broadcast %cst_118 : f32 to vector<8x1xf32>
          %298 = arith.cmpf ogt, %296, %297 : vector<8x1xf32>
          %299 = arith.extui %298 : vector<8x1xi1> to vector<8x1xi32>
          %300 = arith.sitofp %299 : vector<8x1xi32> to vector<8x1xf32>
          %301 = arith.mulf %300, %106 : vector<8x1xf32>
          %cst_119 = arith.constant 1.000000e+00 : f32
          %302 = vector.broadcast %cst_119 : f32 to vector<8x1xf32>
          %303 = arith.subf %302, %300 : vector<8x1xf32>
          %304 = arith.mulf %303, %106 : vector<8x1xf32>
          %305 = arith.mulf %294, %304 : vector<8x1xf32>
          %306 = arith.addf %102, %305 : vector<8x1xf32>
          %c0_120 = arith.constant 0 : index
          %c0_121 = arith.constant 0 : index
          %307 = vector.load %arg26[%c0_120, %c0_121] : memref<8x1xf32, #tpu.memory_space<vmem>>, vector<8x1xf32>
          %cst_122 = arith.constant 1.000000e+00 : f32
          %308 = vector.broadcast %cst_122 : f32 to vector<8x1xf32>
          %309 = arith.subf %308, %306 : vector<8x1xf32>
          %310 = arith.mulf %301, %309 : vector<8x1xf32>
          %311 = arith.addf %307, %310 : vector<8x1xf32>
          %312 = arith.mulf %301, %311 : vector<8x1xf32>
          %313 = arith.addf %306, %312 : vector<8x1xf32>
          %314 = arith.mulf %294, %304 : vector<8x1xf32>
          %315 = arith.mulf %301, %311 : vector<8x1xf32>
          %316 = arith.addf %314, %315 : vector<8x1xf32>
          %c0_123 = arith.constant 0 : index
          %c0_124 = arith.constant 0 : index
          %317 = vector.load %arg24[%c0_123, %c0_124] : memref<8x32xf32, #tpu.memory_space<vmem>>, vector<8x32xf32>
          %318 = vector.broadcast %316 : vector<8x1xf32> to vector<8x32xf32>
          %319 = arith.mulf %282, %318 : vector<8x32xf32>
          %320 = arith.addf %317, %319 : vector<8x32xf32>
          %c0_125 = arith.constant 0 : index
          %c0_126 = arith.constant 0 : index
          %321 = vector.load %arg24[%c0_125, %c0_126] : memref<8x32xf32, #tpu.memory_space<vmem>>, vector<8x32xf32>
          tpu.vector_store %arg24[%c0_125, %c0_126], %320 {strides = array<i32>} : memref<8x32xf32, #tpu.memory_space<vmem>>, vector<8x32xf32>,
          %c0_127 = arith.constant 0 : index
          %c0_128 = arith.constant 0 : index
          %322 = vector.load %arg25[%c0_127, %c0_128] : memref<8x1xf32, #tpu.memory_space<vmem>>, vector<8x1xf32>
          tpu.vector_store %arg25[%c0_127, %c0_128], %313 {strides = array<i32>} : memref<8x1xf32, #tpu.memory_space<vmem>>, vector<8x1xf32>,
          %c0_129 = arith.constant 0 : index
          %c0_130 = arith.constant 0 : index
          %323 = vector.load %arg26[%c0_129, %c0_130] : memref<8x1xf32, #tpu.memory_space<vmem>>, vector<8x1xf32>
          tpu.vector_store %arg26[%c0_129, %c0_130], %311 {strides = array<i32>} : memref<8x1xf32, #tpu.memory_space<vmem>>, vector<8x1xf32>,
          %c0_131 = arith.constant 0 : index
          %c0_132 = arith.constant 0 : index
          %324 = vector.load %arg27[%c0_131, %c0_132] : memref<8x1xf32, #tpu.memory_space<vmem>>, vector<8x1xf32>
          %325 = arith.addf %324, %304 : vector<8x1xf32>
          %326 = arith.addf %325, %301 : vector<8x1xf32>
          %c0_133 = arith.constant 0 : index
          %c0_134 = arith.constant 0 : index
          %327 = vector.load %arg27[%c0_133, %c0_134] : memref<8x1xf32, #tpu.memory_space<vmem>>, vector<8x1xf32>
          tpu.vector_store %arg27[%c0_133, %c0_134], %326 {strides = array<i32>} : memref<8x1xf32, #tpu.memory_space<vmem>>, vector<8x1xf32>,
        } else {
        }
      }
      %c0_59 = arith.constant 0 : index
      %c0_60 = arith.constant 0 : index
      %70 = vector.load %arg23[%c0_59, %c0_60] : memref<8x32xf32, #tpu.memory_space<vmem>>, vector<8x32xf32>
      %c0_61 = arith.constant 0 : index
      %c0_62 = arith.constant 0 : index
      %71 = vector.load %arg25[%c0_61, %c0_62] : memref<8x1xf32, #tpu.memory_space<vmem>>, vector<8x1xf32>
      %cst_63 = arith.constant 9.900000e-01 : f32
      %72 = vector.broadcast %cst_63 : f32 to vector<8x1xf32>
      %73 = arith.cmpf ole, %71, %72 : vector<8x1xf32>
      %74 = arith.extui %73 : vector<8x1xi1> to vector<8x1xi32>
      %75 = arith.sitofp %74 : vector<8x1xi32> to vector<8x1xf32>
      %cst_64 = arith.constant 1.000000e+00 : f32
      %76 = vector.broadcast %cst_64 : f32 to vector<8x1xf32>
      %77 = arith.subf %76, %71 : vector<8x1xf32>
      %78 = arith.mulf %75, %77 : vector<8x1xf32>
      %c0_65 = arith.constant 0 : index
      %c0_66 = arith.constant 0 : index
      %79 = vector.load %arg24[%c0_65, %c0_66] : memref<8x32xf32, #tpu.memory_space<vmem>>, vector<8x32xf32>
      %80 = vector.broadcast %78 : vector<8x1xf32> to vector<8x32xf32>
      %81 = arith.mulf %70, %80 : vector<8x32xf32>
      %82 = arith.addf %79, %81 : vector<8x32xf32>
      %c0_67 = arith.constant 0 : index
      %c0_68 = arith.constant 0 : index
      %83 = vector.load %arg26[%c0_67, %c0_68] : memref<8x1xf32, #tpu.memory_space<vmem>>, vector<8x1xf32>
      %84 = arith.addf %83, %78 : vector<8x1xf32>
      %c0_69 = arith.constant 0 : index
      %c0_70 = arith.constant 0 : index
      %85 = vector.load %arg27[%c0_69, %c0_70] : memref<8x1xf32, #tpu.memory_space<vmem>>, vector<8x1xf32>
      %86 = arith.addf %85, %84 : vector<8x1xf32>
      %cst_71 = arith.constant dense<0.000000e+00> : vector<1xf32>
      %87 = vector.multi_reduction <add>, %86, %cst_71 [0] : vector<8x1xf32> to vector<1xf32>
      %88 = vector.shape_cast %87 : vector<1xf32> to vector<1x1xf32>
      %c0_72 = arith.constant 0 : index
      %c0_73 = arith.constant 0 : index
      %89 = vector.load %arg21[%c0_72, %c0_73] : memref<8x32xf32, #tpu.memory_space<vmem>>, vector<8x32xf32>
      tpu.vector_store %arg21[%c0_72, %c0_73], %82 {strides = array<i32>} : memref<8x32xf32, #tpu.memory_space<vmem>>, vector<8x32xf32>,
      %90 = vector.broadcast %24 : vector<1x32xf32> to vector<8x32xf32>
      %91 = arith.mulf %82, %90 : vector<8x32xf32>
      %92 = vector.broadcast %25 : vector<1x32xf32> to vector<8x32xf32>
      %93 = arith.addf %91, %92 : vector<8x32xf32>
      %94 = arith.index_cast %arg28 : i32 to index
      %c0_74 = arith.constant 0 : index
      %c0_75 = arith.constant 0 : index
      %95 = vector.load %arg20[%94, %c0_74, %c0_75] : memref<8x8x32xf32, #tpu.memory_space<vmem>>, vector<1x8x32xf32>
      %96 = vector.shape_cast %95 : vector<1x8x32xf32> to vector<8x32xf32>
      %97 = vector.shape_cast %93 : vector<8x32xf32> to vector<1x8x32xf32>
      tpu.vector_store %arg20[%94, %c0_74, %c0_75], %97 {strides = array<i32>} : memref<8x8x32xf32, #tpu.memory_space<vmem>>, vector<1x8x32xf32>,
      %c0_76 = arith.constant 0 : index
      %c0_77 = arith.constant 0 : index
      %c0_78 = arith.constant 0 : index
      %98 = vector.load %arg22[%c0_76, %c0_77, %c0_78] : memref<1x1x1xf32, #tpu.memory_space<vmem>>, vector<1x1x1xf32>
      %99 = vector.shape_cast %88 : vector<1x1xf32> to vector<1x1x1xf32>
      %100 = arith.addf %98, %99 : vector<1x1x1xf32>
      %c0_79 = arith.constant 0 : index
      %c0_80 = arith.constant 0 : index
      %c0_81 = arith.constant 0 : index
      %101 = vector.load %arg22[%c0_79, %c0_80, %c0_81] : memref<1x1x1xf32, #tpu.memory_space<vmem>>, vector<1x1x1xf32>
      tpu.vector_store %arg22[%c0_79, %c0_80, %c0_81], %100 {strides = array<i32>} : memref<1x1x1xf32, #tpu.memory_space<vmem>>, vector<1x1x1xf32>,
    }
    %c8_i32_35 = arith.constant 8 : i32
    return
  }
  func.func @transform_0(%arg0: i32, %arg1: i32) -> (i32, i32, i32) {
    %c0_i32 = arith.constant 0 : i32
    %c0_i32_0 = arith.constant 0 : i32
    return %arg1, %arg0, %c0_i32 : i32, i32, i32
  }
  func.func @transform_1(%arg0: i32, %arg1: i32) -> (i32, i32) {
    %c0_i32 = arith.constant 0 : i32
    %c0_i32_0 = arith.constant 0 : i32
    %c0_i32_1 = arith.constant 0 : i32
    return %c0_i32, %c0_i32_0 : i32, i32
  }
  func.func @transform_2(%arg0: i32, %arg1: i32) -> (i32, i32) {
    %c0_i32 = arith.constant 0 : i32
    %c0_i32_0 = arith.constant 0 : i32
    %c0_i32_1 = arith.constant 0 : i32
    return %c0_i32, %c0_i32_0 : i32, i32
  }
  func.func @transform_3(%arg0: i32, %arg1: i32) -> (i32, i32) {
    %c0_i32 = arith.constant 0 : i32
    %c0_i32_0 = arith.constant 0 : i32
    %c0_i32_1 = arith.constant 0 : i32
    return %c0_i32, %c0_i32_0 : i32, i32
  }
  func.func @transform_4(%arg0: i32, %arg1: i32) -> (i32, i32) {
    %c0_i32 = arith.constant 0 : i32
    %c0_i32_0 = arith.constant 0 : i32
    %c0_i32_1 = arith.constant 0 : i32
    return %c0_i32, %c0_i32_0 : i32, i32
  }
  func.func @transform_5(%arg0: i32, %arg1: i32) -> (i32, i32) {
    %c0_i32 = arith.constant 0 : i32
    %c0_i32_0 = arith.constant 0 : i32
    %c0_i32_1 = arith.constant 0 : i32
    return %c0_i32, %c0_i32_0 : i32, i32
  }
  func.func @transform_6(%arg0: i32, %arg1: i32) -> (i32, i32) {
    %c0_i32 = arith.constant 0 : i32
    %c0_i32_0 = arith.constant 0 : i32
    %c0_i32_1 = arith.constant 0 : i32
    return %c0_i32, %c0_i32_0 : i32, i32
  }
  func.func @transform_7(%arg0: i32, %arg1: i32) -> (i32, i32) {
    %c0_i32 = arith.constant 0 : i32
    %c0_i32_0 = arith.constant 0 : i32
    %c0_i32_1 = arith.constant 0 : i32
    return %c0_i32, %c0_i32_0 : i32, i32
  }
  func.func @transform_8(%arg0: i32, %arg1: i32) -> (i32, i32) {
    %c0_i32 = arith.constant 0 : i32
    %c0_i32_0 = arith.constant 0 : i32
    %c0_i32_1 = arith.constant 0 : i32
    return %c0_i32, %c0_i32_0 : i32, i32
  }
  func.func @transform_9(%arg0: i32, %arg1: i32) -> (i32, i32) {
    %c0_i32 = arith.constant 0 : i32
    %c0_i32_0 = arith.constant 0 : i32
    %c0_i32_1 = arith.constant 0 : i32
    return %c0_i32, %c0_i32_0 : i32, i32
  }
  func.func @transform_10(%arg0: i32, %arg1: i32) -> (i32, i32) {
    %c0_i32 = arith.constant 0 : i32
    %c0_i32_0 = arith.constant 0 : i32
    %c0_i32_1 = arith.constant 0 : i32
    return %c0_i32, %c0_i32_0 : i32, i32
  }
  func.func @transform_11(%arg0: i32, %arg1: i32) -> (i32, i32) {
    %c0_i32 = arith.constant 0 : i32
    %c0_i32_0 = arith.constant 0 : i32
    %c0_i32_1 = arith.constant 0 : i32
    return %c0_i32, %c0_i32_0 : i32, i32
  }
  func.func @transform_12(%arg0: i32, %arg1: i32) -> (i32, i32) {
    %c0_i32 = arith.constant 0 : i32
    %c0_i32_0 = arith.constant 0 : i32
    %c0_i32_1 = arith.constant 0 : i32
    return %c0_i32, %c0_i32_0 : i32, i32
  }
  func.func @transform_13(%arg0: i32, %arg1: i32) -> (i32, i32) {
    %c0_i32 = arith.constant 0 : i32
    %c0_i32_0 = arith.constant 0 : i32
    %c0_i32_1 = arith.constant 0 : i32
    return %c0_i32, %c0_i32_0 : i32, i32
  }
  func.func @transform_14(%arg0: i32, %arg1: i32) -> (i32, i32) {
    %c0_i32 = arith.constant 0 : i32
    %c0_i32_0 = arith.constant 0 : i32
    %c0_i32_1 = arith.constant 0 : i32
    return %c0_i32, %c0_i32_0 : i32, i32
  }
  func.func @transform_15(%arg0: i32, %arg1: i32) -> (i32, i32) {
    %c0_i32 = arith.constant 0 : i32
    %c0_i32_0 = arith.constant 0 : i32
    %c0_i32_1 = arith.constant 0 : i32
    return %c0_i32, %c0_i32_0 : i32, i32
  }
  func.func @transform_16(%arg0: i32, %arg1: i32) -> (i32, i32) {
    %c0_i32 = arith.constant 0 : i32
    %c0_i32_0 = arith.constant 0 : i32
    %c0_i32_1 = arith.constant 0 : i32
    return %c0_i32, %c0_i32_0 : i32, i32
  }
  func.func @transform_17(%arg0: i32, %arg1: i32) -> (i32, i32) {
    %c0_i32 = arith.constant 0 : i32
    %c0_i32_0 = arith.constant 0 : i32
    %c0_i32_1 = arith.constant 0 : i32
    return %c0_i32, %c0_i32_0 : i32, i32
  }
  func.func @transform_18(%arg0: i32, %arg1: i32) -> (i32, i32, i32) {
    %c0_i32 = arith.constant 0 : i32
    %c0_i32_0 = arith.constant 0 : i32
    return %arg1, %arg0, %c0_i32 : i32, i32, i32
  }
  func.func @transform_19(%arg0: i32, %arg1: i32) -> (i32, i32) {
    %c0_i32 = arith.constant 0 : i32
    %c0_i32_0 = arith.constant 0 : i32
    return %arg0, %c0_i32 : i32, i32
  }
  func.func @transform_20(%arg0: i32, %arg1: i32) -> (i32, i32, i32) {
    %c0_i32 = arith.constant 0 : i32
    %c0_i32_0 = arith.constant 0 : i32
    %c0_i32_1 = arith.constant 0 : i32
    return %arg0, %c0_i32, %c0_i32_0 : i32, i32, i32
  }
}

</mosaic_0001>

<bundles_post_ra>
// kernel: act_ltc_forward.1
= control target key start
LH: loop header
LB: loop body
LE: loop exit
PB: predicated region body
PF: predicated region fallthrough
CT: control target
= control target key end

     0   :  { %s9689_s0 = inlined_call_operand.vmem [shape: f32[16,16,8], index: 0, kind: input, shape index: {}]   ;;  %s9690_s1 = inlined_call_operand.vmem [shape: f32[1,8], index: 1, kind: input, shape index: {}]   ;;  %s9691_s2 = inlined_call_operand.vmem [shape: f32[1,8], index: 2, kind: input, shape index: {}]   ;;  %s9692_s3 = inlined_call_operand.vmem [shape: f32[8,32], index: 3, kind: input, shape index: {}]   ;;  %s9693_s4 = inlined_call_operand.vmem [shape: f32[8,32], index: 4, kind: input, shape index: {}]   ;;  %s9694_s5 = inlined_call_operand.vmem [shape: f32[8,32], index: 5, kind: input, shape index: {}]   ;;  %s9695_s6 = inlined_call_operand.vmem [shape: f32[8,32], index: 6, kind: input, shape index: {}]   ;;  %s9696_s7 = inlined_call_operand.vmem [shape: f32[32,32], index: 7, kind: input, shape index: {}]   ;;  %s9697_s8 = inlined_call_operand.vmem [shape: f32[32,32], index: 8, kind: input, shape index: {}]   ;;  %s9698_s9 = inlined_call_operand.vmem [shape: f32[32,32], index: 9, kind: input, shape index: {}]   ;;  %s9699_s10 = inlined_call_operand.vmem [shape: f32[32,32], index: 10, kind: input, shape index: {}]   ;;  %s9700_s11 = inlined_call_operand.vmem [shape: f32[1,32], index: 11, kind: input, shape index: {}]   ;;  %s9701_s12 = inlined_call_operand.vmem [shape: f32[1,32], index: 12, kind: input, shape index: {}]   ;;  %s9702_s13 = inlined_call_operand.vmem [shape: f32[1,32], index: 13, kind: input, shape index: {}]   ;;  %s9703_s14 = inlined_call_operand.vmem [shape: f32[1,32], index: 14, kind: input, shape index: {}]   ;;  %s9704_s15 = inlined_call_operand.vmem [shape: f32[1,32], index: 15, kind: input, shape index: {}]   ;;  %s9705_s16 = inlined_call_operand.vmem [shape: f32[1,32], index: 16, kind: input, shape index: {}]   ;;  %s9706_s17 = inlined_call_operand.<no memory space> [shape: f32[1,1], index: 17, kind: input, shape index: {}]   ;;  %s9707_s18 = inlined_call_operand.vmem [shape: f32[16,16,32], index: 18, kind: output, shape index: {0}]   ;;  %s9708_s19 = inlined_call_operand.hbm [shape: f32[16,32], index: 19, kind: output, shape index: {1}]   ;;  %s9709_s20 = inlined_call_operand.vmem [shape: f32[2,1,1], index: 20, kind: output, shape index: {2}]  }
   0x1   :  { %9782 = sst [smem:[#allocation54_spill]] %s9689_s0  ;;  %v26_v0 = vstv %s9706_s17 }
   0x2   :  { %9783 = sst [smem:[#allocation55_spill]] %s9690_s1  ;;  %27 = vst [vmem:[#allocation7] sm:$0x1] %v26_v0 }
   0x3   :  { %9784 = sst [smem:[#allocation56_spill]] %s9691_s2 }
   0x4   :  { %9785 = sst [smem:[#allocation57_spill]] %s9692_s3 }
   0x5   :  { %9786 = sst [smem:[#allocation58_spill]] %s9693_s4 }
   0x6   :  { %9787 = sst [smem:[#allocation59_spill]] %s9701_s12 }
   0x7   :  { %9788 = sst [smem:[#allocation60_spill]] %s9702_s13 }
   0x8   :  { %9789 = sst [smem:[#allocation61_spill]] %s9703_s14 }
   0x9   :  { %9790 = sst [smem:[#allocation62_spill]] %s9704_s15 }
   0xa   :  { %9791 = sst [smem:[#allocation63_spill]] %s9705_s16 }
   0xb   :  { %9792 = sst [smem:[#allocation64_spill]] %s9707_s18 }
   0xc   :  { %9793 = sst [smem:[#allocation65_spill]] %s9708_s19 }
   0xd   :  { %9794 = sst [smem:[#allocation66_spill]] %s9709_s20 }
   0xe   :  { %28 = vsyncpa [#allocation11], 0 }
   0xf   :  { %30 = vsyncpa [#allocation11 + $0x1], 0  ;;  %s7202_s23 = smov 0   ;;  %s7204_s24 = smov 0  }
  0x10   :  { %s7206_s2 = smov 0   ;;  %s7208_s25 = smov 0  }
  0x11   :  { %s7210_s3 = smov 0   ;;  %s7212_s26 = smov 0  }
  0x12   :  { %s7214_s27 = smov 0   ;;  %s7216_s28 = smov 0  }
  0x13   :  { %s7218_s17 = smov 0   ;;  %s7220_s4 = smov 0  }
  0x14 LB: > { %9795 = sst [smem:[#allocation13_spill]] %s7041_s23  ;;  %s5791_s29 = sadd.s32 4294967295, %s7077_s4   ;;  %s7077_s4 = sphi %s7220_s4, %s36_s4   ;;  %s7073_s17 = sphi %s7218_s17, %s9953_s17   ;;  %s7069_s28 = sphi %s7216_s28, %s9952_s28   ;;  %s7065_s27 = sphi %s7214_s27, %s9951_s27   ;;  %s7061_s26 = sphi %s7212_s26, %s9950_s26   ;;  %s7057_s3 = sphi %s7210_s3, %s9949_s3   ;;  %s7053_s25 = sphi %s7208_s25, %s9948_s25   ;;  %s7049_s2 = sphi %s7206_s2, %s9947_s2   ;;  %s7045_s24 = sphi %s7204_s24, %s9955_s24   ;;  %s7041_s23 = sphi %s7202_s23, %s9954_s23  }
  0x15   : > { %9796 = sst [smem:[#allocation14_spill]] %s7049_s2  ;;  %s5792_s30 = sadd.s32 4294967294, %s7077_s4  }
  0x16   : > { %9797 = sst [smem:[#allocation15_spill]] %s7057_s3  ;;  %s45_s0 = sadd.s32 1, %s7069_s28 }
  0x17   : > { %9798 = sst [smem:[#allocation16_spill]] %s7069_s28  ;;  %s48_s21 = sadd.s32 1, %s7073_s17 }
  0x18   : > { %9799 = sst [smem:[#allocation17_spill]] %s7073_s17  ;;  %p46_p0 = scmp.ge.s32.totalorder %s45_s0, 2 }
  0x19   : > { %s57_s1 = sadd.s32 1, %s7057_s3  ;;  %p64_p1 = scmp.ne.s32.totalorder %s7057_s3, %s7053_s25 }
  0x1a   : > { %p65_p2 = scmp.eq.s32.totalorder %s7077_s4, 0  ;;  %s9957_s0 = smov (%p46_p0, %s45_s0), 0 }
  0x1b   : > { %9800 = sst [smem:[#allocation18_spill]] %s9957_s0  ;;  %s9959_s21 = smov (!%p46_p0, %s48_s21), %s7073_s17 }
  0x1c   : > { %s52_s22 = ssub.s32 %s7069_s28, %s9957_s0  ;;  %p7265_p3 = por %p65_p2, %p64_p1 }
  0x1d   : > { %p50_p4 = scmp.ge.s32.totalorder %s9959_s21, 2  ;;  %p453_p5 = scmp.eq.s32.totalorder %s5791_s29, 3 }
  0x1e   : > { %s468_s18 = sadd.s32 1, %s7049_s2  ;;  %p478_p6 = scmp.ne.s32.totalorder %s7049_s2, %s7045_s24 }
  0x1f   : > { %s9961_s21 = smov (%p50_p4, %s9959_s21), 0  ;;  %p7274_p7 = por %p453_p5, %p64_p1 }
  0x20   : > { %9802 = sst [smem:[#allocation19_spill]] %s9961_s21  ;;  %p7278_p8 = por %p478_p6, %p453_p5 }
  0x21   : > { %s53_s0 = ssub.s32 %s7073_s17, %s9961_s21  ;;  %p484_p9 = scmp.ne.s32.totalorder %s7045_s24, %s7041_s23 }
  0x22   : > { %s54_s14 = sor.u32 %s53_s0, %s52_s22  ;;  %p466_p10 = scmp.eq.s32.totalorder %s53_s0, 0 }
  0x23   : > { %p55_p11 = scmp.eq.s32.totalorder %s54_s14, 0  ;;  %p485_p12 = scmp.eq.s32.totalorder %s5792_s30, 3 }
  0x24   : > { %s7287_s29 = scalar_select %p466_p10, %s7049_s2, %s468_s18  }
  0x25   : > { %s7290_s13 = scalar_select %p55_p11, %s7057_s3, %s57_s1  }
  0x26   : > { %9805 = sst [smem:[#allocation20_spill]] %s7287_s29  ;;  %p7292_p13 = por %p485_p12, %p484_p9 }
  0x27   : > { %9806 = sst [smem:[#allocation21_spill]] %s7290_s13  ;;  %p5794_p0 = scmp.ge.s32.totalorder %s7077_s4, 4 }
  0x28   : > { %s9807_s12 = scalar_select %p7292_p13, 1, 0 }
  0x29   : > { %578 = sbr.rel (%p5794_p0) target bundleno = 62 (0x3e), region = 84 }
  0x2a   : > { %9808 = sst [smem:[#allocation22_spill]] %s9807_s12 }
  0x30   : > { %581 = sbr.rel (!%p7265_p3) target bundleno = 62 (0x3e), region = 88  ;;  %s583_s0 = sand.u32 (%p7265_p3), 1, %s7057_s3  }
  0x31   : > { %s6026_s14 = sshll.u32 (%p7265_p3), %s7069_s28, 4  ;;  %s5795_s30 = sshll.u32 (%p7265_p3), %s583_s0, 6 }
  0x32   : > { %s588_s18 = sadd.s32 (%p7265_p3), %s7073_s17, %s6026_s14  ;;  %s9809_s13 = sld [smem:[#allocation54_spill]] (%p7265_p3) }
  0x33   : > { %s5798_s22 = sshll.u32 (%p7265_p3), %s588_s18, 3  ;;  %s585_s2 = scalar_lea.vmem (%p7265_p3), [#allocation8], %s5795_s30 }
  0x38   : > { %s590_s29 = scalar_lea.vmem %s9809_s13, %s5798_s22 }
  0x39   : > { %v632_v1 = vld [vmem:[%s590_s29] sm:$0xff]  ;;  %v634_v2 = vld [vmem:[%s590_s29 + $0x10] sm:$0xff] }
  0x3a   : > { %v636_v3 = vld [vmem:[%s590_s29 + $0x20] sm:$0xff]  ;;  %633 = vst [vmem:[%s585_s2] sm:$0xff] %v632_v1  ;;  %635 = vst [vmem:[%s585_s2 + $0x8] sm:$0xff] %v634_v2  ;;  %v638_v4 = vld [vmem:[%s590_s29 + $0x30] sm:$0xff] }
  0x3b   : > { %637 = vst [vmem:[%s585_s2 + $0x10] sm:$0xff] %v636_v3  ;;  %v640_v5 = vld [vmem:[%s590_s29 + $0x40] sm:$0xff]  ;;  %v642_v6 = vld [vmem:[%s590_s29 + $0x50] sm:$0xff]  ;;  %639 = vst [vmem:[%s585_s2 + $0x18] sm:$0xff] %v638_v4 }
  0x3c   : > { %641 = vst [vmem:[%s585_s2 + $0x20] sm:$0xff] %v640_v5  ;;  %643 = vst [vmem:[%s585_s2 + $0x28] sm:$0xff] %v642_v6  ;;  %v644_v7 = vld [vmem:[%s590_s29 + $0x60] sm:$0xff]  ;;  %v646_v8 = vld [vmem:[%s590_s29 + $0x70] sm:$0xff] }
  0x3d   : > { %645 = vst [vmem:[%s585_s2 + $0x30] sm:$0xff] %v644_v7  ;;  %647 = vst [vmem:[%s585_s2 + $0x38] sm:$0xff] %v646_v8 }
  0x3e PF: > { %p5799_p1 = scmp.ge.s32.totalorder %s7077_s4, 1  ;;  %p652_p2 = scmp.lt.s32.totalorder %s7077_s4, 5 }
  0x40   : > { %p653_p3 = pnand %p5799_p1, %p652_p2 }
  0x42   : > { %656 = sbr.rel (%p653_p3) target bundleno = 2632 (0xa48), region = 126 }
  0x49   : > { %s659_s13 = sand.u32 1, %s7053_s25   ;;  %s9714_s19 = sand.u32 1, %s7045_s24  }
  0x4a   : > { %s7309_s21 = sshll.u32 %s659_s13, 6  ;;  %s5802_s2 = sshll.u32 %s9714_s19, 3 }
  0x4b   : > { %p725_p4 = scmp.lt.s32.totalorder %s7065_s27, 1  ;;  %s9810_s20 = sld [smem:[#allocation66_spill]] }
  0x4c   : > { %s7322_s22 = scalar_lea.vmem [#allocation9], %s7309_s21  ;;  %s7324_s1 = scalar_lea.vmem [#allocation10], %s5802_s2 }
  0x4d   : > { %s726_s29 = scalar_select %p725_p4, %s7065_s27, 1 }
  0x4e   : > { %p5803_p5 = scmp.ne.s32.totalorder %s7061_s26, 0 }
  0x4f   : > { %vm732_vm0 = vcmask (!%p5803_p5), 261120   ;;  %vm734_vm1 = vcmask (!%p5803_p5), 0   ;;  %v7087_v9 = vmov (!%p5803_p5), 0.0  }
  0x50   : > { %731 = sbr.rel (%p5803_p5) target bundleno = 87 (0x57), region = 134  ;;  %733 = vst.msk [vmem:[%s7324_s1] sm:$0xff] (!%p5803_p5), %vm732_vm0, %v7087_v9 }
  0x51   : > { %s7318_s30 = scalar_lea.vmem %s9810_s20, %s726_s29 }
  0x52   : > { %735 = vst.msk [vmem:[%s7318_s30] sm:$0x1] (!%p5803_p5), %vm734_vm1, %v7087_v9 }
  0x57 PF: > { %s9811_s29 = sld [smem:[#allocation55_spill]]  ;;  %s9813_s2 = sld [smem:[#allocation56_spill]]  ;;  %v7352_v14 = vld [vmem:[%s9694_s5] sm:$0xff]  ;;  %v7367_v17 = vld [vmem:[%s9696_s7 + $0x8] sm:$0xff]  ;;  %v7372_v18 = vld [vmem:[%s9696_s7 + $0x10] sm:$0xff] }
  0x58   : > { %s9815_s20 = sld [smem:[#allocation57_spill]]  ;;  %s9817_s3 = sld [smem:[#allocation58_spill]]  ;;  %9819 = vst [vmem:[#allocation27_spill] sm:$0xff] %v7352_v14  ;;  %v7357_v15 = vld [vmem:[%s9695_s6] sm:$0xff]  ;;  %9822 = vst [vmem:[#allocation30_spill] sm:$0xff] %v7367_v17  ;;  %v7377_v19 = vld [vmem:[%s9696_s7 + $0x18] sm:$0xff] }
  0x59   : > { %9820 = vst [vmem:[#allocation28_spill] sm:$0xff] %v7357_v15  ;;  %v7362_v16 = vld [vmem:[%s9696_s7] sm:$0xff]  ;;  %9823 = vst [vmem:[#allocation31_spill] sm:$0xff] %v7372_v18  ;;  %v7387_v21 = vld [vmem:[%s9697_s8 + $0x8] sm:$0xff]  ;;  %s9838_s17 = sld [smem:[#allocation59_spill]]  ;;  %s9844_s19 = sld [smem:[#allocation62_spill]] }
  0x5a   : > { %9821 = vst [vmem:[#allocation29_spill] sm:$0xff] %v7362_v16  ;;  %9824 = vst [vmem:[#allocation32_spill] sm:$0xff] %v7377_v19  ;;  %v7382_v20 = vld [vmem:[%s9697_s8] sm:$0xff]  ;;  %v7392_v22 = vld [vmem:[%s9697_s8 + $0x10] sm:$0xff]  ;;  %s9846_s12 = sld [smem:[#allocation63_spill]]  ;;  %s7471_s23 = smov 0  }
  0x5b   : > { %9825 = vst [vmem:[#allocation33_spill] sm:$0xff] %v7382_v20  ;;  %9826 = vst [vmem:[#allocation34_spill] sm:$0xff] %v7387_v21  ;;  %v7397_v23 = vld [vmem:[%s9697_s8 + $0x18] sm:$0xff]  ;;  %v7402_v24 = vld [vmem:[%s9698_s9] sm:$0xff] }
  0x5c   : > { %9827 = vst [vmem:[#allocation35_spill] sm:$0xff] %v7392_v22  ;;  %9828 = vst [vmem:[#allocation36_spill] sm:$0xff] %v7397_v23  ;;  %v7407_v25 = vld [vmem:[%s9698_s9 + $0x8] sm:$0xff]  ;;  %v7412_v26 = vld [vmem:[%s9698_s9 + $0x10] sm:$0xff] }
  0x5d   : > { %v7332_v10 = vld [vmem:[%s9811_s29] ss:$0 sm:$0xff]  ;;  %9829 = vst [vmem:[#allocation37_spill] sm:$0xff] %v7402_v24  ;;  %9830 = vst [vmem:[#allocation38_spill] sm:$0xff] %v7407_v25  ;;  %v7417_v27 = vld [vmem:[%s9698_s9 + $0x18] sm:$0xff]  ;;  %s9842_s29 = sld [smem:[#allocation61_spill]] }
  0x5e   : > { %9812 = vst [vmem:[#allocation23_spill] sm:$0xff] %v7332_v10  ;;  %v7337_v11 = vld [vmem:[%s9813_s2] ss:$0 sm:$0xff]  ;;  %9831 = vst [vmem:[#allocation39_spill] sm:$0xff] %v7412_v26  ;;  %v7427_v29 = vld [vmem:[%s9699_s10 + $0x8] sm:$0xff]  ;;  %s9840_s2 = sld [smem:[#allocation60_spill]] }
  0x5f   : > { %9814 = vst [vmem:[#allocation24_spill] sm:$0xff] %v7337_v11  ;;  %v7342_v12 = vld [vmem:[%s9815_s20] sm:$0xff]  ;;  %9832 = vst [vmem:[#allocation40_spill] sm:$0xff] %v7417_v27  ;;  %v7432_v30 = vld [vmem:[%s9699_s10 + $0x10] sm:$0xff] }
  0x60   : > { %9816 = vst [vmem:[#allocation25_spill] sm:$0xff] %v7342_v12  ;;  %v7347_v13 = vld [vmem:[%s9817_s3] sm:$0xff]  ;;  %9834 = vst [vmem:[#allocation42_spill] sm:$0xff] %v7427_v29  ;;  %v7437_v31 = vld [vmem:[%s9699_s10 + $0x18] sm:$0xff] }
  0x61   : > { %9818 = vst [vmem:[#allocation26_spill] sm:$0xff] %v7347_v13  ;;  %v7422_v28 = vld [vmem:[%s9699_s10] sm:$0xff]  ;;  %9835 = vst [vmem:[#allocation43_spill] sm:$0xff] %v7432_v30  ;;  %v7469_v38 = vld [vmem:[#allocation7] ss:$0 sm:$0xff] }
  0x62   : > { %9833 = vst [vmem:[#allocation41_spill] sm:$0xff] %v7422_v28  ;;  %9836 = vst [vmem:[#allocation44_spill] sm:$0xff] %v7437_v31  ;;  %v7442_v32 = vld [vmem:[%s9700_s11] ss:$0 sm:$0xff] }
  0x63   : > { %9837 = vst [vmem:[#allocation45_spill] sm:$0xff] %v7442_v32  ;;  %v7447_v33 = vld [vmem:[%s9838_s17] ss:$0 sm:$0xff]  ;;  %9848 = vst [vmem:[#allocation51_spill] sm:$0xff] %v7469_v38 }
  0x64   : > { %9839 = vst [vmem:[#allocation46_spill] sm:$0xff] %v7447_v33  ;;  %v7452_v34 = vld [vmem:[%s9840_s2] ss:$0 sm:$0xff] }
  0x65   : > { %9841 = vst [vmem:[#allocation47_spill] sm:$0xff] %v7452_v34  ;;  %v7457_v35 = vld [vmem:[%s9842_s29] ss:$0 sm:$0xff] }
  0x66   : > { %9843 = vst [vmem:[#allocation48_spill] sm:$0xff] %v7457_v35  ;;  %v7462_v36 = vld [vmem:[%s9844_s19] ss:$0 sm:$0xff] }
  0x67   : > { %9845 = vst [vmem:[#allocation49_spill] sm:$0xff] %v7462_v36  ;;  %v7467_v37 = vld [vmem:[%s9846_s12] ss:$0 sm:$0xff] }
  0x68   : > { %9847 = vst [vmem:[#allocation50_spill] sm:$0xff] %v7467_v37 }
  0x69 LB: >> { %v9849_v13 = vld [vmem:[#allocation26_spill] sm:$0xff]  ;;  %v9850_v12 = vld [vmem:[#allocation25_spill] sm:$0xff]  ;;  %v9851_v15 = vld [vmem:[#allocation28_spill] sm:$0xff]  ;;  %v788_v39 = vlaneseq  ;;  %vm916_vm2 = vcmask 261120   ;;  %vm1094_vm3 = vcmask 7168   ;;  %v9720_v41 = vmov 0.0   ;;  %s7081_s23 = sphi %s7471_s23, %s770_s23  }
  0x6a   : >> { %v9852_v14 = vld [vmem:[#allocation27_spill] sm:$0xff]  ;;  %v1091_v40 = vld [vmem:[%s7324_s1] sm:$0xff]  ;;  %1093 = vst.msk [vmem:[#allocation3] sm:$0xff] %vm916_vm2, %v9720_v41  ;;  %s5804_s17 = sshll.u32 %s7081_s23, 3  ;;  %s9853_s18 = scalar_lea.vmem [#allocation8], %s7309_s21  ;;  %v9855_v11 = vld [vmem:[#allocation24_spill] sm:$0xff] }
  0x6b   : >> { %1092 = vst.msk [vmem:[#allocation2] sm:$0xff] %vm916_vm2, %v1091_v40  ;;  %v789_v42 = vshrl.u32 %v788_v39, 7  ;;  %s772_s14 = scalar_lea.vmem %s9853_s18, %s5804_s17 [#allocation8]  ;;  %v9854_v10 = vld [vmem:[#allocation23_spill] sm:$0xff]  ;;  %vm1051_vm4 = vcmask 1041409   ;;  %vm1053_vm5 = vcmask 1042434   ;;  %vm1055_vm6 = vcmask 1043459  }
  0x6c   : >> { %1095 = vst.msk [vmem:[#allocation4] sm:$0xff] %vm1094_vm3, %v9720_v41  ;;  %1096 = vst.msk [vmem:[#allocation5] sm:$0xff] %vm1094_vm3, %v9720_v41  ;;  %v773_v43 = vld [vmem:[%s772_s14] sm:$0xff]  ;;  %vm1057_vm7 = vcmask 1044484   ;;  %vm1059_vm8 = vcmask 1045509   ;;  %vm1061_vm9 = vcmask 1046534  }
  0x6d   : >> { %1097 = vst.msk [vmem:[#allocation6] sm:$0xff] %vm1094_vm3, %v9720_v41  ;;  %v780_v44 = vmul.f32 %v9854_v10, %v773_v43  ;;  %v7492_v45 = vsub.s32 2, %v789_v42  ;;  %v7494_v46 = vsub.s32 0, %v789_v42  ;;  %v7497_v48 = vsub.s32 3, %v789_v42  ;;  %v9856_v34 = vld [vmem:[#allocation47_spill] sm:$0xff]  ;;  %v9857_v33 = vld [vmem:[#allocation46_spill] sm:$0xff] }
  0x6e   : >> { %v7499_v49 = vsub.s32 1, %v789_v42  ;;  %v7505_v54 = vsub.s32 5, %v789_v42  ;;  %v7507_v55 = vsub.s32 4, %v789_v42  ;;  %v7511_v58 = vsub.s32 7, %v789_v42  ;;  %s7585_s2 = smov 0  }
  0x6f   : >> { %v787_v47 = vadd.f32 %v9855_v11, %v780_v44  ;;  %v7513_v59 = vsub.s32 6, %v789_v42  ;;  %vm1063_vm10 = vcmask 1047559  }
  0x71   : >> { %v805_v50 = vrot.slane %v787_v47, %v7492_v45  ;;  %v791_v51 = vrot.slane %v787_v47, %v7494_v46  ;;  %v812_v52 = vrot.slane %v787_v47, %v7497_v48  ;;  %v798_v53 = vrot.slane %v787_v47, %v7499_v49 }
  0x72   : >> { %v826_v56 = vrot.slane %v787_v47, %v7505_v54  ;;  %v819_v57 = vrot.slane %v787_v47, %v7507_v55  ;;  %v840_v60 = vrot.slane %v787_v47, %v7511_v58  ;;  %v833_v61 = vrot.slane %v787_v47, %v7513_v59 }
  0x73   : >> { %807 = vbcast.lane.b32.xlu1 %v805_v50, 256  ;;  %793 = vbcast.lane.b32.xlu0 %v791_v51, 256 }
  0x77   : >> { %814 = vbcast.lane.b32.xlu1 %v812_v52, 256  ;;  %800 = vbcast.lane.b32.xlu0 %v798_v53, 256 }
  0x7b   : >> { %828 = vbcast.lane.b32.xlu1 %v826_v56, 256  ;;  %821 = vbcast.lane.b32.xlu0 %v819_v57, 256 }
  0x7f   : >> { %842 = vbcast.lane.b32.xlu1 %v840_v60, 256  ;;  %835 = vbcast.lane.b32.xlu0 %v833_v61, 256 }
  0xe5   : >> { %v808_v62 = vpop.permute.xlu1 %807  ;;  %v794_v63 = vpop.permute.xlu0 %793 }
  0xe6   : >> { %v846_v0 = vsub.f32 %v808_v62, %v9852_v14  ;;  %v844_v1 = vsub.f32 %v794_v63, %v9852_v14 }
  0xe8   : >> { %v854_v2 = vmul.f32 %v846_v0, %v9851_v15  ;;  %v852_v3 = vmul.f32 %v844_v1, %v9851_v15 }
  0xe9   : >> { %v815_v4 = vpop.permute.xlu1 %814  ;;  %v801_v5 = vpop.permute.xlu0 %800 }
  0xea   : >> { %v5809_v6 = vmul.f32 -1.442695, %v854_v2  ;;  %v5807_v7 = vmul.f32 -1.442695, %v852_v3  ;;  %v847_v8 = vsub.f32 %v815_v4, %v9852_v14  ;;  %v845_v9 = vsub.f32 %v801_v5, %v9852_v14 }
  0xec   : >> { %6139 = vpow2.f32 %v5809_v6  ;;  %v855_v39 = vmul.f32 %v847_v8, %v9851_v15  ;;  %v853_v40 = vmul.f32 %v845_v9, %v9851_v15 }
  0xed   : >> { %v829_v42 = vpop.permute.xlu1 %828  ;;  %v822_v43 = vpop.permute.xlu0 %821  ;;  %6141 = vpow2.f32 %v5807_v7 }
  0xee   : >> { %v5808_v44 = vmul.f32 -1.442695, %v853_v40  ;;  %v849_v47 = vsub.f32 %v829_v42, %v9852_v14  ;;  %v848_v50 = vsub.f32 %v822_v43, %v9852_v14  ;;  %v5810_v51 = vmul.f32 -1.442695, %v855_v39 }
  0xf0   : >> { %v856_v52 = vmul.f32 %v848_v50, %v9851_v15  ;;  %6143 = vpow2.f32 %v5808_v44  ;;  %v857_v56 = vmul.f32 %v849_v47, %v9851_v15 }
  0xf1   : >> { %v843_v53 = vpop.permute.xlu1 %842  ;;  %6145 = vpow2.f32 %v5810_v51  ;;  %v836_v5 = vpop.permute.xlu0 %835 }
  0xf2   : >> { %v851_v57 = vsub.f32 %v843_v53, %v9852_v14  ;;  %v5811_v60 = vmul.f32 -1.442695, %v856_v52  ;;  %v5812_v63 = vmul.f32 -1.442695, %v857_v56  ;;  %v850_v8 = vsub.f32 %v836_v5, %v9852_v14 }
  0xf4   : >> { %v859_v61 = vmul.f32 %v851_v57, %v9851_v15  ;;  %6147 = vpow2.f32 %v5811_v60  ;;  %v858_v40 = vmul.f32 %v850_v8, %v9851_v15 }
  0xf5   : >> { %6149 = vpow2.f32 %v5812_v63 }
  0xf6   : >> { %v6140_v62 = vpop.eup %6139  ;;  %v5814_v1 = vmul.f32 -1.442695, %v859_v61  ;;  %v5813_v47 = vmul.f32 -1.442695, %v858_v40 }
  0xf7   : >> { %v6142_v0 = vpop.eup %6141  ;;  %v886_v2 = vadd.f32 1.0, %v6140_v62 }
  0xf8   : >> { %v884_v4 = vadd.f32 1.0, %v6142_v0  ;;  %6151 = vpow2.f32 %v5814_v1 }
  0xf9   : >> { %6153 = vrcp.f32 %v886_v2 }
  0xfa   : >> { %v6144_v3 = vpop.eup %6143 }
  0xfb   : >> { %v885_v6 = vadd.f32 1.0, %v6144_v3  ;;  %v6146_v7 = vpop.eup %6145 }
  0xfc   : >> { %v887_v9 = vadd.f32 1.0, %v6146_v7 }
  0xfd   : >> { %6155 = vrcp.f32 %v885_v6 }
  0xfe   : >> { %6157 = vrcp.f32 %v884_v4  ;;  %v6148_v39 = vpop.eup %6147 }
  0xff   : >> { %v6150_v42 = vpop.eup %6149  ;;  %6159 = vrcp.f32 %v887_v9  ;;  %v888_v43 = vadd.f32 1.0, %v6148_v39 }
 0x100   : >> { %v889_v51 = vadd.f32 1.0, %v6150_v42 }
 0x101   : >> { %6161 = vrcp.f32 %v888_v43 }
 0x102   : >> { %v6152_v44 = vpop.eup %6151  ;;  %6163 = vpow2.f32 %v5813_v47 }
 0x103   : >> { %v6154_v50 = vpop.eup %6153  ;;  %v891_v56 = vadd.f32 1.0, %v6152_v44  ;;  %6165 = vrcp.f32 %v889_v51 }
 0x104   : >> { %v910_v61 = vmul.f32 %v6154_v50, %v9849_v13  ;;  %v975_v62 = vmul.f32 %v6154_v50, %v9850_v12 }
 0x105   : >> { %6167 = vrcp.f32 %v891_v56 }
 0x106   : >> { %v931_v4 = vsel %vm916_vm2, %v910_v61, 0.0  ;;  %v995_v5 = vsel %vm916_vm2, %v975_v62, 0.0 }
 0x107   : >> { %v6156_v52 = vpop.eup %6155  ;;  %v932_v43 = vrot.slane %v931_v4, 4  ;;  %v996_v44 = vrot.slane %v995_v5, 4 }
 0x108   : >> { %v6158_v53 = vpop.eup %6157  ;;  %v909_v57 = vmul.f32 %v6156_v52, %v9849_v13  ;;  %v974_v60 = vmul.f32 %v6156_v52, %v9850_v12 }
 0x109   : >> { %v908_v63 = vmul.f32 %v6158_v53, %v9849_v13  ;;  %v973_v0 = vmul.f32 %v6158_v53, %v9850_v12  ;;  %v6160_v1 = vpop.eup %6159 }
 0x10a   : >> { %v924_v2 = vsel %vm916_vm2, %v909_v57, 0.0  ;;  %v988_v3 = vsel %vm916_vm2, %v974_v60, 0.0  ;;  %v911_v8 = vmul.f32 %v6160_v1, %v9849_v13  ;;  %v976_v40 = vmul.f32 %v6160_v1, %v9850_v12 }
 0x10b   : >> { %v917_v6 = vsel %vm916_vm2, %v908_v63, 0.0  ;;  %v981_v7 = vsel %vm916_vm2, %v973_v0, 0.0  ;;  %v925_v9 = vrot.slane %v924_v2, 4  ;;  %v6162_v39 = vpop.eup %6161  ;;  %v989_v42 = vrot.slane %v988_v3, 4 }
 0x10c   : >> { %v918_v47 = vrot.slane %v917_v6, 4  ;;  %v982_v50 = vrot.slane %v981_v7, 4  ;;  %v6164_v51 = vpop.eup %6163  ;;  %v938_v53 = vsel %vm916_vm2, %v911_v8, 0.0  ;;  %v912_v57 = vmul.f32 %v6162_v39, %v9849_v13 }
 0x10d   : >> { %v6166_v52 = vpop.eup %6165  ;;  %v926_v56 = vadd.f32 %v925_v9, %v924_v2  ;;  %v977_v60 = vmul.f32 %v6162_v39, %v9850_v12  ;;  %v1002_v61 = vsel %vm916_vm2, %v976_v40, 0.0  ;;  %v990_v62 = vadd.f32 %v989_v42, %v988_v3 }
 0x10e   : >> { %v933_v0 = vadd.f32 %v932_v43, %v931_v4  ;;  %v997_v1 = vadd.f32 %v996_v44, %v995_v5  ;;  %v919_v41 = vadd.f32 %v918_v47, %v917_v6  ;;  %v983_v10 = vadd.f32 %v982_v50, %v981_v7 }
 0x10f   : >> { %v6168_v63 = vpop.eup %6167  ;;  %v939_v11 = vrot.slane %v938_v53, 4  ;;  %v913_v14 = vmul.f32 %v6166_v52, %v9849_v13  ;;  %v978_v15 = vmul.f32 %v6166_v52, %v9850_v12  ;;  %v1003_v36 = vrot.slane %v1002_v61, 4 }
 0x110   : >> { %v927_v8 = vrot.slane %v926_v56, 2  ;;  %v945_v2 = vsel %vm916_vm2, %v912_v57, 0.0  ;;  %v1009_v9 = vsel %vm916_vm2, %v977_v60, 0.0  ;;  %v991_v39 = vrot.slane %v990_v62, 2 }
 0x111   : >> { %v915_v40 = vmul.f32 %v6168_v63, %v9849_v13  ;;  %v980_v3 = vmul.f32 %v6168_v63, %v9850_v12  ;;  %v890_v4 = vadd.f32 1.0, %v6164_v51  ;;  %v934_v5 = vrot.slane %v933_v0, 2 }
 0x112   : >> { %v998_v6 = vrot.slane %v997_v1, 2  ;;  %v920_v7 = vrot.slane %v919_v41, 2  ;;  %v984_v42 = vrot.slane %v983_v10, 2  ;;  %v952_v43 = vsel %vm916_vm2, %v913_v14, 0.0 }
 0x113   : >> { %v1016_v44 = vsel %vm916_vm2, %v978_v15, 0.0  ;;  %v946_v47 = vrot.slane %v945_v2, 4  ;;  %v1010_v50 = vrot.slane %v1009_v9, 4  ;;  %v940_v52 = vadd.f32 %v939_v11, %v938_v53 }
 0x114   : >> { %v1004_v57 = vadd.f32 %v1003_v36, %v1002_v61  ;;  %v928_v35 = vadd.f32 %v927_v8, %v926_v56  ;;  %v992_v60 = vadd.f32 %v991_v39, %v990_v62  ;;  %v966_v38 = vsel %vm916_vm2, %v915_v40, 0.0 }
 0x115   : >> { %v1030_v37 = vsel %vm916_vm2, %v980_v3, 0.0  ;;  %6169 = vrcp.f32 %v890_v4  ;;  %v935_v51 = vadd.f32 %v934_v5, %v933_v0  ;;  %v999_v63 = vadd.f32 %v998_v6, %v997_v1 }
 0x116   : >> { %v953_v32 = vrot.slane %v952_v43, 4  ;;  %v1017_v23 = vrot.slane %v1016_v44, 4  ;;  %v921_v19 = vadd.f32 %v920_v7, %v919_v41  ;;  %v985_v18 = vadd.f32 %v984_v42, %v983_v10 }
 0x117   : >> { %v947_v14 = vadd.f32 %v946_v47, %v945_v2  ;;  %v1011_v22 = vadd.f32 %v1010_v50, %v1009_v9  ;;  %v967_v15 = vrot.slane %v966_v38, 4  ;;  %v1031_v17 = vrot.slane %v1030_v37, 4 }
 0x118   : >> { %v941_v21 = vrot.slane %v940_v52, 2  ;;  %v1005_v11 = vrot.slane %v1004_v57, 2  ;;  %v929_v36 = vrot.slane %v928_v35, 1  ;;  %v993_v53 = vrot.slane %v992_v60, 1 }
 0x119   : >> { %v936_v56 = vrot.slane %v935_v51, 1  ;;  %v1000_v61 = vrot.slane %v999_v63, 1  ;;  %v954_v62 = vadd.f32 %v953_v32, %v952_v43  ;;  %v1018_v8 = vadd.f32 %v1017_v23, %v1016_v44 }
 0x11a   : >> { %v922_v39 = vrot.slane %v921_v19, 1  ;;  %v986_v40 = vrot.slane %v985_v18, 1  ;;  %v948_v0 = vrot.slane %v947_v14, 2  ;;  %v1012_v1 = vrot.slane %v1011_v22, 2 }
 0x11b   : >> { %v968_v41 = vadd.f32 %v967_v15, %v966_v38  ;;  %v1032_v10 = vadd.f32 %v1031_v17, %v1030_v37  ;;  %v942_v2 = vadd.f32 %v941_v21, %v940_v52  ;;  %v1006_v9 = vadd.f32 %v1005_v11, %v1004_v57 }
 0x11c   : >> { %v930_v3 = vadd.f32 %v929_v36, %v928_v35  ;;  %v994_v4 = vadd.f32 %v993_v53, %v992_v60  ;;  %v937_v5 = vadd.f32 %v936_v56, %v935_v51  ;;  %v1001_v6 = vadd.f32 %v1000_v61, %v999_v63 }
 0x11d   : >> { %v955_v7 = vrot.slane %v954_v62, 2  ;;  %v1019_v42 = vrot.slane %v1018_v8, 2  ;;  %v923_v50 = vadd.f32 %v922_v39, %v921_v19  ;;  %v987_v32 = vadd.f32 %v986_v40, %v985_v18 }
 0x11e   : >> { %v949_v23 = vadd.f32 %v948_v0, %v947_v14  ;;  %v1013_v43 = vadd.f32 %v1012_v1, %v1011_v22  ;;  %v969_v44 = vrot.slane %v968_v41, 2  ;;  %v1033_v16 = vrot.slane %v1032_v10, 2 }
 0x11f   : >> { %v6170_v47 = vpop.eup %6169  ;;  %v943_v17 = vrot.slane %v942_v2, 1  ;;  %v1007_v21 = vrot.slane %v1006_v9, 1  ;;  %v1052_v35 = vsel %vm1051_vm4, %v930_v3, %v923_v50  ;;  %v1081_v37 = vsel %vm1051_vm4, %v994_v4, %v987_v32 }
 0x120   : >> { %v914_v20 = vmul.f32 %v6170_v47, %v9849_v13  ;;  %v979_v38 = vmul.f32 %v6170_v47, %v9850_v12  ;;  %v956_v52 = vadd.f32 %v955_v7, %v954_v62  ;;  %v1020_v57 = vadd.f32 %v1019_v42, %v1018_v8 }
 0x121   : >> { %v950_v19 = vrot.slane %v949_v23, 1  ;;  %v1014_v22 = vrot.slane %v1013_v43, 1  ;;  %v970_v14 = vadd.f32 %v969_v44, %v968_v41  ;;  %v1034_v15 = vadd.f32 %v1033_v16, %v1032_v10 }
 0x122   : >> { %v959_v60 = vsel %vm916_vm2, %v914_v20, 0.0  ;;  %v1023_v18 = vsel %vm916_vm2, %v979_v38, 0.0  ;;  %v1054_v11 = vsel %vm1053_vm5, %v937_v5, %v1052_v35  ;;  %v1082_v36 = vsel %vm1053_vm5, %v1001_v6, %v1081_v37 }
 0x123   : >> { %v960_v51 = vrot.slane %v959_v60, 4  ;;  %v1024_v63 = vrot.slane %v1023_v18, 4  ;;  %v944_v61 = vadd.f32 %v943_v17, %v942_v2  ;;  %v1008_v62 = vadd.f32 %v1007_v21, %v1006_v9 }
 0x124   : >> { %v957_v8 = vrot.slane %v956_v52, 1  ;;  %v1021_v20 = vrot.slane %v1020_v57, 1  ;;  %v951_v39 = vadd.f32 %v950_v19, %v949_v23  ;;  %v1015_v40 = vadd.f32 %v1014_v22, %v1013_v43 }
 0x125   : >> { %v961_v53 = vadd.f32 %v960_v51, %v959_v60  ;;  %v1025_v56 = vadd.f32 %v1024_v63, %v1023_v18  ;;  %v1056_v3 = vsel %vm1055_vm6, %v944_v61, %v1054_v11  ;;  %v1083_v4 = vsel %vm1055_vm6, %v1008_v62, %v1082_v36 }
 0x126   : >> { %v971_v41 = vrot.slane %v970_v14, 1  ;;  %v1035_v16 = vrot.slane %v1034_v15, 1  ;;  %v958_v7 = vadd.f32 %v957_v8, %v956_v52  ;;  %v1022_v6 = vadd.f32 %v1021_v20, %v1020_v57 }
 0x127   : >> { %v962_v0 = vrot.slane %v961_v53, 2  ;;  %v1026_v1 = vrot.slane %v1025_v56, 2  ;;  %v1058_v2 = vsel %vm1057_vm7, %v951_v39, %v1056_v3  ;;  %v1084_v9 = vsel %vm1057_vm7, %v1015_v40, %v1083_v4 }
 0x128   : >> { %v972_v50 = vadd.f32 %v971_v41, %v970_v14  ;;  %v1036_v32 = vadd.f32 %v1035_v16, %v1034_v15  ;;  %v1060_v44 = vsel %vm1059_vm8, %v958_v7, %v1058_v2  ;;  %v1085_v38 = vsel %vm1059_vm8, %v1022_v6, %v1084_v9 }
 0x129   : >> { %v963_v10 = vadd.f32 %v962_v0, %v961_v53  ;;  %v1027_v5 = vadd.f32 %v1026_v1, %v1025_v56 }
 0x12b   : >> { %v964_v42 = vrot.slane %v963_v10, 1  ;;  %v1028_v47 = vrot.slane %v1027_v5, 1 }
 0x12d   : >> { %v965_v23 = vadd.f32 %v964_v42, %v963_v10  ;;  %v1029_v43 = vadd.f32 %v1028_v47, %v1027_v5 }
 0x12f   : >> { %v1062_v17 = vsel %vm1061_vm9, %v965_v23, %v1060_v44  ;;  %v1086_v21 = vsel %vm1061_vm9, %v1029_v43, %v1085_v38 }
 0x130   : >> { %v1064_v35 = vsel %vm1063_vm10, %v972_v50, %v1062_v17  ;;  %v1087_v37 = vsel %vm1063_vm10, %v1036_v32, %v1086_v21 }
 0x131   : >> { %v7580_v52 = vadd.f32 %v9856_v34, %v1064_v35  ;;  %v1089_v57 = vadd.f32 %v9857_v33, %v1087_v37 }
 0x133   : >> { %v7583_v60 = vadd.f32 1e-08, %v1089_v57 }
 0x134 LB: >>> { %v9858_v25 = vld [vmem:[#allocation38_spill] sm:$0xff]  ;;  %v9859_v24 = vld [vmem:[#allocation37_spill] sm:$0xff]  ;;  %v9862_v26 = vld [vmem:[#allocation39_spill] sm:$0xff]  ;;  %v7089_v19 = vmov 0.0   ;;  %s7085_s2 = sphi %s7585_s2, %s1103_s2  }
 0x135   : >>> { %v9860_v29 = vld [vmem:[#allocation42_spill] sm:$0xff]  ;;  %v9861_v28 = vld [vmem:[#allocation41_spill] sm:$0xff]  ;;  %v9863_v30 = vld [vmem:[#allocation43_spill] sm:$0xff] }
 0x136   : >>> { %v9864_v27 = vld [vmem:[#allocation40_spill] sm:$0xff]  ;;  %v7590_v18 = vld [vmem:[#allocation4] sm:$0xff] }
 0x137   : >>> { %v9865_v31 = vld [vmem:[#allocation44_spill] sm:$0xff]  ;;  %9866 = vst [vmem:[#allocation52_spill] sm:$0xff] %v7590_v18  ;;  %vm1105_vm11 = vcmp.le.f32.partialorder %v7590_v18, 0.99 }
 0x138   : >>> { %v7593_v22 = vsel %vm1105_vm11, 1.0, %v7089_v19 }
 0x139   : >>> { %9867 = vst [vmem:[#allocation53_spill] sm:$0xff] %v7593_v22  ;;  %v1108_v51 = vsel %vm1094_vm3, %v7593_v22, -inf }
 0x13a   : >>> { %1109 = vmax.xlane.f32.xlu0 %v1108_v51 }
 0x1c7   : >>> { %v1110_v63 = vpop.xlane.xlu0 %1109 }
 0x1c8   : >>> { %v1111_v14 = vrot.slane %v1110_v63, 4 }
 0x1ca   : >>> { %v1112_v15 = vmax.f32 %v1110_v63, %v1111_v14 }
 0x1cc   : >>> { %v1113_v11 = vrot.slane %v1112_v15, 2 }
 0x1ce   : >>> { %v1114_v36 = vmax.f32 %v1112_v15, %v1113_v11 }
 0x1d0   : >>> { %v1115_v53 = vrot.slane %v1114_v36, 1 }
 0x1d2   : >>> { %v1116_v56 = vmax.f32 %v1114_v36, %v1115_v53 }
 0x1d4   : >>> { %6028 = vpush %v1116_v56 }
 0x205   : >>> { %s6029_s25 = spop %6028 }
 0x206   : >>> { %p1118_p6 = scmp.gt.f32.partialorder %s6029_s25, 0.0 }
 0x207   : >>> { %v1122_v61 = vld [vmem:[#allocation2] sm:$0xff] (%p1118_p6) }
 0x208   : >>> { %1121 = sbr.rel (!%p1118_p6) target bundleno = 2451 (0x993), region = 152  ;;  %v1145_v62 = vrot.slane (%p1118_p6), %v1122_v61, %v7499_v49  ;;  %v1126_v8 = vrot.slane (%p1118_p6), %v1122_v61, %v7494_v46  ;;  %v1164_v20 = vrot.slane (%p1118_p6), %v1122_v61, %v7492_v45  ;;  %v1183_v39 = vrot.slane (%p1118_p6), %v1122_v61, %v7497_v48 }
 0x209   : >>> { %v1202_v40 = vrot.slane (%p1118_p6), %v1122_v61, %v7507_v55  ;;  %v1221_v0 = vrot.slane (%p1118_p6), %v1122_v61, %v7505_v54  ;;  %v1240_v1 = vrot.slane (%p1118_p6), %v1122_v61, %v7513_v59  ;;  %v1259_v3 = vrot.slane (%p1118_p6), %v1122_v61, %v7511_v58 }
 0x20a   : >>> { %1147 = vbcast.lane.b32.xlu1 (%p1118_p6), %v1145_v62, 256  ;;  %1128 = vbcast.lane.b32.xlu0 (%p1118_p6), %v1126_v8, 256 }
 0x20e   : >>> { %1151 = vbcast.lane.b32.xlu1 (%p1118_p6), %v1145_v62, 264  ;;  %1132 = vbcast.lane.b32.xlu0 (%p1118_p6), %v1126_v8, 264 }
 0x212   : >>> { %1170 = vbcast.lane.b32.xlu1 %v1164_v20, 264  ;;  %1166 = vbcast.lane.b32.xlu0 %v1164_v20, 256 }
 0x216   : >>> { %1155 = vbcast.lane.b32.xlu1 %v1145_v62, 272  ;;  %1136 = vbcast.lane.b32.xlu0 %v1126_v8, 272 }
 0x21a   : >>> { %1189 = vbcast.lane.b32.xlu1 %v1183_v39, 264  ;;  %1185 = vbcast.lane.b32.xlu0 %v1183_v39, 256 }
 0x21e   : >>> { %1204 = vbcast.lane.b32.xlu1 %v1202_v40, 256  ;;  %1174 = vbcast.lane.b32.xlu0 %v1164_v20, 272 }
 0x222   : >>> { %1140 = vbcast.lane.b32.xlu1 %v1126_v8, 280  ;;  %1208 = vbcast.lane.b32.xlu0 %v1202_v40, 264 }
 0x226   : >>> { %1193 = vbcast.lane.b32.xlu1 %v1183_v39, 272  ;;  %1159 = vbcast.lane.b32.xlu0 %v1145_v62, 280 }
 0x22a   : >>> { %1227 = vbcast.lane.b32.xlu1 %v1221_v0, 264  ;;  %1223 = vbcast.lane.b32.xlu0 %v1221_v0, 256 }
 0x22e   : >>> { %1212 = vbcast.lane.b32.xlu1 %v1202_v40, 272  ;;  %1178 = vbcast.lane.b32.xlu0 %v1164_v20, 280 }
 0x232   : >>> { %1246 = vbcast.lane.b32.xlu1 %v1240_v1, 264  ;;  %1242 = vbcast.lane.b32.xlu0 %v1240_v1, 256 }
 0x236   : >>> { %1231 = vbcast.lane.b32.xlu1 %v1221_v0, 272  ;;  %1197 = vbcast.lane.b32.xlu0 %v1183_v39, 280 }
 0x23a   : >>> { %1265 = vbcast.lane.b32.xlu1 %v1259_v3, 264  ;;  %1261 = vbcast.lane.b32.xlu0 %v1259_v3, 256 }
 0x23e   : >>> { %1250 = vbcast.lane.b32.xlu1 %v1240_v1, 272  ;;  %1216 = vbcast.lane.b32.xlu0 %v1202_v40, 280 }
 0x242   : >>> { %1269 = vbcast.lane.b32.xlu1 %v1259_v3, 272  ;;  %1235 = vbcast.lane.b32.xlu0 %v1221_v0, 280 }
 0x246   : >>> { %1273 = vbcast.lane.b32.xlu1 %v1259_v3, 280  ;;  %1254 = vbcast.lane.b32.xlu0 %v1240_v1, 280 }
 0x27c   : >>> { %v1148_v4 = vpop.permute.xlu1 %1147  ;;  %v1129_v41 = vpop.permute.xlu0 %1128 }
 0x27d   : >>> { %v1279_v2 = vsub.f32 %v1148_v4, %v9859_v24  ;;  %v1275_v42 = vsub.f32 %v1129_v41, %v9859_v24 }
 0x27f   : >>> { %v1311_v47 = vmul.f32 %v1279_v2, %v9861_v28  ;;  %v1307_v32 = vmul.f32 %v1275_v42, %v9861_v28 }
 0x280   : >>> { %v1152_v16 = vpop.permute.xlu1 %1151  ;;  %v1133_v10 = vpop.permute.xlu0 %1132 }
 0x281   : >>> { %v1280_v50 = vsub.f32 %v1152_v16, %v9858_v25  ;;  %v1276_v23 = vsub.f32 %v1133_v10, %v9858_v25  ;;  %v5822_v38 = vmul.f32 -1.442695, %v1311_v47  ;;  %v5818_v21 = vmul.f32 -1.442695, %v1307_v32 }
 0x283   : >>> { %v1312_v17 = vmul.f32 %v1280_v50, %v9860_v29  ;;  %v1308_v35 = vmul.f32 %v1276_v23, %v9860_v29  ;;  %6173 = vpow2.f32 %v5822_v38 }
 0x284   : >>> { %v1171_v5 = vpop.permute.xlu1 %1170  ;;  %v1167_v7 = vpop.permute.xlu0 %1166  ;;  %6175 = vpow2.f32 %v5818_v21 }
 0x285   : >>> { %v1284_v37 = vsub.f32 %v1171_v5, %v9858_v25  ;;  %v1283_v57 = vsub.f32 %v1167_v7, %v9859_v24  ;;  %v5823_v51 = vmul.f32 -1.442695, %v1312_v17  ;;  %v5819_v14 = vmul.f32 -1.442695, %v1308_v35 }
 0x287   : >>> { %v1316_v15 = vmul.f32 %v1284_v37, %v9860_v29  ;;  %v1315_v11 = vmul.f32 %v1283_v57, %v9861_v28  ;;  %6177 = vpow2.f32 %v5823_v51 }
 0x288   : >>> { %v1137_v6 = vpop.permute.xlu0 %1136  ;;  %v1156_v9 = vpop.permute.xlu1 %1155  ;;  %6179 = vpow2.f32 %v5819_v14 }
 0x289   : >>> { %v1281_v36 = vsub.f32 %v1156_v9, %v9862_v26  ;;  %v5827_v56 = vmul.f32 -1.442695, %v1316_v15  ;;  %v5826_v62 = vmul.f32 -1.442695, %v1315_v11  ;;  %v1277_v20 = vsub.f32 %v1137_v6, %v9862_v26 }
 0x28b   : >>> { %v1313_v8 = vmul.f32 %v1281_v36, %v9863_v30  ;;  %6181 = vpow2.f32 %v5827_v56  ;;  %v1309_v3 = vmul.f32 %v1277_v20, %v9863_v30 }
 0x28c   : >>> { %v1186_v43 = vpop.permute.xlu0 %1185  ;;  %v1190_v44 = vpop.permute.xlu1 %1189  ;;  %6183 = vpow2.f32 %v5826_v62 }
 0x28d   : >>> { %v1288_v39 = vsub.f32 %v1190_v44, %v9858_v25  ;;  %v6174_v40 = vpop.eup %6173  ;;  %v5824_v1 = vmul.f32 -1.442695, %v1313_v8  ;;  %v1287_v2 = vsub.f32 %v1186_v43, %v9859_v24  ;;  %v5820_v9 = vmul.f32 -1.442695, %v1309_v3 }
 0x28e   : >>> { %v6176_v0 = vpop.eup %6175  ;;  %v1439_v10 = vadd.f32 1.0, %v6174_v40 }
 0x28f   : >>> { %v1320_v41 = vmul.f32 %v1288_v39, %v9860_v29  ;;  %v1435_v7 = vadd.f32 1.0, %v6176_v0  ;;  %6185 = vpow2.f32 %v5824_v1  ;;  %v1319_v44 = vmul.f32 %v1287_v2, %v9861_v28 }
 0x290   : >>> { %v7615_v19 = vpop.permute.xlu0 %1174  ;;  %v1205_v63 = vpop.permute.xlu1 %1204  ;;  %6187 = vrcp.f32 %v1439_v10 }
 0x291   : >>> { %v6178_v5 = vpop.eup %6177  ;;  %v5831_v42 = vmul.f32 -1.442695, %v1320_v41  ;;  %6189 = vrcp.f32 %v1435_v7  ;;  %v1291_v38 = vsub.f32 %v1205_v63, %v9859_v24  ;;  %v5830_v37 = vmul.f32 -1.442695, %v1319_v44 }
 0x292   : >>> { %v6180_v6 = vpop.eup %6179  ;;  %v1440_v47 = vadd.f32 1.0, %v6178_v5  ;;  %6191 = vpow2.f32 %v5820_v9  ;;  %v1285_v51 = vsub.f32 %v7615_v19, %v9862_v26 }
 0x293   : >>> { %v1436_v23 = vadd.f32 1.0, %v6180_v6  ;;  %6193 = vpow2.f32 %v5831_v42  ;;  %v1323_v57 = vmul.f32 %v1291_v38, %v9861_v28  ;;  %v9868_v6 = vld [vmem:[#allocation33_spill] sm:$0xff]  ;;  %v9870_v38 = vld [vmem:[#allocation34_spill] sm:$0xff] }
 0x294   : >>> { %v1209_v53 = vpop.permute.xlu0 %1208  ;;  %v1141_v61 = vpop.permute.xlu1 %1140  ;;  %6195 = vrcp.f32 %v1440_v47  ;;  %v1317_v8 = vmul.f32 %v1285_v51, %v9863_v30  ;;  %v9869_v47 = vld [vmem:[#allocation29_spill] sm:$0xff] }
 0x295   : >>> { %v1278_v50 = vsub.f32 %v1141_v61, %v9864_v27  ;;  %v6182_v43 = vpop.eup %6181  ;;  %6197 = vrcp.f32 %v1436_v23  ;;  %v1292_v11 = vsub.f32 %v1209_v53, %v9858_v25  ;;  %v5834_v62 = vmul.f32 -1.442695, %v1323_v57 }
 0x296   : >>> { %v6184_v21 = vpop.eup %6183  ;;  %v1444_v14 = vadd.f32 1.0, %v6182_v43  ;;  %6199 = vpow2.f32 %v5830_v37  ;;  %v5828_v10 = vmul.f32 -1.442695, %v1317_v8 }
 0x297   : >>> { %v1310_v35 = vmul.f32 %v1278_v50, %v9865_v31  ;;  %v1443_v63 = vadd.f32 1.0, %v6184_v21  ;;  %v1324_v0 = vmul.f32 %v1292_v11, %v9860_v29  ;;  %v9871_v21 = vld [vmem:[#allocation30_spill] sm:$0xff] }
 0x298   : >>> { %v1160_v4 = vpop.permute.xlu0 %1159  ;;  %v7625_v16 = vpop.permute.xlu1 %1193  ;;  %6201 = vrcp.f32 %v1444_v14 }
 0x299   : >>> { %v6186_v56 = vpop.eup %6185  ;;  %v5821_v61 = vmul.f32 -1.442695, %v1310_v35  ;;  %v1282_v39 = vsub.f32 %v1160_v4, %v9864_v27  ;;  %6203 = vrcp.f32 %v1443_v63  ;;  %v1289_v53 = vsub.f32 %v7625_v16, %v9862_v26 }
 0x29a   : >>> { %v6188_v20 = vpop.eup %6187  ;;  %v1441_v19 = vadd.f32 1.0, %v6186_v56  ;;  %v5835_v42 = vmul.f32 -1.442695, %v1324_v0 }
 0x29b   : >>> { %v6190_v40 = vpop.eup %6189  ;;  %6205 = vpow2.f32 %v5821_v61  ;;  %v1314_v4 = vmul.f32 %v1282_v39, %v9865_v31  ;;  %v1543_v9 = vmul.f32 %v6188_v20, %v9868_v6  ;;  %v1696_v50 = vmul.f32 %v6188_v20, %v9869_v47 }
 0x29c   : >>> { %v7629_v32 = vpop.permute.xlu0 %1223  ;;  %v7633_v17 = vpop.permute.xlu1 %1227  ;;  %6207 = vpow2.f32 %v5834_v62  ;;  %v1539_v23 = vmul.f32 %v6190_v40, %v9868_v6  ;;  %v1321_v44 = vmul.f32 %v1289_v53, %v9863_v30  ;;  %v1692_v57 = vmul.f32 %v6190_v40, %v9869_v47 }
 0x29d   : >>> { %v6192_v1 = vpop.eup %6191  ;;  %6209 = vrcp.f32 %v1441_v19  ;;  %v5825_v14 = vmul.f32 -1.442695, %v1314_v4  ;;  %v1584_v56 = vsel %vm916_vm2, %v1543_v9, 0.0  ;;  %v1296_v62 = vsub.f32 %v7633_v17, %v9858_v25 }
 0x29e   : >>> { %v6194_v41 = vpop.eup %6193  ;;  %v1437_v16 = vadd.f32 1.0, %v6192_v1  ;;  %6211 = vpow2.f32 %v5828_v10  ;;  %v1737_v39 = vsel %vm916_vm2, %v1696_v50, 0.0  ;;  %v1571_v40 = vsel %vm916_vm2, %v1539_v23, 0.0 }
 0x29f   : >>> { %v6196_v7 = vpop.eup %6195  ;;  %v1448_v37 = vadd.f32 1.0, %v6194_v41  ;;  %6213 = vpow2.f32 %v5835_v42  ;;  %v5832_v19 = vmul.f32 -1.442695, %v1321_v44  ;;  %v1724_v17 = vsel %vm916_vm2, %v1692_v57, 0.0 }
 0x2a0   : >>> { %v7639_v15 = vpop.permute.xlu0 %1178  ;;  %v7642_v36 = vpop.permute.xlu1 %1212  ;;  %v1544_v43 = vmul.f32 %v6196_v7, %v9870_v38  ;;  %v1697_v35 = vmul.f32 %v6196_v7, %v9871_v21  ;;  %6215 = vrcp.f32 %v1437_v16  ;;  %v1328_v23 = vmul.f32 %v1296_v62, %v9860_v29 }
 0x2a1   : >>> { %v6198_v2 = vpop.eup %6197  ;;  %6217 = vrcp.f32 %v1448_v37  ;;  %v1286_v41 = vsub.f32 %v7639_v15, %v9864_v27 }
 0x2a2   : >>> { %v1540_v51 = vmul.f32 %v6198_v2, %v9870_v38  ;;  %v6200_v11 = vpop.eup %6199  ;;  %v1693_v61 = vmul.f32 %v6198_v2, %v9871_v21  ;;  %v1585_v1 = vsel %vm916_vm2, %v1544_v43, 0.0  ;;  %v1738_v53 = vsel %vm916_vm2, %v1697_v35, 0.0 }
 0x2a3   : >>> { %v6202_v20 = vpop.eup %6201  ;;  %v1447_v4 = vadd.f32 1.0, %v6200_v11  ;;  %6219 = vpow2.f32 %v5825_v14  ;;  %v1586_v16 = vadd.f32 %v1585_v1, %v1584_v56  ;;  %v7682_v44 = vadd.f32 %v1738_v53, %v1737_v39  ;;  %v9872_v53 = vld [vmem:[#allocation35_spill] sm:$0xff] }
 0x2a4   : >>> { %v7649_v3 = vpop.permute.xlu0 %1242  ;;  %v7651_v5 = vpop.permute.xlu1 %1246  ;;  %v1572_v7 = vsel %vm916_vm2, %v1540_v51, 0.0  ;;  %v1725_v9 = vsel %vm916_vm2, %v1693_v61, 0.0  ;;  %v1548_v42 = vmul.f32 %v6202_v20, %v9870_v38  ;;  %v1701_v50 = vmul.f32 %v6202_v20, %v9871_v21 }
 0x2a5   : >>> { %v6204_v0 = vpop.eup %6203  ;;  %6221 = vpow2.f32 %v5832_v19  ;;  %v7685_v37 = vadd.f32 %v1572_v7, %v1571_v40  ;;  %v1295_v51 = vsub.f32 %v7629_v32, %v9859_v24  ;;  %v1318_v14 = vmul.f32 %v1286_v41, %v9865_v31 }
 0x2a6   : >>> { %v6206_v10 = vpop.eup %6205  ;;  %v1547_v15 = vmul.f32 %v6204_v0, %v9868_v6  ;;  %v7690_v61 = vadd.f32 %v1725_v9, %v1724_v17  ;;  %v1700_v56 = vmul.f32 %v6204_v0, %v9869_v47  ;;  %v1293_v20 = vsub.f32 %v7642_v36, %v9862_v26 }
 0x2a7   : >>> { %v6208_v2 = vpop.eup %6207  ;;  %v1438_v57 = vadd.f32 1.0, %v6206_v10  ;;  %v1598_v19 = vsel %vm916_vm2, %v1548_v42, 0.0  ;;  %v1751_v40 = vsel %vm916_vm2, %v1701_v50, 0.0  ;;  %6223 = vrcp.f32 %v1447_v4  ;;  %v9873_v10 = vld [vmem:[#allocation31_spill] sm:$0xff] }
 0x2a8   : >>> { %v7662_v63 = vpop.permute.xlu0 %1197  ;;  %v7668_v8 = vpop.permute.xlu1 %1231  ;;  %v1451_v62 = vadd.f32 1.0, %v6208_v2  ;;  %v5839_v1 = vmul.f32 -1.442695, %v1328_v23  ;;  %v1597_v32 = vsel %vm916_vm2, %v1547_v15, 0.0  ;;  %v1327_v36 = vmul.f32 %v1295_v51, %v9861_v28 }
 0x2a9   : >>> { %v6210_v35 = vpop.eup %6209  ;;  %v1297_v0 = vsub.f32 %v7668_v8, %v9862_v26  ;;  %6225 = vrcp.f32 %v1438_v57  ;;  %v5829_v2 = vmul.f32 -1.442695, %v1318_v14  ;;  %v1290_v9 = vsub.f32 %v7662_v63, %v9864_v27 }
 0x2aa   : >>> { %v6212_v39 = vpop.eup %6211  ;;  %v1545_v41 = vmul.f32 %v6210_v35, %v9872_v53  ;;  %v1698_v17 = vmul.f32 %v6210_v35, %v9873_v10  ;;  %6227 = vrcp.f32 %v1451_v62  ;;  %v1325_v50 = vmul.f32 %v1293_v20, %v9863_v30 }
 0x2ab   : >>> { %v6214_v7 = vpop.eup %6213  ;;  %v1445_v4 = vadd.f32 1.0, %v6212_v39  ;;  %v7707_v12 = vadd.f32 %v1598_v19, %v1597_v32  ;;  %v1750_v8 = vsel %vm916_vm2, %v1700_v56, 0.0  ;;  %6229 = vpow2.f32 %v5839_v1 }
 0x2ac   : >>> { %v1262_v43 = vpop.permute.xlu0 %1261  ;;  %v1266_v11 = vpop.permute.xlu1 %1265  ;;  %v1587_v63 = vsel %vm916_vm2, %v1545_v41, 0.0  ;;  %v1740_v62 = vsel %vm916_vm2, %v1698_v17, 0.0  ;;  %v1452_v39 = vadd.f32 1.0, %v6214_v7  ;;  %v1329_v20 = vmul.f32 %v1297_v0, %v9863_v30 }
 0x2ad   : >>> { %v6216_v42 = vpop.eup %6215  ;;  %v1304_v23 = vsub.f32 %v1266_v11, %v9858_v25  ;;  %v1303_v57 = vsub.f32 %v1262_v43, %v9859_v24  ;;  %v5838_v11 = vmul.f32 -1.442695, %v1327_v36  ;;  %6231 = vpow2.f32 %v5829_v2 }
 0x2ae   : >>> { %v6218_v35 = vpop.eup %6217  ;;  %v1322_v19 = vmul.f32 %v1290_v9, %v9865_v31  ;;  %v1541_v1 = vmul.f32 %v6216_v42, %v9872_v53  ;;  %v1694_v43 = vmul.f32 %v6216_v42, %v9873_v10  ;;  %v5836_v13 = vmul.f32 -1.442695, %v1325_v50 }
 0x2af   : >>> { %v6220_v14 = vpop.eup %6219  ;;  %v1336_v33 = vmul.f32 %v1304_v23, %v9860_v29  ;;  %6233 = vrcp.f32 %v1445_v4  ;;  %v1300_v17 = vsub.f32 %v7651_v5, %v9858_v25  ;;  %v1335_v0 = vmul.f32 %v1303_v57, %v9861_v28 }
 0x2b0   : >>> { %v1217_v15 = vpop.permute.xlu0 %1216  ;;  %v7711_v51 = vpop.permute.xlu1 %1250  ;;  %v1442_v41 = vadd.f32 1.0, %v6220_v14  ;;  %v7724_v7 = vadd.f32 %v1751_v40, %v1750_v8  ;;  %v7726_v36 = vadd.f32 %v1587_v63, %v1586_v16  ;;  %6235 = vrcp.f32 %v1452_v39 }
 0x2b1   : >>> { %v1294_v32 = vsub.f32 %v1217_v15, %v9864_v27  ;;  %v6222_v56 = vpop.eup %6221  ;;  %v5840_v2 = vmul.f32 -1.442695, %v1329_v20  ;;  %v7729_v15 = vadd.f32 %v1740_v62, %v7682_v44  ;;  %6237 = vpow2.f32 %v5838_v11 }
 0x2b2   : >>> { %v6224_v9 = vpop.eup %6223  ;;  %v5833_v42 = vmul.f32 -1.442695, %v1322_v19  ;;  %v1574_v23 = vsel %vm916_vm2, %v1541_v1, 0.0  ;;  %v1727_v5 = vsel %vm916_vm2, %v1694_v43, 0.0  ;;  %6239 = vpow2.f32 %v5836_v13 }
 0x2b3   : >>> { %v1326_v4 = vmul.f32 %v1294_v32, %v9865_v31  ;;  %v5847_v40 = vmul.f32 -1.442695, %v1336_v33  ;;  %v6226_v8 = vpop.eup %6225  ;;  %6241 = vrcp.f32 %v1442_v41  ;;  %v1332_v16 = vmul.f32 %v1300_v17, %v9860_v29  ;;  %v9874_v32 = vld [vmem:[#allocation32_spill] sm:$0xff] }
 0x2b4   : >>> { %v1270_v50 = vpop.permute.xlu1 %1269  ;;  %v1299_v57 = vsub.f32 %v7649_v3, %v9859_v24  ;;  %v5846_v44 = vmul.f32 -1.442695, %v1335_v0  ;;  %v6228_v14 = vpop.eup %6227  ;;  %v1552_v63 = vmul.f32 %v6218_v35, %v9870_v38  ;;  %v1705_v62 = vmul.f32 %v6218_v35, %v9871_v21 }
 0x2b5   : >>> { %v1449_v39 = vadd.f32 1.0, %v6222_v56  ;;  %6243 = vpow2.f32 %v5840_v2  ;;  %v6230_v20 = vpop.eup %6229  ;;  %v7740_v11 = vadd.f32 %v1574_v23, %v7685_v37  ;;  %v5837_v13 = vmul.f32 -1.442695, %v1326_v4  ;;  %v1236_v43 = vpop.permute.xlu0 %1235 }
 0x2b6   : >>> { %6245 = vpow2.f32 %v5833_v42  ;;  %v1305_v33 = vsub.f32 %v1270_v50, %v9862_v26  ;;  %v1728_v19 = vadd.f32 %v1727_v5, %v7690_v61  ;;  %v1551_v3 = vmul.f32 %v6224_v9, %v9868_v6 }
 0x2b7   : >>> { %v1695_v1 = vmul.f32 %v6226_v8, %v9874_v32  ;;  %6247 = vpow2.f32 %v5847_v40  ;;  %v6232_v41 = vpop.eup %6231  ;;  %v1704_v35 = vmul.f32 %v6224_v9, %v9869_v47  ;;  %v5843_v56 = vmul.f32 -1.442695, %v1332_v16 }
 0x2b8   : >>> { %v1331_v17 = vmul.f32 %v1299_v57, %v9861_v28  ;;  %6249 = vpow2.f32 %v5846_v44  ;;  %v1274_v37 = vpop.permute.xlu1 %1273  ;;  %v1611_v0 = vsel %vm916_vm2, %v1552_v63, 0.0  ;;  %v1456_v2 = vadd.f32 1.0, %v6230_v20 }
 0x2b9   : >>> { %6251 = vrcp.f32 %v1449_v39  ;;  %v1301_v61 = vsub.f32 %v7711_v51, %v9862_v26  ;;  %v6234_v42 = vpop.eup %6233  ;;  %v1764_v4 = vsel %vm916_vm2, %v1705_v62, 0.0  ;;  %v1337_v50 = vmul.f32 %v1305_v33, %v9863_v30 }
 0x2ba   : >>> { %6253 = vpow2.f32 %v5837_v13  ;;  %v1298_v9 = vsub.f32 %v1236_v43, %v9864_v27  ;;  %v6236_v23 = vpop.eup %6235  ;;  %v1610_v5 = vsel %vm916_vm2, %v1551_v3, 0.0  ;;  %v1729_v40 = vsel %vm916_vm2, %v1695_v1, 0.0 }
 0x2bb   : >>> { %v1446_v16 = vadd.f32 1.0, %v6232_v41  ;;  %v1306_v57 = vsub.f32 %v1274_v37, %v9864_v27  ;;  %v6238_v44 = vpop.eup %6237  ;;  %v1763_v63 = vsel %vm916_vm2, %v1704_v35, 0.0  ;;  %6255 = vpow2.f32 %v5843_v56 }
 0x2bc   : >>> { %v5842_v51 = vmul.f32 -1.442695, %v1331_v17  ;;  %v5848_v39 = vmul.f32 -1.442695, %v1337_v50  ;;  %v6240_v62 = vpop.eup %6239  ;;  %6257 = vrcp.f32 %v1456_v2  ;;  %v1333_v20 = vmul.f32 %v1301_v61, %v9863_v30  ;;  %v9875_v50 = vld [vmem:[#allocation36_spill] sm:$0xff] }
 0x2bd   : >>> { %v1330_v13 = vmul.f32 %v1298_v9, %v9865_v31  ;;  %v1338_v33 = vmul.f32 %v1306_v57, %v9865_v31  ;;  %v7761_v3 = vpop.eup %6241  ;;  %v1555_v1 = vmul.f32 %v6228_v14, %v9868_v6  ;;  %v1549_v43 = vmul.f32 %v6234_v42, %v9872_v53 }
 0x2be   : >>> { %v1730_v41 = vadd.f32 %v1729_v40, %v1728_v19  ;;  %6259 = vpow2.f32 %v5848_v39  ;;  %v1455_v56 = vadd.f32 1.0, %v6238_v44  ;;  %v1702_v61 = vmul.f32 %v6234_v42, %v9873_v10 }
 0x2bf   : >>> { %v6244_v35 = vpop.eup %6243  ;;  %6261 = vrcp.f32 %v1446_v16  ;;  %v5841_v17 = vmul.f32 -1.442695, %v1330_v13  ;;  %v5849_v37 = vmul.f32 -1.442695, %v1338_v33  ;;  %v1542_v9 = vmul.f32 %v6226_v8, %v9875_v50  ;;  %v1255_v13 = vpop.permute.xlu0 %1254 }
 0x2c0   : >>> { %v6246_v2 = vpop.eup %6245  ;;  %v1453_v34 = vadd.f32 1.0, %v6240_v62  ;;  %6263 = vpow2.f32 %v5842_v51  ;;  %v1708_v18 = vmul.f32 %v6228_v14, %v9869_v47  ;;  %v1699_v22 = vmul.f32 %v7761_v3, %v9874_v32 }
 0x2c1   : >>> { %v6248_v57 = vpop.eup %6247  ;;  %v5844_v19 = vmul.f32 -1.442695, %v1333_v20  ;;  %6265 = vpow2.f32 %v5841_v17  ;;  %v7770_v44 = vadd.f32 %v1611_v0, %v1610_v5  ;;  %v7772_v16 = vadd.f32 %v1764_v4, %v1763_v63 }
 0x2c2   : >>> { %v6250_v40 = vpop.eup %6249  ;;  %v1457_v39 = vadd.f32 1.0, %v6244_v35  ;;  %6267 = vpow2.f32 %v5849_v37  ;;  %v1600_v8 = vsel %vm916_vm2, %v1549_v43, 0.0  ;;  %v1731_v62 = vrot.slane %v1730_v41, 4 }
 0x2c3   : >>> { %v6252_v42 = vpop.eup %6251  ;;  %6269 = vrcp.f32 %v1455_v56  ;;  %v1450_v51 = vadd.f32 1.0, %v6246_v2  ;;  %v1753_v33 = vsel %vm916_vm2, %v1702_v61, 0.0  ;;  %v1576_v20 = vsel %vm916_vm2, %v1542_v9, 0.0 }
 0x2c4   : >>> { %v6254_v14 = vpop.eup %6253  ;;  %6271 = vrcp.f32 %v1453_v34  ;;  %v1464_v17 = vadd.f32 1.0, %v6248_v57  ;;  %v1556_v0 = vmul.f32 %v6236_v23, %v9870_v38  ;;  %v1742_v4 = vsel %vm916_vm2, %v1699_v22, 0.0 }
 0x2c5   : >>> { %v1463_v5 = vadd.f32 1.0, %v6250_v40  ;;  %6273 = vpow2.f32 %v5844_v19  ;;  %v6256_v63 = vpop.eup %6255  ;;  %v1709_v43 = vmul.f32 %v6236_v23, %v9871_v21  ;;  %v1454_v35 = vadd.f32 1.0, %v6254_v14 }
 0x2c6   : >>> { %6275 = vrcp.f32 %v1457_v39  ;;  %v1302_v56 = vsub.f32 %v1255_v13, %v9864_v27  ;;  %v6258_v37 = vpop.eup %6257  ;;  %v1623_v2 = vsel %vm916_vm2, %v1555_v1, 0.0  ;;  %v1776_v61 = vsel %vm916_vm2, %v1708_v18, 0.0 }
 0x2c7   : >>> { %v1732_v34 = vadd.f32 %v1731_v62, %v1730_v41  ;;  %6277 = vrcp.f32 %v1450_v51  ;;  %v7784_v57 = vadd.f32 %v1600_v8, %v7707_v12  ;;  %v1754_v22 = vadd.f32 %v1753_v33, %v7724_v7 }
 0x2c8   : >>> { %v6260_v9 = vpop.eup %6259  ;;  %v1743_v19 = vadd.f32 %v1742_v4, %v7729_v15  ;;  %6279 = vrcp.f32 %v1464_v17  ;;  %v1577_v40 = vadd.f32 %v1576_v20, %v7740_v11  ;;  %v1624_v39 = vsel %vm916_vm2, %v1556_v0, 0.0 }
 0x2c9   : >>> { %v6262_v23 = vpop.eup %6261  ;;  %6281 = vrcp.f32 %v1463_v5  ;;  %v1465_v1 = vadd.f32 1.0, %v6260_v9  ;;  %v1777_v18 = vsel %vm916_vm2, %v1709_v43, 0.0  ;;  %v1553_v41 = vmul.f32 %v6252_v42, %v9872_v53 }
 0x2ca   : >>> { %v6264_v13 = vpop.eup %6263  ;;  %6283 = vrcp.f32 %v1454_v35  ;;  %v1334_v12 = vmul.f32 %v1302_v56, %v9865_v31  ;;  %v1733_v7 = vrot.slane %v1732_v34, 2  ;;  %v1706_v15 = vmul.f32 %v6252_v42, %v9873_v10 }
 0x2cb   : >>> { %v6266_v8 = vpop.eup %6265  ;;  %v1546_v62 = vmul.f32 %v7761_v3, %v9875_v50  ;;  %v1460_v11 = vadd.f32 1.0, %v6256_v63  ;;  %v1744_v14 = vrot.slane %v1743_v19, 4  ;;  %v1703_v33 = vmul.f32 %v6262_v23, %v9874_v32 }
 0x2cc   : >>> { %v6268_v51 = vpop.eup %6267  ;;  %6285 = vrcp.f32 %v1465_v1  ;;  %v1458_v20 = vadd.f32 1.0, %v6266_v8  ;;  %v1578_v0 = vrot.slane %v1577_v40, 4  ;;  %v7797_v4 = vadd.f32 %v1624_v39, %v1623_v2 }
 0x2cd   : >>> { %v6270_v17 = vpop.eup %6269  ;;  %v7799_v5 = vadd.f32 %v1777_v18, %v1776_v61  ;;  %v1459_v43 = vadd.f32 1.0, %v6264_v13  ;;  %v1613_v42 = vsel %vm916_vm2, %v1553_v41, 0.0  ;;  %v1466_v56 = vadd.f32 1.0, %v6268_v51 }
 0x2ce   : >>> { %v6272_v35 = vpop.eup %6271  ;;  %6287 = vrcp.f32 %v1458_v20  ;;  %v5845_v3 = vmul.f32 -1.442695, %v1334_v12  ;;  %v7802_v9 = vadd.f32 %v1733_v7, %v1732_v34  ;;  %v1766_v31 = vsel %vm916_vm2, %v1706_v15, 0.0 }
 0x2cf   : >>> { %v6274_v63 = vpop.eup %6273  ;;  %v1589_v1 = vsel %vm916_vm2, %v1546_v62, 0.0  ;;  %6289 = vrcp.f32 %v1460_v11  ;;  %v1745_v2 = vadd.f32 %v1744_v14, %v1743_v19  ;;  %v1560_v61 = vmul.f32 %v6258_v37, %v9870_v38 }
 0x2d0   : >>> { %v7806_v8 = vpop.eup %6275  ;;  %v1755_v39 = vsel %vm916_vm2, %v1703_v33, 0.0  ;;  %6291 = vrcp.f32 %v1466_v56  ;;  %v1713_v18 = vmul.f32 %v6258_v37, %v9871_v21  ;;  %v1559_v34 = vmul.f32 %v6270_v17, %v9868_v6 }
 0x2d1   : >>> { %v7810_v13 = vpop.eup %6277  ;;  %v1712_v41 = vmul.f32 %v6270_v17, %v9869_v47  ;;  %6293 = vrcp.f32 %v1459_v43  ;;  %v7817_v7 = vadd.f32 %v1578_v0, %v1577_v40  ;;  %v7820_v19 = vadd.f32 %v1613_v42, %v7770_v44 }
 0x2d2   : >>> { %v7815_v12 = vpop.eup %6279  ;;  %v1767_v15 = vadd.f32 %v1766_v31, %v7772_v16  ;;  %6295 = vpow2.f32 %v5845_v3  ;;  %v7827_v37 = vadd.f32 %v1589_v1, %v7726_v36  ;;  %v1756_v51 = vadd.f32 %v1755_v39, %v1754_v22 }
 0x2d3   : >>> { %v7823_v62 = vpop.eup %6281  ;;  %v1461_v14 = vadd.f32 1.0, %v6274_v63  ;;  %v1746_v20 = vrot.slane %v1745_v2, 2  ;;  %v1637_v40 = vsel %vm916_vm2, %v1560_v61, 0.0  ;;  %v1710_v44 = vmul.f32 %v6272_v35, %v9873_v10 }
 0x2d4   : >>> { %v7829_v33 = vpop.eup %6283  ;;  %v1550_v17 = vmul.f32 %v6262_v23, %v9875_v50  ;;  %v1790_v31 = vsel %vm916_vm2, %v1713_v18, 0.0  ;;  %v1636_v16 = vsel %vm916_vm2, %v1559_v34, 0.0  ;;  %v1789_v0 = vsel %vm916_vm2, %v1712_v41, 0.0 }
 0x2d5   : >>> { %v1707_v36 = vmul.f32 %v7810_v13, %v9874_v32  ;;  %v1557_v43 = vmul.f32 %v6272_v35, %v9872_v53  ;;  %v1714_v42 = vmul.f32 %v7806_v8, %v9873_v10  ;;  %v1721_v56 = vmul.f32 %v7815_v12, %v9871_v21 }
 0x2d6   : >>> { %v7839_v22 = vpop.eup %6285  ;;  %v1720_v23 = vmul.f32 %v7823_v62, %v9869_v47  ;;  %v1757_v63 = vrot.slane %v1756_v51, 4  ;;  %6297 = vrcp.f32 %v1461_v14  ;;  %v1711_v1 = vmul.f32 %v7829_v33, %v9874_v32 }
 0x2d7   : >>> { %v7851_v39 = vadd.f32 %v1746_v20, %v1745_v2  ;;  %v1779_v35 = vsel %vm916_vm2, %v1710_v44, 0.0  ;;  %v1602_v18 = vsel %vm916_vm2, %v1550_v17, 0.0  ;;  %v1722_v34 = vmul.f32 %v7839_v22, %v9873_v10 }
 0x2d8   : >>> { %v6288_v61 = vpop.eup %6287  ;;  %v7857_v11 = vadd.f32 %v1637_v40, %v1636_v16  ;;  %v1791_v27 = vadd.f32 %v1790_v31, %v1789_v0  ;;  %v1768_v3 = vsel %vm916_vm2, %v1707_v36, 0.0  ;;  %v1626_v2 = vsel %vm916_vm2, %v1557_v43, 0.0 }
 0x2d9   : >>> { %v6290_v41 = vpop.eup %6289  ;;  %v1715_v14 = vmul.f32 %v6288_v61, %v9874_v32  ;;  %v1792_v20 = vsel %vm916_vm2, %v1714_v42, 0.0  ;;  %v1816_v44 = vsel %vm916_vm2, %v1721_v56, 0.0  ;;  %v1815_v17 = vsel %vm916_vm2, %v1720_v23, 0.0 }
 0x2da   : >>> { %v7861_v30 = vpop.eup %6291  ;;  %v1780_v28 = vadd.f32 %v1779_v35, %v7799_v5  ;;  %v7869_v40 = vadd.f32 %v1602_v18, %v7784_v57  ;;  %v1758_v31 = vadd.f32 %v1757_v63, %v1756_v51  ;;  %v1781_v16 = vsel %vm916_vm2, %v1711_v1, 0.0 }
 0x2db   : >>> { %v6294_v26 = vpop.eup %6293  ;;  %v1769_v36 = vadd.f32 %v1768_v3, %v1767_v15  ;;  %v1818_v29 = vsel %vm916_vm2, %v1722_v34, 0.0  ;;  %v1794_v43 = vsel %vm916_vm2, %v1715_v14, 0.0  ;;  %v1723_v42 = vmul.f32 %v7861_v30, %v9874_v32 }
 0x2dc   : >>> { %v6296_v0 = vpop.eup %6295  ;;  %v1564_v56 = vmul.f32 %v6290_v41, %v9870_v38  ;;  %v1717_v23 = vmul.f32 %v6290_v41, %v9871_v21  ;;  %v1793_v5 = vadd.f32 %v1792_v20, %v1791_v27  ;;  %v1817_v35 = vadd.f32 %v1816_v44, %v1815_v17 }
 0x2dd   : >>> { %v1563_v57 = vmul.f32 %v6294_v26, %v9868_v6  ;;  %v1782_v51 = vadd.f32 %v1781_v16, %v1780_v28  ;;  %v1820_v63 = vsel %vm916_vm2, %v1723_v42, 0.0  ;;  %v1462_v1 = vadd.f32 1.0, %v6296_v0 }
 0x2de   : >>> { %v1627_v15 = vadd.f32 %v1626_v2, %v7797_v4  ;;  %v1554_v3 = vmul.f32 %v7810_v13, %v9875_v50  ;;  %v1819_v18 = vadd.f32 %v1818_v29, %v1817_v35  ;;  %v1795_v34 = vadd.f32 %v1794_v43, %v1793_v5 }
 0x2df   : >>> { %v1759_v14 = vrot.slane %v1758_v31, 2  ;;  %v1716_v24 = vmul.f32 %v6294_v26, %v9869_v47  ;;  %v1770_v25 = vrot.slane %v1769_v36, 4  ;;  %6299 = vrcp.f32 %v1462_v1 }
 0x2e0   : >>> { %v6298_v27 = vpop.eup %6297  ;;  %v1604_v41 = vrot.slane %v7869_v40, 4  ;;  %v1650_v28 = vsel %vm916_vm2, %v1564_v56, 0.0  ;;  %v1561_v20 = vmul.f32 %v7806_v8, %v9872_v53  ;;  %v1821_v44 = vadd.f32 %v1820_v63, %v1819_v18 }
 0x2e1   : >>> { %v1803_v4 = vsel %vm916_vm2, %v1717_v23, 0.0  ;;  %v1649_v13 = vsel %vm916_vm2, %v1563_v57, 0.0  ;;  %v1568_v29 = vmul.f32 %v7815_v12, %v9870_v38  ;;  %v1783_v2 = vrot.slane %v1782_v51, 4 }
 0x2e2   : >>> { %v1615_v26 = vsel %vm916_vm2, %v1554_v3, 0.0  ;;  %v1567_v17 = vmul.f32 %v7823_v62, %v9868_v6  ;;  %v1558_v16 = vmul.f32 %v7829_v33, %v9875_v50  ;;  %v1796_v0 = vrot.slane %v1795_v34, 4 }
 0x2e3   : >>> { %v7897_v43 = vadd.f32 %v1759_v14, %v1758_v31  ;;  %v1802_v8 = vsel %vm916_vm2, %v1716_v24, 0.0  ;;  %v1771_v42 = vadd.f32 %v1770_v25, %v1769_v36  ;;  %v1565_v56 = vmul.f32 %v6298_v27, %v9872_v53 }
 0x2e4   : >>> { %v1639_v23 = vsel %vm916_vm2, %v1561_v20, 0.0  ;;  %v1718_v12 = vmul.f32 %v6298_v27, %v9873_v10  ;;  %v1562_v5 = vmul.f32 %v6288_v61, %v9875_v50  ;;  %v1822_v35 = vrot.slane %v1821_v44, 4 }
 0x2e5   : >>> { %v1651_v57 = vadd.f32 %v1650_v28, %v1649_v13  ;;  %v1616_v62 = vadd.f32 %v1615_v26, %v7820_v19  ;;  %v1663_v33 = vsel %vm916_vm2, %v1568_v29, 0.0  ;;  %v1784_v63 = vadd.f32 %v1783_v2, %v1782_v51 }
 0x2e6   : >>> { %v1662_v31 = vsel %vm916_vm2, %v1567_v17, 0.0  ;;  %v1628_v24 = vsel %vm916_vm2, %v1558_v16, 0.0  ;;  %v1569_v25 = vmul.f32 %v7839_v22, %v9872_v53  ;;  %v1797_v36 = vadd.f32 %v1796_v0, %v1795_v34 }
 0x2e7   : >>> { %v1804_v1 = vadd.f32 %v1803_v4, %v1802_v8  ;;  %v1640_v3 = vadd.f32 %v1639_v23, %v7857_v11  ;;  %v1772_v18 = vrot.slane %v1771_v42, 2  ;;  %v1652_v61 = vsel %vm916_vm2, %v1565_v56, 0.0 }
 0x2e8   : >>> { %v1805_v14 = vsel %vm916_vm2, %v1718_v12, 0.0  ;;  %v1641_v19 = vsel %vm916_vm2, %v1562_v5, 0.0  ;;  %v1570_v51 = vmul.f32 %v7861_v30, %v9875_v50  ;;  %v1823_v27 = vadd.f32 %v1822_v35, %v1821_v44 }
 0x2e9   : >>> { %v6300_v28 = vpop.eup %6299  ;;  %v1617_v20 = vrot.slane %v1616_v62, 4  ;;  %v1664_v13 = vadd.f32 %v1663_v33, %v1662_v31  ;;  %v1629_v29 = vadd.f32 %v1628_v24, %v1627_v15  ;;  %v1785_v22 = vrot.slane %v1784_v63, 2 }
 0x2ea   : >>> { %v1665_v34 = vsel %vm916_vm2, %v1569_v25, 0.0  ;;  %v1798_v4 = vrot.slane %v1797_v36, 2  ;;  %v1566_v11 = vmul.f32 %v6300_v28, %v9875_v50  ;;  %v1719_v2 = vmul.f32 %v6300_v28, %v9874_v32 }
 0x2eb   : >>> { %v1773_v26 = vadd.f32 %v1772_v18, %v1771_v42  ;;  %v1653_v17 = vadd.f32 %v1652_v61, %v1651_v57  ;;  %v1806_v16 = vadd.f32 %v1805_v14, %v1804_v1  ;;  %v1642_v0 = vadd.f32 %v1641_v19, %v1640_v3 }
 0x2ec   : >>> { %v1667_v8 = vsel %vm916_vm2, %v1570_v51, 0.0  ;;  %v1824_v30 = vrot.slane %v1823_v27, 2  ;;  %v1654_v44 = vsel %vm916_vm2, %v1566_v11, 0.0  ;;  %v1807_v56 = vsel %vm916_vm2, %v1719_v2, 0.0 }
 0x2ed   : >>> { %v1786_v15 = vadd.f32 %v1785_v22, %v1784_v63  ;;  %v1666_v23 = vadd.f32 %v1665_v34, %v1664_v13  ;;  %v1655_v12 = vadd.f32 %v1654_v44, %v1653_v17  ;;  %v1808_v5 = vadd.f32 %v1807_v56, %v1806_v16 }
 0x2ee   : >>> { %v9876_v35 = vrot.slane %v7827_v37, 4  ;;  %v1748_v42 = vrot.slane %v7851_v39, 1  ;;  %v1630_v57 = vrot.slane %v1629_v29, 4  ;;  %v1799_v31 = vadd.f32 %v1798_v4, %v1797_v36 }
 0x2ef   : >>> { %v1761_v24 = vrot.slane %v7897_v43, 1  ;;  %v1643_v25 = vrot.slane %v1642_v0, 4  ;;  %v1668_v1 = vadd.f32 %v1667_v8, %v1666_v23  ;;  %v1809_v3 = vrot.slane %v1808_v5, 4 }
 0x2f0   : >>> { %v1592_v33 = vadd.f32 %v9876_v35, %v7827_v37  ;;  %v1605_v63 = vadd.f32 %v1604_v41, %v7869_v40  ;;  %v1774_v18 = vrot.slane %v1773_v26, 1  ;;  %v1825_v61 = vadd.f32 %v1824_v30, %v1823_v27 }
 0x2f1   : >>> { %v1656_v14 = vrot.slane %v1655_v12, 4  ;;  %v9877_v19 = vrot.slane %v7802_v9, 1  ;;  %v1618_v51 = vadd.f32 %v1617_v20, %v1616_v62  ;;  %v1787_v28 = vrot.slane %v1786_v15, 1 }
 0x2f2   : >>> { %v1810_v13 = vadd.f32 %v1809_v3, %v1808_v5  ;;  %v1593_v36 = vrot.slane %v1592_v33, 2  ;;  %v1749_v22 = vadd.f32 %v1748_v42, %v7851_v39  ;;  %v1631_v34 = vadd.f32 %v1630_v57, %v1629_v29 }
 0x2f3   : >>> { %v1736_v37 = vadd.f32 %v9877_v19, %v7802_v9  ;;  %v1800_v4 = vrot.slane %v1799_v31, 1  ;;  %v1762_v11 = vadd.f32 %v1761_v24, %v7897_v43  ;;  %v1644_v2 = vadd.f32 %v1643_v25, %v1642_v0 }
 0x2f4   : >>> { %v1669_v17 = vrot.slane %v1668_v1, 4  ;;  %v1811_v40 = vrot.slane %v1810_v13, 2  ;;  %v1606_v41 = vrot.slane %v1605_v63, 2  ;;  %v1775_v27 = vadd.f32 %v1774_v18, %v1773_v26 }
 0x2f5   : >>> { %v1826_v16 = vrot.slane %v1825_v61, 1  ;;  %v1657_v8 = vadd.f32 %v1656_v14, %v1655_v12  ;;  %v1580_v30 = vrot.slane %v7817_v7, 2  ;;  %v1619_v9 = vrot.slane %v1618_v51, 2 }
 0x2f6   : >>> { %v1788_v62 = vadd.f32 %v1787_v28, %v1786_v15  ;;  %v1812_v20 = vadd.f32 %v1811_v40, %v1810_v13  ;;  %v1594_v44 = vadd.f32 %v1593_v36, %v1592_v33  ;;  %v1836_v56 = vsel %vm1051_vm4, %v1749_v22, %v1736_v37 }
 0x2f7   : >>> { %v1632_v39 = vrot.slane %v1631_v34, 2  ;;  %v1801_v29 = vadd.f32 %v1800_v4, %v1799_v31  ;;  %v1837_v23 = vsel %vm1053_vm5, %v1762_v11, %v1836_v56  ;;  %v1645_v43 = vrot.slane %v1644_v2, 2 }
 0x2f8   : >>> { %v1670_v0 = vadd.f32 %v1669_v17, %v1668_v1  ;;  %v1813_v5 = vrot.slane %v1812_v20, 1  ;;  %v1607_v35 = vadd.f32 %v1606_v41, %v1605_v63  ;;  %v1838_v26 = vsel %vm1055_vm6, %v1775_v27, %v1837_v23 }
 0x2f9   : >>> { %v1827_v42 = vadd.f32 %v1826_v16, %v1825_v61  ;;  %v1658_v12 = vrot.slane %v1657_v8, 2  ;;  %v1581_v57 = vadd.f32 %v1580_v30, %v7817_v7  ;;  %v1620_v24 = vadd.f32 %v1619_v9, %v1618_v51 }
 0x2fa   : >>> { %v1839_v15 = vsel %vm1057_vm7, %v1788_v62, %v1838_v26  ;;  %v1814_v33 = vadd.f32 %v1813_v5, %v1812_v20  ;;  %v1633_v25 = vadd.f32 %v1632_v39, %v1631_v34  ;;  %v1595_v31 = vrot.slane %v1594_v44, 1  ;;  %v6957_v62 = vld [vmem:[#allocation2] sm:$0xff]  ;;  %v9878_v20 = vld [vmem:[#allocation45_spill] sm:$0xff] }
 0x2fb   : >>> { %v1840_v3 = vsel %vm1059_vm8, %v1801_v29, %v1839_v15  ;;  %v1646_v18 = vadd.f32 %v1645_v43, %v1644_v2  ;;  %v1671_v14 = vrot.slane %v1670_v0, 2  ;;  %v1608_v19 = vrot.slane %v1607_v35, 1 }
 0x2fc   : >>> { %v1841_v1 = vsel %vm1061_vm9, %v1814_v33, %v1840_v3  ;;  %v1659_v63 = vadd.f32 %v1658_v12, %v1657_v8  ;;  %v1582_v61 = vrot.slane %v1581_v57, 1  ;;  %v1621_v28 = vrot.slane %v1620_v24, 1 }
 0x2fd   : >>> { %v1842_v37 = vsel %vm1063_vm10, %v1827_v42, %v1841_v1  ;;  %v1634_v51 = vrot.slane %v1633_v25, 1  ;;  %v1596_v13 = vadd.f32 %v1595_v31, %v1594_v44  ;;  %v1647_v36 = vrot.slane %v1646_v18, 1 }
 0x2fe   : >>> { %v1844_v7 = vadd.f32 %v1842_v37, %v7583_v60  ;;  %v1672_v22 = vadd.f32 %v1671_v14, %v1670_v0  ;;  %v1609_v34 = vadd.f32 %v1608_v19, %v1607_v35  ;;  %v1660_v4 = vrot.slane %v1659_v63, 1  ;;  %v9879_v19 = vld [vmem:[#allocation38_spill] sm:$0xff]  ;;  %v9880_v37 = vld [vmem:[#allocation37_spill] sm:$0xff] }
 0x2ff   : >>> { %v1583_v11 = vadd.f32 %v1582_v61, %v1581_v57  ;;  %v1622_v2 = vadd.f32 %v1621_v28, %v1620_v24  ;;  %v1635_v17 = vadd.f32 %v1634_v51, %v1633_v25  ;;  %v1648_v41 = vadd.f32 %v1647_v36, %v1646_v18  ;;  %v9881_v28 = vld [vmem:[#allocation42_spill] sm:$0xff]  ;;  %v9882_v36 = vld [vmem:[#allocation41_spill] sm:$0xff] }
 0x300   : >>> { %6301 = vrcp.f32 %v1844_v7  ;;  %v1673_v27 = vrot.slane %v1672_v22, 1  ;;  %v1661_v8 = vadd.f32 %v1660_v4, %v1659_v63  ;;  %v1537_v44 = vmul.f32 %v6957_v62, %v9878_v20 }
 0x301   : >>> { %v1683_v40 = vsel %vm1051_vm4, %v1596_v13, %v1583_v11 }
 0x302   : >>> { %v1684_v16 = vsel %vm1053_vm5, %v1609_v34, %v1683_v40  ;;  %v1674_v39 = vadd.f32 %v1673_v27, %v1672_v22  ;;  %v1538_v43 = vadd.f32 %v1537_v44, %v7580_v52 }
 0x303   : >>> { %v1685_v30 = vsel %vm1055_vm6, %v1622_v2, %v1684_v16 }
 0x304   : >>> { %v1686_v9 = vsel %vm1057_vm7, %v1635_v17, %v1685_v30 }
 0x305   : >>> { %v1687_v56 = vsel %vm1059_vm8, %v1648_v41, %v1686_v9 }
 0x306   : >>> { %v1688_v29 = vsel %vm1061_vm9, %v1661_v8, %v1687_v56 }
 0x307   : >>> { %v1689_v5 = vsel %vm1063_vm10, %v1674_v39, %v1688_v29  ;;  %v9883_v39 = vld [vmem:[#allocation39_spill] sm:$0xff] }
 0x308   : >>> { %v1691_v26 = vadd.f32 %v1689_v5, %v1538_v43 }
 0x30a   : >>> { %v6302_v23 = vpop.eup %6301 }
 0x30b   : >>> { %v1846_v0 = vmul.f32 %v6302_v23, %v1844_v7 }
 0x30d   : >>> { %v1847_v35 = vsub.f32 2.0, %v1846_v0 }
 0x30f   : >>> { %v1848_v42 = vmul.f32 %v6302_v23, %v1847_v35  ;;  %v9884_v35 = vld [vmem:[#allocation43_spill] sm:$0xff] }
 0x311   : >>> { %v7954_v12 = vmul.f32 %v1848_v42, %v1691_v26 }
 0x313   : >>> { %v1853_v57 = vrot.slane %v7954_v12, %v7494_v46  ;;  %v1872_v24 = vrot.slane %v7954_v12, %v7499_v49  ;;  %v1891_v15 = vrot.slane %v7954_v12, %v7492_v45  ;;  %v1910_v33 = vrot.slane %v7954_v12, %v7497_v48 }
 0x314   : >>> { %v1929_v25 = vrot.slane %v7954_v12, %v7507_v55  ;;  %v1948_v3 = vrot.slane %v7954_v12, %v7505_v54  ;;  %v1967_v31 = vrot.slane %v7954_v12, %v7513_v59  ;;  %v1986_v18 = vrot.slane %v7954_v12, %v7511_v58 }
 0x315   : >>> { %1859 = vbcast.lane.b32.xlu1 %v1853_v57, 264  ;;  %1855 = vbcast.lane.b32.xlu0 %v1853_v57, 256 }
 0x319   : >>> { %1878 = vbcast.lane.b32.xlu1 %v1872_v24, 264  ;;  %1874 = vbcast.lane.b32.xlu0 %v1872_v24, 256 }
 0x31d   : >>> { %1897 = vbcast.lane.b32.xlu1 %v1891_v15, 264  ;;  %1893 = vbcast.lane.b32.xlu0 %v1891_v15, 256 }
 0x321   : >>> { %1882 = vbcast.lane.b32.xlu1 %v1872_v24, 272  ;;  %1863 = vbcast.lane.b32.xlu0 %v1853_v57, 272 }
 0x325   : >>> { %1916 = vbcast.lane.b32.xlu1 %v1910_v33, 264  ;;  %1912 = vbcast.lane.b32.xlu0 %v1910_v33, 256 }
 0x329   : >>> { %1931 = vbcast.lane.b32.xlu1 %v1929_v25, 256  ;;  %1901 = vbcast.lane.b32.xlu0 %v1891_v15, 272 }
 0x32d   : >>> { %1867 = vbcast.lane.b32.xlu1 %v1853_v57, 280  ;;  %1935 = vbcast.lane.b32.xlu0 %v1929_v25, 264 }
 0x331   : >>> { %1920 = vbcast.lane.b32.xlu1 %v1910_v33, 272  ;;  %1886 = vbcast.lane.b32.xlu0 %v1872_v24, 280 }
 0x335   : >>> { %1954 = vbcast.lane.b32.xlu1 %v1948_v3, 264  ;;  %1950 = vbcast.lane.b32.xlu0 %v1948_v3, 256 }
 0x339   : >>> { %1939 = vbcast.lane.b32.xlu1 %v1929_v25, 272  ;;  %1905 = vbcast.lane.b32.xlu0 %v1891_v15, 280 }
 0x33d   : >>> { %1973 = vbcast.lane.b32.xlu1 %v1967_v31, 264  ;;  %1969 = vbcast.lane.b32.xlu0 %v1967_v31, 256 }
 0x341   : >>> { %1958 = vbcast.lane.b32.xlu1 %v1948_v3, 272  ;;  %1924 = vbcast.lane.b32.xlu0 %v1910_v33, 280 }
 0x345   : >>> { %1992 = vbcast.lane.b32.xlu1 %v1986_v18, 264  ;;  %1988 = vbcast.lane.b32.xlu0 %v1986_v18, 256 }
 0x349   : >>> { %1977 = vbcast.lane.b32.xlu1 %v1967_v31, 272  ;;  %1943 = vbcast.lane.b32.xlu0 %v1929_v25, 280 }
 0x34d   : >>> { %1996 = vbcast.lane.b32.xlu1 %v1986_v18, 272  ;;  %1962 = vbcast.lane.b32.xlu0 %v1948_v3, 280 }
 0x351   : >>> { %2000 = vbcast.lane.b32.xlu1 %v1986_v18, 280  ;;  %1981 = vbcast.lane.b32.xlu0 %v1967_v31, 280 }
 0x387   : >>> { %v1860_v14 = vpop.permute.xlu1 %1859  ;;  %v1856_v1 = vpop.permute.xlu0 %1855 }
 0x388   : >>> { %v2003_v63 = vsub.f32 %v1860_v14, %v9879_v19  ;;  %v2002_v61 = vsub.f32 %v1856_v1, %v9880_v37 }
 0x38a   : >>> { %v2035_v7 = vmul.f32 %v2003_v63, %v9881_v28  ;;  %v2034_v22 = vmul.f32 %v2002_v61, %v9882_v36 }
 0x38b   : >>> { %v1879_v51 = vpop.permute.xlu1 %1878  ;;  %v1875_v13 = vpop.permute.xlu0 %1874 }
 0x38c   : >>> { %v2007_v34 = vsub.f32 %v1879_v51, %v9879_v19  ;;  %v2006_v4 = vsub.f32 %v1875_v13, %v9880_v37  ;;  %v5852_v11 = vmul.f32 -1.442695, %v2035_v7  ;;  %v5851_v40 = vmul.f32 -1.442695, %v2034_v22 }
 0x38e   : >>> { %v2039_v41 = vmul.f32 %v2007_v34, %v9881_v28  ;;  %v2038_v27 = vmul.f32 %v2006_v4, %v9882_v36  ;;  %6303 = vpow2.f32 %v5852_v11 }
 0x38f   : >>> { %v1898_v2 = vpop.permute.xlu1 %1897  ;;  %v1894_v17 = vpop.permute.xlu0 %1893  ;;  %6305 = vpow2.f32 %v5851_v40 }
 0x390   : >>> { %v2011_v16 = vsub.f32 %v1898_v2, %v9879_v19  ;;  %v2010_v8 = vsub.f32 %v1894_v17, %v9880_v37  ;;  %v5856_v62 = vmul.f32 -1.442695, %v2039_v41  ;;  %v5855_v44 = vmul.f32 -1.442695, %v2038_v27  ;;  %v9885_v17 = vld [vmem:[#allocation40_spill] sm:$0xff] }
 0x392   : >>> { %v2043_v56 = vmul.f32 %v2011_v16, %v9881_v28  ;;  %v2042_v23 = vmul.f32 %v2010_v8, %v9882_v36  ;;  %6307 = vpow2.f32 %v5856_v62 }
 0x393   : >>> { %v1883_v30 = vpop.permute.xlu1 %1882  ;;  %v1864_v9 = vpop.permute.xlu0 %1863  ;;  %6309 = vpow2.f32 %v5855_v44 }
 0x394   : >>> { %v2008_v29 = vsub.f32 %v1883_v30, %v9883_v39  ;;  %v5860_v5 = vmul.f32 -1.442695, %v2043_v56  ;;  %v5859_v42 = vmul.f32 -1.442695, %v2042_v23  ;;  %v2004_v57 = vsub.f32 %v1864_v9, %v9883_v39  ;;  %v9886_v56 = vld [vmem:[#allocation44_spill] sm:$0xff] }
 0x396   : >>> { %v2040_v26 = vmul.f32 %v2008_v29, %v9884_v35  ;;  %6311 = vpow2.f32 %v5860_v5  ;;  %v2036_v18 = vmul.f32 %v2004_v57, %v9884_v35 }
 0x397   : >>> { %v1917_v43 = vpop.permute.xlu1 %1916  ;;  %v1913_v0 = vpop.permute.xlu0 %1912  ;;  %6313 = vpow2.f32 %v5859_v42 }
 0x398   : >>> { %v6304_v33 = vpop.eup %6303  ;;  %v2015_v25 = vsub.f32 %v1917_v43, %v9879_v19  ;;  %v5857_v31 = vmul.f32 -1.442695, %v2040_v26  ;;  %v2014_v1 = vsub.f32 %v1913_v0, %v9880_v37  ;;  %v5853_v34 = vmul.f32 -1.442695, %v2036_v18 }
 0x399   : >>> { %v6306_v3 = vpop.eup %6305  ;;  %v2163_v14 = vadd.f32 1.0, %v6304_v33 }
 0x39a   : >>> { %v2162_v63 = vadd.f32 1.0, %v6306_v3  ;;  %v2047_v61 = vmul.f32 %v2015_v25, %v9881_v28  ;;  %6315 = vpow2.f32 %v5857_v31  ;;  %v2046_v11 = vmul.f32 %v2014_v1, %v9882_v36 }
 0x39b   : >>> { %v1932_v24 = vpop.permute.xlu1 %1931  ;;  %v1902_v15 = vpop.permute.xlu0 %1901  ;;  %6317 = vrcp.f32 %v2163_v14 }
 0x39c   : >>> { %v2018_v7 = vsub.f32 %v1932_v24, %v9880_v37  ;;  %v6308_v22 = vpop.eup %6307  ;;  %6319 = vrcp.f32 %v2162_v63  ;;  %v5864_v2 = vmul.f32 -1.442695, %v2047_v61  ;;  %v2012_v16 = vsub.f32 %v1902_v15, %v9883_v39 }
 0x39d   : >>> { %v6310_v4 = vpop.eup %6309  ;;  %v2167_v41 = vadd.f32 1.0, %v6308_v22  ;;  %6321 = vpow2.f32 %v5853_v34  ;;  %v5863_v9 = vmul.f32 -1.442695, %v2046_v11 }
 0x39e   : >>> { %v2050_v27 = vmul.f32 %v2018_v7, %v9882_v36  ;;  %v2166_v8 = vadd.f32 1.0, %v6310_v4  ;;  %6323 = vpow2.f32 %v5864_v2  ;;  %v2044_v5 = vmul.f32 %v2012_v16, %v9884_v35 }
 0x39f   : >>> { %v1868_v51 = vpop.permute.xlu1 %1867  ;;  %v1936_v13 = vpop.permute.xlu0 %1935  ;;  %6325 = vrcp.f32 %v2167_v41 }
 0x3a0   : >>> { %v2005_v40 = vsub.f32 %v1868_v51, %v9885_v17  ;;  %v6312_v30 = vpop.eup %6311  ;;  %v2019_v23 = vsub.f32 %v1936_v13, %v9879_v19  ;;  %v5867_v0 = vmul.f32 -1.442695, %v2050_v27  ;;  %6327 = vrcp.f32 %v2166_v8 }
 0x3a1   : >>> { %v6314_v44 = vpop.eup %6313  ;;  %v2171_v26 = vadd.f32 1.0, %v6312_v30  ;;  %6329 = vpow2.f32 %v5863_v9  ;;  %v5861_v3 = vmul.f32 -1.442695, %v2044_v5 }
 0x3a2   : >>> { %v2037_v29 = vmul.f32 %v2005_v40, %v9886_v56  ;;  %v2170_v24 = vadd.f32 1.0, %v6314_v44  ;;  %v2051_v33 = vmul.f32 %v2019_v23, %v9881_v28  ;;  %6331 = vpow2.f32 %v5867_v0 }
 0x3a3   : >>> { %v1887_v62 = vpop.permute.xlu0 %1886  ;;  %v1921_v43 = vpop.permute.xlu1 %1920  ;;  %6333 = vrcp.f32 %v2171_v26 }
 0x3a4   : >>> { %v2009_v42 = vsub.f32 %v1887_v62, %v9885_v17  ;;  %v6316_v57 = vpop.eup %6315  ;;  %v5854_v15 = vmul.f32 -1.442695, %v2037_v29  ;;  %6335 = vrcp.f32 %v2170_v24  ;;  %v5868_v7 = vmul.f32 -1.442695, %v2051_v33 }
 0x3a5   : >>> { %v6318_v25 = vpop.eup %6317  ;;  %v2168_v14 = vadd.f32 1.0, %v6316_v57  ;;  %v2016_v51 = vsub.f32 %v1921_v43, %v9883_v39 }
 0x3a6   : >>> { %v6320_v18 = vpop.eup %6319  ;;  %v2041_v1 = vmul.f32 %v2009_v42, %v9886_v56  ;;  %6337 = vpow2.f32 %v5854_v15  ;;  %v2261_v13 = vmul.f32 %v6318_v25, %v9870_v38  ;;  %v2414_v22 = vmul.f32 %v6318_v25, %v9871_v21 }
 0x3a7   : >>> { %v8001_v31 = vpop.permute.xlu0 %1950  ;;  %v8004_v63 = vpop.permute.xlu1 %1954  ;;  %v2260_v34 = vmul.f32 %v6320_v18, %v9868_v6  ;;  %6339 = vpow2.f32 %v5861_v3  ;;  %v2413_v11 = vmul.f32 %v6320_v18, %v9869_v47  ;;  %v2048_v29 = vmul.f32 %v2016_v51, %v9884_v35 }
 0x3a8   : >>> { %v6322_v61 = vpop.eup %6321  ;;  %6341 = vrcp.f32 %v2168_v14  ;;  %v5858_v2 = vmul.f32 -1.442695, %v2041_v1  ;;  %v2293_v9 = vsel %vm916_vm2, %v2261_v13, 0.0  ;;  %v2446_v62 = vsel %vm916_vm2, %v2414_v22, 0.0 }
 0x3a9   : >>> { %v6324_v4 = vpop.eup %6323  ;;  %v2164_v41 = vadd.f32 1.0, %v6322_v61  ;;  %6343 = vpow2.f32 %v5868_v7  ;;  %v2292_v44 = vsel %vm916_vm2, %v2260_v34, 0.0  ;;  %v2445_v23 = vsel %vm916_vm2, %v2413_v11, 0.0 }
 0x3aa   : >>> { %v6326_v40 = vpop.eup %6325  ;;  %6345 = vpow2.f32 %v5858_v2  ;;  %v2175_v57 = vadd.f32 1.0, %v6324_v4  ;;  %v8022_v25 = vadd.f32 %v2293_v9, %v2292_v44  ;;  %v8024_v3 = vadd.f32 %v2446_v62, %v2445_v23 }
 0x3ab   : >>> { %v1906_v27 = vpop.permute.xlu0 %1905  ;;  %v6328_v16 = vpop.eup %6327  ;;  %v2265_v43 = vmul.f32 %v6326_v40, %v9870_v38  ;;  %v2418_v26 = vmul.f32 %v6326_v40, %v9871_v21  ;;  %6347 = vrcp.f32 %v2164_v41  ;;  %v5865_v18 = vmul.f32 -1.442695, %v2048_v29 }
 0x3ac   : >>> { %v8011_v8 = vpop.permute.xlu1 %1939  ;;  %v6330_v30 = vpop.eup %6329  ;;  %v2013_v0 = vsub.f32 %v1906_v27, %v9885_v17  ;;  %v2264_v42 = vmul.f32 %v6328_v16, %v9868_v6  ;;  %v2417_v61 = vmul.f32 %v6328_v16, %v9869_v47  ;;  %v2023_v7 = vsub.f32 %v8004_v63, %v9879_v19 }
 0x3ad   : >>> { %v6332_v5 = vpop.eup %6331  ;;  %v2174_v15 = vadd.f32 1.0, %v6330_v30  ;;  %v2306_v1 = vsel %vm916_vm2, %v2265_v43, 0.0  ;;  %v2459_v34 = vsel %vm916_vm2, %v2418_v26, 0.0  ;;  %6349 = vrcp.f32 %v2175_v57 }
 0x3ae   : >>> { %v6334_v24 = vpop.eup %6333  ;;  %v2045_v51 = vmul.f32 %v2013_v0, %v9886_v56  ;;  %v2305_v4 = vsel %vm916_vm2, %v2264_v42, 0.0  ;;  %v2178_v27 = vadd.f32 1.0, %v6332_v5  ;;  %v2022_v63 = vsub.f32 %v8001_v31, %v9880_v37 }
 0x3af   : >>> { %v6336_v33 = vpop.eup %6335  ;;  %v2269_v11 = vmul.f32 %v6334_v24, %v9870_v38  ;;  %v1970_v2 = vpop.permute.xlu0 %1969  ;;  %v2422_v41 = vmul.f32 %v6334_v24, %v9871_v21  ;;  %6351 = vrcp.f32 %v2174_v15  ;;  %v2458_v44 = vsel %vm916_vm2, %v2417_v61, 0.0 }
 0x3b0   : >>> { %v6338_v14 = vpop.eup %6337  ;;  %v1974_v13 = vpop.permute.xlu1 %1973  ;;  %v2268_v16 = vmul.f32 %v6336_v33, %v9868_v6  ;;  %v2421_v30 = vmul.f32 %v6336_v33, %v9869_v47  ;;  %6353 = vpow2.f32 %v5865_v18  ;;  %v2055_v29 = vmul.f32 %v2023_v7, %v9881_v28 }
 0x3b1   : >>> { %v6340_v22 = vpop.eup %6339  ;;  %v2165_v9 = vadd.f32 1.0, %v6338_v14  ;;  %v2020_v23 = vsub.f32 %v8011_v8, %v9883_v39  ;;  %v5862_v43 = vmul.f32 -1.442695, %v2045_v51  ;;  %v2319_v0 = vsel %vm916_vm2, %v2269_v11, 0.0 }
 0x3b2   : >>> { %v6342_v40 = vpop.eup %6341  ;;  %v2172_v31 = vadd.f32 1.0, %v6340_v22  ;;  %v2027_v26 = vsub.f32 %v1974_v13, %v9879_v19  ;;  %v2472_v57 = vsel %vm916_vm2, %v2422_v41, 0.0  ;;  %6355 = vrcp.f32 %v2178_v27 }
 0x3b3   : >>> { %v6344_v62 = vpop.eup %6343  ;;  %v2266_v5 = vmul.f32 %v6342_v40, %v9872_v53  ;;  %v2054_v24 = vmul.f32 %v2022_v63, %v9882_v36  ;;  %v2026_v15 = vsub.f32 %v1970_v2, %v9880_v37  ;;  %v2318_v8 = vsel %vm916_vm2, %v2268_v16, 0.0  ;;  %v1925_v7 = vpop.permute.xlu0 %1924 }
 0x3b4   : >>> { %v6346_v42 = vpop.eup %6345  ;;  %v1959_v33 = vpop.permute.xlu1 %1958  ;;  %v2471_v14 = vsel %vm916_vm2, %v2421_v30, 0.0  ;;  %6357 = vrcp.f32 %v2165_v9  ;;  %v2179_v61 = vadd.f32 1.0, %v6344_v62  ;;  %v2419_v51 = vmul.f32 %v6342_v40, %v9873_v10 }
 0x3b5   : >>> { %v6348_v18 = vpop.eup %6347  ;;  %v5872_v13 = vmul.f32 -1.442695, %v2055_v29  ;;  %v2052_v22 = vmul.f32 %v2020_v23, %v9884_v35  ;;  %6359 = vpow2.f32 %v5862_v43  ;;  %v2308_v11 = vsel %vm916_vm2, %v2266_v5, 0.0 }
 0x3b6   : >>> { %6361 = vrcp.f32 %v2172_v31  ;;  %v2169_v41 = vadd.f32 1.0, %v6346_v42  ;;  %v2059_v2 = vmul.f32 %v2027_v26, %v9881_v28  ;;  %v2262_v27 = vmul.f32 %v6348_v18, %v9872_v53 }
 0x3b7   : >>> { %v5871_v63 = vmul.f32 -1.442695, %v2054_v24  ;;  %v2058_v16 = vmul.f32 %v2026_v15, %v9882_v36  ;;  %v2024_v30 = vsub.f32 %v1959_v33, %v9883_v39  ;;  %v6350_v9 = vpop.eup %6349  ;;  %v2307_v62 = vadd.f32 %v2306_v1, %v2305_v4  ;;  %v1989_v1 = vpop.permute.xlu0 %1988 }
 0x3b8   : >>> { %v2460_v40 = vadd.f32 %v2459_v34, %v2458_v44  ;;  %v8058_v29 = vadd.f32 %v2319_v0, %v2318_v8  ;;  %6363 = vrcp.f32 %v2179_v61  ;;  %v8060_v43 = vadd.f32 %v2472_v57, %v2471_v14  ;;  %v1993_v26 = vpop.permute.xlu1 %1992 }
 0x3b9   : >>> { %v6352_v23 = vpop.eup %6351  ;;  %v2415_v5 = vmul.f32 %v6348_v18, %v9873_v10  ;;  %6365 = vpow2.f32 %v5872_v13  ;;  %v5869_v31 = vmul.f32 -1.442695, %v2052_v22  ;;  %v8063_v24 = vadd.f32 %v2308_v11, %v2307_v62 }
 0x3ba   : >>> { %v6354_v42 = vpop.eup %6353  ;;  %v2461_v15 = vsel %vm916_vm2, %v2419_v51, 0.0  ;;  %6367 = vrcp.f32 %v2169_v41  ;;  %v5876_v33 = vmul.f32 -1.442695, %v2059_v2  ;;  %v2295_v34 = vsel %vm916_vm2, %v2262_v27, 0.0 }
 0x3bb   : >>> { %6369 = vpow2.f32 %v5871_v63  ;;  %v5875_v4 = vmul.f32 -1.442695, %v2058_v16  ;;  %v2056_v44 = vmul.f32 %v2024_v30, %v9884_v35  ;;  %v2273_v0 = vmul.f32 %v6350_v9, %v9870_v38 }
 0x3bc   : >>> { %v2426_v57 = vmul.f32 %v6350_v9, %v9871_v21  ;;  %v2272_v18 = vmul.f32 %v6352_v23, %v9868_v6  ;;  %v2017_v8 = vsub.f32 %v1925_v7, %v9885_v17  ;;  %v6356_v14 = vpop.eup %6355  ;;  %v8072_v61 = vadd.f32 %v2461_v15, %v2460_v40  ;;  %v1978_v30 = vpop.permute.xlu1 %1977 }
 0x3bd   : >>> { %v2448_v51 = vsel %vm916_vm2, %v2415_v5, 0.0  ;;  %v2176_v13 = vadd.f32 1.0, %v6354_v42  ;;  %6371 = vpow2.f32 %v5869_v31  ;;  %v8076_v11 = vadd.f32 %v2295_v34, %v8022_v25  ;;  %v1944_v5 = vpop.permute.xlu0 %1943 }
 0x3be   : >>> { %v6358_v22 = vpop.eup %6357  ;;  %v2425_v41 = vmul.f32 %v6352_v23, %v9869_v47  ;;  %6373 = vpow2.f32 %v5876_v33  ;;  %v5873_v2 = vmul.f32 -1.442695, %v2056_v44  ;;  %v2049_v63 = vmul.f32 %v2017_v8, %v9886_v56 }
 0x3bf   : >>> { %v6360_v27 = vpop.eup %6359  ;;  %6375 = vpow2.f32 %v5875_v4  ;;  %v2031_v7 = vsub.f32 %v1993_v26, %v9879_v19  ;;  %v2030_v16 = vsub.f32 %v1989_v1, %v9880_v37  ;;  %v2449_v62 = vadd.f32 %v2448_v51, %v8024_v3 }
 0x3c0   : >>> { %v6362_v9 = vpop.eup %6361  ;;  %v2332_v40 = vsel %vm916_vm2, %v2273_v0, 0.0  ;;  %v2485_v25 = vsel %vm916_vm2, %v2426_v57, 0.0  ;;  %v2331_v23 = vsel %vm916_vm2, %v2272_v18, 0.0  ;;  %v2416_v31 = vmul.f32 %v6358_v22, %v9874_v32 }
 0x3c1   : >>> { %v2173_v42 = vadd.f32 1.0, %v6360_v27  ;;  %v5866_v15 = vmul.f32 -1.442695, %v2049_v63  ;;  %v2063_v33 = vmul.f32 %v2031_v7, %v9881_v28  ;;  %v2484_v1 = vsel %vm916_vm2, %v2425_v41, 0.0 }
 0x3c2   : >>> { %v6364_v26 = vpop.eup %6363  ;;  %v2276_v34 = vmul.f32 %v6356_v14, %v9868_v6  ;;  %v2429_v3 = vmul.f32 %v6356_v14, %v9869_v47  ;;  %6377 = vrcp.f32 %v2176_v13  ;;  %v2423_v44 = vmul.f32 %v6362_v9, %v9873_v10 }
 0x3c3   : >>> { %v6366_v4 = vpop.eup %6365  ;;  %6379 = vpow2.f32 %v5873_v2  ;;  %v2062_v0 = vmul.f32 %v2030_v16, %v9882_v36  ;;  %v2028_v57 = vsub.f32 %v1978_v30, %v9883_v39  ;;  %v8094_v8 = vadd.f32 %v2332_v40, %v2331_v23  ;;  %v1997_v2 = vpop.permute.xlu1 %1996 }
 0x3c4   : >>> { %v6368_v18 = vpop.eup %6367  ;;  %v2270_v51 = vmul.f32 %v6362_v9, %v9872_v53  ;;  %v2263_v41 = vmul.f32 %v6358_v22, %v9875_v50  ;;  %6381 = vrcp.f32 %v2173_v42  ;;  %v2450_v14 = vsel %vm916_vm2, %v2416_v31, 0.0  ;;  %v1963_v40 = vpop.permute.xlu0 %1962 }
 0x3c5   : >>> { %v6370_v27 = vpop.eup %6369  ;;  %6383 = vpow2.f32 %v5866_v15  ;;  %v5880_v13 = vmul.f32 -1.442695, %v2063_v33  ;;  %v2060_v63 = vmul.f32 %v2028_v57, %v9884_v35  ;;  %v8100_v7 = vadd.f32 %v2485_v25, %v2484_v1 }
 0x3c6   : >>> { %v8103_v16 = vsel %vm916_vm2, %v2276_v34, 0.0  ;;  %v8106_v30 = vsel %vm916_vm2, %v2429_v3, 0.0  ;;  %v2183_v9 = vadd.f32 1.0, %v6366_v4  ;;  %v2474_v23 = vsel %vm916_vm2, %v2423_v44, 0.0 }
 0x3c7   : >>> { %v6372_v22 = vpop.eup %6371  ;;  %v2420_v31 = vmul.f32 %v6368_v18, %v9874_v32  ;;  %v5879_v42 = vmul.f32 -1.442695, %v2062_v0  ;;  %v2021_v15 = vsub.f32 %v1944_v5, %v9885_v17  ;;  %v8112_v25 = vsel %vm916_vm2, %v2270_v51, 0.0 }
 0x3c8   : >>> { %v6374_v33 = vpop.eup %6373  ;;  %v2451_v1 = vadd.f32 %v2450_v14, %v2449_v62  ;;  %v2277_v34 = vmul.f32 %v6364_v26, %v9870_v38  ;;  %v2182_v57 = vadd.f32 1.0, %v6370_v27  ;;  %v2297_v4 = vsel %vm916_vm2, %v2263_v41, 0.0  ;;  %v2001_v14 = vpop.permute.xlu1 %2000 }
 0x3c9   : >>> { %v6376_v3 = vpop.eup %6375  ;;  %v2430_v36 = vmul.f32 %v6364_v26, %v9871_v21  ;;  %6385 = vpow2.f32 %v5880_v13  ;;  %v5877_v44 = vmul.f32 -1.442695, %v2060_v63  ;;  %v8118_v28 = vadd.f32 %v2474_v23, %v8060_v43  ;;  %v1982_v63 = vpop.permute.xlu0 %1981 }
 0x3ca   : >>> { %v2267_v5 = vmul.f32 %v6368_v18, %v9875_v50  ;;  %6387 = vrcp.f32 %v2183_v9  ;;  %v2180_v0 = vadd.f32 1.0, %v6372_v22  ;;  %v2463_v51 = vsel %vm916_vm2, %v2420_v31, 0.0 }
 0x3cb   : >>> { %v2187_v62 = vadd.f32 1.0, %v6374_v33  ;;  %6389 = vpow2.f32 %v5879_v42  ;;  %v2053_v27 = vmul.f32 %v2021_v15, %v9886_v56  ;;  %v2298_v41 = vadd.f32 %v2297_v4, %v8076_v11 }
 0x3cc   : >>> { %v6378_v37 = vpop.eup %6377  ;;  %v2452_v26 = vrot.slane %v2451_v1, 4  ;;  %6391 = vrcp.f32 %v2182_v57  ;;  %v2186_v13 = vadd.f32 1.0, %v6376_v3  ;;  %v2032_v18 = vsub.f32 %v1997_v2, %v9883_v39 }
 0x3cd   : >>> { %v6380_v43 = vpop.eup %6379  ;;  %6393 = vpow2.f32 %v5877_v44  ;;  %v5870_v23 = vmul.f32 -1.442695, %v2053_v27  ;;  %v2025_v9 = vsub.f32 %v1963_v40, %v9885_v17  ;;  %v2310_v31 = vsel %vm916_vm2, %v2267_v5, 0.0 }
 0x3ce   : >>> { %v8126_v22 = vpop.eup %6381  ;;  %v2464_v42 = vadd.f32 %v2463_v51, %v8072_v61  ;;  %6395 = vrcp.f32 %v2180_v0  ;;  %v2033_v11 = vsub.f32 %v2001_v14, %v9885_v17  ;;  %v2064_v33 = vmul.f32 %v2032_v18, %v9884_v35 }
 0x3cf   : >>> { %v6384_v15 = vpop.eup %6383  ;;  %6397 = vrcp.f32 %v2187_v62  ;;  %v2057_v57 = vmul.f32 %v2025_v9, %v9886_v56  ;;  %v2029_v3 = vsub.f32 %v1982_v63, %v9885_v17  ;;  %v2453_v2 = vadd.f32 %v2452_v26, %v2451_v1 }
 0x3d0   : >>> { %6399 = vrcp.f32 %v2186_v13  ;;  %v2184_v40 = vadd.f32 1.0, %v6380_v43  ;;  %v2177_v4 = vadd.f32 1.0, %v6384_v15  ;;  %v2311_v44 = vadd.f32 %v2310_v31, %v8063_v24 }
 0x3d1   : >>> { %6401 = vpow2.f32 %v5870_v23  ;;  %v5881_v5 = vmul.f32 -1.442695, %v2064_v33  ;;  %v5874_v61 = vmul.f32 -1.442695, %v2057_v57  ;;  %v2424_v0 = vmul.f32 %v8126_v22, %v9874_v32 }
 0x3d2   : >>> { %6403 = vrcp.f32 %v2177_v4  ;;  %v2065_v51 = vmul.f32 %v2033_v11, %v9886_v56  ;;  %v2061_v62 = vmul.f32 %v2029_v3, %v9886_v56  ;;  %v2299_v14 = vrot.slane %v2298_v41, 4 }
 0x3d3   : >>> { %v6386_v27 = vpop.eup %6385  ;;  %v2274_v1 = vmul.f32 %v6378_v37, %v9872_v53  ;;  %v2465_v26 = vrot.slane %v2464_v42, 4  ;;  %6405 = vpow2.f32 %v5881_v5  ;;  %v2454_v63 = vrot.slane %v2453_v2, 2 }
 0x3d4   : >>> { %v6388_v13 = vpop.eup %6387  ;;  %6407 = vrcp.f32 %v2184_v40  ;;  %v5882_v24 = vmul.f32 -1.442695, %v2065_v51  ;;  %v5878_v43 = vmul.f32 -1.442695, %v2061_v62  ;;  %v2345_v18 = vsel %vm916_vm2, %v2277_v34, 0.0 }
 0x3d5   : >>> { %v6390_v23 = vpop.eup %6389  ;;  %v2498_v9 = vsel %vm916_vm2, %v2430_v36, 0.0  ;;  %v2427_v31 = vmul.f32 %v6378_v37, %v9873_v10  ;;  %6409 = vpow2.f32 %v5874_v61  ;;  %v2312_v15 = vrot.slane %v2311_v44, 4 }
 0x3d6   : >>> { %v6392_v11 = vpop.eup %6391  ;;  %v2476_v33 = vsel %vm916_vm2, %v2424_v0, 0.0  ;;  %v2191_v57 = vadd.f32 1.0, %v6386_v27  ;;  %6411 = vpow2.f32 %v5882_v24  ;;  %v8144_v4 = vadd.f32 %v2299_v14, %v2298_v41 }
 0x3d7   : >>> { %v6394_v3 = vpop.eup %6393  ;;  %v2466_v40 = vadd.f32 %v2465_v26, %v2464_v42  ;;  %v2190_v5 = vadd.f32 1.0, %v6390_v23  ;;  %6413 = vpow2.f32 %v5878_v43  ;;  %v8148_v34 = vadd.f32 %v8112_v25, %v8058_v29 }
 0x3d8   : >>> { %v6396_v51 = vpop.eup %6395  ;;  %v8150_v36 = vadd.f32 %v2454_v63, %v2453_v2  ;;  %v8153_v37 = vadd.f32 %v2345_v18, %v8103_v16  ;;  %v2334_v61 = vsel %vm916_vm2, %v2274_v1, 0.0  ;;  %v2487_v62 = vsel %vm916_vm2, %v2427_v31, 0.0 }
 0x3d9   : >>> { %v6398_v0 = vpop.eup %6397  ;;  %v2281_v41 = vmul.f32 %v6388_v13, %v9870_v38  ;;  %v2280_v42 = vmul.f32 %v6392_v11, %v9868_v6  ;;  %v2477_v27 = vadd.f32 %v2476_v33, %v8118_v28  ;;  %v8161_v29 = vadd.f32 %v2498_v9, %v8106_v30 }
 0x3da   : >>> { %v6400_v14 = vpop.eup %6399  ;;  %v8163_v25 = vadd.f32 %v2312_v15, %v2311_v44  ;;  %6415 = vrcp.f32 %v2191_v57  ;;  %v2188_v16 = vadd.f32 1.0, %v6394_v3  ;;  %v2467_v26 = vrot.slane %v2466_v40, 2 }
 0x3db   : >>> { %v6402_v2 = vpop.eup %6401  ;;  %v2434_v63 = vmul.f32 %v6388_v13, %v9871_v21  ;;  %6417 = vrcp.f32 %v2190_v5  ;;  %v8169_v28 = vadd.f32 %v2334_v61, %v8094_v8  ;;  %v2488_v30 = vadd.f32 %v2487_v62, %v8100_v7 }
 0x3dc   : >>> { %v6404_v24 = vpop.eup %6403  ;;  %v2433_v44 = vmul.f32 %v6392_v11, %v9869_v47  ;;  %v2358_v18 = vsel %vm916_vm2, %v2281_v41, 0.0  ;;  %v2357_v9 = vsel %vm916_vm2, %v2280_v42, 0.0  ;;  %v2271_v31 = vmul.f32 %v8126_v22, %v9875_v50 }
 0x3dd   : >>> { %v6406_v23 = vpop.eup %6405  ;;  %v2478_v13 = vrot.slane %v2477_v27, 4  ;;  %v2428_v57 = vmul.f32 %v6404_v24, %v9874_v32  ;;  %6419 = vrcp.f32 %v2188_v16  ;;  %v2181_v8 = vadd.f32 1.0, %v6402_v2 }
 0x3de   : >>> { %v6408_v15 = vpop.eup %6407  ;;  %v8179_v7 = vadd.f32 %v2467_v26, %v2466_v40  ;;  %v2511_v11 = vsel %vm916_vm2, %v2434_v63, 0.0  ;;  %v2278_v5 = vmul.f32 %v6396_v51, %v9872_v53  ;;  %v2431_v61 = vmul.f32 %v6396_v51, %v9873_v10 }
 0x3df   : >>> { %v6410_v3 = vpop.eup %6409  ;;  %v2359_v41 = vadd.f32 %v2358_v18, %v2357_v9  ;;  %v2510_v22 = vsel %vm916_vm2, %v2433_v44, 0.0  ;;  %6421 = vrcp.f32 %v2181_v8  ;;  %v2192_v42 = vadd.f32 1.0, %v6406_v23 }
 0x3e0   : >>> { %v6412_v62 = vpop.eup %6411  ;;  %v2323_v33 = vsel %vm916_vm2, %v2271_v31, 0.0  ;;  %v2479_v16 = vadd.f32 %v2478_v13, %v2477_v27  ;;  %v2285_v2 = vmul.f32 %v6398_v0, %v9870_v38  ;;  %v2489_v40 = vsel %vm916_vm2, %v2428_v57, 0.0 }
 0x3e1   : >>> { %v6414_v1 = vpop.eup %6413  ;;  %v2438_v26 = vmul.f32 %v6398_v0, %v9871_v21  ;;  %6423 = vrcp.f32 %v2192_v42  ;;  %v2185_v63 = vadd.f32 1.0, %v6410_v3  ;;  %v2193_v43 = vadd.f32 1.0, %v6412_v62 }
 0x3e2   : >>> { %v2284_v51 = vmul.f32 %v6400_v14, %v9868_v6  ;;  %v2437_v18 = vmul.f32 %v6400_v14, %v9869_v47  ;;  %v2282_v44 = vmul.f32 %v6408_v15, %v9872_v53  ;;  %v2189_v23 = vadd.f32 1.0, %v6414_v1 }
 0x3e3   : >>> { %v2512_v8 = vadd.f32 %v2511_v11, %v2510_v22  ;;  %v2275_v27 = vmul.f32 %v6404_v24, %v9875_v50  ;;  %v2490_v31 = vadd.f32 %v2489_v40, %v2488_v30  ;;  %6425 = vrcp.f32 %v2185_v63 }
 0x3e4   : >>> { %v6416_v9 = vpop.eup %6415  ;;  %v2347_v57 = vsel %vm916_vm2, %v2278_v5, 0.0  ;;  %v2500_v0 = vsel %vm916_vm2, %v2431_v61, 0.0  ;;  %v8196_v3 = vadd.f32 %v2323_v33, %v8148_v34  ;;  %v2480_v62 = vrot.slane %v2479_v16, 2 }
 0x3e5   : >>> { %v6418_v13 = vpop.eup %6417  ;;  %v2371_v14 = vsel %vm916_vm2, %v2285_v2, 0.0  ;;  %v2524_v42 = vsel %vm916_vm2, %v2438_v26, 0.0  ;;  %v2435_v1 = vmul.f32 %v6408_v15, %v9873_v10  ;;  %6427 = vrcp.f32 %v2193_v43 }
 0x3e6   : >>> { %v2370_v24 = vsel %vm916_vm2, %v2284_v51, 0.0  ;;  %v2523_v30 = vsel %vm916_vm2, %v2437_v18, 0.0  ;;  %v2360_v11 = vsel %vm916_vm2, %v2282_v44, 0.0  ;;  %6429 = vrcp.f32 %v2189_v23 }
 0x3e7   : >>> { %v6420_v5 = vpop.eup %6419  ;;  %v2336_v61 = vsel %vm916_vm2, %v2275_v27, 0.0  ;;  %v2491_v34 = vrot.slane %v2490_v31, 4  ;;  %v2289_v33 = vmul.f32 %v6416_v9, %v9870_v38  ;;  %v2288_v22 = vmul.f32 %v6418_v13, %v9868_v6 }
 0x3e8   : >>> { %v2348_v2 = vadd.f32 %v2347_v57, %v8153_v37  ;;  %v2501_v15 = vadd.f32 %v2500_v0, %v8161_v29  ;;  %v2442_v43 = vmul.f32 %v6416_v9, %v9871_v21  ;;  %v2441_v40 = vmul.f32 %v6418_v13, %v9869_v47 }
 0x3e9   : >>> { %v6422_v26 = vpop.eup %6421  ;;  %v8212_v51 = vadd.f32 %v2480_v62, %v2479_v16  ;;  %v2372_v18 = vadd.f32 %v2371_v14, %v2370_v24  ;;  %v2286_v44 = vmul.f32 %v6420_v5, %v9872_v53  ;;  %v2525_v23 = vadd.f32 %v2524_v42, %v2523_v30 }
 0x3ea   : >>> { %v2361_v27 = vadd.f32 %v2360_v11, %v2359_v41  ;;  %v2513_v6 = vsel %vm916_vm2, %v2435_v1, 0.0  ;;  %v8217_v37 = vadd.f32 %v2336_v61, %v8169_v28  ;;  %v2492_v57 = vadd.f32 %v2491_v34, %v2490_v31 }
 0x3eb   : >>> { %v6424_v29 = vpop.eup %6423  ;;  %v2384_v9 = vsel %vm916_vm2, %v2289_v33, 0.0  ;;  %v2383_v13 = vsel %vm916_vm2, %v2288_v22, 0.0  ;;  %v2432_v0 = vmul.f32 %v6422_v26, %v9874_v32  ;;  %v2537_v16 = vsel %vm916_vm2, %v2442_v43, 0.0 }
 0x3ec   : >>> { %v2536_v62 = vsel %vm916_vm2, %v2441_v40, 0.0  ;;  %v2439_v14 = vmul.f32 %v6420_v5, %v9873_v10  ;;  %v2443_v41 = vmul.f32 %v6424_v29, %v9873_v10  ;;  %v2373_v28 = vsel %vm916_vm2, %v2286_v44, 0.0 }
 0x3ed   : >>> { %v6426_v42 = vpop.eup %6425  ;;  %v2279_v1 = vmul.f32 %v6422_v26, %v9875_v50  ;;  %v2502_v31 = vsel %vm916_vm2, %v2432_v0, 0.0  ;;  %v2290_v24 = vmul.f32 %v6424_v29, %v9872_v53  ;;  %v2514_v30 = vadd.f32 %v2513_v6, %v2512_v8 }
 0x3ee   : >>> { %v2338_v11 = vrot.slane %v8217_v37, 4  ;;  %v2385_v61 = vadd.f32 %v2384_v9, %v2383_v13  ;;  %v2503_v34 = vadd.f32 %v2502_v31, %v2501_v15  ;;  %v2493_v22 = vrot.slane %v2492_v57, 2 }
 0x3ef   : >>> { %v6428_v33 = vpop.eup %6427  ;;  %v2538_v43 = vadd.f32 %v2537_v16, %v2536_v62  ;;  %v2283_v5 = vmul.f32 %v6426_v42, %v9875_v50  ;;  %v2436_v40 = vmul.f32 %v6426_v42, %v9874_v32  ;;  %v2374_v44 = vadd.f32 %v2373_v28, %v2372_v18 }
 0x3f0   : >>> { %v6430_v63 = vpop.eup %6429  ;;  %v2526_v26 = vsel %vm916_vm2, %v2439_v14, 0.0  ;;  %v2504_v10 = vrot.slane %v2503_v34, 4  ;;  %v2539_v0 = vsel %vm916_vm2, %v2443_v41, 0.0  ;;  %v2349_v6 = vsel %vm916_vm2, %v2279_v1, 0.0 }
 0x3f1   : >>> { %v2386_v8 = vsel %vm916_vm2, %v2290_v24, 0.0  ;;  %v2515_v15 = vsel %vm916_vm2, %v2436_v40, 0.0  ;;  %v2444_v29 = vmul.f32 %v6428_v33, %v9874_v32  ;;  %v2362_v13 = vsel %vm916_vm2, %v2283_v5, 0.0 }
 0x3f2   : >>> { %v2505_v9 = vadd.f32 %v2504_v10, %v2503_v34  ;;  %v2516_v16 = vadd.f32 %v2515_v15, %v2514_v30  ;;  %v2291_v62 = vmul.f32 %v6428_v33, %v9875_v50  ;;  %v2540_v18 = vadd.f32 %v2539_v0, %v2538_v43 }
 0x3f3   : >>> { %v2541_v14 = vsel %vm916_vm2, %v2444_v29, 0.0  ;;  %v2287_v42 = vmul.f32 %v6430_v63, %v9875_v50  ;;  %v2440_v41 = vmul.f32 %v6430_v63, %v9874_v32  ;;  %v2527_v28 = vadd.f32 %v2526_v26, %v2525_v23 }
 0x3f4   : >>> { %v2350_v1 = vadd.f32 %v2349_v6, %v2348_v2  ;;  %v2506_v31 = vrot.slane %v2505_v9, 2  ;;  %v2517_v24 = vrot.slane %v2516_v16, 4  ;;  %v2363_v40 = vadd.f32 %v2362_v13, %v2361_v27 }
 0x3f5   : >>> { %v2542_v53 = vadd.f32 %v2541_v14, %v2540_v18  ;;  %v2375_v10 = vsel %vm916_vm2, %v2287_v42, 0.0  ;;  %v2528_v34 = vsel %vm916_vm2, %v2440_v41, 0.0  ;;  %v2494_v30 = vadd.f32 %v2493_v22, %v2492_v57 }
 0x3f6   : >>> { %v2387_v5 = vadd.f32 %v2386_v8, %v2385_v61  ;;  %v2518_v33 = vadd.f32 %v2517_v24, %v2516_v16  ;;  %v2388_v43 = vsel %vm916_vm2, %v2291_v62, 0.0  ;;  %v2507_v0 = vadd.f32 %v2506_v31, %v2505_v9 }
 0x3f7   : >>> { %v2543_v15 = vrot.slane %v2542_v53, 4  ;;  %v2376_v29 = vadd.f32 %v2375_v10, %v2374_v44  ;;  %v2529_v50 = vadd.f32 %v2528_v34, %v2527_v28  ;;  %v2469_v63 = vrot.slane %v8179_v7, 1 }
 0x3f8   : >>> { %v2482_v2 = vrot.slane %v8212_v51, 1  ;;  %v2351_v23 = vrot.slane %v2350_v1, 4  ;;  %v2519_v27 = vrot.slane %v2518_v33, 2  ;;  %v2364_v26 = vrot.slane %v2363_v40, 4 }
 0x3f9   : >>> { %v2389_v6 = vadd.f32 %v2388_v43, %v2387_v5  ;;  %v2544_v13 = vadd.f32 %v2543_v15, %v2542_v53  ;;  %v2530_v18 = vrot.slane %v2529_v50, 4  ;;  %v9887_v57 = vrot.slane %v8196_v3, 4 }
 0x3fa   : >>> { %v2495_v22 = vrot.slane %v2494_v30, 1  ;;  %v2520_v8 = vadd.f32 %v2519_v27, %v2518_v33  ;;  %v2377_v9 = vrot.slane %v2376_v29, 4  ;;  %v2339_v44 = vadd.f32 %v2338_v11, %v8217_v37 }
 0x3fb   : >>> { %v2326_v61 = vadd.f32 %v9887_v57, %v8196_v3  ;;  %v2508_v16 = vrot.slane %v2507_v0, 1  ;;  %v2545_v62 = vrot.slane %v2544_v13, 2  ;;  %v2531_v14 = vadd.f32 %v2530_v18, %v2529_v50 }
 0x3fc   : >>> { %v2470_v42 = vadd.f32 %v2469_v63, %v8179_v7  ;;  %v2483_v41 = vadd.f32 %v2482_v2, %v8212_v51  ;;  %v2352_v28 = vadd.f32 %v2351_v23, %v2350_v1  ;;  %v2521_v31 = vrot.slane %v2520_v8, 1 }
 0x3fd   : >>> { %v2365_v53 = vadd.f32 %v2364_v26, %v2363_v40  ;;  %v2390_v24 = vrot.slane %v2389_v6, 4  ;;  %v2546_v10 = vadd.f32 %v2545_v62, %v2544_v13  ;;  %v2532_v34 = vrot.slane %v2531_v14, 2 }
 0x3fe   : >>> { %v9888_v3 = vrot.slane %v8150_v36, 1  ;;  %v2327_v33 = vrot.slane %v2326_v61, 2  ;;  %v2496_v43 = vadd.f32 %v2495_v22, %v2494_v30  ;;  %v2378_v37 = vadd.f32 %v2377_v9, %v2376_v29 }
 0x3ff   : >>> { %v2340_v11 = vrot.slane %v2339_v44, 2  ;;  %v2509_v15 = vadd.f32 %v2508_v16, %v2507_v0  ;;  %v2547_v50 = vrot.slane %v2546_v10, 1  ;;  %v2533_v27 = vadd.f32 %v2532_v34, %v2531_v14 }
 0x400   : >>> { %v2457_v5 = vadd.f32 %v9888_v3, %v8150_v36  ;;  %v9889_v7 = vrot.slane %v8163_v25, 2  ;;  %v2353_v40 = vrot.slane %v2352_v28, 2  ;;  %v2522_v63 = vadd.f32 %v2521_v31, %v2520_v8 }
 0x401   : >>> { %v2366_v23 = vrot.slane %v2365_v53, 2  ;;  %v2391_v26 = vadd.f32 %v2390_v24, %v2389_v6  ;;  %v2534_v36 = vrot.slane %v2533_v27, 1  ;;  %v2328_v13 = vadd.f32 %v2327_v33, %v2326_v61 }
 0x402   : >>> { %v2315_v51 = vadd.f32 %v9889_v7, %v8163_v25  ;;  %v2557_v1 = vsel %vm1051_vm4, %v2470_v42, %v2457_v5  ;;  %v2548_v29 = vadd.f32 %v2547_v50, %v2546_v10  ;;  %v2379_v0 = vrot.slane %v2378_v37, 2 }
 0x403   : >>> { %v2558_v2 = vsel %vm1053_vm5, %v2483_v41, %v2557_v1  ;;  %v9890_v18 = vrot.slane %v8144_v4, 2  ;;  %v2341_v22 = vadd.f32 %v2340_v11, %v2339_v44  ;;  %v2535_v9 = vadd.f32 %v2534_v36, %v2533_v27 }
 0x404   : >>> { %v2559_v30 = vsel %vm1055_vm6, %v2496_v43, %v2558_v2  ;;  %v2354_v16 = vadd.f32 %v2353_v40, %v2352_v28  ;;  %v2316_v62 = vrot.slane %v2315_v51, 1  ;;  %v2367_v14 = vadd.f32 %v2366_v23, %v2365_v53 }
 0x405   : >>> { %v2302_v57 = vadd.f32 %v9890_v18, %v8144_v4  ;;  %v2560_v25 = vsel %vm1057_vm7, %v2509_v15, %v2559_v30  ;;  %v2392_v6 = vrot.slane %v2391_v26, 2  ;;  %v2329_v42 = vrot.slane %v2328_v13, 1 }
 0x406   : >>> { %v2561_v8 = vsel %vm1059_vm8, %v2522_v63, %v2560_v25  ;;  %v2380_v41 = vadd.f32 %v2379_v0, %v2378_v37  ;;  %v2342_v10 = vrot.slane %v2341_v22, 1  ;;  %v2355_v44 = vrot.slane %v2354_v16, 1 }
 0x407   : >>> { %v2562_v61 = vsel %vm1061_vm9, %v2535_v9, %v2561_v8  ;;  %v2303_v24 = vrot.slane %v2302_v57, 1  ;;  %v2317_v34 = vadd.f32 %v2316_v62, %v2315_v51  ;;  %v2368_v3 = vrot.slane %v2367_v14, 1 }
 0x408   : >>> { %v2563_v31 = vsel %vm1063_vm10, %v2548_v29, %v2562_v61  ;;  %v2393_v5 = vadd.f32 %v2392_v6, %v2391_v26  ;;  %v2330_v28 = vadd.f32 %v2329_v42, %v2328_v13  ;;  %v2381_v33 = vrot.slane %v2380_v41, 1 }
 0x409   : >>> { %v2565_v4 = vadd.f32 %v2563_v31, %v7583_v60  ;;  %v2304_v43 = vadd.f32 %v2303_v24, %v2302_v57  ;;  %v2343_v53 = vadd.f32 %v2342_v10, %v2341_v22  ;;  %v2356_v11 = vadd.f32 %v2355_v44, %v2354_v16  ;;  %v9892_v24 = vld [vmem:[#allocation42_spill] sm:$0xff] }
 0x40a   : >>> { %v2369_v50 = vadd.f32 %v2368_v3, %v2367_v14  ;;  %v2394_v37 = vrot.slane %v2393_v5, 1  ;;  %v2382_v7 = vadd.f32 %v2381_v33, %v2380_v41  ;;  %v2258_v2 = vmul.f32 %v9878_v20, %v7954_v12  ;;  %v9891_v41 = vld [vmem:[#allocation37_spill] sm:$0xff] }
 0x40b   : >>> { %6431 = vrcp.f32 %v2565_v4  ;;  %v2404_v15 = vsel %vm1051_vm4, %v2317_v34, %v2304_v43  ;;  %v9893_v34 = vld [vmem:[#allocation41_spill] sm:$0xff] }
 0x40c   : >>> { %v2405_v27 = vsel %vm1053_vm5, %v2330_v28, %v2404_v15  ;;  %v2395_v63 = vadd.f32 %v2394_v37, %v2393_v5  ;;  %v2259_v30 = vadd.f32 %v2258_v2, %v7580_v52 }
 0x40d   : >>> { %v2406_v1 = vsel %vm1055_vm6, %v2343_v53, %v2405_v27 }
 0x40e   : >>> { %v2407_v40 = vsel %vm1057_vm7, %v2356_v11, %v2406_v1 }
 0x40f   : >>> { %v2408_v51 = vsel %vm1059_vm8, %v2369_v50, %v2407_v40 }
 0x410   : >>> { %v2409_v23 = vsel %vm1061_vm9, %v2382_v7, %v2408_v51 }
 0x411   : >>> { %v2410_v13 = vsel %vm1063_vm10, %v2395_v63, %v2409_v23 }
 0x412   : >>> { %v2412_v0 = vadd.f32 %v2410_v13, %v2259_v30 }
 0x415   : >>> { %v6432_v26 = vpop.eup %6431 }
 0x416   : >>> { %v2567_v36 = vmul.f32 %v6432_v26, %v2565_v4 }
 0x418   : >>> { %v2568_v29 = vsub.f32 2.0, %v2567_v36 }
 0x41a   : >>> { %v2569_v18 = vmul.f32 %v6432_v26, %v2568_v29 }
 0x41c   : >>> { %v8282_v57 = vmul.f32 %v2569_v18, %v2412_v0 }
 0x41e   : >>> { %v2574_v22 = vrot.slane %v8282_v57, %v7494_v46  ;;  %v2593_v12 = vrot.slane %v8282_v57, %v7499_v49  ;;  %v2612_v25 = vrot.slane %v8282_v57, %v7492_v45  ;;  %v2631_v9 = vrot.slane %v8282_v57, %v7497_v48 }
 0x41f   : >>> { %v2650_v16 = vrot.slane %v8282_v57, %v7507_v55  ;;  %v2669_v8 = vrot.slane %v8282_v57, %v7505_v54  ;;  %v2688_v62 = vrot.slane %v8282_v57, %v7513_v59  ;;  %v2707_v14 = vrot.slane %v8282_v57, %v7511_v58 }
 0x420   : >>> { %2580 = vbcast.lane.b32.xlu1 %v2574_v22, 264  ;;  %2576 = vbcast.lane.b32.xlu0 %v2574_v22, 256 }
 0x424   : >>> { %2599 = vbcast.lane.b32.xlu1 %v2593_v12, 264  ;;  %2595 = vbcast.lane.b32.xlu0 %v2593_v12, 256 }
 0x428   : >>> { %2618 = vbcast.lane.b32.xlu1 %v2612_v25, 264  ;;  %2614 = vbcast.lane.b32.xlu0 %v2612_v25, 256 }
 0x42c   : >>> { %2603 = vbcast.lane.b32.xlu1 %v2593_v12, 272  ;;  %2584 = vbcast.lane.b32.xlu0 %v2574_v22, 272 }
 0x430   : >>> { %2637 = vbcast.lane.b32.xlu1 %v2631_v9, 264  ;;  %2633 = vbcast.lane.b32.xlu0 %v2631_v9, 256 }
 0x434   : >>> { %2652 = vbcast.lane.b32.xlu1 %v2650_v16, 256  ;;  %2622 = vbcast.lane.b32.xlu0 %v2612_v25, 272 }
 0x438   : >>> { %2588 = vbcast.lane.b32.xlu1 %v2574_v22, 280  ;;  %2656 = vbcast.lane.b32.xlu0 %v2650_v16, 264 }
 0x43c   : >>> { %2641 = vbcast.lane.b32.xlu1 %v2631_v9, 272  ;;  %2607 = vbcast.lane.b32.xlu0 %v2593_v12, 280 }
 0x440   : >>> { %2675 = vbcast.lane.b32.xlu1 %v2669_v8, 264  ;;  %2671 = vbcast.lane.b32.xlu0 %v2669_v8, 256 }
 0x444   : >>> { %2660 = vbcast.lane.b32.xlu1 %v2650_v16, 272  ;;  %2626 = vbcast.lane.b32.xlu0 %v2612_v25, 280 }
 0x448   : >>> { %2694 = vbcast.lane.b32.xlu1 %v2688_v62, 264  ;;  %2690 = vbcast.lane.b32.xlu0 %v2688_v62, 256 }
 0x44c   : >>> { %2679 = vbcast.lane.b32.xlu1 %v2669_v8, 272  ;;  %2645 = vbcast.lane.b32.xlu0 %v2631_v9, 280 }
 0x450   : >>> { %2713 = vbcast.lane.b32.xlu1 %v2707_v14, 264  ;;  %2709 = vbcast.lane.b32.xlu0 %v2707_v14, 256 }
 0x454   : >>> { %2698 = vbcast.lane.b32.xlu1 %v2688_v62, 272  ;;  %2664 = vbcast.lane.b32.xlu0 %v2650_v16, 280 }
 0x458   : >>> { %2717 = vbcast.lane.b32.xlu1 %v2707_v14, 272  ;;  %2683 = vbcast.lane.b32.xlu0 %v2669_v8, 280 }
 0x45c   : >>> { %2721 = vbcast.lane.b32.xlu1 %v2707_v14, 280  ;;  %2702 = vbcast.lane.b32.xlu0 %v2688_v62, 280 }
 0x492   : >>> { %v2581_v6 = vpop.permute.xlu1 %2580  ;;  %v2577_v61 = vpop.permute.xlu0 %2576 }
 0x493   : >>> { %v2724_v42 = vsub.f32 %v2581_v6, %v9879_v19  ;;  %v2723_v31 = vsub.f32 %v2577_v61, %v9891_v41 }
 0x495   : >>> { %v2756_v10 = vmul.f32 %v2724_v42, %v9892_v24  ;;  %v2755_v3 = vmul.f32 %v2723_v31, %v9893_v34 }
 0x496   : >>> { %v2600_v4 = vpop.permute.xlu1 %2599  ;;  %v2596_v44 = vpop.permute.xlu0 %2595 }
 0x497   : >>> { %v2728_v5 = vsub.f32 %v2600_v4, %v9879_v19  ;;  %v2727_v28 = vsub.f32 %v2596_v44, %v9891_v41  ;;  %v5884_v33 = vmul.f32 -1.442695, %v2756_v10  ;;  %v5883_v11 = vmul.f32 -1.442695, %v2755_v3 }
 0x499   : >>> { %v2760_v15 = vmul.f32 %v2728_v5, %v9892_v24  ;;  %v2759_v50 = vmul.f32 %v2727_v28, %v9893_v34  ;;  %6433 = vpow2.f32 %v5884_v33 }
 0x49a   : >>> { %v2619_v43 = vpop.permute.xlu1 %2618  ;;  %v2615_v53 = vpop.permute.xlu0 %2614  ;;  %6435 = vpow2.f32 %v5883_v11 }
 0x49b   : >>> { %v2732_v37 = vsub.f32 %v2619_v43, %v9879_v19  ;;  %v2731_v27 = vsub.f32 %v2615_v53, %v9891_v41  ;;  %v5888_v40 = vmul.f32 -1.442695, %v2760_v15  ;;  %v5887_v51 = vmul.f32 -1.442695, %v2759_v50 }
 0x49d   : >>> { %v2764_v63 = vmul.f32 %v2732_v37, %v9892_v24  ;;  %v2763_v23 = vmul.f32 %v2731_v27, %v9893_v34  ;;  %6437 = vpow2.f32 %v5888_v40 }
 0x49e   : >>> { %v2604_v7 = vpop.permute.xlu1 %2603  ;;  %v2585_v1 = vpop.permute.xlu0 %2584  ;;  %6439 = vpow2.f32 %v5887_v51 }
 0x49f   : >>> { %v2729_v2 = vsub.f32 %v2604_v7, %v9883_v39  ;;  %v5892_v13 = vmul.f32 -1.442695, %v2764_v63  ;;  %v5891_v29 = vmul.f32 -1.442695, %v2763_v23  ;;  %v2725_v0 = vsub.f32 %v2585_v1, %v9883_v39 }
 0x4a1   : >>> { %v2761_v30 = vmul.f32 %v2729_v2, %v9884_v35  ;;  %6441 = vpow2.f32 %v5892_v13  ;;  %v2757_v8 = vmul.f32 %v2725_v0, %v9884_v35 }
 0x4a2   : >>> { %v2638_v26 = vpop.permute.xlu1 %2637  ;;  %v2634_v36 = vpop.permute.xlu0 %2633  ;;  %6443 = vpow2.f32 %v5891_v29 }
 0x4a3   : >>> { %v6434_v12 = vpop.eup %6433  ;;  %v2736_v25 = vsub.f32 %v2638_v26, %v9879_v19  ;;  %v5889_v16 = vmul.f32 -1.442695, %v2761_v30  ;;  %v2735_v14 = vsub.f32 %v2634_v36, %v9891_v41  ;;  %v5885_v44 = vmul.f32 -1.442695, %v2757_v8 }
 0x4a4   : >>> { %v6436_v9 = vpop.eup %6435  ;;  %v2884_v62 = vadd.f32 1.0, %v6434_v12 }
 0x4a5   : >>> { %v2883_v6 = vadd.f32 1.0, %v6436_v9  ;;  %v2768_v61 = vmul.f32 %v2736_v25, %v9892_v24  ;;  %6445 = vpow2.f32 %v5889_v16  ;;  %v2767_v5 = vmul.f32 %v2735_v14, %v9893_v34 }
 0x4a6   : >>> { %v2653_v18 = vpop.permute.xlu1 %2652  ;;  %v2623_v22 = vpop.permute.xlu0 %2622  ;;  %6447 = vrcp.f32 %v2884_v62 }
 0x4a7   : >>> { %v2739_v42 = vsub.f32 %v2653_v18, %v9891_v41  ;;  %v6438_v4 = vpop.eup %6437  ;;  %6449 = vrcp.f32 %v2883_v6  ;;  %v5896_v28 = vmul.f32 -1.442695, %v2768_v61  ;;  %v2733_v11 = vsub.f32 %v2623_v22, %v9883_v39 }
 0x4a8   : >>> { %v6440_v3 = vpop.eup %6439  ;;  %v2888_v43 = vadd.f32 1.0, %v6438_v4  ;;  %6451 = vpow2.f32 %v5885_v44  ;;  %v5895_v37 = vmul.f32 -1.442695, %v2767_v5 }
 0x4a9   : >>> { %v2771_v53 = vmul.f32 %v2739_v42, %v9893_v34  ;;  %v2887_v15 = vadd.f32 1.0, %v6440_v3  ;;  %6453 = vpow2.f32 %v5896_v28  ;;  %v2765_v2 = vmul.f32 %v2733_v11, %v9884_v35  ;;  %v9894_v42 = vld [vmem:[#allocation33_spill] sm:$0xff] }
 0x4aa   : >>> { %v2589_v31 = vpop.permute.xlu1 %2588  ;;  %v2657_v10 = vpop.permute.xlu0 %2656  ;;  %6455 = vrcp.f32 %v2888_v43 }
 0x4ab   : >>> { %v2726_v33 = vsub.f32 %v2589_v31, %v9885_v17  ;;  %v6442_v50 = vpop.eup %6441  ;;  %v2740_v40 = vsub.f32 %v2657_v10, %v9879_v19  ;;  %v5899_v63 = vmul.f32 -1.442695, %v2771_v53  ;;  %6457 = vrcp.f32 %v2887_v15 }
 0x4ac   : >>> { %v6444_v7 = vpop.eup %6443  ;;  %v2892_v23 = vadd.f32 1.0, %v6442_v50  ;;  %6459 = vpow2.f32 %v5895_v37  ;;  %v5893_v18 = vmul.f32 -1.442695, %v2765_v2 }
 0x4ad   : >>> { %v2758_v1 = vmul.f32 %v2726_v33, %v9886_v56  ;;  %v2891_v13 = vadd.f32 1.0, %v6444_v7  ;;  %v2772_v29 = vmul.f32 %v2740_v40, %v9892_v24  ;;  %6461 = vpow2.f32 %v5899_v63 }
 0x4ae   : >>> { %v2608_v27 = vpop.permute.xlu0 %2607  ;;  %v2642_v51 = vpop.permute.xlu1 %2641  ;;  %6463 = vrcp.f32 %v2892_v23 }
 0x4af   : >>> { %v2730_v26 = vsub.f32 %v2608_v27, %v9885_v17  ;;  %v6446_v36 = vpop.eup %6445  ;;  %v5886_v30 = vmul.f32 -1.442695, %v2758_v1  ;;  %6465 = vrcp.f32 %v2891_v13  ;;  %v5900_v62 = vmul.f32 -1.442695, %v2772_v29 }
 0x4b0   : >>> { %v6448_v0 = vpop.eup %6447  ;;  %v2889_v25 = vadd.f32 1.0, %v6446_v36  ;;  %v2737_v14 = vsub.f32 %v2642_v51, %v9883_v39 }
 0x4b1   : >>> { %v6450_v12 = vpop.eup %6449  ;;  %v2762_v9 = vmul.f32 %v2730_v26, %v9886_v56  ;;  %6467 = vpow2.f32 %v5886_v30  ;;  %v2982_v6 = vmul.f32 %v6448_v0, %v9870_v38  ;;  %v3135_v61 = vmul.f32 %v6448_v0, %v9871_v21 }
 0x4b2   : >>> { %v8329_v22 = vpop.permute.xlu0 %2671  ;;  %v8332_v16 = vpop.permute.xlu1 %2675  ;;  %v2981_v31 = vmul.f32 %v6450_v12, %v9894_v42  ;;  %6469 = vpow2.f32 %v5893_v18  ;;  %v3134_v4 = vmul.f32 %v6450_v12, %v9869_v47  ;;  %v2769_v37 = vmul.f32 %v2737_v14, %v9884_v35 }
 0x4b3   : >>> { %v6452_v8 = vpop.eup %6451  ;;  %6471 = vrcp.f32 %v2889_v25  ;;  %v5890_v44 = vmul.f32 -1.442695, %v2762_v9  ;;  %v3014_v11 = vsel %vm916_vm2, %v2982_v6, 0.0  ;;  %v3167_v15 = vsel %vm916_vm2, %v3135_v61, 0.0 }
 0x4b4   : >>> { %v6454_v10 = vpop.eup %6453  ;;  %v2885_v5 = vadd.f32 1.0, %v6452_v8  ;;  %6473 = vpow2.f32 %v5900_v62  ;;  %v3013_v50 = vsel %vm916_vm2, %v2981_v31, 0.0  ;;  %v3166_v27 = vsel %vm916_vm2, %v3134_v4, 0.0 }
 0x4b5   : >>> { %v6456_v3 = vpop.eup %6455  ;;  %6475 = vpow2.f32 %v5890_v44  ;;  %v2896_v2 = vadd.f32 1.0, %v6454_v10  ;;  %v8350_v13 = vadd.f32 %v3014_v11, %v3013_v50  ;;  %v8352_v30 = vadd.f32 %v3167_v15, %v3166_v27  ;;  %v9895_v27 = vld [vmem:[#allocation35_spill] sm:$0xff] }
 0x4b6   : >>> { %v2627_v28 = vpop.permute.xlu0 %2626  ;;  %v6458_v33 = vpop.eup %6457  ;;  %v2986_v7 = vmul.f32 %v6456_v3, %v9870_v38  ;;  %v3139_v51 = vmul.f32 %v6456_v3, %v9871_v21  ;;  %6477 = vrcp.f32 %v2885_v5  ;;  %v5897_v29 = vmul.f32 -1.442695, %v2769_v37 }
 0x4b7   : >>> { %v8339_v43 = vpop.permute.xlu1 %2660  ;;  %v6460_v53 = vpop.eup %6459  ;;  %v2734_v1 = vsub.f32 %v2627_v28, %v9885_v17  ;;  %v2985_v63 = vmul.f32 %v6458_v33, %v9894_v42  ;;  %v3138_v12 = vmul.f32 %v6458_v33, %v9869_v47  ;;  %v2744_v25 = vsub.f32 %v8332_v16, %v9879_v19 }
 0x4b8   : >>> { %v6462_v40 = vpop.eup %6461  ;;  %v2895_v26 = vadd.f32 1.0, %v6460_v53  ;;  %v3027_v18 = vsel %vm916_vm2, %v2986_v7, 0.0  ;;  %v3180_v14 = vsel %vm916_vm2, %v3139_v51, 0.0  ;;  %6479 = vrcp.f32 %v2896_v2 }
 0x4b9   : >>> { %v6464_v23 = vpop.eup %6463  ;;  %v2766_v9 = vmul.f32 %v2734_v1, %v9886_v56  ;;  %v3026_v6 = vsel %vm916_vm2, %v2985_v63, 0.0  ;;  %v2899_v44 = vadd.f32 1.0, %v6462_v40  ;;  %v2743_v16 = vsub.f32 %v8329_v22, %v9891_v41 }
 0x4ba   : >>> { %v6466_v36 = vpop.eup %6465  ;;  %v2990_v61 = vmul.f32 %v6464_v23, %v9870_v38  ;;  %v2691_v31 = vpop.permute.xlu0 %2690  ;;  %v3143_v4 = vmul.f32 %v6464_v23, %v9871_v21  ;;  %6481 = vrcp.f32 %v2895_v26  ;;  %v3179_v53 = vsel %vm916_vm2, %v3138_v12, 0.0  ;;  %v9896_v12 = vld [vmem:[#allocation31_spill] sm:$0xff] }
 0x4bb   : >>> { %v6468_v0 = vpop.eup %6467  ;;  %v2695_v8 = vpop.permute.xlu1 %2694  ;;  %v2989_v3 = vmul.f32 %v6466_v36, %v9894_v42  ;;  %v3142_v5 = vmul.f32 %v6466_v36, %v9869_v47  ;;  %6483 = vpow2.f32 %v5897_v29  ;;  %v2776_v11 = vmul.f32 %v2744_v25, %v9892_v24 }
 0x4bc   : >>> { %v6470_v62 = vpop.eup %6469  ;;  %v2886_v28 = vadd.f32 1.0, %v6468_v0  ;;  %v2741_v15 = vsub.f32 %v8339_v43, %v9883_v39  ;;  %v5894_v50 = vmul.f32 -1.442695, %v2766_v9  ;;  %v3040_v37 = vsel %vm916_vm2, %v2990_v61, 0.0 }
 0x4bd   : >>> { %v6472_v10 = vpop.eup %6471  ;;  %v2893_v22 = vadd.f32 1.0, %v6470_v62  ;;  %v2748_v1 = vsub.f32 %v2695_v8, %v9879_v19  ;;  %v3193_v51 = vsel %vm916_vm2, %v3143_v4, 0.0  ;;  %6485 = vrcp.f32 %v2899_v44 }
 0x4be   : >>> { %v6474_v33 = vpop.eup %6473  ;;  %v2987_v7 = vmul.f32 %v6472_v10, %v9895_v27  ;;  %v2775_v63 = vmul.f32 %v2743_v16, %v9893_v34  ;;  %v2747_v2 = vsub.f32 %v2691_v31, %v9891_v41  ;;  %v3039_v43 = vsel %vm916_vm2, %v2989_v3, 0.0  ;;  %v2646_v0 = vpop.permute.xlu0 %2645 }
 0x4bf   : >>> { %v6476_v40 = vpop.eup %6475  ;;  %v2680_v23 = vpop.permute.xlu1 %2679  ;;  %v3192_v36 = vsel %vm916_vm2, %v3142_v5, 0.0  ;;  %6487 = vrcp.f32 %v2886_v28  ;;  %v2900_v29 = vadd.f32 1.0, %v6474_v33  ;;  %v3140_v25 = vmul.f32 %v6472_v10, %v9896_v12 }
 0x4c0   : >>> { %v6478_v26 = vpop.eup %6477  ;;  %v5904_v9 = vmul.f32 -1.442695, %v2776_v11  ;;  %v2773_v8 = vmul.f32 %v2741_v15, %v9884_v35  ;;  %6489 = vpow2.f32 %v5894_v50  ;;  %v3029_v62 = vsel %vm916_vm2, %v2987_v7, 0.0 }
 0x4c1   : >>> { %6491 = vrcp.f32 %v2893_v22  ;;  %v2890_v61 = vadd.f32 1.0, %v6476_v40  ;;  %v2780_v31 = vmul.f32 %v2748_v1, %v9892_v24  ;;  %v2983_v4 = vmul.f32 %v6478_v26, %v9895_v27 }
 0x4c2   : >>> { %v5903_v44 = vmul.f32 -1.442695, %v2775_v63  ;;  %v2779_v16 = vmul.f32 %v2747_v2, %v9893_v34  ;;  %v2745_v3 = vsub.f32 %v2680_v23, %v9883_v39  ;;  %v6480_v5 = vpop.eup %6479  ;;  %v3028_v28 = vadd.f32 %v3027_v18, %v3026_v6  ;;  %v2710_v18 = vpop.permute.xlu0 %2709 }
 0x4c3   : >>> { %v3181_v10 = vadd.f32 %v3180_v14, %v3179_v53  ;;  %v8386_v33 = vadd.f32 %v3040_v37, %v3039_v43  ;;  %6493 = vrcp.f32 %v2900_v29  ;;  %v8388_v15 = vadd.f32 %v3193_v51, %v3192_v36  ;;  %v2714_v22 = vpop.permute.xlu1 %2713 }
 0x4c4   : >>> { %v6482_v11 = vpop.eup %6481  ;;  %v3136_v50 = vmul.f32 %v6478_v26, %v9896_v12  ;;  %6495 = vpow2.f32 %v5904_v9  ;;  %v5901_v7 = vmul.f32 -1.442695, %v2773_v8  ;;  %v8391_v40 = vadd.f32 %v3029_v62, %v3028_v28 }
 0x4c5   : >>> { %v6484_v1 = vpop.eup %6483  ;;  %v3182_v63 = vsel %vm916_vm2, %v3140_v25, 0.0  ;;  %6497 = vrcp.f32 %v2890_v61  ;;  %v5908_v2 = vmul.f32 -1.442695, %v2780_v31  ;;  %v3016_v14 = vsel %vm916_vm2, %v2983_v4, 0.0 }
 0x4c6   : >>> { %6499 = vpow2.f32 %v5903_v44  ;;  %v5907_v6 = vmul.f32 -1.442695, %v2779_v16  ;;  %v2777_v53 = vmul.f32 %v2745_v3, %v9884_v35  ;;  %v2994_v37 = vmul.f32 %v6480_v5, %v9870_v38 }
 0x4c7   : >>> { %v3147_v51 = vmul.f32 %v6480_v5, %v9871_v21  ;;  %v2993_v23 = vmul.f32 %v6482_v11, %v9894_v42  ;;  %v2738_v26 = vsub.f32 %v2646_v0, %v9885_v17  ;;  %v6486_v43 = vpop.eup %6485  ;;  %v8400_v36 = vadd.f32 %v3182_v63, %v3181_v10  ;;  %v2699_v16 = vpop.permute.xlu1 %2698 }
 0x4c8   : >>> { %v3169_v29 = vsel %vm916_vm2, %v3136_v50, 0.0  ;;  %v2897_v25 = vadd.f32 1.0, %v6484_v1  ;;  %6501 = vpow2.f32 %v5901_v7  ;;  %v8404_v8 = vadd.f32 %v3016_v14, %v8350_v13 }
 0x4c9   : >>> { %v6488_v9 = vpop.eup %6487  ;;  %v3146_v62 = vmul.f32 %v6482_v11, %v9869_v47  ;;  %6503 = vpow2.f32 %v5908_v2  ;;  %v5905_v61 = vmul.f32 -1.442695, %v2777_v53  ;;  %v2770_v4 = vmul.f32 %v2738_v26, %v9886_v56  ;;  %v2665_v11 = vpop.permute.xlu0 %2664 }
 0x4ca   : >>> { %v6490_v31 = vpop.eup %6489  ;;  %6505 = vpow2.f32 %v5907_v6  ;;  %v2752_v0 = vsub.f32 %v2714_v22, %v9879_v19  ;;  %v2751_v44 = vsub.f32 %v2710_v18, %v9891_v41  ;;  %v3170_v5 = vadd.f32 %v3169_v29, %v8352_v30  ;;  %v9897_v29 = vld [vmem:[#allocation36_spill] sm:$0xff] }
 0x4cb   : >>> { %v6492_v3 = vpop.eup %6491  ;;  %v3053_v28 = vsel %vm916_vm2, %v2994_v37, 0.0  ;;  %v3206_v13 = vsel %vm916_vm2, %v3147_v51, 0.0  ;;  %v3052_v10 = vsel %vm916_vm2, %v2993_v23, 0.0  ;;  %v3137_v50 = vmul.f32 %v6488_v9, %v9874_v32 }
 0x4cc   : >>> { %v2894_v7 = vadd.f32 1.0, %v6490_v31  ;;  %v5898_v1 = vmul.f32 -1.442695, %v2770_v4  ;;  %v2784_v63 = vmul.f32 %v2752_v0, %v9892_v24  ;;  %v3205_v2 = vsel %vm916_vm2, %v3146_v62, 0.0 }
 0x4cd   : >>> { %v6494_v22 = vpop.eup %6493  ;;  %v2997_v18 = vmul.f32 %v6486_v43, %v9894_v42  ;;  %v3150_v30 = vmul.f32 %v6486_v43, %v9869_v47  ;;  %6507 = vrcp.f32 %v2897_v25  ;;  %v3144_v6 = vmul.f32 %v6492_v3, %v9896_v12 }
 0x4ce   : >>> { %v6496_v14 = vpop.eup %6495  ;;  %6509 = vpow2.f32 %v5905_v61  ;;  %v2783_v53 = vmul.f32 %v2751_v44, %v9893_v34  ;;  %v2749_v37 = vsub.f32 %v2699_v16, %v9883_v39  ;;  %v8422_v23 = vadd.f32 %v3053_v28, %v3052_v10  ;;  %v2718_v61 = vpop.permute.xlu1 %2717 }
 0x4cf   : >>> { %v6498_v51 = vpop.eup %6497  ;;  %v2991_v26 = vmul.f32 %v6492_v3, %v9895_v27  ;;  %v2984_v62 = vmul.f32 %v6488_v9, %v9897_v29  ;;  %6511 = vrcp.f32 %v2894_v7  ;;  %v3171_v43 = vsel %vm916_vm2, %v3137_v50, 0.0  ;;  %v2684_v28 = vpop.permute.xlu0 %2683 }
 0x4d0   : >>> { %v6500_v31 = vpop.eup %6499  ;;  %6513 = vpow2.f32 %v5898_v1  ;;  %v5912_v25 = vmul.f32 -1.442695, %v2784_v63  ;;  %v2781_v4 = vmul.f32 %v2749_v37, %v9884_v35  ;;  %v8428_v0 = vadd.f32 %v3206_v13, %v3205_v2 }
 0x4d1   : >>> { %v8431_v44 = vsel %vm916_vm2, %v2997_v18, 0.0  ;;  %v8434_v16 = vsel %vm916_vm2, %v3150_v30, 0.0  ;;  %v2904_v3 = vadd.f32 1.0, %v6496_v14  ;;  %v3195_v10 = vsel %vm916_vm2, %v3144_v6, 0.0 }
 0x4d2   : >>> { %v6502_v9 = vpop.eup %6501  ;;  %v3141_v50 = vmul.f32 %v6498_v51, %v9874_v32  ;;  %v5911_v7 = vmul.f32 -1.442695, %v2783_v53  ;;  %v2742_v1 = vsub.f32 %v2665_v11, %v9885_v17  ;;  %v8440_v13 = vsel %vm916_vm2, %v2991_v26, 0.0 }
 0x4d3   : >>> { %v6504_v63 = vpop.eup %6503  ;;  %v3172_v2 = vadd.f32 %v3171_v43, %v3170_v5  ;;  %v2998_v18 = vmul.f32 %v6494_v22, %v9870_v38  ;;  %v2903_v37 = vadd.f32 1.0, %v6500_v31  ;;  %v3018_v14 = vsel %vm916_vm2, %v2984_v62, 0.0  ;;  %v2722_v43 = vpop.permute.xlu1 %2721 }
 0x4d4   : >>> { %v6506_v30 = vpop.eup %6505  ;;  %v3151_v34 = vmul.f32 %v6494_v22, %v9871_v21  ;;  %6515 = vpow2.f32 %v5912_v25  ;;  %v5909_v6 = vmul.f32 -1.442695, %v2781_v4  ;;  %v8446_v24 = vadd.f32 %v3195_v10, %v8388_v15  ;;  %v2703_v4 = vpop.permute.xlu0 %2702 }
 0x4d5   : >>> { %v2988_v11 = vmul.f32 %v6498_v51, %v9897_v29  ;;  %6517 = vrcp.f32 %v2904_v3  ;;  %v2901_v53 = vadd.f32 1.0, %v6502_v9  ;;  %v3184_v26 = vsel %vm916_vm2, %v3141_v50, 0.0 }
 0x4d6   : >>> { %v2908_v5 = vadd.f32 1.0, %v6504_v63  ;;  %6519 = vpow2.f32 %v5911_v7  ;;  %v2774_v31 = vmul.f32 %v2742_v1, %v9886_v56  ;;  %v3019_v62 = vadd.f32 %v3018_v14, %v8404_v8 }
 0x4d7   : >>> { %v6508_v41 = vpop.eup %6507  ;;  %v3173_v22 = vrot.slane %v3172_v2, 4  ;;  %6521 = vrcp.f32 %v2903_v37  ;;  %v2907_v25 = vadd.f32 1.0, %v6506_v30  ;;  %v2753_v51 = vsub.f32 %v2718_v61, %v9883_v39 }
 0x4d8   : >>> { %v6510_v15 = vpop.eup %6509  ;;  %6523 = vpow2.f32 %v5909_v6  ;;  %v5902_v10 = vmul.f32 -1.442695, %v2774_v31  ;;  %v2746_v3 = vsub.f32 %v2684_v28, %v9885_v17  ;;  %v3031_v50 = vsel %vm916_vm2, %v2988_v11, 0.0 }
 0x4d9   : >>> { %v8454_v9 = vpop.eup %6511  ;;  %v3185_v7 = vadd.f32 %v3184_v26, %v8400_v36  ;;  %6525 = vrcp.f32 %v2901_v53  ;;  %v2754_v8 = vsub.f32 %v2722_v43, %v9885_v17  ;;  %v2785_v63 = vmul.f32 %v2753_v51, %v9884_v35 }
 0x4da   : >>> { %v6514_v1 = vpop.eup %6513  ;;  %6527 = vrcp.f32 %v2908_v5  ;;  %v2778_v37 = vmul.f32 %v2746_v3, %v9886_v56  ;;  %v2750_v30 = vsub.f32 %v2703_v4, %v9885_v17  ;;  %v3174_v61 = vadd.f32 %v3173_v22, %v3172_v2 }
 0x4db   : >>> { %6529 = vrcp.f32 %v2907_v25  ;;  %v2905_v28 = vadd.f32 1.0, %v6510_v15  ;;  %v2898_v14 = vadd.f32 1.0, %v6514_v1  ;;  %v3032_v6 = vadd.f32 %v3031_v50, %v8391_v40 }
 0x4dc   : >>> { %6531 = vpow2.f32 %v5902_v10  ;;  %v5913_v11 = vmul.f32 -1.442695, %v2785_v63  ;;  %v5906_v36 = vmul.f32 -1.442695, %v2778_v37  ;;  %v3145_v53 = vmul.f32 %v8454_v9, %v9874_v32 }
 0x4dd   : >>> { %6533 = vrcp.f32 %v2898_v14  ;;  %v2786_v26 = vmul.f32 %v2754_v8, %v9886_v56  ;;  %v2782_v5 = vmul.f32 %v2750_v30, %v9886_v56  ;;  %v3020_v43 = vrot.slane %v3019_v62, 4 }
 0x4de   : >>> { %v6516_v31 = vpop.eup %6515  ;;  %v2995_v2 = vmul.f32 %v6508_v41, %v9895_v27  ;;  %v3186_v22 = vrot.slane %v3185_v7, 4  ;;  %6535 = vpow2.f32 %v5913_v11  ;;  %v3175_v4 = vrot.slane %v3174_v61, 2 }
 0x4df   : >>> { %v6518_v25 = vpop.eup %6517  ;;  %6537 = vrcp.f32 %v2905_v28  ;;  %v5914_v40 = vmul.f32 -1.442695, %v2786_v26  ;;  %v5910_v15 = vmul.f32 -1.442695, %v2782_v5  ;;  %v3066_v51 = vsel %vm916_vm2, %v2998_v18, 0.0 }
 0x4e0   : >>> { %v6520_v10 = vpop.eup %6519  ;;  %v3219_v3 = vsel %vm916_vm2, %v3151_v34, 0.0  ;;  %v3148_v50 = vmul.f32 %v6508_v41, %v9896_v12  ;;  %6539 = vpow2.f32 %v5906_v36  ;;  %v3033_v1 = vrot.slane %v3032_v6, 4 }
 0x4e1   : >>> { %v6522_v8 = vpop.eup %6521  ;;  %v3197_v63 = vsel %vm916_vm2, %v3145_v53, 0.0  ;;  %v2912_v37 = vadd.f32 1.0, %v6516_v31  ;;  %6541 = vpow2.f32 %v5914_v40  ;;  %v8472_v14 = vadd.f32 %v3020_v43, %v3019_v62 }
 0x4e2   : >>> { %v6524_v30 = vpop.eup %6523  ;;  %v3187_v28 = vadd.f32 %v3186_v22, %v3185_v7  ;;  %v2911_v11 = vadd.f32 1.0, %v6520_v10  ;;  %6543 = vpow2.f32 %v5910_v15  ;;  %v8476_v18 = vadd.f32 %v8440_v13, %v8386_v33 }
 0x4e3   : >>> { %v6526_v26 = vpop.eup %6525  ;;  %v8478_v34 = vadd.f32 %v3175_v4, %v3174_v61  ;;  %v8481_v41 = vadd.f32 %v3066_v51, %v8431_v44  ;;  %v3055_v36 = vsel %vm916_vm2, %v2995_v2, 0.0  ;;  %v3208_v5 = vsel %vm916_vm2, %v3148_v50, 0.0 }
 0x4e4   : >>> { %v6528_v53 = vpop.eup %6527  ;;  %v3002_v62 = vmul.f32 %v6518_v25, %v9870_v38  ;;  %v3001_v7 = vmul.f32 %v6522_v8, %v9894_v42  ;;  %v3198_v31 = vadd.f32 %v3197_v63, %v8446_v24  ;;  %v8489_v33 = vadd.f32 %v3219_v3, %v8434_v16 }
 0x4e5   : >>> { %v6530_v43 = vpop.eup %6529  ;;  %v8491_v13 = vadd.f32 %v3033_v1, %v3032_v6  ;;  %6545 = vrcp.f32 %v2912_v37  ;;  %v2909_v44 = vadd.f32 1.0, %v6524_v30  ;;  %v3188_v22 = vrot.slane %v3187_v28, 2 }
 0x4e6   : >>> { %v6532_v61 = vpop.eup %6531  ;;  %v3155_v4 = vmul.f32 %v6518_v25, %v9871_v21  ;;  %6547 = vrcp.f32 %v2911_v11  ;;  %v8497_v24 = vadd.f32 %v3055_v36, %v8422_v23  ;;  %v3209_v16 = vadd.f32 %v3208_v5, %v8428_v0 }
 0x4e7   : >>> { %v6534_v40 = vpop.eup %6533  ;;  %v3154_v6 = vmul.f32 %v6522_v8, %v9869_v47  ;;  %v3079_v51 = vsel %vm916_vm2, %v3002_v62, 0.0  ;;  %v3078_v3 = vsel %vm916_vm2, %v3001_v7, 0.0  ;;  %v2992_v50 = vmul.f32 %v8454_v9, %v9897_v29 }
 0x4e8   : >>> { %v6536_v10 = vpop.eup %6535  ;;  %v3199_v25 = vrot.slane %v3198_v31, 4  ;;  %v3149_v37 = vmul.f32 %v6534_v40, %v9874_v32  ;;  %6549 = vrcp.f32 %v2909_v44  ;;  %v2902_v23 = vadd.f32 1.0, %v6532_v61 }
 0x4e9   : >>> { %v6538_v1 = vpop.eup %6537  ;;  %v8507_v0 = vadd.f32 %v3188_v22, %v3187_v28  ;;  %v3232_v8 = vsel %vm916_vm2, %v3155_v4, 0.0  ;;  %v2999_v11 = vmul.f32 %v6526_v26, %v9895_v27  ;;  %v3152_v36 = vmul.f32 %v6526_v26, %v9896_v12 }
 0x4ea   : >>> { %v6540_v30 = vpop.eup %6539  ;;  %v3080_v62 = vadd.f32 %v3079_v51, %v3078_v3  ;;  %v3231_v9 = vsel %vm916_vm2, %v3154_v6, 0.0  ;;  %6551 = vrcp.f32 %v2902_v23  ;;  %v2913_v7 = vadd.f32 1.0, %v6536_v10 }
 0x4eb   : >>> { %v6542_v5 = vpop.eup %6541  ;;  %v3044_v63 = vsel %vm916_vm2, %v2992_v50, 0.0  ;;  %v3200_v44 = vadd.f32 %v3199_v25, %v3198_v31  ;;  %v3006_v61 = vmul.f32 %v6528_v53, %v9870_v38  ;;  %v3210_v28 = vsel %vm916_vm2, %v3149_v37, 0.0 }
 0x4ec   : >>> { %v6544_v2 = vpop.eup %6543  ;;  %v3159_v22 = vmul.f32 %v6528_v53, %v9871_v21  ;;  %6553 = vrcp.f32 %v2913_v7  ;;  %v2906_v4 = vadd.f32 1.0, %v6540_v30  ;;  %v2914_v15 = vadd.f32 1.0, %v6542_v5 }
 0x4ed   : >>> { %v3005_v26 = vmul.f32 %v6530_v43, %v9894_v42  ;;  %v3158_v51 = vmul.f32 %v6530_v43, %v9869_v47  ;;  %v3003_v6 = vmul.f32 %v6538_v1, %v9895_v27  ;;  %v2910_v10 = vadd.f32 1.0, %v6544_v2 }
 0x4ee   : >>> { %v3233_v23 = vadd.f32 %v3232_v8, %v3231_v9  ;;  %v2996_v31 = vmul.f32 %v6534_v40, %v9897_v29  ;;  %v3211_v50 = vadd.f32 %v3210_v28, %v3209_v16  ;;  %6555 = vrcp.f32 %v2906_v4 }
 0x4ef   : >>> { %v6546_v3 = vpop.eup %6545  ;;  %v3068_v37 = vsel %vm916_vm2, %v2999_v11, 0.0  ;;  %v3221_v53 = vsel %vm916_vm2, %v3152_v36, 0.0  ;;  %v8524_v30 = vadd.f32 %v3044_v63, %v8476_v18  ;;  %v3201_v5 = vrot.slane %v3200_v44, 2 }
 0x4f0   : >>> { %v6548_v25 = vpop.eup %6547  ;;  %v3092_v43 = vsel %vm916_vm2, %v3006_v61, 0.0  ;;  %v3245_v7 = vsel %vm916_vm2, %v3159_v22, 0.0  ;;  %v3156_v2 = vmul.f32 %v6538_v1, %v9896_v12  ;;  %6557 = vrcp.f32 %v2914_v15 }
 0x4f1   : >>> { %v3091_v40 = vsel %vm916_vm2, %v3005_v26, 0.0  ;;  %v3244_v16 = vsel %vm916_vm2, %v3158_v51, 0.0  ;;  %v3081_v8 = vsel %vm916_vm2, %v3003_v6, 0.0  ;;  %6559 = vrcp.f32 %v2910_v10 }
 0x4f2   : >>> { %v6550_v11 = vpop.eup %6549  ;;  %v3057_v36 = vsel %vm916_vm2, %v2996_v31, 0.0  ;;  %v3212_v18 = vrot.slane %v3211_v50, 4  ;;  %v3010_v63 = vmul.f32 %v6546_v3, %v9870_v38  ;;  %v3009_v9 = vmul.f32 %v6548_v25, %v9894_v42 }
 0x4f3   : >>> { %v3069_v61 = vadd.f32 %v3068_v37, %v8481_v41  ;;  %v3222_v1 = vadd.f32 %v3221_v53, %v8489_v33  ;;  %v3163_v15 = vmul.f32 %v6546_v3, %v9871_v21  ;;  %v3162_v28 = vmul.f32 %v6548_v25, %v9869_v47 }
 0x4f4   : >>> { %v6552_v22 = vpop.eup %6551  ;;  %v8540_v26 = vadd.f32 %v3201_v5, %v3200_v44  ;;  %v3093_v51 = vadd.f32 %v3092_v43, %v3091_v40  ;;  %v3007_v6 = vmul.f32 %v6550_v11, %v9895_v27  ;;  %v3246_v10 = vadd.f32 %v3245_v7, %v3244_v16 }
 0x4f5   : >>> { %v3082_v31 = vadd.f32 %v3081_v8, %v3080_v62  ;;  %v3234_v42 = vsel %vm916_vm2, %v3156_v2, 0.0  ;;  %v8545_v41 = vadd.f32 %v3057_v36, %v8497_v24  ;;  %v3213_v37 = vadd.f32 %v3212_v18, %v3211_v50 }
 0x4f6   : >>> { %v6554_v33 = vpop.eup %6553  ;;  %v3105_v3 = vsel %vm916_vm2, %v3010_v63, 0.0  ;;  %v3104_v25 = vsel %vm916_vm2, %v3009_v9, 0.0  ;;  %v3153_v53 = vmul.f32 %v6552_v22, %v9874_v32  ;;  %v3258_v44 = vsel %vm916_vm2, %v3163_v15, 0.0 }
 0x4f7   : >>> { %v3257_v5 = vsel %vm916_vm2, %v3162_v28, 0.0  ;;  %v3160_v43 = vmul.f32 %v6550_v11, %v9896_v12  ;;  %v3164_v62 = vmul.f32 %v6554_v33, %v9896_v12  ;;  %v3094_v24 = vsel %vm916_vm2, %v3007_v6, 0.0 }
 0x4f8   : >>> { %v6556_v7 = vpop.eup %6555  ;;  %v3000_v2 = vmul.f32 %v6552_v22, %v9897_v29  ;;  %v3223_v50 = vsel %vm916_vm2, %v3153_v53, 0.0  ;;  %v3011_v40 = vmul.f32 %v6554_v33, %v9895_v27  ;;  %v3235_v16 = vadd.f32 %v3234_v42, %v3233_v23 }
 0x4f9   : >>> { %v3059_v8 = vrot.slane %v8545_v41, 4  ;;  %v3106_v36 = vadd.f32 %v3105_v3, %v3104_v25  ;;  %v3224_v18 = vadd.f32 %v3223_v50, %v3222_v1  ;;  %v3214_v9 = vrot.slane %v3213_v37, 2 }
 0x4fa   : >>> { %v6558_v63 = vpop.eup %6557  ;;  %v3259_v15 = vadd.f32 %v3258_v44, %v3257_v5  ;;  %v3004_v11 = vmul.f32 %v6556_v7, %v9897_v29  ;;  %v3157_v28 = vmul.f32 %v6556_v7, %v9874_v32  ;;  %v3095_v6 = vadd.f32 %v3094_v24, %v3093_v51 }
 0x4fb   : >>> { %v6560_v4 = vpop.eup %6559  ;;  %v3247_v22 = vsel %vm916_vm2, %v3160_v43, 0.0  ;;  %v3225_v12 = vrot.slane %v3224_v18, 4  ;;  %v3260_v53 = vsel %vm916_vm2, %v3164_v62, 0.0  ;;  %v3070_v42 = vsel %vm916_vm2, %v3000_v2, 0.0 }
 0x4fc   : >>> { %v3107_v23 = vsel %vm916_vm2, %v3011_v40, 0.0  ;;  %v3236_v1 = vsel %vm916_vm2, %v3157_v28, 0.0  ;;  %v3165_v33 = vmul.f32 %v6558_v63, %v9874_v32  ;;  %v3083_v25 = vsel %vm916_vm2, %v3004_v11, 0.0 }
 0x4fd   : >>> { %v3226_v3 = vadd.f32 %v3225_v12, %v3224_v18  ;;  %v3237_v44 = vadd.f32 %v3236_v1, %v3235_v16  ;;  %v3012_v5 = vmul.f32 %v6558_v63, %v9897_v29  ;;  %v3261_v51 = vadd.f32 %v3260_v53, %v3259_v15 }
 0x4fe   : >>> { %v3262_v43 = vsel %vm916_vm2, %v3165_v33, 0.0  ;;  %v3008_v7 = vmul.f32 %v6560_v4, %v9897_v29  ;;  %v3161_v62 = vmul.f32 %v6560_v4, %v9874_v32  ;;  %v3248_v24 = vadd.f32 %v3247_v22, %v3246_v10 }
 0x4ff   : >>> { %v3071_v2 = vadd.f32 %v3070_v42, %v3069_v61  ;;  %v3227_v50 = vrot.slane %v3226_v3, 2  ;;  %v3238_v40 = vrot.slane %v3237_v44, 4  ;;  %v3084_v28 = vadd.f32 %v3083_v25, %v3082_v31 }
 0x500   : >>> { %v3263_v27 = vadd.f32 %v3262_v43, %v3261_v51  ;;  %v3096_v12 = vsel %vm916_vm2, %v3008_v7, 0.0  ;;  %v3249_v18 = vsel %vm916_vm2, %v3161_v62, 0.0  ;;  %v3215_v16 = vadd.f32 %v3214_v9, %v3213_v37 }
 0x501   : >>> { %v3108_v11 = vadd.f32 %v3107_v23, %v3106_v36  ;;  %v3239_v63 = vadd.f32 %v3238_v40, %v3237_v44  ;;  %v3109_v15 = vsel %vm916_vm2, %v3012_v5, 0.0  ;;  %v3228_v53 = vadd.f32 %v3227_v50, %v3226_v3 }
 0x502   : >>> { %v3264_v1 = vrot.slane %v3263_v27, 4  ;;  %v3097_v33 = vadd.f32 %v3096_v12, %v3095_v6  ;;  %v3250_v29 = vadd.f32 %v3249_v18, %v3248_v24  ;;  %v3190_v4 = vrot.slane %v8507_v0, 1 }
 0x503   : >>> { %v3203_v61 = vrot.slane %v8540_v26, 1  ;;  %v3072_v10 = vrot.slane %v3071_v2, 4  ;;  %v3240_v31 = vrot.slane %v3239_v63, 2  ;;  %v3085_v22 = vrot.slane %v3084_v28, 4 }
 0x504   : >>> { %v3110_v42 = vadd.f32 %v3109_v15, %v3108_v11  ;;  %v3265_v25 = vadd.f32 %v3264_v1, %v3263_v27  ;;  %v3251_v51 = vrot.slane %v3250_v29, 4  ;;  %v9898_v37 = vrot.slane %v8524_v30, 4 }
 0x505   : >>> { %v3216_v9 = vrot.slane %v3215_v16, 1  ;;  %v3241_v23 = vadd.f32 %v3240_v31, %v3239_v63  ;;  %v3098_v3 = vrot.slane %v3097_v33, 4  ;;  %v3060_v6 = vadd.f32 %v3059_v8, %v8545_v41 }
 0x506   : >>> { %v3047_v36 = vadd.f32 %v9898_v37, %v8524_v30  ;;  %v3229_v44 = vrot.slane %v3228_v53, 1  ;;  %v3266_v5 = vrot.slane %v3265_v25, 2  ;;  %v3252_v43 = vadd.f32 %v3251_v51, %v3250_v29 }
 0x507   : >>> { %v3191_v7 = vadd.f32 %v3190_v4, %v8507_v0  ;;  %v3204_v62 = vadd.f32 %v3203_v61, %v8540_v26  ;;  %v3073_v24 = vadd.f32 %v3072_v10, %v3071_v2  ;;  %v3242_v50 = vrot.slane %v3241_v23, 1 }
 0x508   : >>> { %v3086_v27 = vadd.f32 %v3085_v22, %v3084_v28  ;;  %v3111_v40 = vrot.slane %v3110_v42, 4  ;;  %v3267_v12 = vadd.f32 %v3266_v5, %v3265_v25  ;;  %v3253_v18 = vrot.slane %v3252_v43, 2 }
 0x509   : >>> { %v9899_v30 = vrot.slane %v8478_v34, 1  ;;  %v3048_v63 = vrot.slane %v3047_v36, 2  ;;  %v3217_v15 = vadd.f32 %v3216_v9, %v3215_v16  ;;  %v3099_v41 = vadd.f32 %v3098_v3, %v3097_v33 }
 0x50a   : >>> { %v3061_v8 = vrot.slane %v3060_v6, 2  ;;  %v3230_v1 = vadd.f32 %v3229_v44, %v3228_v53  ;;  %v3268_v29 = vrot.slane %v3267_v12, 1  ;;  %v3254_v31 = vadd.f32 %v3253_v18, %v3252_v43 }
 0x50b   : >>> { %v3178_v11 = vadd.f32 %v9899_v30, %v8478_v34  ;;  %v9900_v0 = vrot.slane %v8491_v13, 2  ;;  %v3074_v28 = vrot.slane %v3073_v24, 2  ;;  %v3243_v4 = vadd.f32 %v3242_v50, %v3241_v23 }
 0x50c   : >>> { %v3087_v10 = vrot.slane %v3086_v27, 2  ;;  %v3112_v22 = vadd.f32 %v3111_v40, %v3110_v42  ;;  %v3255_v34 = vrot.slane %v3254_v31, 1  ;;  %v3049_v25 = vadd.f32 %v3048_v63, %v3047_v36 }
 0x50d   : >>> { %v3036_v26 = vadd.f32 %v9900_v0, %v8491_v13  ;;  %v3278_v2 = vsel %vm1051_vm4, %v3191_v7, %v3178_v11  ;;  %v3269_v33 = vadd.f32 %v3268_v29, %v3267_v12  ;;  %v3100_v53 = vrot.slane %v3099_v41, 2 }
 0x50e   : >>> { %v3279_v61 = vsel %vm1053_vm5, %v3204_v62, %v3278_v2  ;;  %v9901_v51 = vrot.slane %v8472_v14, 2  ;;  %v3062_v9 = vadd.f32 %v3061_v8, %v3060_v6  ;;  %v3256_v3 = vadd.f32 %v3255_v34, %v3254_v31 }
 0x50f   : >>> { %v3280_v16 = vsel %vm1055_vm6, %v3217_v15, %v3279_v61  ;;  %v3075_v44 = vadd.f32 %v3074_v28, %v3073_v24  ;;  %v3037_v5 = vrot.slane %v3036_v26, 1  ;;  %v3088_v43 = vadd.f32 %v3087_v10, %v3086_v27 }
 0x510   : >>> { %v3023_v37 = vadd.f32 %v9901_v51, %v8472_v14  ;;  %v3281_v13 = vsel %vm1057_vm7, %v3230_v1, %v3280_v16  ;;  %v3113_v42 = vrot.slane %v3112_v22, 2  ;;  %v3050_v7 = vrot.slane %v3049_v25, 1 }
 0x511   : >>> { %v3282_v23 = vsel %vm1059_vm8, %v3243_v4, %v3281_v13  ;;  %v3101_v62 = vadd.f32 %v3100_v53, %v3099_v41  ;;  %v3063_v12 = vrot.slane %v3062_v9, 1  ;;  %v3076_v6 = vrot.slane %v3075_v44, 1 }
 0x512   : >>> { %v3283_v36 = vsel %vm1061_vm9, %v3256_v3, %v3282_v23  ;;  %v3024_v40 = vrot.slane %v3023_v37, 1  ;;  %v3038_v18 = vadd.f32 %v3037_v5, %v3036_v26  ;;  %v3089_v30 = vrot.slane %v3088_v43, 1 }
 0x513   : >>> { %v3284_v50 = vsel %vm1063_vm10, %v3269_v33, %v3283_v36  ;;  %v3114_v11 = vadd.f32 %v3113_v42, %v3112_v22  ;;  %v3051_v24 = vadd.f32 %v3050_v7, %v3049_v25  ;;  %v3102_v63 = vrot.slane %v3101_v62, 1 }
 0x514   : >>> { %v3286_v14 = vadd.f32 %v3284_v50, %v7583_v60  ;;  %v3025_v15 = vadd.f32 %v3024_v40, %v3023_v37  ;;  %v3064_v27 = vadd.f32 %v3063_v12, %v3062_v9  ;;  %v3077_v8 = vadd.f32 %v3076_v6, %v3075_v44  ;;  %v9903_v40 = vld [vmem:[#allocation42_spill] sm:$0xff] }
 0x515   : >>> { %v3090_v29 = vadd.f32 %v3089_v30, %v3088_v43  ;;  %v3115_v41 = vrot.slane %v3114_v11, 1  ;;  %v3103_v0 = vadd.f32 %v3102_v63, %v3101_v62  ;;  %v2979_v61 = vmul.f32 %v9878_v20, %v8282_v57  ;;  %v9902_v62 = vld [vmem:[#allocation37_spill] sm:$0xff] }
 0x516   : >>> { %6561 = vrcp.f32 %v3286_v14  ;;  %v3125_v1 = vsel %vm1051_vm4, %v3038_v18, %v3025_v15  ;;  %v9904_v18 = vld [vmem:[#allocation41_spill] sm:$0xff] }
 0x517   : >>> { %v3126_v31 = vsel %vm1053_vm5, %v3051_v24, %v3125_v1  ;;  %v3116_v4 = vadd.f32 %v3115_v41, %v3114_v11  ;;  %v2980_v16 = vadd.f32 %v2979_v61, %v7580_v52 }
 0x518   : >>> { %v3127_v2 = vsel %vm1055_vm6, %v3064_v27, %v3126_v31 }
 0x519   : >>> { %v3128_v28 = vsel %vm1057_vm7, %v3077_v8, %v3127_v2 }
 0x51a   : >>> { %v3129_v26 = vsel %vm1059_vm8, %v3090_v29, %v3128_v28 }
 0x51b   : >>> { %v3130_v10 = vsel %vm1061_vm9, %v3103_v0, %v3129_v26 }
 0x51c   : >>> { %v3131_v25 = vsel %vm1063_vm10, %v3116_v4, %v3130_v10 }
 0x51d   : >>> { %v3133_v53 = vadd.f32 %v3131_v25, %v2980_v16 }
 0x520   : >>> { %v6562_v22 = vpop.eup %6561 }
 0x521   : >>> { %v3288_v34 = vmul.f32 %v6562_v22, %v3286_v14 }
 0x523   : >>> { %v3289_v33 = vsub.f32 2.0, %v3288_v34 }
 0x525   : >>> { %v3290_v51 = vmul.f32 %v6562_v22, %v3289_v33 }
 0x527   : >>> { %v8610_v37 = vmul.f32 %v3290_v51, %v3133_v53 }
 0x529   : >>> { %v3295_v9 = vrot.slane %v8610_v37, %v7494_v46  ;;  %v3314_v57 = vrot.slane %v8610_v37, %v7499_v49  ;;  %v3333_v13 = vrot.slane %v8610_v37, %v7492_v45  ;;  %v3352_v3 = vrot.slane %v8610_v37, %v7497_v48 }
 0x52a   : >>> { %v3371_v44 = vrot.slane %v8610_v37, %v7507_v55  ;;  %v3390_v23 = vrot.slane %v8610_v37, %v7505_v54  ;;  %v3409_v5 = vrot.slane %v8610_v37, %v7513_v59  ;;  %v3428_v43 = vrot.slane %v8610_v37, %v7511_v58 }
 0x52b   : >>> { %3301 = vbcast.lane.b32.xlu1 %v3295_v9, 264  ;;  %3297 = vbcast.lane.b32.xlu0 %v3295_v9, 256 }
 0x52f   : >>> { %3320 = vbcast.lane.b32.xlu1 %v3314_v57, 264  ;;  %3316 = vbcast.lane.b32.xlu0 %v3314_v57, 256 }
 0x533   : >>> { %3339 = vbcast.lane.b32.xlu1 %v3333_v13, 264  ;;  %3335 = vbcast.lane.b32.xlu0 %v3333_v13, 256 }
 0x537   : >>> { %3324 = vbcast.lane.b32.xlu1 %v3314_v57, 272  ;;  %3305 = vbcast.lane.b32.xlu0 %v3295_v9, 272 }
 0x53b   : >>> { %3358 = vbcast.lane.b32.xlu1 %v3352_v3, 264  ;;  %3354 = vbcast.lane.b32.xlu0 %v3352_v3, 256 }
 0x53f   : >>> { %3373 = vbcast.lane.b32.xlu1 %v3371_v44, 256  ;;  %3343 = vbcast.lane.b32.xlu0 %v3333_v13, 272 }
 0x543   : >>> { %3309 = vbcast.lane.b32.xlu1 %v3295_v9, 280  ;;  %3377 = vbcast.lane.b32.xlu0 %v3371_v44, 264 }
 0x547   : >>> { %3362 = vbcast.lane.b32.xlu1 %v3352_v3, 272  ;;  %3328 = vbcast.lane.b32.xlu0 %v3314_v57, 280 }
 0x54b   : >>> { %3396 = vbcast.lane.b32.xlu1 %v3390_v23, 264  ;;  %3392 = vbcast.lane.b32.xlu0 %v3390_v23, 256 }
 0x54f   : >>> { %3381 = vbcast.lane.b32.xlu1 %v3371_v44, 272  ;;  %3347 = vbcast.lane.b32.xlu0 %v3333_v13, 280 }
 0x553   : >>> { %3415 = vbcast.lane.b32.xlu1 %v3409_v5, 264  ;;  %3411 = vbcast.lane.b32.xlu0 %v3409_v5, 256 }
 0x557   : >>> { %3400 = vbcast.lane.b32.xlu1 %v3390_v23, 272  ;;  %3366 = vbcast.lane.b32.xlu0 %v3352_v3, 280 }
 0x55b   : >>> { %3434 = vbcast.lane.b32.xlu1 %v3428_v43, 264  ;;  %3430 = vbcast.lane.b32.xlu0 %v3428_v43, 256 }
 0x55f   : >>> { %3419 = vbcast.lane.b32.xlu1 %v3409_v5, 272  ;;  %3385 = vbcast.lane.b32.xlu0 %v3371_v44, 280 }
 0x563   : >>> { %3438 = vbcast.lane.b32.xlu1 %v3428_v43, 272  ;;  %3404 = vbcast.lane.b32.xlu0 %v3390_v23, 280 }
 0x567   : >>> { %3442 = vbcast.lane.b32.xlu1 %v3428_v43, 280  ;;  %3423 = vbcast.lane.b32.xlu0 %v3409_v5, 280 }
 0x59d   : >>> { %v3302_v42 = vpop.permute.xlu1 %3301  ;;  %v3298_v36 = vpop.permute.xlu0 %3297 }
 0x59e   : >>> { %v3445_v7 = vsub.f32 %v3302_v42, %v9879_v19  ;;  %v3444_v50 = vsub.f32 %v3298_v36, %v9902_v62 }
 0x5a0   : >>> { %v3477_v12 = vmul.f32 %v3445_v7, %v9903_v40  ;;  %v3476_v30 = vmul.f32 %v3444_v50, %v9904_v18 }
 0x5a1   : >>> { %v3321_v14 = vpop.permute.xlu1 %3320  ;;  %v3317_v6 = vpop.permute.xlu0 %3316 }
 0x5a2   : >>> { %v3449_v11 = vsub.f32 %v3321_v14, %v9879_v19  ;;  %v3448_v24 = vsub.f32 %v3317_v6, %v9902_v62  ;;  %v5916_v63 = vmul.f32 -1.442695, %v3477_v12  ;;  %v5915_v8 = vmul.f32 -1.442695, %v3476_v30 }
 0x5a4   : >>> { %v3481_v1 = vmul.f32 %v3449_v11, %v9903_v40  ;;  %v3480_v29 = vmul.f32 %v3448_v24, %v9904_v18  ;;  %6563 = vpow2.f32 %v5916_v63 }
 0x5a5   : >>> { %v3340_v15 = vpop.permute.xlu1 %3339  ;;  %v3336_v27 = vpop.permute.xlu0 %3335  ;;  %6565 = vpow2.f32 %v5915_v8 }
 0x5a6   : >>> { %v3453_v41 = vsub.f32 %v3340_v15, %v9879_v19  ;;  %v3452_v31 = vsub.f32 %v3336_v27, %v9902_v62  ;;  %v5920_v28 = vmul.f32 -1.442695, %v3481_v1  ;;  %v5919_v26 = vmul.f32 -1.442695, %v3480_v29 }
 0x5a8   : >>> { %v3485_v4 = vmul.f32 %v3453_v41, %v9903_v40  ;;  %v3484_v10 = vmul.f32 %v3452_v31, %v9904_v18  ;;  %6567 = vpow2.f32 %v5920_v28 }
 0x5a9   : >>> { %v3325_v0 = vpop.permute.xlu1 %3324  ;;  %v3306_v2 = vpop.permute.xlu0 %3305  ;;  %6569 = vpow2.f32 %v5919_v26 }
 0x5aa   : >>> { %v3450_v61 = vsub.f32 %v3325_v0, %v9883_v39  ;;  %v5924_v25 = vmul.f32 -1.442695, %v3485_v4  ;;  %v5923_v33 = vmul.f32 -1.442695, %v3484_v10  ;;  %v3446_v53 = vsub.f32 %v3306_v2, %v9883_v39 }
 0x5ac   : >>> { %v3482_v16 = vmul.f32 %v3450_v61, %v9884_v35  ;;  %6571 = vpow2.f32 %v5924_v25  ;;  %v3478_v23 = vmul.f32 %v3446_v53, %v9884_v35 }
 0x5ad   : >>> { %v3359_v22 = vpop.permute.xlu1 %3358  ;;  %v3355_v34 = vpop.permute.xlu0 %3354  ;;  %6573 = vpow2.f32 %v5923_v33 }
 0x5ae   : >>> { %v6564_v57 = vpop.eup %6563  ;;  %v3457_v13 = vsub.f32 %v3359_v22, %v9879_v19  ;;  %v5921_v44 = vmul.f32 -1.442695, %v3482_v16  ;;  %v3456_v43 = vsub.f32 %v3355_v34, %v9902_v62  ;;  %v5917_v6 = vmul.f32 -1.442695, %v3478_v23 }
 0x5af   : >>> { %v6566_v3 = vpop.eup %6565  ;;  %v3605_v5 = vadd.f32 1.0, %v6564_v57 }
 0x5b0   : >>> { %v3604_v42 = vadd.f32 1.0, %v6566_v3  ;;  %v3489_v36 = vmul.f32 %v3457_v13, %v9903_v40  ;;  %6575 = vpow2.f32 %v5921_v44  ;;  %v3488_v11 = vmul.f32 %v3456_v43, %v9904_v18 }
 0x5b1   : >>> { %v3374_v51 = vpop.permute.xlu1 %3373  ;;  %v3344_v9 = vpop.permute.xlu0 %3343  ;;  %6577 = vrcp.f32 %v3605_v5 }
 0x5b2   : >>> { %v3460_v7 = vsub.f32 %v3374_v51, %v9902_v62  ;;  %v6568_v14 = vpop.eup %6567  ;;  %6579 = vrcp.f32 %v3604_v42  ;;  %v5928_v24 = vmul.f32 -1.442695, %v3489_v36  ;;  %v3454_v8 = vsub.f32 %v3344_v9, %v9883_v39 }
 0x5b3   : >>> { %v6570_v30 = vpop.eup %6569  ;;  %v3609_v15 = vadd.f32 1.0, %v6568_v14  ;;  %6581 = vpow2.f32 %v5917_v6  ;;  %v5927_v41 = vmul.f32 -1.442695, %v3488_v11 }
 0x5b4   : >>> { %v3492_v27 = vmul.f32 %v3460_v7, %v9904_v18  ;;  %v3608_v1 = vadd.f32 1.0, %v6570_v30  ;;  %6583 = vpow2.f32 %v5928_v24  ;;  %v3486_v61 = vmul.f32 %v3454_v8, %v9884_v35  ;;  %v9905_v7 = vld [vmem:[#allocation33_spill] sm:$0xff] }
 0x5b5   : >>> { %v3310_v50 = vpop.permute.xlu1 %3309  ;;  %v3378_v12 = vpop.permute.xlu0 %3377  ;;  %6585 = vrcp.f32 %v3609_v15 }
 0x5b6   : >>> { %v3447_v63 = vsub.f32 %v3310_v50, %v9885_v17  ;;  %v6572_v29 = vpop.eup %6571  ;;  %v3461_v28 = vsub.f32 %v3378_v12, %v9879_v19  ;;  %v5931_v4 = vmul.f32 -1.442695, %v3492_v27  ;;  %6587 = vrcp.f32 %v3608_v1 }
 0x5b7   : >>> { %v6574_v0 = vpop.eup %6573  ;;  %v3613_v10 = vadd.f32 1.0, %v6572_v29  ;;  %6589 = vpow2.f32 %v5927_v41  ;;  %v5925_v51 = vmul.f32 -1.442695, %v3486_v61 }
 0x5b8   : >>> { %v3479_v2 = vmul.f32 %v3447_v63, %v9886_v56  ;;  %v3612_v25 = vadd.f32 1.0, %v6574_v0  ;;  %v3493_v33 = vmul.f32 %v3461_v28, %v9903_v40  ;;  %6591 = vpow2.f32 %v5931_v4 }
 0x5b9   : >>> { %v3329_v31 = vpop.permute.xlu0 %3328  ;;  %v3363_v26 = vpop.permute.xlu1 %3362  ;;  %6593 = vrcp.f32 %v3613_v10 }
 0x5ba   : >>> { %v3451_v22 = vsub.f32 %v3329_v31, %v9885_v17  ;;  %v6576_v34 = vpop.eup %6575  ;;  %v5918_v16 = vmul.f32 -1.442695, %v3479_v2  ;;  %6595 = vrcp.f32 %v3612_v25  ;;  %v5932_v5 = vmul.f32 -1.442695, %v3493_v33 }
 0x5bb   : >>> { %v6578_v53 = vpop.eup %6577  ;;  %v3610_v13 = vadd.f32 1.0, %v6576_v34  ;;  %v3458_v43 = vsub.f32 %v3363_v26, %v9883_v39 }
 0x5bc   : >>> { %v6580_v57 = vpop.eup %6579  ;;  %v3483_v3 = vmul.f32 %v3451_v22, %v9886_v56  ;;  %6597 = vpow2.f32 %v5918_v16  ;;  %v3703_v42 = vmul.f32 %v6578_v53, %v9870_v38  ;;  %v3856_v36 = vmul.f32 %v6578_v53, %v9871_v21 }
 0x5bd   : >>> { %v8657_v9 = vpop.permute.xlu0 %3392  ;;  %v8660_v44 = vpop.permute.xlu1 %3396  ;;  %v3702_v50 = vmul.f32 %v6580_v57, %v9905_v7  ;;  %6599 = vpow2.f32 %v5925_v51  ;;  %v3855_v14 = vmul.f32 %v6580_v57, %v9869_v47  ;;  %v3490_v41 = vmul.f32 %v3458_v43, %v9884_v35 }
 0x5be   : >>> { %v6582_v23 = vpop.eup %6581  ;;  %6601 = vrcp.f32 %v3610_v13  ;;  %v5922_v6 = vmul.f32 -1.442695, %v3483_v3  ;;  %v3735_v8 = vsel %vm916_vm2, %v3703_v42, 0.0  ;;  %v3888_v1 = vsel %vm916_vm2, %v3856_v36, 0.0 }
 0x5bf   : >>> { %v6584_v12 = vpop.eup %6583  ;;  %v3606_v11 = vadd.f32 1.0, %v6582_v23  ;;  %6603 = vpow2.f32 %v5932_v5  ;;  %v3734_v29 = vsel %vm916_vm2, %v3702_v50, 0.0  ;;  %v3887_v31 = vsel %vm916_vm2, %v3855_v14, 0.0 }
 0x5c0   : >>> { %v6586_v30 = vpop.eup %6585  ;;  %6605 = vpow2.f32 %v5922_v6  ;;  %v3617_v61 = vadd.f32 1.0, %v6584_v12  ;;  %v8678_v25 = vadd.f32 %v3735_v8, %v3734_v29  ;;  %v8680_v16 = vadd.f32 %v3888_v1, %v3887_v31  ;;  %v9906_v31 = vld [vmem:[#allocation35_spill] sm:$0xff] }
 0x5c1   : >>> { %v3348_v24 = vpop.permute.xlu0 %3347  ;;  %v6588_v63 = vpop.eup %6587  ;;  %v3707_v0 = vmul.f32 %v6586_v30, %v9870_v38  ;;  %v3860_v26 = vmul.f32 %v6586_v30, %v9871_v21  ;;  %6607 = vrcp.f32 %v3606_v11  ;;  %v5929_v33 = vmul.f32 -1.442695, %v3490_v41 }
 0x5c2   : >>> { %v8667_v15 = vpop.permute.xlu1 %3381  ;;  %v6590_v27 = vpop.eup %6589  ;;  %v3455_v2 = vsub.f32 %v3348_v24, %v9885_v17  ;;  %v3706_v4 = vmul.f32 %v6588_v63, %v9905_v7  ;;  %v3859_v57 = vmul.f32 %v6588_v63, %v9869_v47  ;;  %v3465_v13 = vsub.f32 %v8660_v44, %v9879_v19 }
 0x5c3   : >>> { %v6592_v28 = vpop.eup %6591  ;;  %v3616_v22 = vadd.f32 1.0, %v6590_v27  ;;  %v3748_v51 = vsel %vm916_vm2, %v3707_v0, 0.0  ;;  %v3901_v43 = vsel %vm916_vm2, %v3860_v26, 0.0  ;;  %6609 = vrcp.f32 %v3617_v61 }
 0x5c4   : >>> { %v6594_v10 = vpop.eup %6593  ;;  %v3487_v3 = vmul.f32 %v3455_v2, %v9886_v56  ;;  %v3747_v42 = vsel %vm916_vm2, %v3706_v4, 0.0  ;;  %v3620_v6 = vadd.f32 1.0, %v6592_v28  ;;  %v3464_v44 = vsub.f32 %v8657_v9, %v9902_v62 }
 0x5c5   : >>> { %v6596_v34 = vpop.eup %6595  ;;  %v3711_v36 = vmul.f32 %v6594_v10, %v9870_v38  ;;  %v3412_v50 = vpop.permute.xlu0 %3411  ;;  %v3864_v14 = vmul.f32 %v6594_v10, %v9871_v21  ;;  %6611 = vrcp.f32 %v3616_v22  ;;  %v3900_v27 = vsel %vm916_vm2, %v3859_v57, 0.0  ;;  %v9907_v57 = vld [vmem:[#allocation31_spill] sm:$0xff] }
 0x5c6   : >>> { %v6598_v53 = vpop.eup %6597  ;;  %v3416_v23 = vpop.permute.xlu1 %3415  ;;  %v3710_v30 = vmul.f32 %v6596_v34, %v9905_v7  ;;  %v3863_v11 = vmul.f32 %v6596_v34, %v9869_v47  ;;  %6613 = vpow2.f32 %v5929_v33  ;;  %v3497_v8 = vmul.f32 %v3465_v13, %v9903_v40 }
 0x5c7   : >>> { %v6600_v5 = vpop.eup %6599  ;;  %v3607_v24 = vadd.f32 1.0, %v6598_v53  ;;  %v3462_v1 = vsub.f32 %v8667_v15, %v9883_v39  ;;  %v5926_v29 = vmul.f32 -1.442695, %v3487_v3  ;;  %v3761_v41 = vsel %vm916_vm2, %v3711_v36, 0.0 }
 0x5c8   : >>> { %v6602_v12 = vpop.eup %6601  ;;  %v3614_v9 = vadd.f32 1.0, %v6600_v5  ;;  %v3469_v2 = vsub.f32 %v3416_v23, %v9879_v19  ;;  %v3914_v26 = vsel %vm916_vm2, %v3864_v14, 0.0  ;;  %6615 = vrcp.f32 %v3620_v6 }
 0x5c9   : >>> { %v6604_v63 = vpop.eup %6603  ;;  %v3708_v0 = vmul.f32 %v6602_v12, %v9906_v31  ;;  %v3496_v4 = vmul.f32 %v3464_v44, %v9904_v18  ;;  %v3468_v61 = vsub.f32 %v3412_v50, %v9902_v62  ;;  %v3760_v15 = vsel %vm916_vm2, %v3710_v30, 0.0  ;;  %v3367_v53 = vpop.permute.xlu0 %3366 }
 0x5ca   : >>> { %v6606_v28 = vpop.eup %6605  ;;  %v3401_v10 = vpop.permute.xlu1 %3400  ;;  %v3913_v34 = vsel %vm916_vm2, %v3863_v11, 0.0  ;;  %6617 = vrcp.f32 %v3607_v24  ;;  %v3621_v33 = vadd.f32 1.0, %v6604_v63  ;;  %v3861_v13 = vmul.f32 %v6602_v12, %v9907_v57 }
 0x5cb   : >>> { %v6608_v22 = vpop.eup %6607  ;;  %v5936_v3 = vmul.f32 -1.442695, %v3497_v8  ;;  %v3494_v23 = vmul.f32 %v3462_v1, %v9884_v35  ;;  %6619 = vpow2.f32 %v5926_v29  ;;  %v3750_v5 = vsel %vm916_vm2, %v3708_v0, 0.0 }
 0x5cc   : >>> { %6621 = vrcp.f32 %v3614_v9  ;;  %v3611_v36 = vadd.f32 1.0, %v6606_v28  ;;  %v3501_v50 = vmul.f32 %v3469_v2, %v9903_v40  ;;  %v3704_v14 = vmul.f32 %v6608_v22, %v9906_v31 }
 0x5cd   : >>> { %v5935_v6 = vmul.f32 -1.442695, %v3496_v4  ;;  %v3500_v44 = vmul.f32 %v3468_v61, %v9904_v18  ;;  %v3466_v30 = vsub.f32 %v3401_v10, %v9883_v39  ;;  %v6610_v11 = vpop.eup %6609  ;;  %v3749_v24 = vadd.f32 %v3748_v51, %v3747_v42  ;;  %v3431_v51 = vpop.permute.xlu0 %3430 }
 0x5ce   : >>> { %v3902_v12 = vadd.f32 %v3901_v43, %v3900_v27  ;;  %v8714_v63 = vadd.f32 %v3761_v41, %v3760_v15  ;;  %6623 = vrcp.f32 %v3621_v33  ;;  %v8716_v1 = vadd.f32 %v3914_v26, %v3913_v34  ;;  %v3435_v9 = vpop.permute.xlu1 %3434 }
 0x5cf   : >>> { %v6612_v8 = vpop.eup %6611  ;;  %v3857_v29 = vmul.f32 %v6608_v22, %v9907_v57  ;;  %6625 = vpow2.f32 %v5936_v3  ;;  %v5933_v0 = vmul.f32 -1.442695, %v3494_v23  ;;  %v8719_v28 = vadd.f32 %v3750_v5, %v3749_v24 }
 0x5d0   : >>> { %v6614_v2 = vpop.eup %6613  ;;  %v3903_v4 = vsel %vm916_vm2, %v3861_v13, 0.0  ;;  %6627 = vrcp.f32 %v3611_v36  ;;  %v5940_v61 = vmul.f32 -1.442695, %v3501_v50  ;;  %v3737_v43 = vsel %vm916_vm2, %v3704_v14, 0.0 }
 0x5d1   : >>> { %6629 = vpow2.f32 %v5935_v6  ;;  %v5939_v42 = vmul.f32 -1.442695, %v3500_v44  ;;  %v3498_v27 = vmul.f32 %v3466_v30, %v9884_v35  ;;  %v3715_v41 = vmul.f32 %v6610_v11, %v9870_v38 }
 0x5d2   : >>> { %v3868_v26 = vmul.f32 %v6610_v11, %v9871_v21  ;;  %v3714_v10 = vmul.f32 %v6612_v8, %v9905_v7  ;;  %v3459_v22 = vsub.f32 %v3367_v53, %v9885_v17  ;;  %v6616_v15 = vpop.eup %6615  ;;  %v8728_v34 = vadd.f32 %v3903_v4, %v3902_v12  ;;  %v3420_v44 = vpop.permute.xlu1 %3419 }
 0x5d3   : >>> { %v3890_v33 = vsel %vm916_vm2, %v3857_v29, 0.0  ;;  %v3618_v13 = vadd.f32 1.0, %v6614_v2  ;;  %6631 = vpow2.f32 %v5933_v0  ;;  %v8732_v23 = vadd.f32 %v3737_v43, %v8678_v25 }
 0x5d4   : >>> { %v6618_v3 = vpop.eup %6617  ;;  %v3867_v5 = vmul.f32 %v6612_v8, %v9869_v47  ;;  %6633 = vpow2.f32 %v5940_v61  ;;  %v5937_v36 = vmul.f32 -1.442695, %v3498_v27  ;;  %v3491_v14 = vmul.f32 %v3459_v22, %v9886_v56  ;;  %v3386_v8 = vpop.permute.xlu0 %3385 }
 0x5d5   : >>> { %v6620_v50 = vpop.eup %6619  ;;  %6635 = vpow2.f32 %v5939_v42  ;;  %v3473_v53 = vsub.f32 %v3435_v9, %v9879_v19  ;;  %v3472_v6 = vsub.f32 %v3431_v51, %v9902_v62  ;;  %v3891_v11 = vadd.f32 %v3890_v33, %v8680_v16  ;;  %v9908_v33 = vld [vmem:[#allocation36_spill] sm:$0xff] }
 0x5d6   : >>> { %v6622_v30 = vpop.eup %6621  ;;  %v3774_v24 = vsel %vm916_vm2, %v3715_v41, 0.0  ;;  %v3927_v25 = vsel %vm916_vm2, %v3868_v26, 0.0  ;;  %v3773_v12 = vsel %vm916_vm2, %v3714_v10, 0.0  ;;  %v3858_v29 = vmul.f32 %v6618_v3, %v9874_v32 }
 0x5d7   : >>> { %v3615_v0 = vadd.f32 1.0, %v6620_v50  ;;  %v5930_v2 = vmul.f32 -1.442695, %v3491_v14  ;;  %v3505_v4 = vmul.f32 %v3473_v53, %v9903_v40  ;;  %v3926_v61 = vsel %vm916_vm2, %v3867_v5, 0.0 }
 0x5d8   : >>> { %v6624_v9 = vpop.eup %6623  ;;  %v3718_v51 = vmul.f32 %v6616_v15, %v9905_v7  ;;  %v3871_v16 = vmul.f32 %v6616_v15, %v9869_v47  ;;  %6637 = vrcp.f32 %v3618_v13  ;;  %v3865_v42 = vmul.f32 %v6622_v30, %v9907_v57 }
 0x5d9   : >>> { %v6626_v43 = vpop.eup %6625  ;;  %6639 = vpow2.f32 %v5937_v36  ;;  %v3504_v27 = vmul.f32 %v3472_v6, %v9904_v18  ;;  %v3470_v41 = vsub.f32 %v3420_v44, %v9883_v39  ;;  %v8750_v10 = vadd.f32 %v3774_v24, %v3773_v12  ;;  %v3439_v36 = vpop.permute.xlu1 %3438 }
 0x5da   : >>> { %v6628_v26 = vpop.eup %6627  ;;  %v3712_v22 = vmul.f32 %v6622_v30, %v9906_v31  ;;  %v3705_v5 = vmul.f32 %v6618_v3, %v9908_v33  ;;  %6641 = vrcp.f32 %v3615_v0  ;;  %v3892_v15 = vsel %vm916_vm2, %v3858_v29, 0.0  ;;  %v3405_v24 = vpop.permute.xlu0 %3404 }
 0x5db   : >>> { %v6630_v50 = vpop.eup %6629  ;;  %6643 = vpow2.f32 %v5930_v2  ;;  %v5944_v13 = vmul.f32 -1.442695, %v3505_v4  ;;  %v3502_v14 = vmul.f32 %v3470_v41, %v9884_v35  ;;  %v8756_v53 = vadd.f32 %v3927_v25, %v3926_v61 }
 0x5dc   : >>> { %v8759_v6 = vsel %vm916_vm2, %v3718_v51, 0.0  ;;  %v8762_v44 = vsel %vm916_vm2, %v3871_v16, 0.0  ;;  %v3625_v30 = vadd.f32 1.0, %v6626_v43  ;;  %v3916_v12 = vsel %vm916_vm2, %v3865_v42, 0.0 }
 0x5dd   : >>> { %v6632_v3 = vpop.eup %6631  ;;  %v3862_v29 = vmul.f32 %v6628_v26, %v9874_v32  ;;  %v5943_v0 = vmul.f32 -1.442695, %v3504_v27  ;;  %v3463_v2 = vsub.f32 %v3386_v8, %v9885_v17  ;;  %v8768_v25 = vsel %vm916_vm2, %v3712_v22, 0.0 }
 0x5de   : >>> { %v6634_v4 = vpop.eup %6633  ;;  %v3893_v61 = vadd.f32 %v3892_v15, %v3891_v11  ;;  %v3719_v51 = vmul.f32 %v6624_v9, %v9870_v38  ;;  %v3624_v41 = vadd.f32 1.0, %v6630_v50  ;;  %v3739_v43 = vsel %vm916_vm2, %v3705_v5, 0.0  ;;  %v3443_v15 = vpop.permute.xlu1 %3442 }
 0x5df   : >>> { %v6636_v16 = vpop.eup %6635  ;;  %v3872_v18 = vmul.f32 %v6624_v9, %v9871_v21  ;;  %6645 = vpow2.f32 %v5944_v13  ;;  %v5941_v42 = vmul.f32 -1.442695, %v3502_v14  ;;  %v8774_v40 = vadd.f32 %v3916_v12, %v8716_v1  ;;  %v3424_v14 = vpop.permute.xlu0 %3423 }
 0x5e0   : >>> { %v3709_v8 = vmul.f32 %v6628_v26, %v9908_v33  ;;  %6647 = vrcp.f32 %v3625_v30  ;;  %v3622_v27 = vadd.f32 1.0, %v6632_v3  ;;  %v3905_v22 = vsel %vm916_vm2, %v3862_v29, 0.0 }
 0x5e1   : >>> { %v3629_v11 = vadd.f32 1.0, %v6634_v4  ;;  %6649 = vpow2.f32 %v5943_v0  ;;  %v3495_v50 = vmul.f32 %v3463_v2, %v9886_v56  ;;  %v3740_v5 = vadd.f32 %v3739_v43, %v8732_v23 }
 0x5e2   : >>> { %v6638_v62 = vpop.eup %6637  ;;  %v3894_v9 = vrot.slane %v3893_v61, 4  ;;  %6651 = vrcp.f32 %v3624_v41  ;;  %v3628_v13 = vadd.f32 1.0, %v6636_v16  ;;  %v3474_v26 = vsub.f32 %v3439_v36, %v9883_v39 }
 0x5e3   : >>> { %v6640_v1 = vpop.eup %6639  ;;  %6653 = vpow2.f32 %v5941_v42  ;;  %v5934_v12 = vmul.f32 -1.442695, %v3495_v50  ;;  %v3467_v30 = vsub.f32 %v3405_v24, %v9885_v17  ;;  %v3752_v29 = vsel %vm916_vm2, %v3709_v8, 0.0 }
 0x5e4   : >>> { %v8782_v3 = vpop.eup %6641  ;;  %v3906_v0 = vadd.f32 %v3905_v22, %v8728_v34  ;;  %6655 = vrcp.f32 %v3622_v27  ;;  %v3475_v23 = vsub.f32 %v3443_v15, %v9885_v17  ;;  %v3506_v4 = vmul.f32 %v3474_v26, %v9884_v35 }
 0x5e5   : >>> { %v6644_v2 = vpop.eup %6643  ;;  %6657 = vrcp.f32 %v3629_v11  ;;  %v3499_v41 = vmul.f32 %v3467_v30, %v9886_v56  ;;  %v3471_v16 = vsub.f32 %v3424_v14, %v9885_v17  ;;  %v3895_v36 = vadd.f32 %v3894_v9, %v3893_v61 }
 0x5e6   : >>> { %6659 = vrcp.f32 %v3628_v13  ;;  %v3626_v24 = vadd.f32 1.0, %v6640_v1  ;;  %v3619_v43 = vadd.f32 1.0, %v6644_v2  ;;  %v3753_v42 = vadd.f32 %v3752_v29, %v8719_v28 }
 0x5e7   : >>> { %6661 = vpow2.f32 %v5934_v12  ;;  %v5945_v8 = vmul.f32 -1.442695, %v3506_v4  ;;  %v5938_v34 = vmul.f32 -1.442695, %v3499_v41  ;;  %v3866_v27 = vmul.f32 %v8782_v3, %v9874_v32 }
 0x5e8   : >>> { %6663 = vrcp.f32 %v3619_v43  ;;  %v3507_v22 = vmul.f32 %v3475_v23, %v9886_v56  ;;  %v3503_v11 = vmul.f32 %v3471_v16, %v9886_v56  ;;  %v3741_v15 = vrot.slane %v3740_v5, 4 }
 0x5e9   : >>> { %v6646_v50 = vpop.eup %6645  ;;  %v3716_v61 = vmul.f32 %v6638_v62, %v9906_v31  ;;  %v3907_v9 = vrot.slane %v3906_v0, 4  ;;  %6665 = vpow2.f32 %v5945_v8  ;;  %v3896_v14 = vrot.slane %v3895_v36, 2 }
 0x5ea   : >>> { %v6648_v13 = vpop.eup %6647  ;;  %6667 = vrcp.f32 %v3626_v24  ;;  %v5946_v28 = vmul.f32 -1.442695, %v3507_v22  ;;  %v5942_v1 = vmul.f32 -1.442695, %v3503_v11  ;;  %v3787_v26 = vsel %vm916_vm2, %v3719_v51, 0.0 }
 0x5eb   : >>> { %v6650_v12 = vpop.eup %6649  ;;  %v3940_v30 = vsel %vm916_vm2, %v3872_v18, 0.0  ;;  %v3869_v29 = vmul.f32 %v6638_v62, %v9907_v57  ;;  %6669 = vpow2.f32 %v5938_v34  ;;  %v3754_v2 = vrot.slane %v3753_v42, 4 }
 0x5ec   : >>> { %v6652_v23 = vpop.eup %6651  ;;  %v3918_v4 = vsel %vm916_vm2, %v3866_v27, 0.0  ;;  %v3633_v41 = vadd.f32 1.0, %v6646_v50  ;;  %6671 = vpow2.f32 %v5946_v28  ;;  %v8800_v43 = vadd.f32 %v3741_v15, %v3740_v5 }
 0x5ed   : >>> { %v6654_v16 = vpop.eup %6653  ;;  %v3908_v24 = vadd.f32 %v3907_v9, %v3906_v0  ;;  %v3632_v8 = vadd.f32 1.0, %v6650_v12  ;;  %6673 = vpow2.f32 %v5942_v1  ;;  %v8804_v51 = vadd.f32 %v8768_v25, %v8714_v63 }
 0x5ee   : >>> { %v6656_v22 = vpop.eup %6655  ;;  %v8806_v18 = vadd.f32 %v3896_v14, %v3895_v36  ;;  %v8809_v62 = vadd.f32 %v3787_v26, %v8759_v6  ;;  %v3776_v34 = vsel %vm916_vm2, %v3716_v61, 0.0  ;;  %v3929_v11 = vsel %vm916_vm2, %v3869_v29, 0.0 }
 0x5ef   : >>> { %v6658_v27 = vpop.eup %6657  ;;  %v3723_v5 = vmul.f32 %v6648_v13, %v9870_v38  ;;  %v3722_v0 = vmul.f32 %v6652_v23, %v9905_v7  ;;  %v3919_v50 = vadd.f32 %v3918_v4, %v8774_v40  ;;  %v8817_v63 = vadd.f32 %v3940_v30, %v8762_v44 }
 0x5f0   : >>> { %v6660_v15 = vpop.eup %6659  ;;  %v8819_v25 = vadd.f32 %v3754_v2, %v3753_v42  ;;  %6675 = vrcp.f32 %v3633_v41  ;;  %v3630_v6 = vadd.f32 1.0, %v6654_v16  ;;  %v3909_v9 = vrot.slane %v3908_v24, 2 }
 0x5f1   : >>> { %v6662_v36 = vpop.eup %6661  ;;  %v3876_v14 = vmul.f32 %v6648_v13, %v9871_v21  ;;  %6677 = vrcp.f32 %v3632_v8  ;;  %v8825_v40 = vadd.f32 %v3776_v34, %v8750_v10  ;;  %v3930_v44 = vadd.f32 %v3929_v11, %v8756_v53 }
 0x5f2   : >>> { %v6664_v28 = vpop.eup %6663  ;;  %v3875_v42 = vmul.f32 %v6652_v23, %v9869_v47  ;;  %v3800_v26 = vsel %vm916_vm2, %v3723_v5, 0.0  ;;  %v3799_v30 = vsel %vm916_vm2, %v3722_v0, 0.0  ;;  %v3713_v29 = vmul.f32 %v8782_v3, %v9908_v33 }
 0x5f3   : >>> { %v6666_v12 = vpop.eup %6665  ;;  %v3920_v13 = vrot.slane %v3919_v50, 4  ;;  %v3870_v41 = vmul.f32 %v6664_v28, %v9874_v32  ;;  %6679 = vrcp.f32 %v3630_v6  ;;  %v3623_v10 = vadd.f32 1.0, %v6662_v36 }
 0x5f4   : >>> { %v6668_v2 = vpop.eup %6667  ;;  %v8835_v53 = vadd.f32 %v3909_v9, %v3908_v24  ;;  %v3953_v23 = vsel %vm916_vm2, %v3876_v14, 0.0  ;;  %v3720_v8 = vmul.f32 %v6656_v22, %v9906_v31  ;;  %v3873_v34 = vmul.f32 %v6656_v22, %v9907_v57 }
 0x5f5   : >>> { %v6670_v16 = vpop.eup %6669  ;;  %v3801_v5 = vadd.f32 %v3800_v26, %v3799_v30  ;;  %v3952_v3 = vsel %vm916_vm2, %v3875_v42, 0.0  ;;  %6681 = vrcp.f32 %v3623_v10  ;;  %v3634_v0 = vadd.f32 1.0, %v6666_v12 }
 0x5f6   : >>> { %v6672_v11 = vpop.eup %6671  ;;  %v3765_v4 = vsel %vm916_vm2, %v3713_v29, 0.0  ;;  %v3921_v6 = vadd.f32 %v3920_v13, %v3919_v50  ;;  %v3727_v36 = vmul.f32 %v6658_v27, %v9870_v38  ;;  %v3931_v24 = vsel %vm916_vm2, %v3870_v41, 0.0 }
 0x5f7   : >>> { %v6674_v61 = vpop.eup %6673  ;;  %v3880_v9 = vmul.f32 %v6658_v27, %v9871_v21  ;;  %6683 = vrcp.f32 %v3634_v0  ;;  %v3627_v14 = vadd.f32 1.0, %v6670_v16  ;;  %v3635_v1 = vadd.f32 1.0, %v6672_v11 }
 0x5f8   : >>> { %v3726_v22 = vmul.f32 %v6660_v15, %v9905_v7  ;;  %v3879_v26 = vmul.f32 %v6660_v15, %v9869_v47  ;;  %v3724_v42 = vmul.f32 %v6668_v2, %v9906_v31  ;;  %v3631_v12 = vadd.f32 1.0, %v6674_v61 }
 0x5f9   : >>> { %v3954_v10 = vadd.f32 %v3953_v23, %v3952_v3  ;;  %v3717_v50 = vmul.f32 %v6664_v28, %v9908_v33  ;;  %v3932_v29 = vadd.f32 %v3931_v24, %v3930_v44  ;;  %6685 = vrcp.f32 %v3627_v14 }
 0x5fa   : >>> { %v6676_v30 = vpop.eup %6675  ;;  %v3789_v41 = vsel %vm916_vm2, %v3720_v8, 0.0  ;;  %v3942_v27 = vsel %vm916_vm2, %v3873_v34, 0.0  ;;  %v8852_v16 = vadd.f32 %v3765_v4, %v8804_v51  ;;  %v3922_v11 = vrot.slane %v3921_v6, 2 }
 0x5fb   : >>> { %v6678_v13 = vpop.eup %6677  ;;  %v3813_v15 = vsel %vm916_vm2, %v3727_v36, 0.0  ;;  %v3966_v0 = vsel %vm916_vm2, %v3880_v9, 0.0  ;;  %v3877_v61 = vmul.f32 %v6668_v2, %v9907_v57  ;;  %6687 = vrcp.f32 %v3635_v1 }
 0x5fc   : >>> { %v3812_v28 = vsel %vm916_vm2, %v3726_v22, 0.0  ;;  %v3965_v44 = vsel %vm916_vm2, %v3879_v26, 0.0  ;;  %v3802_v23 = vsel %vm916_vm2, %v3724_v42, 0.0  ;;  %6689 = vrcp.f32 %v3631_v12 }
 0x5fd   : >>> { %v6680_v8 = vpop.eup %6679  ;;  %v3778_v34 = vsel %vm916_vm2, %v3717_v50, 0.0  ;;  %v3933_v51 = vrot.slane %v3932_v29, 4  ;;  %v3731_v4 = vmul.f32 %v6676_v30, %v9870_v38  ;;  %v3730_v3 = vmul.f32 %v6678_v13, %v9905_v7 }
 0x5fe   : >>> { %v3790_v36 = vadd.f32 %v3789_v41, %v8809_v62  ;;  %v3943_v2 = vadd.f32 %v3942_v27, %v8817_v63  ;;  %v3884_v1 = vmul.f32 %v6676_v30, %v9871_v21  ;;  %v3883_v24 = vmul.f32 %v6678_v13, %v9869_v47 }
 0x5ff   : >>> { %v6682_v9 = vpop.eup %6681  ;;  %v8868_v22 = vadd.f32 %v3922_v11, %v3921_v6  ;;  %v3814_v26 = vadd.f32 %v3813_v15, %v3812_v28  ;;  %v3728_v42 = vmul.f32 %v6680_v8, %v9906_v31  ;;  %v3967_v12 = vadd.f32 %v3966_v0, %v3965_v44 }
 0x600   : >>> { %v3803_v50 = vadd.f32 %v3802_v23, %v3801_v5  ;;  %v3955_v7 = vsel %vm916_vm2, %v3877_v61, 0.0  ;;  %v8873_v62 = vadd.f32 %v3778_v34, %v8825_v40  ;;  %v3934_v41 = vadd.f32 %v3933_v51, %v3932_v29 }
 0x601   : >>> { %v6684_v63 = vpop.eup %6683  ;;  %v3826_v30 = vsel %vm916_vm2, %v3731_v4, 0.0  ;;  %v3825_v13 = vsel %vm916_vm2, %v3730_v3, 0.0  ;;  %v3874_v27 = vmul.f32 %v6682_v9, %v9874_v32  ;;  %v3979_v6 = vsel %vm916_vm2, %v3884_v1, 0.0 }
 0x602   : >>> { %v3978_v11 = vsel %vm916_vm2, %v3883_v24, 0.0  ;;  %v3881_v15 = vmul.f32 %v6680_v8, %v9907_v57  ;;  %v3885_v5 = vmul.f32 %v6684_v63, %v9907_v57  ;;  %v3815_v40 = vsel %vm916_vm2, %v3728_v42, 0.0 }
 0x603   : >>> { %v6686_v0 = vpop.eup %6685  ;;  %v3721_v61 = vmul.f32 %v6682_v9, %v9908_v33  ;;  %v3944_v29 = vsel %vm916_vm2, %v3874_v27, 0.0  ;;  %v3732_v28 = vmul.f32 %v6684_v63, %v9906_v31  ;;  %v3956_v44 = vadd.f32 %v3955_v7, %v3954_v10 }
 0x604   : >>> { %v3780_v23 = vrot.slane %v8873_v62, 4  ;;  %v3827_v34 = vadd.f32 %v3826_v30, %v3825_v13  ;;  %v3945_v51 = vadd.f32 %v3944_v29, %v3943_v2  ;;  %v3935_v3 = vrot.slane %v3934_v41, 2 }
 0x605   : >>> { %v6688_v4 = vpop.eup %6687  ;;  %v3980_v1 = vadd.f32 %v3979_v6, %v3978_v11  ;;  %v3725_v8 = vmul.f32 %v6686_v0, %v9908_v33  ;;  %v3878_v24 = vmul.f32 %v6686_v0, %v9874_v32  ;;  %v3816_v42 = vadd.f32 %v3815_v40, %v3814_v26 }
 0x606   : >>> { %v6690_v14 = vpop.eup %6689  ;;  %v3968_v9 = vsel %vm916_vm2, %v3881_v15, 0.0  ;;  %v3946_v57 = vrot.slane %v3945_v51, 4  ;;  %v3981_v27 = vsel %vm916_vm2, %v3885_v5, 0.0  ;;  %v3791_v7 = vsel %vm916_vm2, %v3721_v61, 0.0 }
 0x607   : >>> { %v3828_v10 = vsel %vm916_vm2, %v3732_v28, 0.0  ;;  %v3957_v2 = vsel %vm916_vm2, %v3878_v24, 0.0  ;;  %v3886_v63 = vmul.f32 %v6688_v4, %v9874_v32  ;;  %v3804_v13 = vsel %vm916_vm2, %v3725_v8, 0.0 }
 0x608   : >>> { %v3947_v30 = vadd.f32 %v3946_v57, %v3945_v51  ;;  %v3958_v6 = vadd.f32 %v3957_v2, %v3956_v44  ;;  %v3733_v11 = vmul.f32 %v6688_v4, %v9908_v33  ;;  %v3982_v26 = vadd.f32 %v3981_v27, %v3980_v1 }
 0x609   : >>> { %v3983_v15 = vsel %vm916_vm2, %v3886_v63, 0.0  ;;  %v3729_v0 = vmul.f32 %v6690_v14, %v9908_v33  ;;  %v3882_v5 = vmul.f32 %v6690_v14, %v9874_v32  ;;  %v3969_v40 = vadd.f32 %v3968_v9, %v3967_v12 }
 0x60a   : >>> { %v3792_v61 = vadd.f32 %v3791_v7, %v3790_v36  ;;  %v3948_v29 = vrot.slane %v3947_v30, 2  ;;  %v3959_v28 = vrot.slane %v3958_v6, 4  ;;  %v3805_v24 = vadd.f32 %v3804_v13, %v3803_v50 }
 0x60b   : >>> { %v3984_v31 = vadd.f32 %v3983_v15, %v3982_v26  ;;  %v3817_v57 = vsel %vm916_vm2, %v3729_v0, 0.0  ;;  %v3970_v51 = vsel %vm916_vm2, %v3882_v5, 0.0  ;;  %v3936_v44 = vadd.f32 %v3935_v3, %v3934_v41 }
 0x60c   : >>> { %v3829_v8 = vadd.f32 %v3828_v10, %v3827_v34  ;;  %v3960_v4 = vadd.f32 %v3959_v28, %v3958_v6  ;;  %v3830_v1 = vsel %vm916_vm2, %v3733_v11, 0.0  ;;  %v3949_v27 = vadd.f32 %v3948_v29, %v3947_v30 }
 0x60d   : >>> { %v3985_v2 = vrot.slane %v3984_v31, 4  ;;  %v3818_v63 = vadd.f32 %v3817_v57, %v3816_v42  ;;  %v3971_v33 = vadd.f32 %v3970_v51, %v3969_v40  ;;  %v3911_v14 = vrot.slane %v8835_v53, 1 }
 0x60e   : >>> { %v3924_v36 = vrot.slane %v8868_v22, 1  ;;  %v3793_v12 = vrot.slane %v3792_v61, 4  ;;  %v3961_v50 = vrot.slane %v3960_v4, 2  ;;  %v3806_v9 = vrot.slane %v3805_v24, 4 }
 0x60f   : >>> { %v3831_v7 = vadd.f32 %v3830_v1, %v3829_v8  ;;  %v3986_v13 = vadd.f32 %v3985_v2, %v3984_v31  ;;  %v3972_v26 = vrot.slane %v3971_v33, 4  ;;  %v9909_v41 = vrot.slane %v8852_v16, 4 }
 0x610   : >>> { %v3937_v3 = vrot.slane %v3936_v44, 1  ;;  %v3962_v10 = vadd.f32 %v3961_v50, %v3960_v4  ;;  %v3819_v30 = vrot.slane %v3818_v63, 4  ;;  %v3781_v42 = vadd.f32 %v3780_v23, %v8873_v62 }
 0x611   : >>> { %v3768_v34 = vadd.f32 %v9909_v41, %v8852_v16  ;;  %v3950_v6 = vrot.slane %v3949_v27, 1  ;;  %v3987_v11 = vrot.slane %v3986_v13, 2  ;;  %v3973_v15 = vadd.f32 %v3972_v26, %v3971_v33 }
 0x612   : >>> { %v3912_v0 = vadd.f32 %v3911_v14, %v8835_v53  ;;  %v3925_v5 = vadd.f32 %v3924_v36, %v8868_v22  ;;  %v3794_v40 = vadd.f32 %v3793_v12, %v3792_v61  ;;  %v3963_v29 = vrot.slane %v3962_v10, 1 }
 0x613   : >>> { %v3807_v31 = vadd.f32 %v3806_v9, %v3805_v24  ;;  %v3832_v28 = vrot.slane %v3831_v7, 4  ;;  %v3988_v57 = vadd.f32 %v3987_v11, %v3986_v13  ;;  %v3974_v51 = vrot.slane %v3973_v15, 2 }
 0x614   : >>> { %v9910_v16 = vrot.slane %v8806_v18, 1  ;;  %v3769_v4 = vrot.slane %v3768_v34, 2  ;;  %v3938_v1 = vadd.f32 %v3937_v3, %v3936_v44  ;;  %v3820_v62 = vadd.f32 %v3819_v30, %v3818_v63 }
 0x615   : >>> { %v3782_v23 = vrot.slane %v3781_v42, 2  ;;  %v3951_v2 = vadd.f32 %v3950_v6, %v3949_v27  ;;  %v3989_v33 = vrot.slane %v3988_v57, 1  ;;  %v3975_v50 = vadd.f32 %v3974_v51, %v3973_v15 }
 0x616   : >>> { %v3899_v8 = vadd.f32 %v9910_v16, %v8806_v18  ;;  %v9911_v53 = vrot.slane %v8819_v25, 2  ;;  %v3795_v24 = vrot.slane %v3794_v40, 2  ;;  %v3964_v14 = vadd.f32 %v3963_v29, %v3962_v10 }
 0x617   : >>> { %v3808_v12 = vrot.slane %v3807_v31, 2  ;;  %v3833_v9 = vadd.f32 %v3832_v28, %v3831_v7  ;;  %v3976_v18 = vrot.slane %v3975_v50, 1  ;;  %v3770_v13 = vadd.f32 %v3769_v4, %v3768_v34 }
 0x618   : >>> { %v3757_v22 = vadd.f32 %v9911_v53, %v8819_v25  ;;  %v3999_v61 = vsel %vm1051_vm4, %v3912_v0, %v3899_v8  ;;  %v3990_v63 = vadd.f32 %v3989_v33, %v3988_v57  ;;  %v3821_v27 = vrot.slane %v3820_v62, 2 }
 0x619   : >>> { %v4000_v36 = vsel %vm1053_vm5, %v3925_v5, %v3999_v61  ;;  %v9912_v26 = vrot.slane %v8800_v43, 2  ;;  %v3783_v3 = vadd.f32 %v3782_v23, %v3781_v42  ;;  %v3977_v30 = vadd.f32 %v3976_v18, %v3975_v50 }
 0x61a   : >>> { %v4001_v44 = vsel %vm1055_vm6, %v3938_v1, %v4000_v36  ;;  %v3796_v6 = vadd.f32 %v3795_v24, %v3794_v40  ;;  %v3758_v11 = vrot.slane %v3757_v22, 1  ;;  %v3809_v15 = vadd.f32 %v3808_v12, %v3807_v31 }
 0x61b   : >>> { %v3744_v41 = vadd.f32 %v9912_v26, %v8800_v43  ;;  %v4002_v25 = vsel %vm1057_vm7, %v3951_v2, %v4001_v44  ;;  %v3834_v7 = vrot.slane %v3833_v9, 2  ;;  %v3771_v0 = vrot.slane %v3770_v13, 1 }
 0x61c   : >>> { %v4003_v10 = vsel %vm1059_vm8, %v3964_v14, %v4002_v25  ;;  %v3822_v5 = vadd.f32 %v3821_v27, %v3820_v62  ;;  %v3784_v57 = vrot.slane %v3783_v3, 1  ;;  %v3797_v42 = vrot.slane %v3796_v6, 1 }
 0x61d   : >>> { %v4004_v34 = vsel %vm1061_vm9, %v3977_v30, %v4003_v10  ;;  %v3745_v28 = vrot.slane %v3744_v41, 1  ;;  %v3759_v51 = vadd.f32 %v3758_v11, %v3757_v22  ;;  %v3810_v16 = vrot.slane %v3809_v15, 1 }
 0x61e   : >>> { %v4005_v29 = vsel %vm1063_vm10, %v3990_v63, %v4004_v34  ;;  %v3835_v8 = vadd.f32 %v3834_v7, %v3833_v9  ;;  %v3772_v40 = vadd.f32 %v3771_v0, %v3770_v13  ;;  %v3823_v4 = vrot.slane %v3822_v5, 1 }
 0x61f   : >>> { %v4007_v43 = vadd.f32 %v4005_v29, %v7583_v60  ;;  %v3746_v1 = vadd.f32 %v3745_v28, %v3744_v41  ;;  %v3785_v31 = vadd.f32 %v3784_v57, %v3783_v3  ;;  %v3798_v23 = vadd.f32 %v3797_v42, %v3796_v6  ;;  %v9914_v28 = vld [vmem:[#allocation42_spill] sm:$0xff] }
 0x620   : >>> { %v3811_v33 = vadd.f32 %v3810_v16, %v3809_v15  ;;  %v3836_v62 = vrot.slane %v3835_v8, 1  ;;  %v3824_v53 = vadd.f32 %v3823_v4, %v3822_v5  ;;  %v3700_v36 = vmul.f32 %v9878_v20, %v8610_v37  ;;  %v9913_v5 = vld [vmem:[#allocation37_spill] sm:$0xff] }
 0x621   : >>> { %6691 = vrcp.f32 %v4007_v43  ;;  %v3846_v2 = vsel %vm1051_vm4, %v3759_v51, %v3746_v1  ;;  %v9915_v51 = vld [vmem:[#allocation41_spill] sm:$0xff] }
 0x622   : >>> { %v3847_v50 = vsel %vm1053_vm5, %v3772_v40, %v3846_v2  ;;  %v3837_v14 = vadd.f32 %v3836_v62, %v3835_v8  ;;  %v3701_v44 = vadd.f32 %v3700_v36, %v7580_v52 }
 0x623   : >>> { %v3848_v61 = vsel %vm1055_vm6, %v3785_v31, %v3847_v50 }
 0x624   : >>> { %v3849_v24 = vsel %vm1057_vm7, %v3798_v23, %v3848_v61 }
 0x625   : >>> { %v3850_v22 = vsel %vm1059_vm8, %v3811_v33, %v3849_v24 }
 0x626   : >>> { %v3851_v12 = vsel %vm1061_vm9, %v3824_v53, %v3850_v22 }
 0x627   : >>> { %v3852_v13 = vsel %vm1063_vm10, %v3837_v14, %v3851_v12 }
 0x628   : >>> { %v3854_v27 = vadd.f32 %v3852_v13, %v3701_v44 }
 0x62b   : >>> { %v6692_v9 = vpop.eup %6691 }
 0x62c   : >>> { %v4009_v18 = vmul.f32 %v6692_v9, %v4007_v43 }
 0x62e   : >>> { %v4010_v63 = vsub.f32 2.0, %v4009_v18 }
 0x630   : >>> { %v4011_v26 = vmul.f32 %v6692_v9, %v4010_v63 }
 0x632   : >>> { %v8938_v41 = vmul.f32 %v4011_v26, %v3854_v27 }
 0x634   : >>> { %v4016_v3 = vrot.slane %v8938_v41, %v7494_v46  ;;  %v4035_v37 = vrot.slane %v8938_v41, %v7499_v49  ;;  %v4054_v25 = vrot.slane %v8938_v41, %v7492_v45  ;;  %v4073_v30 = vrot.slane %v8938_v41, %v7497_v48 }
 0x635   : >>> { %v4092_v6 = vrot.slane %v8938_v41, %v7507_v55  ;;  %v4111_v10 = vrot.slane %v8938_v41, %v7505_v54  ;;  %v4130_v11 = vrot.slane %v8938_v41, %v7513_v59  ;;  %v4149_v15 = vrot.slane %v8938_v41, %v7511_v58 }
 0x636   : >>> { %4022 = vbcast.lane.b32.xlu1 %v4016_v3, 264  ;;  %4018 = vbcast.lane.b32.xlu0 %v4016_v3, 256 }
 0x63a   : >>> { %4041 = vbcast.lane.b32.xlu1 %v4035_v37, 264  ;;  %4037 = vbcast.lane.b32.xlu0 %v4035_v37, 256 }
 0x63e   : >>> { %4060 = vbcast.lane.b32.xlu1 %v4054_v25, 264  ;;  %4056 = vbcast.lane.b32.xlu0 %v4054_v25, 256 }
 0x642   : >>> { %4045 = vbcast.lane.b32.xlu1 %v4035_v37, 272  ;;  %4026 = vbcast.lane.b32.xlu0 %v4016_v3, 272 }
 0x646   : >>> { %4079 = vbcast.lane.b32.xlu1 %v4073_v30, 264  ;;  %4075 = vbcast.lane.b32.xlu0 %v4073_v30, 256 }
 0x64a   : >>> { %4094 = vbcast.lane.b32.xlu1 %v4092_v6, 256  ;;  %4064 = vbcast.lane.b32.xlu0 %v4054_v25, 272 }
 0x64e   : >>> { %4030 = vbcast.lane.b32.xlu1 %v4016_v3, 280  ;;  %4098 = vbcast.lane.b32.xlu0 %v4092_v6, 264 }
 0x652   : >>> { %4083 = vbcast.lane.b32.xlu1 %v4073_v30, 272  ;;  %4049 = vbcast.lane.b32.xlu0 %v4035_v37, 280 }
 0x656   : >>> { %4117 = vbcast.lane.b32.xlu1 %v4111_v10, 264  ;;  %4113 = vbcast.lane.b32.xlu0 %v4111_v10, 256 }
 0x65a   : >>> { %4102 = vbcast.lane.b32.xlu1 %v4092_v6, 272  ;;  %4068 = vbcast.lane.b32.xlu0 %v4054_v25, 280 }
 0x65e   : >>> { %4136 = vbcast.lane.b32.xlu1 %v4130_v11, 264  ;;  %4132 = vbcast.lane.b32.xlu0 %v4130_v11, 256 }
 0x662   : >>> { %4121 = vbcast.lane.b32.xlu1 %v4111_v10, 272  ;;  %4087 = vbcast.lane.b32.xlu0 %v4073_v30, 280 }
 0x666   : >>> { %4155 = vbcast.lane.b32.xlu1 %v4149_v15, 264  ;;  %4151 = vbcast.lane.b32.xlu0 %v4149_v15, 256 }
 0x66a   : >>> { %4140 = vbcast.lane.b32.xlu1 %v4130_v11, 272  ;;  %4106 = vbcast.lane.b32.xlu0 %v4092_v6, 280 }
 0x66e   : >>> { %4159 = vbcast.lane.b32.xlu1 %v4149_v15, 272  ;;  %4125 = vbcast.lane.b32.xlu0 %v4111_v10, 280 }
 0x672   : >>> { %4163 = vbcast.lane.b32.xlu1 %v4149_v15, 280  ;;  %4144 = vbcast.lane.b32.xlu0 %v4130_v11, 280 }
 0x6a8   : >>> { %v4023_v7 = vpop.permute.xlu1 %4022  ;;  %v4019_v34 = vpop.permute.xlu0 %4018 }
 0x6a9   : >>> { %v4166_v0 = vsub.f32 %v4023_v7, %v9879_v19  ;;  %v4165_v29 = vsub.f32 %v4019_v34, %v9913_v5 }
 0x6ab   : >>> { %v4198_v57 = vmul.f32 %v4166_v0, %v9914_v28  ;;  %v4197_v16 = vmul.f32 %v4165_v29, %v9915_v51 }
 0x6ac   : >>> { %v4042_v43 = vpop.permute.xlu1 %4041  ;;  %v4038_v42 = vpop.permute.xlu0 %4037 }
 0x6ad   : >>> { %v4170_v8 = vsub.f32 %v4042_v43, %v9879_v19  ;;  %v4169_v40 = vsub.f32 %v4038_v42, %v9913_v5  ;;  %v5948_v4 = vmul.f32 -1.442695, %v4198_v57  ;;  %v5947_v23 = vmul.f32 -1.442695, %v4197_v16 }
 0x6af   : >>> { %v4202_v2 = vmul.f32 %v4170_v8, %v9914_v28  ;;  %v4201_v33 = vmul.f32 %v4169_v40, %v9915_v51  ;;  %6693 = vpow2.f32 %v5948_v4 }
 0x6b0   : >>> { %v4061_v1 = vpop.permute.xlu1 %4060  ;;  %v4057_v31 = vpop.permute.xlu0 %4056  ;;  %6695 = vpow2.f32 %v5947_v23 }
 0x6b1   : >>> { %v4174_v62 = vsub.f32 %v4061_v1, %v9879_v19  ;;  %v4173_v50 = vsub.f32 %v4057_v31, %v9913_v5  ;;  %v5952_v24 = vmul.f32 -1.442695, %v4202_v2  ;;  %v5951_v22 = vmul.f32 -1.442695, %v4201_v33 }
 0x6b3   : >>> { %v4206_v14 = vmul.f32 %v4174_v62, %v9914_v28  ;;  %v4205_v12 = vmul.f32 %v4173_v50, %v9915_v51  ;;  %6697 = vpow2.f32 %v5952_v24 }
 0x6b4   : >>> { %v4046_v53 = vpop.permute.xlu1 %4045  ;;  %v4027_v61 = vpop.permute.xlu0 %4026  ;;  %6699 = vpow2.f32 %v5951_v22 }
 0x6b5   : >>> { %v4171_v36 = vsub.f32 %v4046_v53, %v9883_v39  ;;  %v5956_v13 = vmul.f32 -1.442695, %v4206_v14  ;;  %v5955_v63 = vmul.f32 -1.442695, %v4205_v12  ;;  %v4167_v27 = vsub.f32 %v4027_v61, %v9883_v39 }
 0x6b7   : >>> { %v4203_v44 = vmul.f32 %v4171_v36, %v9884_v35  ;;  %6701 = vpow2.f32 %v5956_v13  ;;  %v4199_v10 = vmul.f32 %v4167_v27, %v9884_v35 }
 0x6b8   : >>> { %v4080_v9 = vpop.permute.xlu1 %4079  ;;  %v4076_v18 = vpop.permute.xlu0 %4075  ;;  %6703 = vpow2.f32 %v5955_v63 }
 0x6b9   : >>> { %v6694_v37 = vpop.eup %6693  ;;  %v4178_v25 = vsub.f32 %v4080_v9, %v9879_v19  ;;  %v5953_v6 = vmul.f32 -1.442695, %v4203_v44  ;;  %v4177_v15 = vsub.f32 %v4076_v18, %v9913_v5  ;;  %v5949_v42 = vmul.f32 -1.442695, %v4199_v10 }
 0x6ba   : >>> { %v6696_v30 = vpop.eup %6695  ;;  %v4326_v11 = vadd.f32 1.0, %v6694_v37 }
 0x6bb   : >>> { %v4325_v7 = vadd.f32 1.0, %v6696_v30  ;;  %v4210_v34 = vmul.f32 %v4178_v25, %v9914_v28  ;;  %6705 = vpow2.f32 %v5953_v6  ;;  %v4209_v8 = vmul.f32 %v4177_v15, %v9915_v51 }
 0x6bc   : >>> { %v4095_v26 = vpop.permute.xlu1 %4094  ;;  %v4065_v3 = vpop.permute.xlu0 %4064  ;;  %6707 = vrcp.f32 %v4326_v11 }
 0x6bd   : >>> { %v4181_v0 = vsub.f32 %v4095_v26, %v9913_v5  ;;  %v6698_v43 = vpop.eup %6697  ;;  %6709 = vrcp.f32 %v4325_v7  ;;  %v5960_v40 = vmul.f32 -1.442695, %v4210_v34  ;;  %v4175_v23 = vsub.f32 %v4065_v3, %v9883_v39 }
 0x6be   : >>> { %v6700_v16 = vpop.eup %6699  ;;  %v4330_v1 = vadd.f32 1.0, %v6698_v43  ;;  %6711 = vpow2.f32 %v5949_v42  ;;  %v5959_v62 = vmul.f32 -1.442695, %v4209_v8 }
 0x6bf   : >>> { %v4213_v31 = vmul.f32 %v4181_v0, %v9915_v51  ;;  %v4329_v2 = vadd.f32 1.0, %v6700_v16  ;;  %6713 = vpow2.f32 %v5960_v40  ;;  %v4207_v36 = vmul.f32 %v4175_v23, %v9884_v35  ;;  %v9916_v0 = vld [vmem:[#allocation33_spill] sm:$0xff] }
 0x6c0   : >>> { %v4031_v29 = vpop.permute.xlu1 %4030  ;;  %v4099_v57 = vpop.permute.xlu0 %4098  ;;  %6715 = vrcp.f32 %v4330_v1 }
 0x6c1   : >>> { %v4168_v4 = vsub.f32 %v4031_v29, %v9885_v17  ;;  %v6702_v33 = vpop.eup %6701  ;;  %v4182_v24 = vsub.f32 %v4099_v57, %v9879_v19  ;;  %v5963_v14 = vmul.f32 -1.442695, %v4213_v31  ;;  %6717 = vrcp.f32 %v4329_v2 }
 0x6c2   : >>> { %v6704_v53 = vpop.eup %6703  ;;  %v4334_v12 = vadd.f32 1.0, %v6702_v33  ;;  %6719 = vpow2.f32 %v5959_v62  ;;  %v5957_v26 = vmul.f32 -1.442695, %v4207_v36 }
 0x6c3   : >>> { %v4200_v61 = vmul.f32 %v4168_v4, %v9886_v56  ;;  %v4333_v13 = vadd.f32 1.0, %v6704_v53  ;;  %v4214_v63 = vmul.f32 %v4182_v24, %v9914_v28  ;;  %6721 = vpow2.f32 %v5963_v14 }
 0x6c4   : >>> { %v4050_v50 = vpop.permute.xlu0 %4049  ;;  %v4084_v22 = vpop.permute.xlu1 %4083  ;;  %6723 = vrcp.f32 %v4334_v12 }
 0x6c5   : >>> { %v4172_v9 = vsub.f32 %v4050_v50, %v9885_v17  ;;  %v6706_v18 = vpop.eup %6705  ;;  %v5950_v44 = vmul.f32 -1.442695, %v4200_v61  ;;  %6725 = vrcp.f32 %v4333_v13  ;;  %v5964_v11 = vmul.f32 -1.442695, %v4214_v63 }
 0x6c6   : >>> { %v6708_v27 = vpop.eup %6707  ;;  %v4331_v25 = vadd.f32 1.0, %v6706_v18  ;;  %v4179_v15 = vsub.f32 %v4084_v22, %v9883_v39 }
 0x6c7   : >>> { %v6710_v37 = vpop.eup %6709  ;;  %v4204_v30 = vmul.f32 %v4172_v9, %v9886_v56  ;;  %6727 = vpow2.f32 %v5950_v44  ;;  %v4424_v7 = vmul.f32 %v6708_v27, %v9870_v38  ;;  %v4577_v34 = vmul.f32 %v6708_v27, %v9871_v21 }
 0x6c8   : >>> { %v8985_v3 = vpop.permute.xlu0 %4113  ;;  %v8988_v6 = vpop.permute.xlu1 %4117  ;;  %v4423_v29 = vmul.f32 %v6710_v37, %v9916_v0  ;;  %6729 = vpow2.f32 %v5957_v26  ;;  %v4576_v43 = vmul.f32 %v6710_v37, %v9869_v47  ;;  %v4211_v62 = vmul.f32 %v4179_v15, %v9884_v35 }
 0x6c9   : >>> { %v6712_v10 = vpop.eup %6711  ;;  %6731 = vrcp.f32 %v4331_v25  ;;  %v5954_v42 = vmul.f32 -1.442695, %v4204_v30  ;;  %v4456_v23 = vsel %vm916_vm2, %v4424_v7, 0.0  ;;  %v4609_v2 = vsel %vm916_vm2, %v4577_v34, 0.0 }
 0x6ca   : >>> { %v6714_v57 = vpop.eup %6713  ;;  %v4327_v8 = vadd.f32 1.0, %v6712_v10  ;;  %6733 = vpow2.f32 %v5964_v11  ;;  %v4455_v33 = vsel %vm916_vm2, %v4423_v29, 0.0  ;;  %v4608_v50 = vsel %vm916_vm2, %v4576_v43, 0.0 }
 0x6cb   : >>> { %v6716_v16 = vpop.eup %6715  ;;  %6735 = vpow2.f32 %v5954_v42  ;;  %v4338_v36 = vadd.f32 1.0, %v6714_v57  ;;  %v9006_v13 = vadd.f32 %v4456_v23, %v4455_v33  ;;  %v9008_v44 = vadd.f32 %v4609_v2, %v4608_v50  ;;  %v9917_v50 = vld [vmem:[#allocation35_spill] sm:$0xff] }
 0x6cc   : >>> { %v4069_v40 = vpop.permute.xlu0 %4068  ;;  %v6718_v4 = vpop.eup %6717  ;;  %v4428_v53 = vmul.f32 %v6716_v16, %v9870_v38  ;;  %v4581_v22 = vmul.f32 %v6716_v16, %v9871_v21  ;;  %6737 = vrcp.f32 %v4327_v8  ;;  %v5961_v63 = vmul.f32 -1.442695, %v4211_v62 }
 0x6cd   : >>> { %v8995_v1 = vpop.permute.xlu1 %4102  ;;  %v6720_v31 = vpop.eup %6719  ;;  %v4176_v61 = vsub.f32 %v4069_v40, %v9885_v17  ;;  %v4427_v14 = vmul.f32 %v6718_v4, %v9916_v0  ;;  %v4580_v37 = vmul.f32 %v6718_v4, %v9869_v47  ;;  %v4186_v25 = vsub.f32 %v8988_v6, %v9879_v19 }
 0x6ce   : >>> { %v6722_v24 = vpop.eup %6721  ;;  %v4337_v9 = vadd.f32 1.0, %v6720_v31  ;;  %v4469_v26 = vsel %vm916_vm2, %v4428_v53, 0.0  ;;  %v4622_v15 = vsel %vm916_vm2, %v4581_v22, 0.0  ;;  %6739 = vrcp.f32 %v4338_v36 }
 0x6cf   : >>> { %v6724_v12 = vpop.eup %6723  ;;  %v4208_v30 = vmul.f32 %v4176_v61, %v9886_v56  ;;  %v4468_v7 = vsel %vm916_vm2, %v4427_v14, 0.0  ;;  %v4341_v42 = vadd.f32 1.0, %v6722_v24  ;;  %v4185_v6 = vsub.f32 %v8985_v3, %v9913_v5 }
 0x6d0   : >>> { %v6726_v18 = vpop.eup %6725  ;;  %v4432_v34 = vmul.f32 %v6724_v12, %v9870_v38  ;;  %v4133_v29 = vpop.permute.xlu0 %4132  ;;  %v4585_v43 = vmul.f32 %v6724_v12, %v9871_v21  ;;  %6741 = vrcp.f32 %v4337_v9  ;;  %v4621_v31 = vsel %vm916_vm2, %v4580_v37, 0.0  ;;  %v9918_v37 = vld [vmem:[#allocation31_spill] sm:$0xff] }
 0x6d1   : >>> { %v6728_v27 = vpop.eup %6727  ;;  %v4137_v10 = vpop.permute.xlu1 %4136  ;;  %v4431_v16 = vmul.f32 %v6726_v18, %v9916_v0  ;;  %v4584_v8 = vmul.f32 %v6726_v18, %v9869_v47  ;;  %6743 = vpow2.f32 %v5961_v63  ;;  %v4218_v23 = vmul.f32 %v4186_v25, %v9914_v28 }
 0x6d2   : >>> { %v6730_v11 = vpop.eup %6729  ;;  %v4328_v40 = vadd.f32 1.0, %v6728_v27  ;;  %v4183_v2 = vsub.f32 %v8995_v1, %v9883_v39  ;;  %v5958_v33 = vmul.f32 -1.442695, %v4208_v30  ;;  %v4482_v62 = vsel %vm916_vm2, %v4432_v34, 0.0 }
 0x6d3   : >>> { %v6732_v57 = vpop.eup %6731  ;;  %v4335_v3 = vadd.f32 1.0, %v6730_v11  ;;  %v4190_v61 = vsub.f32 %v4137_v10, %v9879_v19  ;;  %v4635_v22 = vsel %vm916_vm2, %v4585_v43, 0.0  ;;  %6745 = vrcp.f32 %v4341_v42 }
 0x6d4   : >>> { %v6734_v4 = vpop.eup %6733  ;;  %v4429_v53 = vmul.f32 %v6732_v57, %v9917_v50  ;;  %v4217_v14 = vmul.f32 %v4185_v6, %v9915_v51  ;;  %v4189_v36 = vsub.f32 %v4133_v29, %v9913_v5  ;;  %v4481_v1 = vsel %vm916_vm2, %v4431_v16, 0.0  ;;  %v4088_v27 = vpop.permute.xlu0 %4087 }
 0x6d5   : >>> { %v6736_v24 = vpop.eup %6735  ;;  %v4122_v12 = vpop.permute.xlu1 %4121  ;;  %v4634_v18 = vsel %vm916_vm2, %v4584_v8, 0.0  ;;  %6747 = vrcp.f32 %v4328_v40  ;;  %v4342_v63 = vadd.f32 1.0, %v6734_v4  ;;  %v4582_v25 = vmul.f32 %v6732_v57, %v9918_v37 }
 0x6d6   : >>> { %v6738_v9 = vpop.eup %6737  ;;  %v5968_v30 = vmul.f32 -1.442695, %v4218_v23  ;;  %v4215_v10 = vmul.f32 %v4183_v2, %v9884_v35  ;;  %6749 = vpow2.f32 %v5958_v33  ;;  %v4471_v11 = vsel %vm916_vm2, %v4429_v53, 0.0 }
 0x6d7   : >>> { %6751 = vrcp.f32 %v4335_v3  ;;  %v4332_v34 = vadd.f32 1.0, %v6736_v24  ;;  %v4222_v29 = vmul.f32 %v4190_v61, %v9914_v28  ;;  %v4425_v43 = vmul.f32 %v6738_v9, %v9917_v50 }
 0x6d8   : >>> { %v5967_v42 = vmul.f32 -1.442695, %v4217_v14  ;;  %v4221_v6 = vmul.f32 %v4189_v36, %v9915_v51  ;;  %v4187_v16 = vsub.f32 %v4122_v12, %v9883_v39  ;;  %v6740_v8 = vpop.eup %6739  ;;  %v4470_v40 = vadd.f32 %v4469_v26, %v4468_v7  ;;  %v4152_v26 = vpop.permute.xlu0 %4151 }
 0x6d9   : >>> { %v4623_v57 = vadd.f32 %v4622_v15, %v4621_v31  ;;  %v9042_v4 = vadd.f32 %v4482_v62, %v4481_v1  ;;  %6753 = vrcp.f32 %v4342_v63  ;;  %v9044_v2 = vadd.f32 %v4635_v22, %v4634_v18  ;;  %v4156_v3 = vpop.permute.xlu1 %4155 }
 0x6da   : >>> { %v6742_v23 = vpop.eup %6741  ;;  %v4578_v33 = vmul.f32 %v6738_v9, %v9918_v37  ;;  %6755 = vpow2.f32 %v5968_v30  ;;  %v5965_v53 = vmul.f32 -1.442695, %v4215_v10  ;;  %v9047_v24 = vadd.f32 %v4471_v11, %v4470_v40 }
 0x6db   : >>> { %v6744_v61 = vpop.eup %6743  ;;  %v4624_v14 = vsel %vm916_vm2, %v4582_v25, 0.0  ;;  %6757 = vrcp.f32 %v4332_v34  ;;  %v5972_v36 = vmul.f32 -1.442695, %v4222_v29  ;;  %v4458_v15 = vsel %vm916_vm2, %v4425_v43, 0.0 }
 0x6dc   : >>> { %6759 = vpow2.f32 %v5967_v42  ;;  %v5971_v7 = vmul.f32 -1.442695, %v4221_v6  ;;  %v4219_v31 = vmul.f32 %v4187_v16, %v9884_v35  ;;  %v4436_v62 = vmul.f32 %v6740_v8, %v9870_v38 }
 0x6dd   : >>> { %v4589_v22 = vmul.f32 %v6740_v8, %v9871_v21  ;;  %v4435_v12 = vmul.f32 %v6742_v23, %v9916_v0  ;;  %v4180_v9 = vsub.f32 %v4088_v27, %v9885_v17  ;;  %v6746_v1 = vpop.eup %6745  ;;  %v9056_v18 = vadd.f32 %v4624_v14, %v4623_v57  ;;  %v4141_v6 = vpop.permute.xlu1 %4140 }
 0x6de   : >>> { %v4611_v63 = vsel %vm916_vm2, %v4578_v33, 0.0  ;;  %v4339_v25 = vadd.f32 1.0, %v6744_v61  ;;  %6761 = vpow2.f32 %v5965_v53  ;;  %v9060_v10 = vadd.f32 %v4458_v15, %v9006_v13 }
 0x6df   : >>> { %v6748_v30 = vpop.eup %6747  ;;  %v4588_v11 = vmul.f32 %v6742_v23, %v9869_v47  ;;  %6763 = vpow2.f32 %v5972_v36  ;;  %v5969_v34 = vmul.f32 -1.442695, %v4219_v31  ;;  %v4212_v43 = vmul.f32 %v4180_v9, %v9886_v56  ;;  %v4107_v23 = vpop.permute.xlu0 %4106 }
 0x6e0   : >>> { %v6750_v29 = vpop.eup %6749  ;;  %6765 = vpow2.f32 %v5971_v7  ;;  %v4194_v27 = vsub.f32 %v4156_v3, %v9879_v19  ;;  %v4193_v42 = vsub.f32 %v4152_v26, %v9913_v5  ;;  %v4612_v8 = vadd.f32 %v4611_v63, %v9008_v44  ;;  %v9919_v63 = vld [vmem:[#allocation36_spill] sm:$0xff] }
 0x6e1   : >>> { %v6752_v16 = vpop.eup %6751  ;;  %v4495_v40 = vsel %vm916_vm2, %v4436_v62, 0.0  ;;  %v4648_v13 = vsel %vm916_vm2, %v4589_v22, 0.0  ;;  %v4494_v57 = vsel %vm916_vm2, %v4435_v12, 0.0  ;;  %v4579_v33 = vmul.f32 %v6748_v30, %v9874_v32 }
 0x6e2   : >>> { %v4336_v53 = vadd.f32 1.0, %v6750_v29  ;;  %v5962_v61 = vmul.f32 -1.442695, %v4212_v43  ;;  %v4226_v14 = vmul.f32 %v4194_v27, %v9914_v28  ;;  %v4647_v36 = vsel %vm916_vm2, %v4588_v11, 0.0 }
 0x6e3   : >>> { %v6754_v3 = vpop.eup %6753  ;;  %v4439_v26 = vmul.f32 %v6746_v1, %v9916_v0  ;;  %v4592_v44 = vmul.f32 %v6746_v1, %v9869_v47  ;;  %6767 = vrcp.f32 %v4339_v25  ;;  %v4586_v7 = vmul.f32 %v6752_v16, %v9918_v37 }
 0x6e4   : >>> { %v6756_v15 = vpop.eup %6755  ;;  %6769 = vpow2.f32 %v5969_v34  ;;  %v4225_v31 = vmul.f32 %v4193_v42, %v9915_v51  ;;  %v4191_v62 = vsub.f32 %v4141_v6, %v9883_v39  ;;  %v9078_v12 = vadd.f32 %v4495_v40, %v4494_v57  ;;  %v4160_v34 = vpop.permute.xlu1 %4159 }
 0x6e5   : >>> { %v6758_v22 = vpop.eup %6757  ;;  %v4433_v9 = vmul.f32 %v6752_v16, %v9917_v50  ;;  %v4426_v11 = vmul.f32 %v6748_v30, %v9919_v63  ;;  %6771 = vrcp.f32 %v4336_v53  ;;  %v4613_v1 = vsel %vm916_vm2, %v4579_v33, 0.0  ;;  %v4126_v40 = vpop.permute.xlu0 %4125 }
 0x6e6   : >>> { %v6760_v29 = vpop.eup %6759  ;;  %6773 = vpow2.f32 %v5962_v61  ;;  %v5976_v25 = vmul.f32 -1.442695, %v4226_v14  ;;  %v4223_v43 = vmul.f32 %v4191_v62, %v9884_v35  ;;  %v9084_v27 = vadd.f32 %v4648_v13, %v4647_v36 }
 0x6e7   : >>> { %v9087_v42 = vsel %vm916_vm2, %v4439_v26, 0.0  ;;  %v9090_v6 = vsel %vm916_vm2, %v4592_v44, 0.0  ;;  %v4346_v16 = vadd.f32 1.0, %v6756_v15  ;;  %v4637_v57 = vsel %vm916_vm2, %v4586_v7, 0.0 }
 0x6e8   : >>> { %v6762_v30 = vpop.eup %6761  ;;  %v4583_v33 = vmul.f32 %v6758_v22, %v9874_v32  ;;  %v5975_v53 = vmul.f32 -1.442695, %v4225_v31  ;;  %v4184_v61 = vsub.f32 %v4107_v23, %v9885_v17  ;;  %v9096_v13 = vsel %vm916_vm2, %v4433_v9, 0.0 }
 0x6e9   : >>> { %v6764_v14 = vpop.eup %6763  ;;  %v4614_v36 = vadd.f32 %v4613_v1, %v4612_v8  ;;  %v4440_v26 = vmul.f32 %v6754_v3, %v9870_v38  ;;  %v4345_v62 = vadd.f32 1.0, %v6760_v29  ;;  %v4460_v15 = vsel %vm916_vm2, %v4426_v11, 0.0  ;;  %v4164_v1 = vpop.permute.xlu1 %4163 }
 0x6ea   : >>> { %v6766_v44 = vpop.eup %6765  ;;  %v4593_v51 = vmul.f32 %v6754_v3, %v9871_v21  ;;  %6775 = vpow2.f32 %v5976_v25  ;;  %v5973_v7 = vmul.f32 -1.442695, %v4223_v43  ;;  %v9102_v28 = vadd.f32 %v4637_v57, %v9044_v2  ;;  %v4145_v43 = vpop.permute.xlu0 %4144 }
 0x6eb   : >>> { %v4430_v23 = vmul.f32 %v6758_v22, %v9919_v63  ;;  %6777 = vrcp.f32 %v4346_v16  ;;  %v4343_v31 = vadd.f32 1.0, %v6762_v30  ;;  %v4626_v9 = vsel %vm916_vm2, %v4583_v33, 0.0 }
 0x6ec   : >>> { %v4350_v8 = vadd.f32 1.0, %v6764_v14  ;;  %6779 = vpow2.f32 %v5975_v53  ;;  %v4216_v29 = vmul.f32 %v4184_v61, %v9886_v56  ;;  %v4461_v11 = vadd.f32 %v4460_v15, %v9060_v10 }
 0x6ed   : >>> { %v6768_v5 = vpop.eup %6767  ;;  %v4615_v3 = vrot.slane %v4614_v36, 4  ;;  %6781 = vrcp.f32 %v4345_v62  ;;  %v4349_v25 = vadd.f32 1.0, %v6766_v44  ;;  %v4195_v22 = vsub.f32 %v4160_v34, %v9883_v39 }
 0x6ee   : >>> { %v6770_v2 = vpop.eup %6769  ;;  %6783 = vpow2.f32 %v5973_v7  ;;  %v5966_v57 = vmul.f32 -1.442695, %v4216_v29  ;;  %v4188_v16 = vsub.f32 %v4126_v40, %v9885_v17  ;;  %v4473_v33 = vsel %vm916_vm2, %v4430_v23, 0.0 }
 0x6ef   : >>> { %v9110_v30 = vpop.eup %6771  ;;  %v4627_v53 = vadd.f32 %v4626_v9, %v9056_v18  ;;  %6785 = vrcp.f32 %v4343_v31  ;;  %v4196_v10 = vsub.f32 %v4164_v1, %v9885_v17  ;;  %v4227_v14 = vmul.f32 %v4195_v22, %v9884_v35 }
 0x6f0   : >>> { %v6774_v61 = vpop.eup %6773  ;;  %6787 = vrcp.f32 %v4350_v8  ;;  %v4220_v62 = vmul.f32 %v4188_v16, %v9886_v56  ;;  %v4192_v44 = vsub.f32 %v4145_v43, %v9885_v17  ;;  %v4616_v34 = vadd.f32 %v4615_v3, %v4614_v36 }
 0x6f1   : >>> { %6789 = vrcp.f32 %v4349_v25  ;;  %v4347_v40 = vadd.f32 1.0, %v6770_v2  ;;  %v4340_v15 = vadd.f32 1.0, %v6774_v61  ;;  %v4474_v7 = vadd.f32 %v4473_v33, %v9047_v24 }
 0x6f2   : >>> { %6791 = vpow2.f32 %v5966_v57  ;;  %v5977_v23 = vmul.f32 -1.442695, %v4227_v14  ;;  %v5970_v18 = vmul.f32 -1.442695, %v4220_v62  ;;  %v4587_v31 = vmul.f32 %v9110_v30, %v9874_v32 }
 0x6f3   : >>> { %6793 = vrcp.f32 %v4340_v15  ;;  %v4228_v9 = vmul.f32 %v4196_v10, %v9886_v56  ;;  %v4224_v8 = vmul.f32 %v4192_v44, %v9886_v56  ;;  %v4462_v1 = vrot.slane %v4461_v11, 4 }
 0x6f4   : >>> { %v6776_v29 = vpop.eup %6775  ;;  %v4437_v36 = vmul.f32 %v6768_v5, %v9917_v50  ;;  %v4628_v3 = vrot.slane %v4627_v53, 4  ;;  %6795 = vpow2.f32 %v5977_v23  ;;  %v4617_v43 = vrot.slane %v4616_v34, 2 }
 0x6f5   : >>> { %v6778_v25 = vpop.eup %6777  ;;  %6797 = vrcp.f32 %v4347_v40  ;;  %v5978_v24 = vmul.f32 -1.442695, %v4228_v9  ;;  %v5974_v2 = vmul.f32 -1.442695, %v4224_v8  ;;  %v4508_v22 = vsel %vm916_vm2, %v4440_v26, 0.0 }
 0x6f6   : >>> { %v6780_v57 = vpop.eup %6779  ;;  %v4661_v16 = vsel %vm916_vm2, %v4593_v51, 0.0  ;;  %v4590_v33 = vmul.f32 %v6768_v5, %v9918_v37  ;;  %6799 = vpow2.f32 %v5970_v18  ;;  %v4475_v61 = vrot.slane %v4474_v7, 4 }
 0x6f7   : >>> { %v6782_v10 = vpop.eup %6781  ;;  %v4639_v14 = vsel %vm916_vm2, %v4587_v31, 0.0  ;;  %v4354_v62 = vadd.f32 1.0, %v6776_v29  ;;  %6801 = vpow2.f32 %v5978_v24  ;;  %v9128_v15 = vadd.f32 %v4462_v1, %v4461_v11 }
 0x6f8   : >>> { %v6784_v44 = vpop.eup %6783  ;;  %v4629_v40 = vadd.f32 %v4628_v3, %v4627_v53  ;;  %v4353_v23 = vadd.f32 1.0, %v6780_v57  ;;  %6803 = vpow2.f32 %v5974_v2  ;;  %v9132_v26 = vadd.f32 %v9096_v13, %v9042_v4 }
 0x6f9   : >>> { %v6786_v9 = vpop.eup %6785  ;;  %v9134_v51 = vadd.f32 %v4617_v43, %v4616_v34  ;;  %v9137_v5 = vadd.f32 %v4508_v22, %v9087_v42  ;;  %v4497_v18 = vsel %vm916_vm2, %v4437_v36, 0.0  ;;  %v4650_v8 = vsel %vm916_vm2, %v4590_v33, 0.0 }
 0x6fa   : >>> { %v6788_v31 = vpop.eup %6787  ;;  %v4444_v11 = vmul.f32 %v6778_v25, %v9870_v38  ;;  %v4443_v53 = vmul.f32 %v6782_v10, %v9916_v0  ;;  %v4640_v29 = vadd.f32 %v4639_v14, %v9102_v28  ;;  %v9145_v4 = vadd.f32 %v4661_v16, %v9090_v6 }
 0x6fb   : >>> { %v6790_v1 = vpop.eup %6789  ;;  %v9147_v13 = vadd.f32 %v4475_v61, %v4474_v7  ;;  %6805 = vrcp.f32 %v4354_v62  ;;  %v4351_v42 = vadd.f32 1.0, %v6784_v44  ;;  %v4630_v3 = vrot.slane %v4629_v40, 2 }
 0x6fc   : >>> { %v6792_v34 = vpop.eup %6791  ;;  %v4597_v43 = vmul.f32 %v6778_v25, %v9871_v21  ;;  %6807 = vrcp.f32 %v4353_v23  ;;  %v9153_v28 = vadd.f32 %v4497_v18, %v9078_v12  ;;  %v4651_v6 = vadd.f32 %v4650_v8, %v9084_v27 }
 0x6fd   : >>> { %v6794_v24 = vpop.eup %6793  ;;  %v4596_v7 = vmul.f32 %v6782_v10, %v9869_v47  ;;  %v4521_v22 = vsel %vm916_vm2, %v4444_v11, 0.0  ;;  %v4520_v16 = vsel %vm916_vm2, %v4443_v53, 0.0  ;;  %v4434_v33 = vmul.f32 %v9110_v30, %v9919_v63 }
 0x6fe   : >>> { %v6796_v57 = vpop.eup %6795  ;;  %v4641_v25 = vrot.slane %v4640_v29, 4  ;;  %v4591_v62 = vmul.f32 %v6794_v24, %v9874_v32  ;;  %6809 = vrcp.f32 %v4351_v42  ;;  %v4344_v12 = vadd.f32 1.0, %v6792_v34 }
 0x6ff   : >>> { %v6798_v61 = vpop.eup %6797  ;;  %v9163_v27 = vadd.f32 %v4630_v3, %v4629_v40  ;;  %v4674_v10 = vsel %vm916_vm2, %v4597_v43, 0.0  ;;  %v4441_v23 = vmul.f32 %v6786_v9, %v9917_v50  ;;  %v4594_v18 = vmul.f32 %v6786_v9, %v9918_v37 }
 0x700   : >>> { %v6800_v44 = vpop.eup %6799  ;;  %v4522_v11 = vadd.f32 %v4521_v22, %v4520_v16  ;;  %v4673_v30 = vsel %vm916_vm2, %v4596_v7, 0.0  ;;  %6811 = vrcp.f32 %v4344_v12  ;;  %v4355_v53 = vadd.f32 1.0, %v6796_v57 }
 0x701   : >>> { %v6802_v8 = vpop.eup %6801  ;;  %v4486_v14 = vsel %vm916_vm2, %v4434_v33, 0.0  ;;  %v4642_v42 = vadd.f32 %v4641_v25, %v4640_v29  ;;  %v4448_v34 = vmul.f32 %v6788_v31, %v9870_v38  ;;  %v4652_v40 = vsel %vm916_vm2, %v4591_v62, 0.0 }
 0x702   : >>> { %v6804_v36 = vpop.eup %6803  ;;  %v4601_v3 = vmul.f32 %v6788_v31, %v9871_v21  ;;  %6813 = vrcp.f32 %v4355_v53  ;;  %v4348_v43 = vadd.f32 1.0, %v6800_v44  ;;  %v4356_v2 = vadd.f32 1.0, %v6802_v8 }
 0x703   : >>> { %v4447_v9 = vmul.f32 %v6790_v1, %v9916_v0  ;;  %v4600_v22 = vmul.f32 %v6790_v1, %v9869_v47  ;;  %v4445_v7 = vmul.f32 %v6798_v61, %v9917_v50  ;;  %v4352_v57 = vadd.f32 1.0, %v6804_v36 }
 0x704   : >>> { %v4675_v12 = vadd.f32 %v4674_v10, %v4673_v30  ;;  %v4438_v29 = vmul.f32 %v6794_v24, %v9919_v63  ;;  %v4653_v33 = vadd.f32 %v4652_v40, %v4651_v6  ;;  %6815 = vrcp.f32 %v4348_v43 }
 0x705   : >>> { %v6806_v16 = vpop.eup %6805  ;;  %v4510_v62 = vsel %vm916_vm2, %v4441_v23, 0.0  ;;  %v4663_v31 = vsel %vm916_vm2, %v4594_v18, 0.0  ;;  %v9180_v44 = vadd.f32 %v4486_v14, %v9132_v26  ;;  %v4643_v8 = vrot.slane %v4642_v42, 2 }
 0x706   : >>> { %v6808_v25 = vpop.eup %6807  ;;  %v4534_v1 = vsel %vm916_vm2, %v4448_v34, 0.0  ;;  %v4687_v53 = vsel %vm916_vm2, %v4601_v3, 0.0  ;;  %v4598_v36 = vmul.f32 %v6798_v61, %v9918_v37  ;;  %6817 = vrcp.f32 %v4356_v2 }
 0x707   : >>> { %v4533_v24 = vsel %vm916_vm2, %v4447_v9, 0.0  ;;  %v4686_v6 = vsel %vm916_vm2, %v4600_v22, 0.0  ;;  %v4523_v10 = vsel %vm916_vm2, %v4445_v7, 0.0  ;;  %6819 = vrcp.f32 %v4352_v57 }
 0x708   : >>> { %v6810_v23 = vpop.eup %6809  ;;  %v4499_v18 = vsel %vm916_vm2, %v4438_v29, 0.0  ;;  %v4654_v26 = vrot.slane %v4653_v33, 4  ;;  %v4452_v14 = vmul.f32 %v6806_v16, %v9870_v38  ;;  %v4451_v30 = vmul.f32 %v6808_v25, %v9916_v0 }
 0x709   : >>> { %v4511_v34 = vadd.f32 %v4510_v62, %v9137_v5  ;;  %v4664_v61 = vadd.f32 %v4663_v31, %v9145_v4  ;;  %v4605_v2 = vmul.f32 %v6806_v16, %v9871_v21  ;;  %v4604_v40 = vmul.f32 %v6808_v25, %v9869_v47 }
 0x70a   : >>> { %v6812_v3 = vpop.eup %6811  ;;  %v9196_v9 = vadd.f32 %v4643_v8, %v4642_v42  ;;  %v4535_v22 = vadd.f32 %v4534_v1, %v4533_v24  ;;  %v4449_v7 = vmul.f32 %v6810_v23, %v9917_v50  ;;  %v4688_v57 = vadd.f32 %v4687_v53, %v4686_v6 }
 0x70b   : >>> { %v4524_v29 = vadd.f32 %v4523_v10, %v4522_v11  ;;  %v4676_v0 = vsel %vm916_vm2, %v4598_v36, 0.0  ;;  %v9201_v5 = vadd.f32 %v4499_v18, %v9153_v28  ;;  %v4655_v62 = vadd.f32 %v4654_v26, %v4653_v33 }
 0x70c   : >>> { %v6814_v4 = vpop.eup %6813  ;;  %v4547_v16 = vsel %vm916_vm2, %v4452_v14, 0.0  ;;  %v4546_v25 = vsel %vm916_vm2, %v4451_v30, 0.0  ;;  %v4595_v31 = vmul.f32 %v6812_v3, %v9874_v32  ;;  %v4700_v42 = vsel %vm916_vm2, %v4605_v2, 0.0 }
 0x70d   : >>> { %v4699_v8 = vsel %vm916_vm2, %v4604_v40, 0.0  ;;  %v4602_v1 = vmul.f32 %v6810_v23, %v9918_v37  ;;  %v4606_v11 = vmul.f32 %v6814_v4, %v9918_v37  ;;  %v4536_v28 = vsel %vm916_vm2, %v4449_v7, 0.0 }
 0x70e   : >>> { %v6816_v53 = vpop.eup %6815  ;;  %v4442_v36 = vmul.f32 %v6812_v3, %v9919_v63  ;;  %v4665_v33 = vsel %vm916_vm2, %v4595_v31, 0.0  ;;  %v4453_v24 = vmul.f32 %v6814_v4, %v9917_v50  ;;  %v4677_v6 = vadd.f32 %v4676_v0, %v4675_v12 }
 0x70f   : >>> { %v4501_v10 = vrot.slane %v9201_v5, 4  ;;  %v4548_v18 = vadd.f32 %v4547_v16, %v4546_v25  ;;  %v4666_v26 = vadd.f32 %v4665_v33, %v4664_v61  ;;  %v4656_v30 = vrot.slane %v4655_v62, 2 }
 0x710   : >>> { %v6818_v14 = vpop.eup %6817  ;;  %v4701_v2 = vadd.f32 %v4700_v42, %v4699_v8  ;;  %v4446_v23 = vmul.f32 %v6816_v53, %v9919_v63  ;;  %v4599_v40 = vmul.f32 %v6816_v53, %v9874_v32  ;;  %v4537_v7 = vadd.f32 %v4536_v28, %v4535_v22 }
 0x711   : >>> { %v6820_v43 = vpop.eup %6819  ;;  %v4689_v3 = vsel %vm916_vm2, %v4602_v1, 0.0  ;;  %v4667_v37 = vrot.slane %v4666_v26, 4  ;;  %v4702_v31 = vsel %vm916_vm2, %v4606_v11, 0.0  ;;  %v4512_v0 = vsel %vm916_vm2, %v4442_v36, 0.0 }
 0x712   : >>> { %v4549_v12 = vsel %vm916_vm2, %v4453_v24, 0.0  ;;  %v4678_v61 = vsel %vm916_vm2, %v4599_v40, 0.0  ;;  %v4607_v4 = vmul.f32 %v6818_v14, %v9874_v32  ;;  %v4525_v25 = vsel %vm916_vm2, %v4446_v23, 0.0 }
 0x713   : >>> { %v4668_v16 = vadd.f32 %v4667_v37, %v4666_v26  ;;  %v4679_v42 = vadd.f32 %v4678_v61, %v4677_v6  ;;  %v4454_v8 = vmul.f32 %v6818_v14, %v9919_v63  ;;  %v4703_v22 = vadd.f32 %v4702_v31, %v4701_v2 }
 0x714   : >>> { %v4704_v1 = vsel %vm916_vm2, %v4607_v4, 0.0  ;;  %v4450_v53 = vmul.f32 %v6820_v43, %v9919_v63  ;;  %v4603_v11 = vmul.f32 %v6820_v43, %v9874_v32  ;;  %v4690_v28 = vadd.f32 %v4689_v3, %v4688_v57 }
 0x715   : >>> { %v4513_v36 = vadd.f32 %v4512_v0, %v4511_v34  ;;  %v4669_v33 = vrot.slane %v4668_v16, 2  ;;  %v4680_v24 = vrot.slane %v4679_v42, 4  ;;  %v4526_v40 = vadd.f32 %v4525_v25, %v4524_v29 }
 0x716   : >>> { %v4705_v50 = vadd.f32 %v4704_v1, %v4703_v22  ;;  %v4538_v37 = vsel %vm916_vm2, %v4450_v53, 0.0  ;;  %v4691_v26 = vsel %vm916_vm2, %v4603_v11, 0.0  ;;  %v4657_v6 = vadd.f32 %v4656_v30, %v4655_v62 }
 0x717   : >>> { %v4550_v23 = vadd.f32 %v4549_v12, %v4548_v18  ;;  %v4681_v14 = vadd.f32 %v4680_v24, %v4679_v42  ;;  %v4551_v2 = vsel %vm916_vm2, %v4454_v8, 0.0  ;;  %v4670_v31 = vadd.f32 %v4669_v33, %v4668_v16 }
 0x718   : >>> { %v4706_v61 = vrot.slane %v4705_v50, 4  ;;  %v4539_v4 = vadd.f32 %v4538_v37, %v4537_v7  ;;  %v4692_v63 = vadd.f32 %v4691_v26, %v4690_v28  ;;  %v4632_v43 = vrot.slane %v9163_v27, 1 }
 0x719   : >>> { %v4645_v34 = vrot.slane %v9196_v9, 1  ;;  %v4514_v57 = vrot.slane %v4513_v36, 4  ;;  %v4682_v29 = vrot.slane %v4681_v14, 2  ;;  %v4527_v3 = vrot.slane %v4526_v40, 4 }
 0x71a   : >>> { %v4552_v0 = vadd.f32 %v4551_v2, %v4550_v23  ;;  %v4707_v25 = vadd.f32 %v4706_v61, %v4705_v50  ;;  %v4693_v22 = vrot.slane %v4692_v63, 4  ;;  %v9920_v62 = vrot.slane %v9180_v44, 4 }
 0x71b   : >>> { %v4658_v30 = vrot.slane %v4657_v6, 1  ;;  %v4683_v12 = vadd.f32 %v4682_v29, %v4681_v14  ;;  %v4540_v16 = vrot.slane %v4539_v4, 4  ;;  %v4502_v7 = vadd.f32 %v4501_v10, %v9201_v5 }
 0x71c   : >>> { %v4489_v18 = vadd.f32 %v9920_v62, %v9180_v44  ;;  %v4671_v42 = vrot.slane %v4670_v31, 1  ;;  %v4708_v8 = vrot.slane %v4707_v25, 2  ;;  %v4694_v1 = vadd.f32 %v4693_v22, %v4692_v63 }
 0x71d   : >>> { %v4633_v53 = vadd.f32 %v4632_v43, %v9163_v27  ;;  %v4646_v11 = vadd.f32 %v4645_v34, %v9196_v9  ;;  %v4515_v28 = vadd.f32 %v4514_v57, %v4513_v36  ;;  %v4684_v33 = vrot.slane %v4683_v12, 1 }
 0x71e   : >>> { %v4528_v50 = vadd.f32 %v4527_v3, %v4526_v40  ;;  %v4553_v24 = vrot.slane %v4552_v0, 4  ;;  %v4709_v37 = vadd.f32 %v4708_v8, %v4707_v25  ;;  %v4695_v26 = vrot.slane %v4694_v1, 2 }
 0x71f   : >>> { %v9921_v44 = vrot.slane %v9134_v51, 1  ;;  %v4490_v14 = vrot.slane %v4489_v18, 2  ;;  %v4659_v2 = vadd.f32 %v4658_v30, %v4657_v6  ;;  %v4541_v5 = vadd.f32 %v4540_v16, %v4539_v4 }
 0x720   : >>> { %v4503_v10 = vrot.slane %v4502_v7, 2  ;;  %v4672_v61 = vadd.f32 %v4671_v42, %v4670_v31  ;;  %v4710_v63 = vrot.slane %v4709_v37, 1  ;;  %v4696_v29 = vadd.f32 %v4695_v26, %v4694_v1 }
 0x721   : >>> { %v4620_v23 = vadd.f32 %v9921_v44, %v9134_v51  ;;  %v9922_v27 = vrot.slane %v9147_v13, 2  ;;  %v4516_v40 = vrot.slane %v4515_v28, 2  ;;  %v4685_v43 = vadd.f32 %v4684_v33, %v4683_v12 }
 0x722   : >>> { %v4529_v57 = vrot.slane %v4528_v50, 2  ;;  %v4554_v3 = vadd.f32 %v4553_v24, %v4552_v0  ;;  %v4697_v51 = vrot.slane %v4696_v29, 1  ;;  %v4491_v25 = vadd.f32 %v4490_v14, %v4489_v18 }
 0x723   : >>> { %v4478_v9 = vadd.f32 %v9922_v27, %v9147_v13  ;;  %v4720_v36 = vsel %vm1051_vm4, %v4633_v53, %v4620_v23  ;;  %v4711_v4 = vadd.f32 %v4710_v63, %v4709_v37  ;;  %v4542_v31 = vrot.slane %v4541_v5, 2 }
 0x724   : >>> { %v4721_v34 = vsel %vm1053_vm5, %v4646_v11, %v4720_v36  ;;  %v9923_v22 = vrot.slane %v9128_v15, 2  ;;  %v4504_v30 = vadd.f32 %v4503_v10, %v4502_v7  ;;  %v4698_v16 = vadd.f32 %v4697_v51, %v4696_v29 }
 0x725   : >>> { %v4722_v6 = vsel %vm1055_vm6, %v4659_v2, %v4721_v34  ;;  %v4517_v42 = vadd.f32 %v4516_v40, %v4515_v28  ;;  %v4479_v8 = vrot.slane %v4478_v9, 1  ;;  %v4530_v1 = vadd.f32 %v4529_v57, %v4528_v50 }
 0x726   : >>> { %v4465_v62 = vadd.f32 %v9923_v22, %v9128_v15  ;;  %v4723_v13 = vsel %vm1057_vm7, %v4672_v61, %v4722_v6  ;;  %v4555_v0 = vrot.slane %v4554_v3, 2  ;;  %v4492_v53 = vrot.slane %v4491_v25, 1 }
 0x727   : >>> { %v4724_v12 = vsel %vm1059_vm8, %v4685_v43, %v4723_v13  ;;  %v4543_v11 = vadd.f32 %v4542_v31, %v4541_v5  ;;  %v4505_v37 = vrot.slane %v4504_v30, 1  ;;  %v4518_v7 = vrot.slane %v4517_v42, 1 }
 0x728   : >>> { %v4725_v18 = vsel %vm1061_vm9, %v4698_v16, %v4724_v12  ;;  %v4466_v24 = vrot.slane %v4465_v62, 1  ;;  %v4480_v26 = vadd.f32 %v4479_v8, %v4478_v9  ;;  %v4531_v44 = vrot.slane %v4530_v1, 1 }
 0x729   : >>> { %v4726_v33 = vsel %vm1063_vm10, %v4711_v4, %v4725_v18  ;;  %v4556_v23 = vadd.f32 %v4555_v0, %v4554_v3  ;;  %v4493_v28 = vadd.f32 %v4492_v53, %v4491_v25  ;;  %v4544_v14 = vrot.slane %v4543_v11, 1 }
 0x72a   : >>> { %v4728_v15 = vadd.f32 %v4726_v33, %v7583_v60  ;;  %v4467_v2 = vadd.f32 %v4466_v24, %v4465_v62  ;;  %v4506_v50 = vadd.f32 %v4505_v37, %v4504_v30  ;;  %v4519_v10 = vadd.f32 %v4518_v7, %v4517_v42  ;;  %v9925_v24 = vld [vmem:[#allocation42_spill] sm:$0xff] }
 0x72b   : >>> { %v4532_v63 = vadd.f32 %v4531_v44, %v4530_v1  ;;  %v4557_v5 = vrot.slane %v4556_v23, 1  ;;  %v4545_v27 = vadd.f32 %v4544_v14, %v4543_v11  ;;  %v4421_v34 = vmul.f32 %v9878_v20, %v8938_v41  ;;  %v9924_v11 = vld [vmem:[#allocation37_spill] sm:$0xff] }
 0x72c   : >>> { %6821 = vrcp.f32 %v4728_v15  ;;  %v4567_v61 = vsel %vm1051_vm4, %v4480_v26, %v4467_v2 }
 0x72d   : >>> { %v4568_v29 = vsel %vm1053_vm5, %v4493_v28, %v4567_v61  ;;  %v4558_v43 = vadd.f32 %v4557_v5, %v4556_v23  ;;  %v4422_v6 = vadd.f32 %v4421_v34, %v7580_v52 }
 0x72e   : >>> { %v4569_v36 = vsel %vm1055_vm6, %v4506_v50, %v4568_v29 }
 0x72f   : >>> { %v4570_v40 = vsel %vm1057_vm7, %v4519_v10, %v4569_v36 }
 0x730   : >>> { %v4571_v9 = vsel %vm1059_vm8, %v4532_v63, %v4570_v40 }
 0x731   : >>> { %v4572_v57 = vsel %vm1061_vm9, %v4545_v27, %v4571_v9 }
 0x732   : >>> { %v4573_v25 = vsel %vm1063_vm10, %v4558_v43, %v4572_v57 }
 0x733   : >>> { %v4575_v31 = vadd.f32 %v4573_v25, %v4422_v6 }
 0x736   : >>> { %v6822_v3 = vpop.eup %6821 }
 0x737   : >>> { %v4730_v51 = vmul.f32 %v6822_v3, %v4728_v15  ;;  %v9926_v15 = vld [vmem:[#allocation41_spill] sm:$0xff] }
 0x739   : >>> { %v4731_v4 = vsub.f32 2.0, %v4730_v51 }
 0x73b   : >>> { %v4732_v22 = vmul.f32 %v6822_v3, %v4731_v4 }
 0x73d   : >>> { %v9266_v62 = vmul.f32 %v4732_v22, %v4575_v31 }
 0x73f   : >>> { %v4737_v30 = vrot.slane %v9266_v62, %v7494_v46  ;;  %v4756_v41 = vrot.slane %v9266_v62, %v7499_v49  ;;  %v4775_v13 = vrot.slane %v9266_v62, %v7492_v45  ;;  %v4794_v16 = vrot.slane %v9266_v62, %v7497_v48 }
 0x740   : >>> { %v4813_v42 = vrot.slane %v9266_v62, %v7507_v55  ;;  %v4832_v12 = vrot.slane %v9266_v62, %v7505_v54  ;;  %v4851_v8 = vrot.slane %v9266_v62, %v7513_v59  ;;  %v4870_v1 = vrot.slane %v9266_v62, %v7511_v58 }
 0x741   : >>> { %4743 = vbcast.lane.b32.xlu1 %v4737_v30, 264  ;;  %4739 = vbcast.lane.b32.xlu0 %v4737_v30, 256 }
 0x745   : >>> { %4762 = vbcast.lane.b32.xlu1 %v4756_v41, 264  ;;  %4758 = vbcast.lane.b32.xlu0 %v4756_v41, 256 }
 0x749   : >>> { %4781 = vbcast.lane.b32.xlu1 %v4775_v13, 264  ;;  %4777 = vbcast.lane.b32.xlu0 %v4775_v13, 256 }
 0x74d   : >>> { %4766 = vbcast.lane.b32.xlu1 %v4756_v41, 272  ;;  %4747 = vbcast.lane.b32.xlu0 %v4737_v30, 272 }
 0x751   : >>> { %4800 = vbcast.lane.b32.xlu1 %v4794_v16, 264  ;;  %4796 = vbcast.lane.b32.xlu0 %v4794_v16, 256 }
 0x755   : >>> { %4815 = vbcast.lane.b32.xlu1 %v4813_v42, 256  ;;  %4785 = vbcast.lane.b32.xlu0 %v4775_v13, 272 }
 0x759   : >>> { %4751 = vbcast.lane.b32.xlu1 %v4737_v30, 280  ;;  %4819 = vbcast.lane.b32.xlu0 %v4813_v42, 264 }
 0x75d   : >>> { %4804 = vbcast.lane.b32.xlu1 %v4794_v16, 272  ;;  %4770 = vbcast.lane.b32.xlu0 %v4756_v41, 280 }
 0x761   : >>> { %4838 = vbcast.lane.b32.xlu1 %v4832_v12, 264  ;;  %4834 = vbcast.lane.b32.xlu0 %v4832_v12, 256 }
 0x765   : >>> { %4823 = vbcast.lane.b32.xlu1 %v4813_v42, 272  ;;  %4789 = vbcast.lane.b32.xlu0 %v4775_v13, 280 }
 0x769   : >>> { %4857 = vbcast.lane.b32.xlu1 %v4851_v8, 264  ;;  %4853 = vbcast.lane.b32.xlu0 %v4851_v8, 256 }
 0x76d   : >>> { %4842 = vbcast.lane.b32.xlu1 %v4832_v12, 272  ;;  %4808 = vbcast.lane.b32.xlu0 %v4794_v16, 280 }
 0x771   : >>> { %4876 = vbcast.lane.b32.xlu1 %v4870_v1, 264  ;;  %4872 = vbcast.lane.b32.xlu0 %v4870_v1, 256 }
 0x775   : >>> { %4861 = vbcast.lane.b32.xlu1 %v4851_v8, 272  ;;  %4827 = vbcast.lane.b32.xlu0 %v4813_v42, 280 }
 0x779   : >>> { %4880 = vbcast.lane.b32.xlu1 %v4870_v1, 272  ;;  %4846 = vbcast.lane.b32.xlu0 %v4832_v12, 280 }
 0x77d   : >>> { %4884 = vbcast.lane.b32.xlu1 %v4870_v1, 280  ;;  %4865 = vbcast.lane.b32.xlu0 %v4851_v8, 280 }
 0x7b3   : >>> { %v4744_v0 = vpop.permute.xlu1 %4743  ;;  %v4740_v18 = vpop.permute.xlu0 %4739 }
 0x7b4   : >>> { %v4887_v53 = vsub.f32 %v4744_v0, %v9879_v19  ;;  %v4886_v33 = vsub.f32 %v4740_v18, %v9924_v11 }
 0x7b6   : >>> { %v4919_v37 = vmul.f32 %v4887_v53, %v9925_v24  ;;  %v4918_v7 = vmul.f32 %v4886_v33, %v9926_v15 }
 0x7b7   : >>> { %v4763_v26 = vpop.permute.xlu1 %4762  ;;  %v4759_v44 = vpop.permute.xlu0 %4758 }
 0x7b8   : >>> { %v5980_v23 = vmul.f32 -1.442695, %v4919_v37  ;;  %v4891_v28 = vsub.f32 %v4763_v26, %v9879_v19  ;;  %v4890_v14 = vsub.f32 %v4759_v44, %v9924_v11  ;;  %v5979_v2 = vmul.f32 -1.442695, %v4918_v7 }
 0x7ba   : >>> { %v4923_v50 = vmul.f32 %v4891_v28, %v9925_v24  ;;  %6823 = vpow2.f32 %v5980_v23  ;;  %v4922_v10 = vmul.f32 %v4890_v14, %v9926_v15 }
 0x7bb   : >>> { %v4782_v61 = vpop.permute.xlu1 %4781  ;;  %v4778_v63 = vpop.permute.xlu0 %4777  ;;  %6825 = vpow2.f32 %v5979_v2 }
 0x7bc   : >>> { %v4895_v5 = vsub.f32 %v4782_v61, %v9879_v19  ;;  %v4894_v29 = vsub.f32 %v4778_v63, %v9924_v11  ;;  %v5984_v27 = vmul.f32 -1.442695, %v4923_v50  ;;  %v5983_v9 = vmul.f32 -1.442695, %v4922_v10 }
 0x7be   : >>> { %v4927_v36 = vmul.f32 %v4895_v5, %v9925_v24  ;;  %v4926_v40 = vmul.f32 %v4894_v29, %v9926_v15  ;;  %6827 = vpow2.f32 %v5984_v27 }
 0x7bf   : >>> { %v4767_v43 = vpop.permute.xlu1 %4766  ;;  %v4748_v34 = vpop.permute.xlu0 %4747  ;;  %6829 = vpow2.f32 %v5983_v9 }
 0x7c0   : >>> { %v4892_v57 = vsub.f32 %v4767_v43, %v9883_v39  ;;  %v5988_v3 = vmul.f32 -1.442695, %v4927_v36  ;;  %v4888_v51 = vsub.f32 %v4748_v34, %v9883_v39  ;;  %v5987_v25 = vmul.f32 -1.442695, %v4926_v40 }
 0x7c2   : >>> { %v4924_v6 = vmul.f32 %v4892_v57, %v9884_v35  ;;  %6831 = vpow2.f32 %v5988_v3  ;;  %v4920_v41 = vmul.f32 %v4888_v51, %v9884_v35 }
 0x7c3   : >>> { %v4801_v4 = vpop.permute.xlu1 %4800  ;;  %v4797_v31 = vpop.permute.xlu0 %4796  ;;  %6833 = vpow2.f32 %v5987_v25 }
 0x7c4   : >>> { %v4899_v22 = vsub.f32 %v4801_v4, %v9879_v19  ;;  %v6824_v30 = vpop.eup %6823  ;;  %v4898_v13 = vsub.f32 %v4797_v31, %v9924_v11  ;;  %v5985_v16 = vmul.f32 -1.442695, %v4924_v6  ;;  %v5981_v18 = vmul.f32 -1.442695, %v4920_v41 }
 0x7c5   : >>> { %v6826_v42 = vpop.eup %6825  ;;  %v5047_v0 = vadd.f32 1.0, %v6824_v30 }
 0x7c6   : >>> { %v4931_v12 = vmul.f32 %v4899_v22, %v9925_v24  ;;  %v4930_v53 = vmul.f32 %v4898_v13, %v9926_v15  ;;  %v5046_v37 = vadd.f32 1.0, %v6826_v42  ;;  %6835 = vpow2.f32 %v5985_v16 }
 0x7c7   : >>> { %v4816_v8 = vpop.permute.xlu1 %4815  ;;  %v4786_v1 = vpop.permute.xlu0 %4785  ;;  %6837 = vrcp.f32 %v5047_v0 }
 0x7c8   : >>> { %v4902_v33 = vsub.f32 %v4816_v8, %v9924_v11  ;;  %v5992_v7 = vmul.f32 -1.442695, %v4931_v12  ;;  %v6828_v44 = vpop.eup %6827  ;;  %v4896_v23 = vsub.f32 %v4786_v1, %v9883_v39  ;;  %6839 = vpow2.f32 %v5981_v18 }
 0x7c9   : >>> { %v6830_v14 = vpop.eup %6829  ;;  %v5991_v2 = vmul.f32 -1.442695, %v4930_v53  ;;  %6841 = vrcp.f32 %v5046_v37  ;;  %v5051_v63 = vadd.f32 1.0, %v6828_v44 }
 0x7ca   : >>> { %v4934_v50 = vmul.f32 %v4902_v33, %v9926_v15  ;;  %6843 = vpow2.f32 %v5992_v7  ;;  %v5050_v29 = vadd.f32 1.0, %v6830_v14  ;;  %v4928_v27 = vmul.f32 %v4896_v23, %v9884_v35  ;;  %v9927_v7 = vld [vmem:[#allocation33_spill] sm:$0xff] }
 0x7cb   : >>> { %v4752_v26 = vpop.permute.xlu1 %4751  ;;  %v4820_v28 = vpop.permute.xlu0 %4819  ;;  %6845 = vpow2.f32 %v5991_v2 }
 0x7cc   : >>> { %v4889_v10 = vsub.f32 %v4752_v26, %v9885_v17  ;;  %v6832_v61 = vpop.eup %6831  ;;  %v4903_v36 = vsub.f32 %v4820_v28, %v9879_v19  ;;  %v5995_v40 = vmul.f32 -1.442695, %v4934_v50  ;;  %6847 = vrcp.f32 %v5051_v63 }
 0x7cd   : >>> { %v6834_v5 = vpop.eup %6833  ;;  %v5055_v43 = vadd.f32 1.0, %v6832_v61  ;;  %6849 = vrcp.f32 %v5050_v29  ;;  %v5989_v25 = vmul.f32 -1.442695, %v4928_v27 }
 0x7ce   : >>> { %v4921_v9 = vmul.f32 %v4889_v10, %v9886_v56  ;;  %v5054_v3 = vadd.f32 1.0, %v6834_v5  ;;  %v4935_v6 = vmul.f32 %v4903_v36, %v9925_v24  ;;  %6851 = vpow2.f32 %v5995_v40 }
 0x7cf   : >>> { %v4805_v34 = vpop.permute.xlu1 %4804  ;;  %v4771_v57 = vpop.permute.xlu0 %4770  ;;  %6853 = vrcp.f32 %v5055_v43 }
 0x7d0   : >>> { %v6836_v51 = vpop.eup %6835  ;;  %v5982_v4 = vmul.f32 -1.442695, %v4921_v9  ;;  %v4893_v31 = vsub.f32 %v4771_v57, %v9885_v17  ;;  %6855 = vrcp.f32 %v5054_v3  ;;  %v5996_v16 = vmul.f32 -1.442695, %v4935_v6 }
 0x7d1   : >>> { %v6838_v22 = vpop.eup %6837  ;;  %v5052_v41 = vadd.f32 1.0, %v6836_v51  ;;  %6857 = vpow2.f32 %v5989_v25  ;;  %v4900_v42 = vsub.f32 %v4805_v34, %v9883_v39 }
 0x7d2   : >>> { %v6840_v30 = vpop.eup %6839  ;;  %6859 = vpow2.f32 %v5982_v4  ;;  %v4925_v0 = vmul.f32 %v4893_v31, %v9886_v56  ;;  %v5145_v33 = vmul.f32 %v6838_v22, %v9870_v38  ;;  %v5298_v37 = vmul.f32 %v6838_v22, %v9871_v21 }
 0x7d3   : >>> { %v6842_v13 = vpop.eup %6841  ;;  %v4839_v12 = vpop.permute.xlu1 %4838  ;;  %v5048_v18 = vadd.f32 1.0, %v6840_v30  ;;  %6861 = vrcp.f32 %v5052_v41  ;;  %v4932_v23 = vmul.f32 %v4900_v42, %v9884_v35 }
 0x7d4   : >>> { %v9314_v8 = vpop.permute.xlu0 %4834  ;;  %v6844_v1 = vpop.eup %6843  ;;  %v5144_v26 = vmul.f32 %v6842_v13, %v9927_v7  ;;  %6863 = vpow2.f32 %v5996_v16  ;;  %v5297_v14 = vmul.f32 %v6842_v13, %v9869_v47  ;;  %v5986_v2 = vmul.f32 -1.442695, %v4925_v0 }
 0x7d5   : >>> { %v6846_v53 = vpop.eup %6845  ;;  %v5059_v44 = vadd.f32 1.0, %v6844_v1  ;;  %6865 = vrcp.f32 %v5048_v18  ;;  %v5177_v29 = vsel %vm916_vm2, %v5145_v33, 0.0  ;;  %v5330_v36 = vsel %vm916_vm2, %v5298_v37, 0.0 }
 0x7d6   : >>> { %v6848_v28 = vpop.eup %6847  ;;  %v5058_v10 = vadd.f32 1.0, %v6846_v53  ;;  %v5176_v40 = vsel %vm916_vm2, %v5144_v26, 0.0  ;;  %v5993_v9 = vmul.f32 -1.442695, %v4932_v23  ;;  %v5329_v34 = vsel %vm916_vm2, %v5297_v14, 0.0 }
 0x7d7   : >>> { %v6850_v50 = vpop.eup %6849  ;;  %v9322_v61 = vpop.permute.xlu1 %4823  ;;  %6867 = vrcp.f32 %v5059_v44  ;;  %v5149_v57 = vmul.f32 %v6848_v28, %v9870_v38  ;;  %v5302_v3 = vmul.f32 %v6848_v28, %v9871_v21  ;;  %v4907_v4 = vsub.f32 %v4839_v12, %v9879_v19 }
 0x7d8   : >>> { %v4790_v63 = vpop.permute.xlu0 %4789  ;;  %v6852_v5 = vpop.eup %6851  ;;  %6869 = vpow2.f32 %v5986_v2  ;;  %v5148_v25 = vmul.f32 %v6850_v50, %v9927_v7  ;;  %v9332_v22 = vadd.f32 %v5177_v29, %v5176_v40  ;;  %v5301_v30 = vmul.f32 %v6850_v50, %v9869_v47  ;;  %v9928_v40 = vld [vmem:[#allocation35_spill] sm:$0xff] }
 0x7d9   : >>> { %v6854_v27 = vpop.eup %6853  ;;  %6871 = vrcp.f32 %v5058_v10  ;;  %v5062_v6 = vadd.f32 1.0, %v6852_v5  ;;  %v4897_v41 = vsub.f32 %v4790_v63, %v9885_v17  ;;  %v4906_v42 = vsub.f32 %v9314_v8, %v9924_v11 }
 0x7da   : >>> { %v6856_v43 = vpop.eup %6855  ;;  %v5153_v13 = vmul.f32 %v6854_v27, %v9870_v38  ;;  %6873 = vpow2.f32 %v5993_v9  ;;  %v9342_v12 = vadd.f32 %v5330_v36, %v5329_v34  ;;  %v5190_v53 = vsel %vm916_vm2, %v5149_v57, 0.0  ;;  %v9929_v34 = vld [vmem:[#allocation31_spill] sm:$0xff] }
 0x7db   : >>> { %v6858_v51 = vpop.eup %6857  ;;  %v5152_v16 = vmul.f32 %v6856_v43, %v9927_v7  ;;  %v4858_v1 = vpop.permute.xlu1 %4857  ;;  %v5343_v33 = vsel %vm916_vm2, %v5302_v3, 0.0  ;;  %v5189_v44 = vsel %vm916_vm2, %v5148_v25, 0.0  ;;  %6875 = vrcp.f32 %v5062_v6 }
 0x7dc   : >>> { %v6860_v31 = vpop.eup %6859  ;;  %v9340_v0 = vpop.permute.xlu0 %4853  ;;  %v5056_v37 = vadd.f32 1.0, %v6858_v51  ;;  %v4939_v28 = vmul.f32 %v4907_v4, %v9925_v24  ;;  %v5342_v8 = vsel %vm916_vm2, %v5301_v30, 0.0  ;;  %v5306_v14 = vmul.f32 %v6854_v27, %v9871_v21 }
 0x7dd   : >>> { %v6862_v18 = vpop.eup %6861  ;;  %v5049_v23 = vadd.f32 1.0, %v6860_v31  ;;  %v5305_v2 = vmul.f32 %v6856_v43, %v9869_v47  ;;  %v4929_v50 = vmul.f32 %v4897_v41, %v9886_v56  ;;  %v5203_v63 = vsel %vm916_vm2, %v5153_v13, 0.0 }
 0x7de   : >>> { %v6864_v26 = vpop.eup %6863  ;;  %v5202_v5 = vsel %vm916_vm2, %v5152_v16, 0.0  ;;  %v4938_v29 = vmul.f32 %v4906_v42, %v9926_v15  ;;  %v4904_v36 = vsub.f32 %v9322_v61, %v9883_v39  ;;  %v5150_v9 = vmul.f32 %v6862_v18, %v9928_v40 }
 0x7df   : >>> { %v6866_v10 = vpop.eup %6865  ;;  %v5303_v57 = vmul.f32 %v6862_v18, %v9929_v34  ;;  %6877 = vrcp.f32 %v5056_v37  ;;  %v5063_v27 = vadd.f32 1.0, %v6864_v26  ;;  %v5191_v43 = vadd.f32 %v5190_v53, %v5189_v44  ;;  %v4843_v6 = vpop.permute.xlu1 %4842 }
 0x7e0   : >>> { %v5344_v51 = vadd.f32 %v5343_v33, %v5342_v8  ;;  %6879 = vrcp.f32 %v5049_v23  ;;  %v6000_v25 = vmul.f32 -1.442695, %v4939_v28  ;;  %v9359_v4 = vpop.permute.xlu0 %4808  ;;  %v5356_v30 = vsel %vm916_vm2, %v5306_v14, 0.0 }
 0x7e1   : >>> { %v6868_v3 = vpop.eup %6867  ;;  %v5355_v41 = vsel %vm916_vm2, %v5305_v2, 0.0  ;;  %v5146_v61 = vmul.f32 %v6866_v10, %v9928_v40  ;;  %v5990_v13 = vmul.f32 -1.442695, %v4929_v50  ;;  %v9364_v42 = vadd.f32 %v5203_v63, %v5202_v5 }
 0x7e2   : >>> { %v6870_v31 = vpop.eup %6869  ;;  %v5999_v18 = vmul.f32 -1.442695, %v4938_v29  ;;  %v4936_v53 = vmul.f32 %v4904_v36, %v9884_v35  ;;  %v4911_v33 = vsub.f32 %v4858_v1, %v9879_v19  ;;  %v5192_v37 = vsel %vm916_vm2, %v5150_v9, 0.0 }
 0x7e3   : >>> { %v6872_v16 = vpop.eup %6871  ;;  %v5345_v26 = vsel %vm916_vm2, %v5303_v57, 0.0  ;;  %v5299_v44 = vmul.f32 %v6866_v10, %v9929_v34  ;;  %6881 = vrcp.f32 %v5063_v27  ;;  %v5157_v28 = vmul.f32 %v6868_v3, %v9870_v38  ;;  %v4877_v36 = vpop.permute.xlu1 %4876 }
 0x7e4   : >>> { %v6874_v23 = vpop.eup %6873  ;;  %v5310_v8 = vmul.f32 %v6868_v3, %v9871_v21  ;;  %v5053_v14 = vadd.f32 1.0, %v6870_v31  ;;  %6883 = vpow2.f32 %v6000_v25  ;;  %v5179_v2 = vsel %vm916_vm2, %v5146_v61, 0.0  ;;  %v4873_v9 = vpop.permute.xlu0 %4872 }
 0x7e5   : >>> { %v5156_v50 = vmul.f32 %v6872_v16, %v9927_v7  ;;  %6885 = vpow2.f32 %v5990_v13  ;;  %v4910_v1 = vsub.f32 %v9340_v0, %v9924_v11  ;;  %v6876_v63 = vpop.eup %6875  ;;  %v5309_v5 = vmul.f32 %v6872_v16, %v9869_v47 }
 0x7e6   : >>> { %6887 = vpow2.f32 %v5999_v18  ;;  %v5997_v10 = vmul.f32 -1.442695, %v4936_v53  ;;  %v4943_v29 = vmul.f32 %v4911_v33, %v9925_v24  ;;  %v9379_v57 = vadd.f32 %v5356_v30, %v5355_v41 }
 0x7e7   : >>> { %v9381_v27 = vadd.f32 %v5192_v37, %v5191_v43  ;;  %v5060_v3 = vadd.f32 1.0, %v6874_v23  ;;  %v4908_v25 = vsub.f32 %v4843_v6, %v9883_v39  ;;  %v9384_v31 = vadd.f32 %v5345_v26, %v5344_v51 }
 0x7e8   : >>> { %v9387_v0 = vadd.f32 %v5179_v2, %v9332_v22  ;;  %v5332_v61 = vsel %vm916_vm2, %v5299_v44, 0.0  ;;  %6889 = vrcp.f32 %v5053_v14  ;;  %v5216_v16 = vsel %vm916_vm2, %v5157_v28, 0.0  ;;  %v4828_v14 = vpop.permute.xlu0 %4827 }
 0x7e9   : >>> { %v6878_v13 = vpop.eup %6877  ;;  %v5215_v18 = vsel %vm916_vm2, %v5156_v50, 0.0  ;;  %v5160_v30 = vmul.f32 %v6876_v63, %v9927_v7  ;;  %v4942_v43 = vmul.f32 %v4910_v1, %v9926_v15  ;;  %v5369_v6 = vsel %vm916_vm2, %v5310_v8, 0.0  ;;  %v4862_v8 = vpop.permute.xlu1 %4861 }
 0x7ea   : >>> { %v6880_v41 = vpop.eup %6879  ;;  %v5368_v51 = vsel %vm916_vm2, %v5309_v5, 0.0  ;;  %6891 = vpow2.f32 %v5997_v10  ;;  %v6004_v22 = vmul.f32 -1.442695, %v4943_v29  ;;  %v5333_v53 = vadd.f32 %v5332_v61, %v9342_v12 }
 0x7eb   : >>> { %v5313_v33 = vmul.f32 %v6876_v63, %v9869_v47  ;;  %6893 = vrcp.f32 %v5060_v3  ;;  %v4940_v37 = vmul.f32 %v4908_v25, %v9884_v35  ;;  %v9399_v26 = vadd.f32 %v5216_v16, %v5215_v18 }
 0x7ec   : >>> { %v5154_v44 = vmul.f32 %v6878_v13, %v9928_v40  ;;  %v4901_v23 = vsub.f32 %v9359_v4, %v9885_v17  ;;  %v4915_v28 = vsub.f32 %v4877_v36, %v9879_v19  ;;  %v9405_v50 = vadd.f32 %v5369_v6, %v5368_v51 }
 0x7ed   : >>> { %v6882_v2 = vpop.eup %6881  ;;  %v5228_v12 = vsel %vm916_vm2, %v5160_v30, 0.0  ;;  %v5300_v1 = vmul.f32 %v6880_v41, %v9874_v32  ;;  %v6003_v63 = vmul.f32 -1.442695, %v4942_v43  ;;  %6895 = vpow2.f32 %v6004_v22  ;;  %v9930_v30 = vld [vmem:[#allocation36_spill] sm:$0xff] }
 0x7ee   : >>> { %v6884_v5 = vpop.eup %6883  ;;  %v6001_v10 = vmul.f32 -1.442695, %v4940_v37  ;;  %v4933_v29 = vmul.f32 %v4901_v23, %v9886_v56  ;;  %v4947_v3 = vmul.f32 %v4915_v28, %v9925_v24  ;;  %v5307_v19 = vmul.f32 %v6878_v13, %v9929_v34  ;;  %v4881_v28 = vpop.permute.xlu1 %4880 }
 0x7ef   : >>> { %v6886_v4 = vpop.eup %6885  ;;  %v4914_v36 = vsub.f32 %v4873_v9, %v9924_v11  ;;  %v4912_v25 = vsub.f32 %v4862_v8, %v9883_v39  ;;  %v4905_v61 = vsub.f32 %v4828_v14, %v9885_v17  ;;  %v5205_v18 = vsel %vm916_vm2, %v5154_v44, 0.0  ;;  %v4847_v14 = vpop.permute.xlu0 %4846 }
 0x7f0   : >>> { %v6888_v16 = vpop.eup %6887  ;;  %v5147_v43 = vmul.f32 %v6880_v41, %v9930_v30  ;;  %v5057_v6 = vadd.f32 1.0, %v6886_v4  ;;  %v5994_v51 = vmul.f32 -1.442695, %v4933_v29  ;;  %6897 = vpow2.f32 %v6003_v63 }
 0x7f1   : >>> { %v6008_v22 = vmul.f32 -1.442695, %v4947_v3  ;;  %v4946_v24 = vmul.f32 %v4914_v36, %v9926_v15  ;;  %v4944_v37 = vmul.f32 %v4912_v25, %v9884_v35  ;;  %v5334_v11 = vsel %vm916_vm2, %v5300_v1, 0.0 }
 0x7f2   : >>> { %v6890_v13 = vpop.eup %6889  ;;  %v5067_v9 = vadd.f32 1.0, %v6884_v5  ;;  %6899 = vpow2.f32 %v6001_v10  ;;  %v4937_v23 = vmul.f32 %v4905_v61, %v9886_v56  ;;  %v5358_v44 = vsel %vm916_vm2, %v5307_v19, 0.0 }
 0x7f3   : >>> { %v5161_v41 = vmul.f32 %v6882_v2, %v9870_v38  ;;  %v5066_v8 = vadd.f32 1.0, %v6888_v16  ;;  %6901 = vrcp.f32 %v5057_v6  ;;  %v5181_v15 = vsel %vm916_vm2, %v5147_v43, 0.0 }
 0x7f4   : >>> { %v6892_v63 = vpop.eup %6891  ;;  %v5314_v29 = vmul.f32 %v6882_v2, %v9871_v21  ;;  %6903 = vpow2.f32 %v5994_v51  ;;  %v6007_v3 = vmul.f32 -1.442695, %v4946_v24  ;;  %v5335_v5 = vadd.f32 %v5334_v11, %v5333_v53 }
 0x7f5   : >>> { %v6894_v1 = vpop.eup %6893  ;;  %v5304_v10 = vmul.f32 %v6890_v13, %v9874_v32  ;;  %6905 = vpow2.f32 %v6008_v22  ;;  %v6005_v4 = vmul.f32 -1.442695, %v4944_v37  ;;  %v5381_v19 = vsel %vm916_vm2, %v5313_v33, 0.0  ;;  %v4885_v33 = vpop.permute.xlu1 %4884 }
 0x7f6   : >>> { %6907 = vrcp.f32 %v5067_v9  ;;  %v5998_v36 = vmul.f32 -1.442695, %v4937_v23  ;;  %v4916_v25 = vsub.f32 %v4881_v28, %v9883_v39  ;;  %v9429_v61 = vadd.f32 %v5205_v18, %v9364_v42  ;;  %v4866_v18 = vpop.permute.xlu0 %4865 }
 0x7f7   : >>> { %v5229_v16 = vsel %vm916_vm2, %v5161_v41, 0.0  ;;  %6909 = vrcp.f32 %v5066_v8  ;;  %v5064_v2 = vadd.f32 1.0, %v6892_v63  ;;  %v6896_v43 = vpop.eup %6895  ;;  %v9433_v53 = vadd.f32 %v5358_v44, %v9379_v57 }
 0x7f8   : >>> { %v5182_v6 = vadd.f32 %v5181_v15, %v9387_v0  ;;  %v5382_v51 = vsel %vm916_vm2, %v5314_v29, 0.0  ;;  %6911 = vpow2.f32 %v6007_v3  ;;  %v5336_v22 = vrot.slane %v5335_v5, 4 }
 0x7f9   : >>> { %v5158_v39 = vmul.f32 %v6894_v1, %v9928_v40  ;;  %v5347_v42 = vsel %vm916_vm2, %v5304_v10, 0.0  ;;  %6913 = vpow2.f32 %v6005_v4  ;;  %v9439_v24 = vadd.f32 %v5229_v16, %v5228_v12 }
 0x7fa   : >>> { %6915 = vpow2.f32 %v5998_v36  ;;  %v4948_v37 = vmul.f32 %v4916_v25, %v9884_v35  ;;  %v4909_v57 = vsub.f32 %v4847_v14, %v9885_v17  ;;  %v6898_v11 = vpop.eup %6897  ;;  %v5311_v0 = vmul.f32 %v6894_v1, %v9929_v34 }
 0x7fb   : >>> { %6917 = vrcp.f32 %v5064_v2  ;;  %v5071_v9 = vadd.f32 1.0, %v6896_v43  ;;  %v4917_v23 = vsub.f32 %v4885_v33, %v9885_v17  ;;  %v5348_v44 = vadd.f32 %v5347_v42, %v9384_v31 }
 0x7fc   : >>> { %v6900_v28 = vpop.eup %6899  ;;  %v6009_v41 = vmul.f32 -1.442695, %v4948_v37  ;;  %v4941_v8 = vmul.f32 %v4909_v57, %v9886_v56  ;;  %v4913_v12 = vsub.f32 %v4866_v18, %v9885_v17  ;;  %v5183_v15 = vrot.slane %v5182_v6, 4 }
 0x7fd   : >>> { %v6902_v63 = vpop.eup %6901  ;;  %v5337_v35 = vadd.f32 %v5336_v22, %v5335_v5  ;;  %v5218_v14 = vsel %vm916_vm2, %v5158_v39, 0.0  ;;  %v5151_v29 = vmul.f32 %v6890_v13, %v9930_v30  ;;  %v5070_v1 = vadd.f32 1.0, %v6898_v11 }
 0x7fe   : >>> { %v6904_v3 = vpop.eup %6903  ;;  %6919 = vpow2.f32 %v6009_v41  ;;  %v6002_v10 = vmul.f32 -1.442695, %v4941_v8  ;;  %v4949_v4 = vmul.f32 %v4917_v23, %v9886_v56  ;;  %v5371_v31 = vsel %vm916_vm2, %v5311_v0, 0.0 }
 0x7ff   : >>> { %v6906_v36 = vpop.eup %6905  ;;  %6921 = vrcp.f32 %v5071_v9  ;;  %v5068_v25 = vadd.f32 1.0, %v6900_v28  ;;  %v5061_v16 = vadd.f32 1.0, %v6904_v3  ;;  %v5349_v2 = vrot.slane %v5348_v44, 4 }
 0x800   : >>> { %v6908_v17 = vpop.eup %6907  ;;  %v5308_v5 = vmul.f32 %v6902_v63, %v9874_v32  ;;  %6923 = vpow2.f32 %v6002_v10  ;;  %v4945_v43 = vmul.f32 %v4913_v12, %v9886_v56  ;;  %v9454_v33 = vadd.f32 %v5382_v51, %v5381_v19 }
 0x801   : >>> { %v6910_v13 = vpop.eup %6909  ;;  %v5194_v22 = vsel %vm916_vm2, %v5151_v29, 0.0  ;;  %6925 = vrcp.f32 %v5061_v16  ;;  %v5075_v39 = vadd.f32 1.0, %v6906_v36  ;;  %v9457_v18 = vadd.f32 %v5183_v15, %v5182_v6 }
 0x802   : >>> { %v6912_v42 = vpop.eup %6911  ;;  %v5155_v37 = vmul.f32 %v6902_v63, %v9930_v30  ;;  %6927 = vrcp.f32 %v5070_v1  ;;  %v6010_v57 = vmul.f32 -1.442695, %v4949_v4  ;;  %v5338_v0 = vrot.slane %v5337_v35, 2 }
 0x803   : >>> { %v6914_v11 = vpop.eup %6913  ;;  %v9461_v9 = vadd.f32 %v5218_v14, %v9399_v26  ;;  %v9464_v56 = vadd.f32 %v5371_v31, %v9405_v50  ;;  %6929 = vrcp.f32 %v5068_v25  ;;  %v5195_v51 = vadd.f32 %v5194_v22, %v9381_v27 }
 0x804   : >>> { %v6916_v19 = vpop.eup %6915  ;;  %v5350_v23 = vadd.f32 %v5349_v2, %v5348_v44  ;;  %v5360_v6 = vsel %vm916_vm2, %v5308_v5, 0.0  ;;  %v6006_v28 = vmul.f32 -1.442695, %v4945_v43  ;;  %v5165_v8 = vmul.f32 %v6908_v17, %v9870_v38 }
 0x805   : >>> { %v6918_v41 = vpop.eup %6917  ;;  %6931 = vrcp.f32 %v5075_v39  ;;  %v5074_v12 = vadd.f32 1.0, %v6912_v42  ;;  %v5065_v63 = vadd.f32 1.0, %v6916_v19  ;;  %v5318_v26 = vmul.f32 %v6908_v17, %v9871_v21 }
 0x806   : >>> { %v5164_v15 = vmul.f32 %v6910_v13, %v9927_v7  ;;  %v5207_v50 = vsel %vm916_vm2, %v5155_v37, 0.0  ;;  %6933 = vpow2.f32 %v6010_v57  ;;  %v5317_v14 = vmul.f32 %v6910_v13, %v9869_v47 }
 0x807   : >>> { %v5361_v27 = vadd.f32 %v5360_v6, %v9433_v53  ;;  %v5072_v44 = vadd.f32 1.0, %v6914_v11  ;;  %6935 = vrcp.f32 %v5065_v63  ;;  %v9474_v3 = vadd.f32 %v5338_v0, %v5337_v35 }
 0x808   : >>> { %v6920_v29 = vpop.eup %6919  ;;  %v5196_v1 = vrot.slane %v5195_v51, 4  ;;  %v5162_v10 = vmul.f32 %v6918_v41, %v9928_v40  ;;  %6937 = vpow2.f32 %v6006_v28  ;;  %v5351_v36 = vrot.slane %v5350_v23, 2 }
 0x809   : >>> { %v6922_v4 = vpop.eup %6921  ;;  %v5315_v31 = vmul.f32 %v6918_v41, %v9929_v34  ;;  %v5208_v25 = vadd.f32 %v5207_v50, %v9429_v61  ;;  %6939 = vrcp.f32 %v5074_v12  ;;  %v5242_v17 = vsel %vm916_vm2, %v5165_v8, 0.0 }
 0x80a   : >>> { %v6924_v16 = vpop.eup %6923  ;;  %v5395_v53 = vsel %vm916_vm2, %v5318_v26, 0.0  ;;  %v5241_v2 = vsel %vm916_vm2, %v5164_v15, 0.0  ;;  %v5076_v35 = vadd.f32 1.0, %v6920_v29  ;;  %v5394_v43 = vsel %vm916_vm2, %v5317_v14, 0.0 }
 0x80b   : >>> { %v6926_v5 = vpop.eup %6925  ;;  %v5362_v13 = vrot.slane %v5361_v27, 4  ;;  %6941 = vrcp.f32 %v5072_v44  ;;  %v5069_v22 = vadd.f32 1.0, %v6924_v16  ;;  %v9483_v42 = vadd.f32 %v5196_v1, %v5195_v51 }
 0x80c   : >>> { %v6928_v39 = vpop.eup %6927  ;;  %v5231_v61 = vsel %vm916_vm2, %v5162_v10, 0.0  ;;  %v5312_v37 = vmul.f32 %v6926_v5, %v9874_v32  ;;  %6943 = vrcp.f32 %v5076_v35  ;;  %v5384_v11 = vsel %vm916_vm2, %v5315_v31, 0.0 }
 0x80d   : >>> { %v6930_v57 = vpop.eup %6929  ;;  %v5209_v0 = vrot.slane %v5208_v25, 4  ;;  %v5169_v19 = vmul.f32 %v6922_v4, %v9870_v38  ;;  %6945 = vrcp.f32 %v5069_v22  ;;  %v9489_v6 = vadd.f32 %v5351_v36, %v5350_v23 }
 0x80e   : >>> { %v9491_v28 = vadd.f32 %v5242_v17, %v5241_v2  ;;  %v5396_v41 = vadd.f32 %v5395_v53, %v5394_v43  ;;  %v5322_v51 = vmul.f32 %v6922_v4, %v9871_v21  ;;  %v9495_v12 = vadd.f32 %v5231_v61, %v9439_v24 }
 0x80f   : >>> { %v6932_v8 = vpop.eup %6931  ;;  %v5363_v63 = vadd.f32 %v5362_v13, %v5361_v27  ;;  %v5168_v26 = vmul.f32 %v6928_v39, %v9927_v7  ;;  %v5373_v15 = vsel %vm916_vm2, %v5312_v37, 0.0  ;;  %v5385_v14 = vadd.f32 %v5384_v11, %v9454_v33 }
 0x810   : >>> { %v6934_v50 = vpop.eup %6933  ;;  %v5321_v23 = vmul.f32 %v6928_v39, %v9869_v47  ;;  %v5319_v44 = vmul.f32 %v6930_v57, %v9929_v34  ;;  %v9503_v10 = vadd.f32 %v5209_v0, %v5208_v25  ;;  %v5255_v24 = vsel %vm916_vm2, %v5169_v19, 0.0 }
 0x811   : >>> { %v6936_v1 = vpop.eup %6935  ;;  %v5340_v4 = vrot.slane %v9474_v3, 1  ;;  %v5408_v31 = vsel %vm916_vm2, %v5322_v51, 0.0  ;;  %v5159_v33 = vmul.f32 %v6926_v5, %v9930_v30  ;;  %v5374_v16 = vadd.f32 %v5373_v15, %v9464_v56 }
 0x812   : >>> { %v6938_v36 = vpop.eup %6937  ;;  %v5316_v17 = vmul.f32 %v6936_v1, %v9874_v32  ;;  %v5364_v2 = vrot.slane %v5363_v63, 2  ;;  %v5254_v25 = vsel %vm916_vm2, %v5168_v26, 0.0  ;;  %v5166_v35 = vmul.f32 %v6930_v57, %v9928_v40 }
 0x813   : >>> { %v6940_v53 = vpop.eup %6939  ;;  %v5077_v43 = vadd.f32 1.0, %v6934_v50  ;;  %v5407_v13 = vsel %vm916_vm2, %v5321_v23, 0.0  ;;  %v5397_v22 = vsel %vm916_vm2, %v5319_v44, 0.0  ;;  %v5073_v61 = vadd.f32 1.0, %v6938_v36 }
 0x814   : >>> { %v5386_v39 = vsel %vm916_vm2, %v5316_v17, 0.0  ;;  %v5173_v5 = vmul.f32 %v6932_v8, %v9870_v38  ;;  %v5326_v56 = vmul.f32 %v6932_v8, %v9871_v21  ;;  %v5220_v19 = vsel %vm916_vm2, %v5159_v33, 0.0 }
 0x815   : >>> { %v6942_v37 = vpop.eup %6941  ;;  %v5387_v11 = vadd.f32 %v5386_v39, %v5385_v14  ;;  %6947 = vrcp.f32 %v5077_v43  ;;  %v5375_v51 = vrot.slane %v5374_v16, 4  ;;  %v5172_v57 = vmul.f32 %v6940_v53, %v9927_v7 }
 0x816   : >>> { %v6944_v0 = vpop.eup %6943  ;;  %6949 = vrcp.f32 %v5073_v61  ;;  %v9521_v15 = vadd.f32 %v5364_v2, %v5363_v63  ;;  %v5256_v50 = vadd.f32 %v5255_v24, %v5254_v25  ;;  %v5244_v23 = vsel %vm916_vm2, %v5166_v35, 0.0 }
 0x817   : >>> { %v6946_v26 = vpop.eup %6945  ;;  %v5325_v44 = vmul.f32 %v6940_v53, %v9869_v47  ;;  %v5170_v36 = vmul.f32 %v6942_v37, %v9928_v40  ;;  %v5163_v8 = vmul.f32 %v6936_v1, %v9930_v30  ;;  %v5388_v14 = vrot.slane %v5387_v11, 4 }
 0x818   : >>> { %v5320_v17 = vmul.f32 %v6946_v26, %v9874_v32  ;;  %v5398_v33 = vadd.f32 %v5397_v22, %v5396_v41  ;;  %v5221_v43 = vadd.f32 %v5220_v19, %v9461_v9  ;;  %v5268_v39 = vsel %vm916_vm2, %v5173_v5, 0.0 }
 0x819   : >>> { %v5421_v63 = vsel %vm916_vm2, %v5326_v56, 0.0  ;;  %v5376_v2 = vadd.f32 %v5375_v51, %v5374_v16  ;;  %v5267_v24 = vsel %vm916_vm2, %v5172_v57, 0.0  ;;  %v5327_v25 = vmul.f32 %v6944_v0, %v9929_v34 }
 0x81a   : >>> { %v5399_v53 = vsel %vm916_vm2, %v5320_v17, 0.0  ;;  %v5420_v35 = vsel %vm916_vm2, %v5325_v44, 0.0  ;;  %v5323_v1 = vmul.f32 %v6942_v37, %v9929_v34  ;;  %v5167_v61 = vmul.f32 %v6946_v26, %v9930_v30 }
 0x81b   : >>> { %v5400_v41 = vadd.f32 %v5399_v53, %v5398_v33  ;;  %v5257_v9 = vsel %vm916_vm2, %v5170_v36, 0.0  ;;  %v5233_v22 = vsel %vm916_vm2, %v5163_v8, 0.0  ;;  %v5389_v5 = vadd.f32 %v5388_v14, %v5387_v11 }
 0x81c   : >>> { %v5174_v16 = vmul.f32 %v6944_v0, %v9928_v40  ;;  %v5409_v56 = vadd.f32 %v5408_v31, %v5407_v13  ;;  %v5245_v19 = vadd.f32 %v5244_v23, %v9491_v28  ;;  %v5222_v51 = vrot.slane %v5221_v43, 4 }
 0x81d   : >>> { %v5401_v57 = vrot.slane %v5400_v41, 4  ;;  %v5377_v17 = vrot.slane %v5376_v2, 2  ;;  %v5269_v29 = vadd.f32 %v5268_v39, %v5267_v24  ;;  %v5422_v44 = vadd.f32 %v5421_v63, %v5420_v35 }
 0x81e   : >>> { %v5423_v37 = vsel %vm916_vm2, %v5327_v25, 0.0  ;;  %v5258_v26 = vadd.f32 %v5257_v9, %v5256_v50  ;;  %v5410_v33 = vsel %vm916_vm2, %v5323_v1, 0.0  ;;  %v5234_v36 = vadd.f32 %v5233_v22, %v9495_v12 }
 0x81f   : >>> { %v6948_v27 = vpop.eup %6947  ;;  %v5246_v11 = vsel %vm916_vm2, %v5167_v61, 0.0  ;;  %v5390_v0 = vrot.slane %v5389_v5, 2  ;;  %v5270_v31 = vsel %vm916_vm2, %v5174_v16, 0.0  ;;  %v5424_v23 = vadd.f32 %v5423_v37, %v5422_v44 }
 0x820   : >>> { %v6950_v8 = vpop.eup %6949  ;;  %v5175_v28 = vmul.f32 %v6948_v27, %v9930_v30  ;;  %v5328_v13 = vmul.f32 %v6948_v27, %v9874_v32  ;;  %v5402_v14 = vadd.f32 %v5401_v57, %v5400_v41  ;;  %v5411_v63 = vadd.f32 %v5410_v33, %v5409_v56 }
 0x821   : >>> { %v5171_v39 = vmul.f32 %v6950_v8, %v9930_v30  ;;  %v5324_v50 = vmul.f32 %v6950_v8, %v9874_v32  ;;  %v5247_v24 = vadd.f32 %v5246_v11, %v5245_v19  ;;  %v5378_v25 = vadd.f32 %v5377_v17, %v5376_v2 }
 0x822   : >>> { %v5425_v12 = vsel %vm916_vm2, %v5328_v13, 0.0  ;;  %v5272_v53 = vsel %vm916_vm2, %v5175_v28, 0.0  ;;  %v5271_v9 = vadd.f32 %v5270_v31, %v5269_v29  ;;  %v5391_v41 = vadd.f32 %v5390_v0, %v5389_v5 }
 0x823   : >>> { %v5426_v35 = vadd.f32 %v5425_v12, %v5424_v23  ;;  %v5259_v1 = vsel %vm916_vm2, %v5171_v39, 0.0  ;;  %v5412_v61 = vsel %vm916_vm2, %v5324_v50, 0.0  ;;  %v5235_v16 = vrot.slane %v5234_v36, 4 }
 0x824   : >>> { %v5260_v27 = vadd.f32 %v5259_v1, %v5258_v26  ;;  %v5413_v22 = vadd.f32 %v5412_v61, %v5411_v63  ;;  %v5353_v44 = vrot.slane %v9489_v6, 1  ;;  %v5403_v56 = vrot.slane %v5402_v14, 2 }
 0x825   : >>> { %v5427_v57 = vrot.slane %v5426_v35, 4  ;;  %v5248_v37 = vrot.slane %v5247_v24, 4  ;;  %v5273_v33 = vadd.f32 %v5272_v53, %v5271_v9  ;;  %v5366_v2 = vrot.slane %v9521_v15, 1 }
 0x826   : >>> { %v5414_v19 = vrot.slane %v5413_v22, 4  ;;  %v5261_v17 = vrot.slane %v5260_v27, 4  ;;  %v5379_v11 = vrot.slane %v5378_v25, 1  ;;  %v5404_v8 = vadd.f32 %v5403_v56, %v5402_v14 }
 0x827   : >>> { %v5428_v28 = vadd.f32 %v5427_v57, %v5426_v35  ;;  %v5223_v23 = vadd.f32 %v5222_v51, %v5221_v43  ;;  %v5341_v29 = vadd.f32 %v5340_v4, %v9474_v3  ;;  %v5392_v5 = vrot.slane %v5391_v41, 1 }
 0x828   : >>> { %v5415_v13 = vadd.f32 %v5414_v19, %v5413_v22  ;;  %v5236_v26 = vadd.f32 %v5235_v16, %v5234_v36  ;;  %v5354_v0 = vadd.f32 %v5353_v44, %v9489_v6  ;;  %v5405_v31 = vrot.slane %v5404_v8, 1 }
 0x829   : >>> { %v5429_v39 = vrot.slane %v5428_v28, 2  ;;  %v5249_v50 = vadd.f32 %v5248_v37, %v5247_v24  ;;  %v5274_v63 = vrot.slane %v5273_v33, 4  ;;  %v5367_v12 = vadd.f32 %v5366_v2, %v9521_v15 }
 0x82a   : >>> { %v5416_v53 = vrot.slane %v5415_v13, 2  ;;  %v5211_v14 = vrot.slane %v9503_v10, 2  ;;  %v5262_v35 = vadd.f32 %v5261_v17, %v5260_v27  ;;  %v5380_v1 = vadd.f32 %v5379_v11, %v5378_v25 }
 0x82b   : >>> { %v5430_v43 = vadd.f32 %v5429_v39, %v5428_v28  ;;  %v9931_v51 = vrot.slane %v9483_v42, 2  ;;  %v5224_v4 = vrot.slane %v5223_v23, 2  ;;  %v5393_v36 = vadd.f32 %v5392_v5, %v5391_v41 }
 0x82c   : >>> { %v5417_v61 = vadd.f32 %v5416_v53, %v5415_v13  ;;  %v5237_v6 = vrot.slane %v5236_v26, 2  ;;  %v5406_v9 = vadd.f32 %v5405_v31, %v5404_v8  ;;  %v5441_v24 = vsel %vm1051_vm4, %v5354_v0, %v5341_v29 }
 0x82d   : >>> { %v5199_v3 = vadd.f32 %v9931_v51, %v9483_v42  ;;  %v5431_v22 = vrot.slane %v5430_v43, 1  ;;  %v5250_v16 = vrot.slane %v5249_v50, 2  ;;  %v5275_v15 = vadd.f32 %v5274_v63, %v5273_v33 }
 0x82e   : >>> { %v5418_v57 = vrot.slane %v5417_v61, 1  ;;  %v5442_v44 = vsel %vm1053_vm5, %v5367_v12, %v5441_v24  ;;  %v5212_v25 = vadd.f32 %v5211_v14, %v9503_v10  ;;  %v5263_v27 = vrot.slane %v5262_v35, 2 }
 0x82f   : >>> { %v5432_v56 = vadd.f32 %v5431_v22, %v5430_v43  ;;  %v5443_v19 = vsel %vm1055_vm6, %v5380_v1, %v5442_v44  ;;  %v9932_v42 = vrot.slane %v9457_v18, 2  ;;  %v5225_v37 = vadd.f32 %v5224_v4, %v5223_v23 }
 0x830   : >>> { %v5419_v2 = vadd.f32 %v5418_v57, %v5417_v61  ;;  %v5444_v17 = vsel %vm1057_vm7, %v5393_v36, %v5443_v19  ;;  %v5238_v11 = vadd.f32 %v5237_v6, %v5236_v26  ;;  %v5200_v8 = vrot.slane %v5199_v3, 1 }
 0x831   : >>> { %v5186_v41 = vadd.f32 %v9932_v42, %v9457_v18  ;;  %v5445_v33 = vsel %vm1059_vm8, %v5406_v9, %v5444_v17  ;;  %v5251_v28 = vadd.f32 %v5250_v16, %v5249_v50  ;;  %v5276_v13 = vrot.slane %v5275_v15, 2 }
 0x832   : >>> { %v5446_v10 = vsel %vm1061_vm9, %v5419_v2, %v5445_v33  ;;  %v5213_v29 = vrot.slane %v5212_v25, 1  ;;  %v5264_v5 = vadd.f32 %v5263_v27, %v5262_v35  ;;  %v5226_v39 = vrot.slane %v5225_v37, 1 }
 0x833   : >>> { %v5447_v0 = vsel %vm1063_vm10, %v5432_v56, %v5446_v10  ;;  %v5187_v31 = vrot.slane %v5186_v41, 1  ;;  %v5239_v23 = vrot.slane %v5238_v11, 1  ;;  %v5201_v63 = vadd.f32 %v5200_v8, %v5199_v3 }
 0x834   : >>> { %v5449_v18 = vadd.f32 %v5447_v0, %v7583_v60  ;;  %v5252_v12 = vrot.slane %v5251_v28, 1  ;;  %v5277_v53 = vadd.f32 %v5276_v13, %v5275_v15  ;;  %v5214_v26 = vadd.f32 %v5213_v29, %v5212_v25  ;;  %v9935_v29 = vld [vmem:[#allocation53_spill] sm:$0xff]  ;;  %v9936_v0 = vld [vmem:[#allocation52_spill] sm:$0xff] }
 0x835   : >>> { %v5265_v14 = vrot.slane %v5264_v5, 1  ;;  %v5188_v1 = vadd.f32 %v5187_v31, %v5186_v41  ;;  %v5227_v50 = vadd.f32 %v5226_v39, %v5225_v37  ;;  %v5240_v43 = vadd.f32 %v5239_v23, %v5238_v11  ;;  %v9933_v41 = vld [vmem:[#allocation50_spill] sm:$0xff]  ;;  %v9934_v11 = vld [vmem:[#allocation51_spill] sm:$0xff] }
 0x836   : >>> { %6951 = vrcp.f32 %v5449_v18  ;;  %v5253_v51 = vadd.f32 %v5252_v12, %v5251_v28  ;;  %v5278_v4 = vrot.slane %v5277_v53, 1  ;;  %v5142_v24 = vmul.f32 %v9878_v20, %v9266_v62 }
 0x837   : >>> { %v5288_v35 = vsel %vm1051_vm4, %v5201_v63, %v5188_v1  ;;  %v5266_v36 = vadd.f32 %v5265_v14, %v5264_v5  ;;  %v7090_v62 = vmov 0   ;;  %v7091_v39 = vmov 0.0   ;;  %v5507_v63 = vld [vmem:[#allocation6] sm:$0xff] }
 0x838   : >>> { %v5289_v61 = vsel %vm1053_vm5, %v5214_v26, %v5288_v35  ;;  %v5279_v3 = vadd.f32 %v5278_v4, %v5277_v53  ;;  %v5143_v25 = vadd.f32 %v5142_v24, %v7580_v52  ;;  %6171 = vset.pattern.permute.xlu1 %v7090_v62  ;;  %6172 = vset.pattern.permute.xlu0 %v7090_v62 }
 0x839   : >>> { %v5290_v6 = vsel %vm1055_vm6, %v5227_v50, %v5289_v61 }
 0x83a   : >>> { %v5291_v9 = vsel %vm1057_vm7, %v5240_v43, %v5290_v6 }
 0x83b   : >>> { %v5292_v22 = vsel %vm1059_vm8, %v5253_v51, %v5291_v9  ;;  %v5489_v51 = vld [vmem:[#allocation5] sm:$0xff]  ;;  %v5496_v9 = vld [vmem:[#allocation3] sm:$0xff] }
 0x83c   : >>> { %v5293_v16 = vsel %vm1061_vm9, %v5266_v36, %v5292_v22 }
 0x83d   : >>> { %v5294_v44 = vsel %vm1063_vm10, %v5279_v3, %v5293_v16 }
 0x83e   : >>> { %v5296_v56 = vadd.f32 %v5294_v44, %v5143_v25 }
 0x840   : >>> { %v6952_v15 = vpop.eup %6951 }
 0x841   : >>> { %v5451_v57 = vmul.f32 %v6952_v15, %v5449_v18 }
 0x843   : >>> { %v5452_v27 = vsub.f32 2.0, %v5451_v57 }
 0x845   : >>> { %v5453_v19 = vmul.f32 %v6952_v15, %v5452_v27 }
 0x847   : >>> { %v5454_v42 = vmul.f32 %v5453_v19, %v5296_v56 }
 0x849   : >>> { %v5462_v37 = vmul.f32 %v9933_v41, %v5454_v42  ;;  %5455 = vst.msk [vmem:[#allocation2] sm:$0xff] %vm916_vm2, %v5454_v42 }
 0x84b   : >>> { %v5463_v2 = vsel %vm916_vm2, %v5462_v37, 0.0 }
 0x84c   : >>> { %5464 = vadd.xlane.f32.xlu0 %v5463_v2 }
 0x8d9   : >>> { %v5465_v17 = vpop.xlane.xlu0 %5464 }
 0x8da   : >>> { %v5472_v33 = vadd.f32 %v9934_v11, %v5465_v17 }
 0x8dc   : >>> { %v6013_v8 = vmul.f32 -1.442695, %v5472_v33 }
 0x8de   : >>> { %6953 = vpow2.f32 %v6013_v8 }
 0x8e8   : >>> { %v6954_v28 = vpop.eup %6953 }
 0x8e9   : >>> { %v5476_v13 = vadd.f32 1.0, %v6954_v28 }
 0x8eb   : >>> { %6955 = vrcp.f32 %v5476_v13 }
 0x8f5   : >>> { %v6956_v10 = vpop.eup %6955 }
 0x8f6   : >>> { %v5479_v5 = vmul.f32 %v6956_v10, %v9935_v29 }
 0x8f8   : >>> { %v5480_v31 = vadd.f32 %v5479_v5, %v9936_v0 }
 0x8fa   : >>> { %vm5481_vm12 = vcmp.gt.f32.partialorder %v5480_v31, 0.99 }
 0x8fb   : >>> { %v6014_v18 = vsel %vm5481_vm12, 1.0, %v7091_v39 }
 0x8fc   : >>> { %v5485_v23 = vsub.f32 1.0, %v6014_v18  ;;  %v5484_v53 = vmul.f32 %v6014_v18, %v9935_v29 }
 0x8fe   : >>> { %v5486_v12 = vmul.f32 %v9935_v29, %v5485_v23 }
 0x900   : >>> { %v5487_v26 = vmul.f32 %v6956_v10, %v5486_v12  ;;  %v5508_v14 = vadd.f32 %v5507_v63, %v5486_v12 }
 0x902   : >>> { %v5488_v1 = vadd.f32 %v5487_v26, %v9936_v0  ;;  %v5509_v50 = vadd.f32 %v5508_v14, %v5484_v53 }
 0x904   : >>> { %v5490_v43 = vsub.f32 1.0, %v5488_v1  ;;  %5510 = vst.msk [vmem:[#allocation6] sm:$0xff] %vm1094_vm3, %v5509_v50 }
 0x906   : >>> { %v5491_v4 = vmul.f32 %v5490_v43, %v5484_v53 }
 0x908   : >>> { %v5492_v35 = vadd.f32 %v5491_v4, %v5489_v51 }
 0x90a   : >>> { %v5493_v36 = vmul.f32 %v5492_v35, %v5484_v53  ;;  %5506 = vst.msk [vmem:[#allocation5] sm:$0xff] %vm1094_vm3, %v5492_v35 }
 0x90c   : >>> { %v5495_v61 = vadd.f32 %v5493_v36, %v5487_v26  ;;  %v5494_v6 = vadd.f32 %v5493_v36, %v5488_v1 }
 0x90e   : >>> { %5499 = vperm.xlu1 %6171, %v5495_v61   ;;  %5505 = vst.msk [vmem:[#allocation4] sm:$0xff] %vm1094_vm3, %v5494_v6 }
 0x98d   : >>> { %v5500_v3 = vpop.permute.xlu1 %5499 }
 0x98e   : >>> { %v5502_v22 = vmul.f32 %v5500_v3, %v5454_v42 }
 0x990   : >>> { %v5503_v24 = vadd.f32 %v5502_v22, %v5496_v9 }
 0x992   : >>> { %5504 = vst.msk [vmem:[#allocation3] sm:$0xff] %vm916_vm2, %v5503_v24 }
 0x993 PF: >>> { %s1103_s2 = sadd.s32 1, %s7085_s2  }
 0x994   : >>> { %p1100_p9 = scmp.ge.s32.totalorder %s1103_s2, 10  }
 0x995   : >> { %v5512_v16 = vld [vmem:[#allocation4] sm:$0xff] (%p1100_p9)  ;;  %v7092_v15 = vmov (%p1100_p9), 0   ;;  %v9937_v44 = vmov (%p1100_p9), 0.0   ;;  %v5526_v27 = vld [vmem:[#allocation5] sm:$0xff] (%p1100_p9)  ;;  %v5528_v19 = vld [vmem:[#allocation6] sm:$0xff] (%p1100_p9)  ;;  %vm5556_vm14 = vcmask (%p1100_p9), 0   ;;  %s5552_s13 = scalar_lea.vmem (%p1100_p9), %s7322_s22, %s5804_s17 [#allocation9] }
 0x996   : >> { %1102 = sbr.rel (!%p1100_p9) target bundleno = 308 (0x134), region = 256  ;;  %6958 = vset.pattern.permute.xlu0 (%p1100_p9), %v7092_v15  ;;  %vm5513_vm13 = vcmp.le.f32.partialorder (%p1100_p9), %v5512_v16, 0.99  ;;  %v5516_v57 = vsub.f32 (%p1100_p9), 1.0, %v5512_v16  ;;  %v5554_v49 = vld [vmem:[%s7318_s30] sm:$0x1] (%p1100_p9) }
 0x997   : >> { %v6015_v25 = vsel (%p1100_p9), %vm5513_vm13, 1.0, %v9937_v44  ;;  %v5511_v58 = vld [vmem:[#allocation2] sm:$0xff] (%p1100_p9)  ;;  %v9939_v8 = vld [vmem:[#allocation49_spill] sm:$0xff] (%p1100_p9)  ;;  %s770_s23 = sadd.s32 (%p1100_p9), 1, %s7081_s23  }
 0x998   : >> { %v5517_v56 = vmul.f32 (%p1100_p9), %v6015_v25, %v5516_v57  ;;  %v9938_v11 = vld [vmem:[#allocation48_spill] sm:$0xff] (%p1100_p9)  ;;  %p767_p10 = scmp.ge.s32.totalorder (%p1100_p9), %s770_s23, 8  }
 0x999   : >> { %v5518_v59 = vld [vmem:[#allocation3] sm:$0xff] (%p1100_p9) }
 0x99a   : >> { %5521 = vperm.xlu0 (%p1100_p9), %6958, %v5517_v56   ;;  %v5527_v42 = vadd.f32 (%p1100_p9), %v5526_v27, %v5517_v56 }
 0x99c   : >> { %v5529_v41 = vadd.f32 (%p1100_p9), %v5528_v19, %v5527_v42 }
 0x99d   : > { %s9940_s29 = sand.u32 (%p767_p10), 1, %s7045_s24  }
 0x99e   : >> { %v5530_v37 = vsel %vm1094_vm3, %v5529_v41, 0.0  ;;  %s9620_s0 = scalar_lea.sflag (%p767_p10), [#allocation11], %s9940_s29 }
 0x99f   : >> { %v5531_v2 = vrot.slane %v5530_v37, 4 }
 0x9a1   : >> { %v5532_v62 = vadd.f32 %v5531_v2, %v5530_v37 }
 0x9a3   : >> { %v5533_v45 = vrot.slane %v5532_v62, 2 }
 0x9a5   : >> { %v5534_v46 = vadd.f32 %v5533_v45, %v5532_v62 }
 0x9a7   : >> { %v5535_v48 = vrot.slane %v5534_v46, 1 }
 0x9a9   : >> { %v5536_v54 = vadd.f32 %v5535_v48, %v5534_v46 }
 0x9ab   : >> { %v5555_v55 = vadd.f32 %v5554_v49, %v5536_v54 }
 0x9ad   : >> { %5557 = vst.msk [vmem:[%s7318_s30] sm:$0x1] %vm5556_vm14, %v5555_v55 }
 0xa19   : >> { %v5522_v52 = vpop.permute.xlu0 %5521 }
 0xa1a   : >> { %v5524_v60 = vmul.f32 %v5522_v52, %v5511_v58 }
 0xa1c   : >> { %v5525_v17 = vadd.f32 %v5524_v60, %v5518_v59  ;;  %769 = sbr.rel (!%p767_p10) target bundleno = 105 (0x69), region = 267 }
 0xa1e   : >> { %5537 = vst.msk [vmem:[%s7324_s1] sm:$0xff] %vm916_vm2, %v5525_v17  ;;  %v5544_v33 = vmul.f32 %v9938_v11, %v5525_v17 }
 0xa20   : >> { %v5551_v28 = vadd.f32 %v9939_v8, %v5544_v33 }
 0xa22   : >> { %5553 = vst.msk [vmem:[%s5552_s13] sm:$0xff] %vm916_vm2, %v5551_v28 }
 0xa23   : > { %5572 = sbr.rel (!%p7274_p7) target bundleno = 2607 (0xa2f), region = 156  ;;  %s6027_s20 = sshll.u32 (%p7274_p7), %s7061_s26, 4 }
 0xa24   : > { %s5575_s21 = sadd.s32 (%p7274_p7), %s7065_s27, %s6027_s20  ;;  %s9941_s3 = sld [smem:[#allocation64_spill]] (%p7274_p7) }
 0xa25   : > { %s6022_s16 = sshll.u32 (%p7274_p7), %s5575_s21, 3 }
 0xa29   : > { %v5619_v13 = vld [vmem:[%s7322_s22] sm:$0xff] (%p7274_p7)  ;;  %v5621_v10 = vld [vmem:[%s7322_s22 + $0x8] sm:$0xff] (%p7274_p7)  ;;  %v5623_v47 = vld [vmem:[%s7322_s22 + $0x10] sm:$0xff] (%p7274_p7) }
 0xa2a   : > { %v5625_v38 = vld [vmem:[%s7322_s22 + $0x18] sm:$0xff]  ;;  %v5627_v21 = vld [vmem:[%s7322_s22 + $0x20] sm:$0xff]  ;;  %v5629_v32 = vld [vmem:[%s7322_s22 + $0x28] sm:$0xff]  ;;  %s5577_s28 = scalar_lea.vmem %s9941_s3, %s6022_s16 }
 0xa2b   : > { %v5631_v20 = vld [vmem:[%s7322_s22 + $0x30] sm:$0xff]  ;;  %v5633_v7 = vld [vmem:[%s7322_s22 + $0x38] sm:$0xff]  ;;  %5620 = vst [vmem:[%s5577_s28] sm:$0xff] %v5619_v13  ;;  %5622 = vst [vmem:[%s5577_s28 + $0x10] sm:$0xff] %v5621_v10 }
 0xa2c   : > { %5624 = vst [vmem:[%s5577_s28 + $0x20] sm:$0xff] %v5623_v47  ;;  %5626 = vst [vmem:[%s5577_s28 + $0x30] sm:$0xff] %v5625_v38 }
 0xa2d   : > { %5628 = vst [vmem:[%s5577_s28 + $0x40] sm:$0xff] %v5627_v21  ;;  %5630 = vst [vmem:[%s5577_s28 + $0x50] sm:$0xff] %v5629_v32 }
 0xa2e   : > { %5632 = vst [vmem:[%s5577_s28 + $0x60] sm:$0xff] %v5631_v20  ;;  %5634 = vst [vmem:[%s5577_s28 + $0x70] sm:$0xff] %v5633_v7 }
 0xa2f PF: > { %s6023_s26 = sshll.u32 %s7065_s27, 7  ;;  %s5647_s12 = sshll.u32 %s7324_s1, 4  ;;  %s5648_s12 = int_to_ptr.vmem [resolvable:$true] %s5647_s12 }
 0xa30   : > { %s9942_s17 = sld [smem:[#allocation65_spill]]  ;;  %s6959_s2 = scalar_lea.vmem %s5648_s12, 128 }
 0xa31   : > { %p6960_p7 = scmp.ne.s32.totalorder %s5648_s12, %s6959_s2  ;;  %s7093_s25 = smov [#allocation10]  }
 0xa32   : > { %s6963_s13 = sshll.u32 %s7093_s25, 4  ;;  %s6964_s13 = int_to_ptr.vmem [resolvable:$false] %s6963_s13 }
 0xa33   : > { %p6961_p11 = pnand %p6960_p7, %p7278_p8  ;;  %s6965_s29 = scalar_lea.vmem %s6964_s13, 256 }
 0xa34   : > { %p6966_p0 = scmp.lt.s32.totalorder %s5648_s12, %s6964_s13  ;;  %p6967_p1 = scmp.lt.s32.totalorder %s6965_s29, %s6959_s2 }
 0xa35   : > { %p6962_p12 = pneg %p6961_p11 }
 0xa36   : > { %s9943_s18 = smov %s9942_s17  ;;  %s5645_s14 = scalar_lea.hbm %s9942_s17, %s6023_s26 }
 0xa37   : > { %p6968_p2 = por %p6967_p1, %p6966_p0 }
 0xa39   : > { %p6969_p3 = pnand %p6968_p2, %p6962_p12 }
 0xa3b   : > { %6972 = shalt.err (!%p6969_p3)
}
 0xa3c   : > { %s6973_s27 = scalar_lea.hbm %s5645_s14, 128  ;;  %s6977_s21 = scalar_lea.hbm %s9943_s18, 256 }
 0xa3d   : > { %p6974_p4 = scmp.ne.s32.totalorder %s5645_s14, %s6973_s27  ;;  %p6978_p9 = scmp.lt.u32.totalorder %s5645_s14, %s9943_s18 }
 0xa3e   : > { %p6979_p10 = scmp.lt.u32.totalorder %s6977_s21, %s6973_s27  ;;  %p6981_p11 = scmp.lt.u32.totalorder %s6973_s27, %s5645_s14 }
 0xa3f   : > { %p6975_p5 = pnand %p6974_p4, %p7278_p8 }
 0xa40   : > { %p6980_p7 = por %p6979_p10, %p6978_p9 }
 0xa41   : > { %p6976_p6 = pneg %p6975_p5 }
 0xa42   : > { %p6982_p0 = por %p6981_p11, %p6980_p7 }
 0xa44   : > { %p6983_p12 = pnand %p6982_p0, %p6976_p6 }
 0xa46   : > { %6986 = shalt.err (!%p6983_p12)
}
 0xa47   : > { %6030 = dma.vmem_to_hbm [thread:$0]  (%p7278_p8), %s5648_s12, 128, %s5645_s14, %s9620_s0  }
 0xa48 PF: > { %s9944_s19 = sld [smem:[#allocation13_spill]]  ;;  %p6036_p1 = scmp.ge.s32.totalorder %s7077_s4, 2 }
 0xa4a   : > { %p6033_p2 = pnand %p6036_p1, %p7292_p13 }
 0xa4e   : > { %s5669_s28 = sand.u32 1, %s9944_s19  }
 0xa4f   : > { %s5670_s26 = scalar_lea.sflag [#allocation11], %s5669_s28 }
 0xa50   : > { %7036 = dma.done.wait (!%p6033_p2), %s5670_s26, 128  }
 0xa51   : > { %7038 = vsyncadd (!%p6033_p2), %s5670_s26, 4294967168  ;;  %s36_s4 = sadd.s32 1, %s7077_s4   ;;  %s9946_s22 = sld [smem:[#allocation14_spill]] }
 0xa52   : > { %p33_p3 = scmp.ge.s32.totalorder %s36_s4, 6   ;;  %s9947_s2 = sld [smem:[#allocation20_spill]] }
 0xa53   : > { %s9948_s25 = sld [smem:[#allocation15_spill]]  ;;  %s9949_s3 = sld [smem:[#allocation21_spill]] }
 0xa54   : > { %s9950_s26 = sld [smem:[#allocation16_spill]]  ;;  %s9951_s27 = sld [smem:[#allocation17_spill]] }
 0xa55   : > { %s9952_s28 = sld [smem:[#allocation18_spill]]  ;;  %s9953_s17 = sld [smem:[#allocation19_spill]] }
 0xa56   : > { %s9954_s23 = smov %s7045_s24  ;;  %35 = sbr.rel (!%p33_p3) target bundleno = 20 (0x14), region = 278 }
 0xa57   : > { %s9955_s24 = smov %s9946_s22 }
 0xa5d   :  { %5681 = vsyncpa [#allocation11], 1 }
 0xa5e   :  { %5683 = vsyncpa [#allocation11 + $0x1], 1 }

</bundles_post_ra>
